<compile_context>
chip_gen: v5e
topology: v5e:2x2
jax: 0.10.0
libtpu: 0.0.40
codegen_flags: <defaults>
</compile_context>

<pallas_src>
import functools

import jax
import jax.numpy as jnp
from jax import lax
from jax.experimental import pallas as pl
from jax.experimental.pallas import tpu as pltpu


def _round_up(x, m):
    return (x + m - 1) // m * m


def _fasttext_kernel(tok_ref,            # SMEM (B_pad*S,) int32  (scalar prefetch)
                     emb_hbm,            # HBM  (V, H) f32        (pl.ANY)
                     w1_ref, b1_ref,     # VMEM (H, H), (1, H)
                     w2_ref, b2_ref,     # VMEM (H, Cp), (1, Cp)
                     out_ref,            # VMEM (TB, Cp)
                     acc_ref,            # VMEM scratch (TB, H) f32
                     stage_ref,          # VMEM scratch (NBUF*8, H) f32
                     sems,               # DMA semaphores (NBUF,)
                     *, seq_len, nbuf, inner_unroll):
    tb, hidden = acc_ref.shape
    s = seq_len
    n_groups = tb // 8
    total = n_groups * s                      # token positions in this tile
    pf = min(nbuf - 1, s)                     # prefetch distance (positions)
    tile_base = pl.program_id(0) * (tb * s)   # flat token offset of this tile

    def issue(tok, slot, i):
        # One embedding row -> sublane i of staging slot `slot`.
        pltpu.make_async_copy(emb_hbm.at[tok],
                              stage_ref.at[slot * 8 + i],
                              sems.at[slot]).start()

    # ---- Prime: start the first `pf` token positions of group 0. ----
    for q in range(pf):                       # static python loop (pf <= nbuf-1)
        for i in range(8):
            issue(tok_ref[tile_base + i * s + q], q % nbuf, i)

    # ---- Outer loop over 8-sequence groups, inner loop over token positions. ----
    def group_body(g, carry):
        grow0 = tile_base + g * (8 * s)       # flat id offset of this group
        p0 = g * s                            # global position of (g, t=0)

        def tok_body(t, acc):
            p = p0 + t
            slot = jnp.bitwise_and(p, nbuf - 1)

            # All scalar (SMEM) id reads happen before any DMA wait.
            cur = [tok_ref[grow0 + i * s + t] for i in range(8)]

            t_nl = t + pf                     # position to prefetch (pf ahead)
            wrap = t_nl >= s
            t_n = jnp.where(wrap, t_nl - s, t_nl)
            g_n = jnp.minimum(g + wrap.astype(jnp.int32), n_groups - 1)
            ngrow0 = tile_base + g_n * (8 * s)
            nxt = [tok_ref[ngrow0 + i * s + t_n] for i in range(8)]
            slot_n = jnp.bitwise_and(p + pf, nbuf - 1)

            @pl.when(p + pf < total)          # issue prefetch before the waits
            def _():
                for i in range(8):
                    issue(nxt[i], slot_n, i)

            for i in range(8):                # wait this position's 8 row DMAs
                pltpu.make_async_copy(emb_hbm.at[cur[i]],
                                      stage_ref.at[slot * 8 + i],
                                      sems.at[slot]).wait()

            base = pl.multiple_of(slot * 8, 8)
            return acc + stage_ref[pl.ds(base, 8), :]        # one (8, H) block add

        acc = lax.fori_loop(0, s, tok_body,
                            jnp.zeros((8, hidden), jnp.float32),
                            unroll=inner_unroll)
        acc_ref[pl.ds(pl.multiple_of(g * 8, 8), 8), :] = acc  # aligned (8, H) flush
        return carry

    lax.fori_loop(0, n_groups, group_body, 0)

    # ---- fc1 / fc on the whole (TB, H) mean block: one MXU matmul each. ----
    mean = acc_ref[...] * (1.0 / s)           # PyTorch .mean(1) divides by S
    h = jnp.dot(mean, w1_ref[...], preferred_element_type=jnp.float32) + b1_ref[...]
    z = jnp.dot(h, w2_ref[...], preferred_element_type=jnp.float32) + b2_ref[...]
    out_ref[...] = z.astype(out_ref.dtype)


def prepare_fasttext_params(emb_table, w1, b1, w2, b2):
    """One-time layout of the nn.Module parameters for the Pallas kernel
    (hoisted out of the forward: no per-call padding / transposes)."""
    emb = jnp.asarray(emb_table, jnp.float32)            # (V, H): unpadded, HBM
    h = emb.shape[1]
    c = int(w2.shape[0])
    cp = _round_up(c, 128)                               # lane-dense logits
    w1_t = jnp.asarray(w1, jnp.float32).T                # (H, H):   x @ W1^T
    b1_r = jnp.asarray(b1, jnp.float32).reshape(1, h)
    w2_t = jnp.zeros((h, cp), jnp.float32).at[:, :c].set(jnp.asarray(w2, jnp.float32).T)
    b2_r = jnp.zeros((1, cp), jnp.float32).at[0, :c].set(jnp.asarray(b2, jnp.float32))
    return dict(emb=emb, w1_t=w1_t, b1=b1_r, w2_t=w2_t, b2=b2_r, num_classes=c)


def fasttext_forward(text, params, *, block_b=None, nbuf=8):
    """text: (B, S) int token ids.  Returns (B, num_classes) f32 logits."""
    emb, w1_t, b1, w2_t, b2 = (params["emb"], params["w1_t"], params["b1"],
                               params["w2_t"], params["b2"])
    c = params["num_classes"]
    tokens = jnp.asarray(text, jnp.int32)
    assert tokens.ndim == 2
    b_dim, s = tokens.shape
    _v, h = emb.shape
    cp = w2_t.shape[1]

    assert nbuf >= 2 and (nbuf & (nbuf - 1)) == 0, "nbuf must be a power of two"
    b8 = _round_up(b_dim, 8)
    if block_b is None:
        # >=2 "parallel" batch tiles whenever possible (keeps both v7x TCs busy).
        block_b = min(128, max(8, _round_up((b8 + 1) // 2, 8)))
    assert block_b % 8 == 0
    b_pad = _round_up(b8, block_b)

    # Pad rows use token 0 (= padding_idx); their outputs are sliced off below.
    tok_flat = jnp.zeros((b_pad, s), jnp.int32).at[:b_dim].set(tokens).reshape(-1)

    if s % 8 == 0:
        inner_unroll = 8
    elif s % 4 == 0:
        inner_unroll = 4
    elif s % 2 == 0:
        inner_unroll = 2
    else:
        inner_unroll = 1

    kernel = functools.partial(_fasttext_kernel, seq_len=s, nbuf=nbuf,
                               inner_unroll=inner_unroll)

    out = pl.pallas_call(
        kernel,
        out_shape=jax.ShapeDtypeStruct((b_pad, cp), jnp.float32),
        grid_spec=pltpu.PrefetchScalarGridSpec(
            num_scalar_prefetch=1,                           # token ids -> SMEM
            grid=(b_pad // block_b,),
            in_specs=[
                pl.BlockSpec(memory_space=pl.ANY),            # emb table stays in HBM
                pl.BlockSpec((h, h), lambda bt, tok: (0, 0)),  # fc1 weight^T
                pl.BlockSpec((1, h), lambda bt, tok: (0, 0)),  # fc1 bias
                pl.BlockSpec((h, cp), lambda bt, tok: (0, 0)),  # fc  weight^T (class-padded)
                pl.BlockSpec((1, cp), lambda bt, tok: (0, 0)),  # fc  bias     (class-padded)
            ],
            out_specs=pl.BlockSpec((block_b, cp), lambda bt, tok: (bt, 0)),
            scratch_shapes=[
                pltpu.VMEM((block_b, h), jnp.float32),        # per-tile sequence sums
                pltpu.VMEM((nbuf * 8, h), jnp.float32),       # gather staging slots
                pltpu.SemaphoreType.DMA((nbuf,)),             # one sem per slot (8 rows each)
            ],
        ),
        compiler_params=pltpu.CompilerParams(
            dimension_semantics=("parallel",)),               # batch tiles across TCs
    )(tok_flat, emb, w1_t, b1, w2_t, b2)

    return out[:b_dim, :c]


def fasttext_reference(tokens, emb_table, w1, b1, w2, b2):
    e = emb_table[tokens]                     # (B, S, H)
    hmid = e.mean(axis=1) @ w1.T + b1         # (B, H)
    return hmid @ w2.T + b2                   # (B, C)


if __name__ == "__main__":
    # Small, module-consistent shapes.
    B, S = 2, 8           # batch, sequence length
    H = 32                # hidden_dim
    C = 10                # num_classes
    V = 512               # vocab_size (small for the synthetic demo; module default 98635)
    PADDING_IDX = 0

    key = jax.random.PRNGKey(0)
    k_emb, k_w1, k_b1, k_w2, k_b2, k_tok = jax.random.split(key, 6)

    emb_table = jax.random.normal(k_emb, (V, H), dtype=jnp.float32) * 0.1
    emb_table = emb_table.at[PADDING_IDX].set(0.0)        # padding_idx row = 0
    w1 = jax.random.normal(k_w1, (H, H), dtype=jnp.float32) * 0.1
    b1 = jax.random.normal(k_b1, (H,), dtype=jnp.float32) * 0.1
    w2 = jax.random.normal(k_w2, (C, H), dtype=jnp.float32) * 0.1
    b2 = jax.random.normal(k_b2, (C,), dtype=jnp.float32) * 0.1

    # x = (text, text_lengths); text_lengths is unpacked but unused in the
    # reference forward, so it only appears here for interface fidelity.
    text = jax.random.randint(k_tok, (B, S), 0, V, dtype=jnp.int32)
    text = text.at[0, 0].set(PADDING_IDX)                 # exercise padding row
    text_lengths = jnp.array([S, S - 2], dtype=jnp.int32)
    x = (text, text_lengths)

    params = prepare_fasttext_params(emb_table, w1, b1, w2, b2)
    out = fasttext_forward(x[0], params)
    out = jax.block_until_ready(out)

    ref = fasttext_reference(text, emb_table, w1, b1, w2, b2)
    assert out.shape == (B, C), out.shape
    assert jnp.allclose(out, ref, atol=1e-4, rtol=1e-4), (out, ref)

    print("KERNEL_OK")
</pallas_src>

<mosaic_0001>
module attributes {stable_mosaic.version = 11 : i64} {
  func.func @_fasttext_kernel(%arg0: i32, %arg1: memref<64xi32, #tpu.memory_space<smem>>, %arg2: memref<512x32xf32, #tpu.memory_space<any>>, %arg3: memref<32x32xf32, #tpu.memory_space<vmem>>, %arg4: memref<1x32xf32, #tpu.memory_space<vmem>>, %arg5: memref<32x128xf32, #tpu.memory_space<vmem>>, %arg6: memref<1x128xf32, #tpu.memory_space<vmem>>, %arg7: memref<8x128xf32, #tpu.memory_space<vmem>>, %arg8: memref<8x32xf32, #tpu.memory_space<vmem>>, %arg9: memref<64x32xf32, #tpu.memory_space<vmem>>, %arg10: memref<8x!tpu.dma_semaphore, #tpu.memory_space<semaphore_mem>>) attributes {dimension_semantics = [#tpu.dimension_semantics<parallel>], iteration_bounds = array<i64: 1>, scalar_prefetch = 1 : i64, scratch_operands = 3 : i64, tpu.core_type = #tpu.core_type<tc>, window_params = [{}, {pipeline_mode = #tpu.pipeline_mode<synchronous>, transform_indices = @transform_1, window_bounds = array<i64: 32, 32>}, {pipeline_mode = #tpu.pipeline_mode<synchronous>, transform_indices = @transform_2, window_bounds = array<i64: 1, 32>}, {pipeline_mode = #tpu.pipeline_mode<synchronous>, transform_indices = @transform_3, window_bounds = array<i64: 32, 128>}, {pipeline_mode = #tpu.pipeline_mode<synchronous>, transform_indices = @transform_4, window_bounds = array<i64: 1, 128>}, {transform_indices = @transform_5, window_bounds = array<i64: 8, 128>}]} {
    %c64_i32 = arith.constant 64 : i32
    %0 = arith.muli %arg0, %c64_i32 : i32
    %c0_i32 = arith.constant 0 : i32
    %1 = arith.addi %0, %c0_i32 : i32
    %c0_i32_0 = arith.constant 0 : i32
    %2 = arith.addi %1, %c0_i32_0 : i32
    %3 = arith.index_cast %2 : i32 to index
    %4 = memref.load %arg1[%3] : memref<64xi32, #tpu.memory_space<smem>>
    %c0_i32_1 = arith.constant 0 : i32
    %c0_i32_2 = arith.constant 0 : i32
    %c0_i32_3 = arith.constant 0 : i32
    %5 = tpu.memref_slice %arg2[%4, %c0_i32_3] : memref<512x32xf32, #tpu.memory_space<any>> -> memref<1x32xf32, #tpu.memory_space<any>>
    %6 = tpu.memref_squeeze %5 : memref<1x32xf32, #tpu.memory_space<any>> -> memref<32xf32, #tpu.memory_space<any>>
    %c0_i32_4 = arith.constant 0 : i32
    %7 = tpu.memref_slice %arg9[%c0_i32_1, %c0_i32_4] : memref<64x32xf32, #tpu.memory_space<vmem>> -> memref<1x32xf32, #tpu.memory_space<vmem>>
    %8 = tpu.memref_squeeze %7 : memref<1x32xf32, #tpu.memory_space<vmem>> -> memref<32xf32, #tpu.memory_space<vmem>>
    %9 = tpu.memref_slice %arg10[%c0_i32_2] : memref<8x!tpu.dma_semaphore, #tpu.memory_space<semaphore_mem>> -> memref<1x!tpu.dma_semaphore, #tpu.memory_space<semaphore_mem>>
    %10 = tpu.memref_squeeze %9 : memref<1x!tpu.dma_semaphore, #tpu.memory_space<semaphore_mem>> -> memref<!tpu.dma_semaphore, #tpu.memory_space<semaphore_mem>>
    tpu.enqueue_dma source(%6 : memref<32xf32, #tpu.memory_space<any>>) target(%8 : memref<32xf32, #tpu.memory_space<vmem>>) target_semaphore(%10 : memref<!tpu.dma_semaphore, #tpu.memory_space<semaphore_mem>>)
    %c8_i32 = arith.constant 8 : i32
    %11 = arith.addi %0, %c8_i32 : i32
    %c0_i32_5 = arith.constant 0 : i32
    %12 = arith.addi %11, %c0_i32_5 : i32
    %13 = arith.index_cast %12 : i32 to index
    %14 = memref.load %arg1[%13] : memref<64xi32, #tpu.memory_space<smem>>
    %c1_i32 = arith.constant 1 : i32
    %c0_i32_6 = arith.constant 0 : i32
    %c0_i32_7 = arith.constant 0 : i32
    %15 = tpu.memref_slice %arg2[%14, %c0_i32_7] : memref<512x32xf32, #tpu.memory_space<any>> -> memref<1x32xf32, #tpu.memory_space<any>>
    %16 = tpu.memref_squeeze %15 : memref<1x32xf32, #tpu.memory_space<any>> -> memref<32xf32, #tpu.memory_space<any>>
    %c0_i32_8 = arith.constant 0 : i32
    %17 = tpu.memref_slice %arg9[%c1_i32, %c0_i32_8] : memref<64x32xf32, #tpu.memory_space<vmem>> -> memref<1x32xf32, #tpu.memory_space<vmem>>
    %18 = tpu.memref_squeeze %17 : memref<1x32xf32, #tpu.memory_space<vmem>> -> memref<32xf32, #tpu.memory_space<vmem>>
    %19 = tpu.memref_slice %arg10[%c0_i32_6] : memref<8x!tpu.dma_semaphore, #tpu.memory_space<semaphore_mem>> -> memref<1x!tpu.dma_semaphore, #tpu.memory_space<semaphore_mem>>
    %20 = tpu.memref_squeeze %19 : memref<1x!tpu.dma_semaphore, #tpu.memory_space<semaphore_mem>> -> memref<!tpu.dma_semaphore, #tpu.memory_space<semaphore_mem>>
    tpu.enqueue_dma source(%16 : memref<32xf32, #tpu.memory_space<any>>) target(%18 : memref<32xf32, #tpu.memory_space<vmem>>) target_semaphore(%20 : memref<!tpu.dma_semaphore, #tpu.memory_space<semaphore_mem>>)
    %c16_i32 = arith.constant 16 : i32
    %21 = arith.addi %0, %c16_i32 : i32
    %c0_i32_9 = arith.constant 0 : i32
    %22 = arith.addi %21, %c0_i32_9 : i32
    %23 = arith.index_cast %22 : i32 to index
    %24 = memref.load %arg1[%23] : memref<64xi32, #tpu.memory_space<smem>>
    %c2_i32 = arith.constant 2 : i32
    %c0_i32_10 = arith.constant 0 : i32
    %c0_i32_11 = arith.constant 0 : i32
    %25 = tpu.memref_slice %arg2[%24, %c0_i32_11] : memref<512x32xf32, #tpu.memory_space<any>> -> memref<1x32xf32, #tpu.memory_space<any>>
    %26 = tpu.memref_squeeze %25 : memref<1x32xf32, #tpu.memory_space<any>> -> memref<32xf32, #tpu.memory_space<any>>
    %c0_i32_12 = arith.constant 0 : i32
    %27 = tpu.memref_slice %arg9[%c2_i32, %c0_i32_12] : memref<64x32xf32, #tpu.memory_space<vmem>> -> memref<1x32xf32, #tpu.memory_space<vmem>>
    %28 = tpu.memref_squeeze %27 : memref<1x32xf32, #tpu.memory_space<vmem>> -> memref<32xf32, #tpu.memory_space<vmem>>
    %29 = tpu.memref_slice %arg10[%c0_i32_10] : memref<8x!tpu.dma_semaphore, #tpu.memory_space<semaphore_mem>> -> memref<1x!tpu.dma_semaphore, #tpu.memory_space<semaphore_mem>>
    %30 = tpu.memref_squeeze %29 : memref<1x!tpu.dma_semaphore, #tpu.memory_space<semaphore_mem>> -> memref<!tpu.dma_semaphore, #tpu.memory_space<semaphore_mem>>
    tpu.enqueue_dma source(%26 : memref<32xf32, #tpu.memory_space<any>>) target(%28 : memref<32xf32, #tpu.memory_space<vmem>>) target_semaphore(%30 : memref<!tpu.dma_semaphore, #tpu.memory_space<semaphore_mem>>)
    %c24_i32 = arith.constant 24 : i32
    %31 = arith.addi %0, %c24_i32 : i32
    %c0_i32_13 = arith.constant 0 : i32
    %32 = arith.addi %31, %c0_i32_13 : i32
    %33 = arith.index_cast %32 : i32 to index
    %34 = memref.load %arg1[%33] : memref<64xi32, #tpu.memory_space<smem>>
    %c3_i32 = arith.constant 3 : i32
    %c0_i32_14 = arith.constant 0 : i32
    %c0_i32_15 = arith.constant 0 : i32
    %35 = tpu.memref_slice %arg2[%34, %c0_i32_15] : memref<512x32xf32, #tpu.memory_space<any>> -> memref<1x32xf32, #tpu.memory_space<any>>
    %36 = tpu.memref_squeeze %35 : memref<1x32xf32, #tpu.memory_space<any>> -> memref<32xf32, #tpu.memory_space<any>>
    %c0_i32_16 = arith.constant 0 : i32
    %37 = tpu.memref_slice %arg9[%c3_i32, %c0_i32_16] : memref<64x32xf32, #tpu.memory_space<vmem>> -> memref<1x32xf32, #tpu.memory_space<vmem>>
    %38 = tpu.memref_squeeze %37 : memref<1x32xf32, #tpu.memory_space<vmem>> -> memref<32xf32, #tpu.memory_space<vmem>>
    %39 = tpu.memref_slice %arg10[%c0_i32_14] : memref<8x!tpu.dma_semaphore, #tpu.memory_space<semaphore_mem>> -> memref<1x!tpu.dma_semaphore, #tpu.memory_space<semaphore_mem>>
    %40 = tpu.memref_squeeze %39 : memref<1x!tpu.dma_semaphore, #tpu.memory_space<semaphore_mem>> -> memref<!tpu.dma_semaphore, #tpu.memory_space<semaphore_mem>>
    tpu.enqueue_dma source(%36 : memref<32xf32, #tpu.memory_space<any>>) target(%38 : memref<32xf32, #tpu.memory_space<vmem>>) target_semaphore(%40 : memref<!tpu.dma_semaphore, #tpu.memory_space<semaphore_mem>>)
    %c32_i32 = arith.constant 32 : i32
    %41 = arith.addi %0, %c32_i32 : i32
    %c0_i32_17 = arith.constant 0 : i32
    %42 = arith.addi %41, %c0_i32_17 : i32
    %43 = arith.index_cast %42 : i32 to index
    %44 = memref.load %arg1[%43] : memref<64xi32, #tpu.memory_space<smem>>
    %c4_i32 = arith.constant 4 : i32
    %c0_i32_18 = arith.constant 0 : i32
    %c0_i32_19 = arith.constant 0 : i32
    %45 = tpu.memref_slice %arg2[%44, %c0_i32_19] : memref<512x32xf32, #tpu.memory_space<any>> -> memref<1x32xf32, #tpu.memory_space<any>>
    %46 = tpu.memref_squeeze %45 : memref<1x32xf32, #tpu.memory_space<any>> -> memref<32xf32, #tpu.memory_space<any>>
    %c0_i32_20 = arith.constant 0 : i32
    %47 = tpu.memref_slice %arg9[%c4_i32, %c0_i32_20] : memref<64x32xf32, #tpu.memory_space<vmem>> -> memref<1x32xf32, #tpu.memory_space<vmem>>
    %48 = tpu.memref_squeeze %47 : memref<1x32xf32, #tpu.memory_space<vmem>> -> memref<32xf32, #tpu.memory_space<vmem>>
    %49 = tpu.memref_slice %arg10[%c0_i32_18] : memref<8x!tpu.dma_semaphore, #tpu.memory_space<semaphore_mem>> -> memref<1x!tpu.dma_semaphore, #tpu.memory_space<semaphore_mem>>
    %50 = tpu.memref_squeeze %49 : memref<1x!tpu.dma_semaphore, #tpu.memory_space<semaphore_mem>> -> memref<!tpu.dma_semaphore, #tpu.memory_space<semaphore_mem>>
    tpu.enqueue_dma source(%46 : memref<32xf32, #tpu.memory_space<any>>) target(%48 : memref<32xf32, #tpu.memory_space<vmem>>) target_semaphore(%50 : memref<!tpu.dma_semaphore, #tpu.memory_space<semaphore_mem>>)
    %c40_i32 = arith.constant 40 : i32
    %51 = arith.addi %0, %c40_i32 : i32
    %c0_i32_21 = arith.constant 0 : i32
    %52 = arith.addi %51, %c0_i32_21 : i32
    %53 = arith.index_cast %52 : i32 to index
    %54 = memref.load %arg1[%53] : memref<64xi32, #tpu.memory_space<smem>>
    %c5_i32 = arith.constant 5 : i32
    %c0_i32_22 = arith.constant 0 : i32
    %c0_i32_23 = arith.constant 0 : i32
    %55 = tpu.memref_slice %arg2[%54, %c0_i32_23] : memref<512x32xf32, #tpu.memory_space<any>> -> memref<1x32xf32, #tpu.memory_space<any>>
    %56 = tpu.memref_squeeze %55 : memref<1x32xf32, #tpu.memory_space<any>> -> memref<32xf32, #tpu.memory_space<any>>
    %c0_i32_24 = arith.constant 0 : i32
    %57 = tpu.memref_slice %arg9[%c5_i32, %c0_i32_24] : memref<64x32xf32, #tpu.memory_space<vmem>> -> memref<1x32xf32, #tpu.memory_space<vmem>>
    %58 = tpu.memref_squeeze %57 : memref<1x32xf32, #tpu.memory_space<vmem>> -> memref<32xf32, #tpu.memory_space<vmem>>
    %59 = tpu.memref_slice %arg10[%c0_i32_22] : memref<8x!tpu.dma_semaphore, #tpu.memory_space<semaphore_mem>> -> memref<1x!tpu.dma_semaphore, #tpu.memory_space<semaphore_mem>>
    %60 = tpu.memref_squeeze %59 : memref<1x!tpu.dma_semaphore, #tpu.memory_space<semaphore_mem>> -> memref<!tpu.dma_semaphore, #tpu.memory_space<semaphore_mem>>
    tpu.enqueue_dma source(%56 : memref<32xf32, #tpu.memory_space<any>>) target(%58 : memref<32xf32, #tpu.memory_space<vmem>>) target_semaphore(%60 : memref<!tpu.dma_semaphore, #tpu.memory_space<semaphore_mem>>)
    %c48_i32 = arith.constant 48 : i32
    %61 = arith.addi %0, %c48_i32 : i32
    %c0_i32_25 = arith.constant 0 : i32
    %62 = arith.addi %61, %c0_i32_25 : i32
    %63 = arith.index_cast %62 : i32 to index
    %64 = memref.load %arg1[%63] : memref<64xi32, #tpu.memory_space<smem>>
    %c6_i32 = arith.constant 6 : i32
    %c0_i32_26 = arith.constant 0 : i32
    %c0_i32_27 = arith.constant 0 : i32
    %65 = tpu.memref_slice %arg2[%64, %c0_i32_27] : memref<512x32xf32, #tpu.memory_space<any>> -> memref<1x32xf32, #tpu.memory_space<any>>
    %66 = tpu.memref_squeeze %65 : memref<1x32xf32, #tpu.memory_space<any>> -> memref<32xf32, #tpu.memory_space<any>>
    %c0_i32_28 = arith.constant 0 : i32
    %67 = tpu.memref_slice %arg9[%c6_i32, %c0_i32_28] : memref<64x32xf32, #tpu.memory_space<vmem>> -> memref<1x32xf32, #tpu.memory_space<vmem>>
    %68 = tpu.memref_squeeze %67 : memref<1x32xf32, #tpu.memory_space<vmem>> -> memref<32xf32, #tpu.memory_space<vmem>>
    %69 = tpu.memref_slice %arg10[%c0_i32_26] : memref<8x!tpu.dma_semaphore, #tpu.memory_space<semaphore_mem>> -> memref<1x!tpu.dma_semaphore, #tpu.memory_space<semaphore_mem>>
    %70 = tpu.memref_squeeze %69 : memref<1x!tpu.dma_semaphore, #tpu.memory_space<semaphore_mem>> -> memref<!tpu.dma_semaphore, #tpu.memory_space<semaphore_mem>>
    tpu.enqueue_dma source(%66 : memref<32xf32, #tpu.memory_space<any>>) target(%68 : memref<32xf32, #tpu.memory_space<vmem>>) target_semaphore(%70 : memref<!tpu.dma_semaphore, #tpu.memory_space<semaphore_mem>>)
    %c56_i32 = arith.constant 56 : i32
    %71 = arith.addi %0, %c56_i32 : i32
    %c0_i32_29 = arith.constant 0 : i32
    %72 = arith.addi %71, %c0_i32_29 : i32
    %73 = arith.index_cast %72 : i32 to index
    %74 = memref.load %arg1[%73] : memref<64xi32, #tpu.memory_space<smem>>
    %c7_i32 = arith.constant 7 : i32
    %c0_i32_30 = arith.constant 0 : i32
    %c0_i32_31 = arith.constant 0 : i32
    %75 = tpu.memref_slice %arg2[%74, %c0_i32_31] : memref<512x32xf32, #tpu.memory_space<any>> -> memref<1x32xf32, #tpu.memory_space<any>>
    %76 = tpu.memref_squeeze %75 : memref<1x32xf32, #tpu.memory_space<any>> -> memref<32xf32, #tpu.memory_space<any>>
    %c0_i32_32 = arith.constant 0 : i32
    %77 = tpu.memref_slice %arg9[%c7_i32, %c0_i32_32] : memref<64x32xf32, #tpu.memory_space<vmem>> -> memref<1x32xf32, #tpu.memory_space<vmem>>
    %78 = tpu.memref_squeeze %77 : memref<1x32xf32, #tpu.memory_space<vmem>> -> memref<32xf32, #tpu.memory_space<vmem>>
    %79 = tpu.memref_slice %arg10[%c0_i32_30] : memref<8x!tpu.dma_semaphore, #tpu.memory_space<semaphore_mem>> -> memref<1x!tpu.dma_semaphore, #tpu.memory_space<semaphore_mem>>
    %80 = tpu.memref_squeeze %79 : memref<1x!tpu.dma_semaphore, #tpu.memory_space<semaphore_mem>> -> memref<!tpu.dma_semaphore, #tpu.memory_space<semaphore_mem>>
    tpu.enqueue_dma source(%76 : memref<32xf32, #tpu.memory_space<any>>) target(%78 : memref<32xf32, #tpu.memory_space<vmem>>) target_semaphore(%80 : memref<!tpu.dma_semaphore, #tpu.memory_space<semaphore_mem>>)
    %c0_i32_33 = arith.constant 0 : i32
    %81 = arith.addi %0, %c0_i32_33 : i32
    %c1_i32_34 = arith.constant 1 : i32
    %82 = arith.addi %81, %c1_i32_34 : i32
    %83 = arith.index_cast %82 : i32 to index
    %84 = memref.load %arg1[%83] : memref<64xi32, #tpu.memory_space<smem>>
    %c8_i32_35 = arith.constant 8 : i32
    %c1_i32_36 = arith.constant 1 : i32
    %c0_i32_37 = arith.constant 0 : i32
    %85 = tpu.memref_slice %arg2[%84, %c0_i32_37] : memref<512x32xf32, #tpu.memory_space<any>> -> memref<1x32xf32, #tpu.memory_space<any>>
    %86 = tpu.memref_squeeze %85 : memref<1x32xf32, #tpu.memory_space<any>> -> memref<32xf32, #tpu.memory_space<any>>
    %c0_i32_38 = arith.constant 0 : i32
    %87 = tpu.memref_slice %arg9[%c8_i32_35, %c0_i32_38] : memref<64x32xf32, #tpu.memory_space<vmem>> -> memref<1x32xf32, #tpu.memory_space<vmem>>
    %88 = tpu.memref_squeeze %87 : memref<1x32xf32, #tpu.memory_space<vmem>> -> memref<32xf32, #tpu.memory_space<vmem>>
    %89 = tpu.memref_slice %arg10[%c1_i32_36] : memref<8x!tpu.dma_semaphore, #tpu.memory_space<semaphore_mem>> -> memref<1x!tpu.dma_semaphore, #tpu.memory_space<semaphore_mem>>
    %90 = tpu.memref_squeeze %89 : memref<1x!tpu.dma_semaphore, #tpu.memory_space<semaphore_mem>> -> memref<!tpu.dma_semaphore, #tpu.memory_space<semaphore_mem>>
    tpu.enqueue_dma source(%86 : memref<32xf32, #tpu.memory_space<any>>) target(%88 : memref<32xf32, #tpu.memory_space<vmem>>) target_semaphore(%90 : memref<!tpu.dma_semaphore, #tpu.memory_space<semaphore_mem>>)
    %c8_i32_39 = arith.constant 8 : i32
    %91 = arith.addi %0, %c8_i32_39 : i32
    %c1_i32_40 = arith.constant 1 : i32
    %92 = arith.addi %91, %c1_i32_40 : i32
    %93 = arith.index_cast %92 : i32 to index
    %94 = memref.load %arg1[%93] : memref<64xi32, #tpu.memory_space<smem>>
    %c9_i32 = arith.constant 9 : i32
    %c1_i32_41 = arith.constant 1 : i32
    %c0_i32_42 = arith.constant 0 : i32
    %95 = tpu.memref_slice %arg2[%94, %c0_i32_42] : memref<512x32xf32, #tpu.memory_space<any>> -> memref<1x32xf32, #tpu.memory_space<any>>
    %96 = tpu.memref_squeeze %95 : memref<1x32xf32, #tpu.memory_space<any>> -> memref<32xf32, #tpu.memory_space<any>>
    %c0_i32_43 = arith.constant 0 : i32
    %97 = tpu.memref_slice %arg9[%c9_i32, %c0_i32_43] : memref<64x32xf32, #tpu.memory_space<vmem>> -> memref<1x32xf32, #tpu.memory_space<vmem>>
    %98 = tpu.memref_squeeze %97 : memref<1x32xf32, #tpu.memory_space<vmem>> -> memref<32xf32, #tpu.memory_space<vmem>>
    %99 = tpu.memref_slice %arg10[%c1_i32_41] : memref<8x!tpu.dma_semaphore, #tpu.memory_space<semaphore_mem>> -> memref<1x!tpu.dma_semaphore, #tpu.memory_space<semaphore_mem>>
    %100 = tpu.memref_squeeze %99 : memref<1x!tpu.dma_semaphore, #tpu.memory_space<semaphore_mem>> -> memref<!tpu.dma_semaphore, #tpu.memory_space<semaphore_mem>>
    tpu.enqueue_dma source(%96 : memref<32xf32, #tpu.memory_space<any>>) target(%98 : memref<32xf32, #tpu.memory_space<vmem>>) target_semaphore(%100 : memref<!tpu.dma_semaphore, #tpu.memory_space<semaphore_mem>>)
    %c16_i32_44 = arith.constant 16 : i32
    %101 = arith.addi %0, %c16_i32_44 : i32
    %c1_i32_45 = arith.constant 1 : i32
    %102 = arith.addi %101, %c1_i32_45 : i32
    %103 = arith.index_cast %102 : i32 to index
    %104 = memref.load %arg1[%103] : memref<64xi32, #tpu.memory_space<smem>>
    %c10_i32 = arith.constant 10 : i32
    %c1_i32_46 = arith.constant 1 : i32
    %c0_i32_47 = arith.constant 0 : i32
    %105 = tpu.memref_slice %arg2[%104, %c0_i32_47] : memref<512x32xf32, #tpu.memory_space<any>> -> memref<1x32xf32, #tpu.memory_space<any>>
    %106 = tpu.memref_squeeze %105 : memref<1x32xf32, #tpu.memory_space<any>> -> memref<32xf32, #tpu.memory_space<any>>
    %c0_i32_48 = arith.constant 0 : i32
    %107 = tpu.memref_slice %arg9[%c10_i32, %c0_i32_48] : memref<64x32xf32, #tpu.memory_space<vmem>> -> memref<1x32xf32, #tpu.memory_space<vmem>>
    %108 = tpu.memref_squeeze %107 : memref<1x32xf32, #tpu.memory_space<vmem>> -> memref<32xf32, #tpu.memory_space<vmem>>
    %109 = tpu.memref_slice %arg10[%c1_i32_46] : memref<8x!tpu.dma_semaphore, #tpu.memory_space<semaphore_mem>> -> memref<1x!tpu.dma_semaphore, #tpu.memory_space<semaphore_mem>>
    %110 = tpu.memref_squeeze %109 : memref<1x!tpu.dma_semaphore, #tpu.memory_space<semaphore_mem>> -> memref<!tpu.dma_semaphore, #tpu.memory_space<semaphore_mem>>
    tpu.enqueue_dma source(%106 : memref<32xf32, #tpu.memory_space<any>>) target(%108 : memref<32xf32, #tpu.memory_space<vmem>>) target_semaphore(%110 : memref<!tpu.dma_semaphore, #tpu.memory_space<semaphore_mem>>)
    %c24_i32_49 = arith.constant 24 : i32
    %111 = arith.addi %0, %c24_i32_49 : i32
    %c1_i32_50 = arith.constant 1 : i32
    %112 = arith.addi %111, %c1_i32_50 : i32
    %113 = arith.index_cast %112 : i32 to index
    %114 = memref.load %arg1[%113] : memref<64xi32, #tpu.memory_space<smem>>
    %c11_i32 = arith.constant 11 : i32
    %c1_i32_51 = arith.constant 1 : i32
    %c0_i32_52 = arith.constant 0 : i32
    %115 = tpu.memref_slice %arg2[%114, %c0_i32_52] : memref<512x32xf32, #tpu.memory_space<any>> -> memref<1x32xf32, #tpu.memory_space<any>>
    %116 = tpu.memref_squeeze %115 : memref<1x32xf32, #tpu.memory_space<any>> -> memref<32xf32, #tpu.memory_space<any>>
    %c0_i32_53 = arith.constant 0 : i32
    %117 = tpu.memref_slice %arg9[%c11_i32, %c0_i32_53] : memref<64x32xf32, #tpu.memory_space<vmem>> -> memref<1x32xf32, #tpu.memory_space<vmem>>
    %118 = tpu.memref_squeeze %117 : memref<1x32xf32, #tpu.memory_space<vmem>> -> memref<32xf32, #tpu.memory_space<vmem>>
    %119 = tpu.memref_slice %arg10[%c1_i32_51] : memref<8x!tpu.dma_semaphore, #tpu.memory_space<semaphore_mem>> -> memref<1x!tpu.dma_semaphore, #tpu.memory_space<semaphore_mem>>
    %120 = tpu.memref_squeeze %119 : memref<1x!tpu.dma_semaphore, #tpu.memory_space<semaphore_mem>> -> memref<!tpu.dma_semaphore, #tpu.memory_space<semaphore_mem>>
    tpu.enqueue_dma source(%116 : memref<32xf32, #tpu.memory_space<any>>) target(%118 : memref<32xf32, #tpu.memory_space<vmem>>) target_semaphore(%120 : memref<!tpu.dma_semaphore, #tpu.memory_space<semaphore_mem>>)
    %c32_i32_54 = arith.constant 32 : i32
    %121 = arith.addi %0, %c32_i32_54 : i32
    %c1_i32_55 = arith.constant 1 : i32
    %122 = arith.addi %121, %c1_i32_55 : i32
    %123 = arith.index_cast %122 : i32 to index
    %124 = memref.load %arg1[%123] : memref<64xi32, #tpu.memory_space<smem>>
    %c12_i32 = arith.constant 12 : i32
    %c1_i32_56 = arith.constant 1 : i32
    %c0_i32_57 = arith.constant 0 : i32
    %125 = tpu.memref_slice %arg2[%124, %c0_i32_57] : memref<512x32xf32, #tpu.memory_space<any>> -> memref<1x32xf32, #tpu.memory_space<any>>
    %126 = tpu.memref_squeeze %125 : memref<1x32xf32, #tpu.memory_space<any>> -> memref<32xf32, #tpu.memory_space<any>>
    %c0_i32_58 = arith.constant 0 : i32
    %127 = tpu.memref_slice %arg9[%c12_i32, %c0_i32_58] : memref<64x32xf32, #tpu.memory_space<vmem>> -> memref<1x32xf32, #tpu.memory_space<vmem>>
    %128 = tpu.memref_squeeze %127 : memref<1x32xf32, #tpu.memory_space<vmem>> -> memref<32xf32, #tpu.memory_space<vmem>>
    %129 = tpu.memref_slice %arg10[%c1_i32_56] : memref<8x!tpu.dma_semaphore, #tpu.memory_space<semaphore_mem>> -> memref<1x!tpu.dma_semaphore, #tpu.memory_space<semaphore_mem>>
    %130 = tpu.memref_squeeze %129 : memref<1x!tpu.dma_semaphore, #tpu.memory_space<semaphore_mem>> -> memref<!tpu.dma_semaphore, #tpu.memory_space<semaphore_mem>>
    tpu.enqueue_dma source(%126 : memref<32xf32, #tpu.memory_space<any>>) target(%128 : memref<32xf32, #tpu.memory_space<vmem>>) target_semaphore(%130 : memref<!tpu.dma_semaphore, #tpu.memory_space<semaphore_mem>>)
    %c40_i32_59 = arith.constant 40 : i32
    %131 = arith.addi %0, %c40_i32_59 : i32
    %c1_i32_60 = arith.constant 1 : i32
    %132 = arith.addi %131, %c1_i32_60 : i32
    %133 = arith.index_cast %132 : i32 to index
    %134 = memref.load %arg1[%133] : memref<64xi32, #tpu.memory_space<smem>>
    %c13_i32 = arith.constant 13 : i32
    %c1_i32_61 = arith.constant 1 : i32
    %c0_i32_62 = arith.constant 0 : i32
    %135 = tpu.memref_slice %arg2[%134, %c0_i32_62] : memref<512x32xf32, #tpu.memory_space<any>> -> memref<1x32xf32, #tpu.memory_space<any>>
    %136 = tpu.memref_squeeze %135 : memref<1x32xf32, #tpu.memory_space<any>> -> memref<32xf32, #tpu.memory_space<any>>
    %c0_i32_63 = arith.constant 0 : i32
    %137 = tpu.memref_slice %arg9[%c13_i32, %c0_i32_63] : memref<64x32xf32, #tpu.memory_space<vmem>> -> memref<1x32xf32, #tpu.memory_space<vmem>>
    %138 = tpu.memref_squeeze %137 : memref<1x32xf32, #tpu.memory_space<vmem>> -> memref<32xf32, #tpu.memory_space<vmem>>
    %139 = tpu.memref_slice %arg10[%c1_i32_61] : memref<8x!tpu.dma_semaphore, #tpu.memory_space<semaphore_mem>> -> memref<1x!tpu.dma_semaphore, #tpu.memory_space<semaphore_mem>>
    %140 = tpu.memref_squeeze %139 : memref<1x!tpu.dma_semaphore, #tpu.memory_space<semaphore_mem>> -> memref<!tpu.dma_semaphore, #tpu.memory_space<semaphore_mem>>
    tpu.enqueue_dma source(%136 : memref<32xf32, #tpu.memory_space<any>>) target(%138 : memref<32xf32, #tpu.memory_space<vmem>>) target_semaphore(%140 : memref<!tpu.dma_semaphore, #tpu.memory_space<semaphore_mem>>)
    %c48_i32_64 = arith.constant 48 : i32
    %141 = arith.addi %0, %c48_i32_64 : i32
    %c1_i32_65 = arith.constant 1 : i32
    %142 = arith.addi %141, %c1_i32_65 : i32
    %143 = arith.index_cast %142 : i32 to index
    %144 = memref.load %arg1[%143] : memref<64xi32, #tpu.memory_space<smem>>
    %c14_i32 = arith.constant 14 : i32
    %c1_i32_66 = arith.constant 1 : i32
    %c0_i32_67 = arith.constant 0 : i32
    %145 = tpu.memref_slice %arg2[%144, %c0_i32_67] : memref<512x32xf32, #tpu.memory_space<any>> -> memref<1x32xf32, #tpu.memory_space<any>>
    %146 = tpu.memref_squeeze %145 : memref<1x32xf32, #tpu.memory_space<any>> -> memref<32xf32, #tpu.memory_space<any>>
    %c0_i32_68 = arith.constant 0 : i32
    %147 = tpu.memref_slice %arg9[%c14_i32, %c0_i32_68] : memref<64x32xf32, #tpu.memory_space<vmem>> -> memref<1x32xf32, #tpu.memory_space<vmem>>
    %148 = tpu.memref_squeeze %147 : memref<1x32xf32, #tpu.memory_space<vmem>> -> memref<32xf32, #tpu.memory_space<vmem>>
    %149 = tpu.memref_slice %arg10[%c1_i32_66] : memref<8x!tpu.dma_semaphore, #tpu.memory_space<semaphore_mem>> -> memref<1x!tpu.dma_semaphore, #tpu.memory_space<semaphore_mem>>
    %150 = tpu.memref_squeeze %149 : memref<1x!tpu.dma_semaphore, #tpu.memory_space<semaphore_mem>> -> memref<!tpu.dma_semaphore, #tpu.memory_space<semaphore_mem>>
    tpu.enqueue_dma source(%146 : memref<32xf32, #tpu.memory_space<any>>) target(%148 : memref<32xf32, #tpu.memory_space<vmem>>) target_semaphore(%150 : memref<!tpu.dma_semaphore, #tpu.memory_space<semaphore_mem>>)
    %c56_i32_69 = arith.constant 56 : i32
    %151 = arith.addi %0, %c56_i32_69 : i32
    %c1_i32_70 = arith.constant 1 : i32
    %152 = arith.addi %151, %c1_i32_70 : i32
    %153 = arith.index_cast %152 : i32 to index
    %154 = memref.load %arg1[%153] : memref<64xi32, #tpu.memory_space<smem>>
    %c15_i32 = arith.constant 15 : i32
    %c1_i32_71 = arith.constant 1 : i32
    %c0_i32_72 = arith.constant 0 : i32
    %155 = tpu.memref_slice %arg2[%154, %c0_i32_72] : memref<512x32xf32, #tpu.memory_space<any>> -> memref<1x32xf32, #tpu.memory_space<any>>
    %156 = tpu.memref_squeeze %155 : memref<1x32xf32, #tpu.memory_space<any>> -> memref<32xf32, #tpu.memory_space<any>>
    %c0_i32_73 = arith.constant 0 : i32
    %157 = tpu.memref_slice %arg9[%c15_i32, %c0_i32_73] : memref<64x32xf32, #tpu.memory_space<vmem>> -> memref<1x32xf32, #tpu.memory_space<vmem>>
    %158 = tpu.memref_squeeze %157 : memref<1x32xf32, #tpu.memory_space<vmem>> -> memref<32xf32, #tpu.memory_space<vmem>>
    %159 = tpu.memref_slice %arg10[%c1_i32_71] : memref<8x!tpu.dma_semaphore, #tpu.memory_space<semaphore_mem>> -> memref<1x!tpu.dma_semaphore, #tpu.memory_space<semaphore_mem>>
    %160 = tpu.memref_squeeze %159 : memref<1x!tpu.dma_semaphore, #tpu.memory_space<semaphore_mem>> -> memref<!tpu.dma_semaphore, #tpu.memory_space<semaphore_mem>>
    tpu.enqueue_dma source(%156 : memref<32xf32, #tpu.memory_space<any>>) target(%158 : memref<32xf32, #tpu.memory_space<vmem>>) target_semaphore(%160 : memref<!tpu.dma_semaphore, #tpu.memory_space<semaphore_mem>>)
    %c0_i32_74 = arith.constant 0 : i32
    %161 = arith.addi %0, %c0_i32_74 : i32
    %c2_i32_75 = arith.constant 2 : i32
    %162 = arith.addi %161, %c2_i32_75 : i32
    %163 = arith.index_cast %162 : i32 to index
    %164 = memref.load %arg1[%163] : memref<64xi32, #tpu.memory_space<smem>>
    %c16_i32_76 = arith.constant 16 : i32
    %c2_i32_77 = arith.constant 2 : i32
    %c0_i32_78 = arith.constant 0 : i32
    %165 = tpu.memref_slice %arg2[%164, %c0_i32_78] : memref<512x32xf32, #tpu.memory_space<any>> -> memref<1x32xf32, #tpu.memory_space<any>>
    %166 = tpu.memref_squeeze %165 : memref<1x32xf32, #tpu.memory_space<any>> -> memref<32xf32, #tpu.memory_space<any>>
    %c0_i32_79 = arith.constant 0 : i32
    %167 = tpu.memref_slice %arg9[%c16_i32_76, %c0_i32_79] : memref<64x32xf32, #tpu.memory_space<vmem>> -> memref<1x32xf32, #tpu.memory_space<vmem>>
    %168 = tpu.memref_squeeze %167 : memref<1x32xf32, #tpu.memory_space<vmem>> -> memref<32xf32, #tpu.memory_space<vmem>>
    %169 = tpu.memref_slice %arg10[%c2_i32_77] : memref<8x!tpu.dma_semaphore, #tpu.memory_space<semaphore_mem>> -> memref<1x!tpu.dma_semaphore, #tpu.memory_space<semaphore_mem>>
    %170 = tpu.memref_squeeze %169 : memref<1x!tpu.dma_semaphore, #tpu.memory_space<semaphore_mem>> -> memref<!tpu.dma_semaphore, #tpu.memory_space<semaphore_mem>>
    tpu.enqueue_dma source(%166 : memref<32xf32, #tpu.memory_space<any>>) target(%168 : memref<32xf32, #tpu.memory_space<vmem>>) target_semaphore(%170 : memref<!tpu.dma_semaphore, #tpu.memory_space<semaphore_mem>>)
    %c8_i32_80 = arith.constant 8 : i32
    %171 = arith.addi %0, %c8_i32_80 : i32
    %c2_i32_81 = arith.constant 2 : i32
    %172 = arith.addi %171, %c2_i32_81 : i32
    %173 = arith.index_cast %172 : i32 to index
    %174 = memref.load %arg1[%173] : memref<64xi32, #tpu.memory_space<smem>>
    %c17_i32 = arith.constant 17 : i32
    %c2_i32_82 = arith.constant 2 : i32
    %c0_i32_83 = arith.constant 0 : i32
    %175 = tpu.memref_slice %arg2[%174, %c0_i32_83] : memref<512x32xf32, #tpu.memory_space<any>> -> memref<1x32xf32, #tpu.memory_space<any>>
    %176 = tpu.memref_squeeze %175 : memref<1x32xf32, #tpu.memory_space<any>> -> memref<32xf32, #tpu.memory_space<any>>
    %c0_i32_84 = arith.constant 0 : i32
    %177 = tpu.memref_slice %arg9[%c17_i32, %c0_i32_84] : memref<64x32xf32, #tpu.memory_space<vmem>> -> memref<1x32xf32, #tpu.memory_space<vmem>>
    %178 = tpu.memref_squeeze %177 : memref<1x32xf32, #tpu.memory_space<vmem>> -> memref<32xf32, #tpu.memory_space<vmem>>
    %179 = tpu.memref_slice %arg10[%c2_i32_82] : memref<8x!tpu.dma_semaphore, #tpu.memory_space<semaphore_mem>> -> memref<1x!tpu.dma_semaphore, #tpu.memory_space<semaphore_mem>>
    %180 = tpu.memref_squeeze %179 : memref<1x!tpu.dma_semaphore, #tpu.memory_space<semaphore_mem>> -> memref<!tpu.dma_semaphore, #tpu.memory_space<semaphore_mem>>
    tpu.enqueue_dma source(%176 : memref<32xf32, #tpu.memory_space<any>>) target(%178 : memref<32xf32, #tpu.memory_space<vmem>>) target_semaphore(%180 : memref<!tpu.dma_semaphore, #tpu.memory_space<semaphore_mem>>)
    %c16_i32_85 = arith.constant 16 : i32
    %181 = arith.addi %0, %c16_i32_85 : i32
    %c2_i32_86 = arith.constant 2 : i32
    %182 = arith.addi %181, %c2_i32_86 : i32
    %183 = arith.index_cast %182 : i32 to index
    %184 = memref.load %arg1[%183] : memref<64xi32, #tpu.memory_space<smem>>
    %c18_i32 = arith.constant 18 : i32
    %c2_i32_87 = arith.constant 2 : i32
    %c0_i32_88 = arith.constant 0 : i32
    %185 = tpu.memref_slice %arg2[%184, %c0_i32_88] : memref<512x32xf32, #tpu.memory_space<any>> -> memref<1x32xf32, #tpu.memory_space<any>>
    %186 = tpu.memref_squeeze %185 : memref<1x32xf32, #tpu.memory_space<any>> -> memref<32xf32, #tpu.memory_space<any>>
    %c0_i32_89 = arith.constant 0 : i32
    %187 = tpu.memref_slice %arg9[%c18_i32, %c0_i32_89] : memref<64x32xf32, #tpu.memory_space<vmem>> -> memref<1x32xf32, #tpu.memory_space<vmem>>
    %188 = tpu.memref_squeeze %187 : memref<1x32xf32, #tpu.memory_space<vmem>> -> memref<32xf32, #tpu.memory_space<vmem>>
    %189 = tpu.memref_slice %arg10[%c2_i32_87] : memref<8x!tpu.dma_semaphore, #tpu.memory_space<semaphore_mem>> -> memref<1x!tpu.dma_semaphore, #tpu.memory_space<semaphore_mem>>
    %190 = tpu.memref_squeeze %189 : memref<1x!tpu.dma_semaphore, #tpu.memory_space<semaphore_mem>> -> memref<!tpu.dma_semaphore, #tpu.memory_space<semaphore_mem>>
    tpu.enqueue_dma source(%186 : memref<32xf32, #tpu.memory_space<any>>) target(%188 : memref<32xf32, #tpu.memory_space<vmem>>) target_semaphore(%190 : memref<!tpu.dma_semaphore, #tpu.memory_space<semaphore_mem>>)
    %c24_i32_90 = arith.constant 24 : i32
    %191 = arith.addi %0, %c24_i32_90 : i32
    %c2_i32_91 = arith.constant 2 : i32
    %192 = arith.addi %191, %c2_i32_91 : i32
    %193 = arith.index_cast %192 : i32 to index
    %194 = memref.load %arg1[%193] : memref<64xi32, #tpu.memory_space<smem>>
    %c19_i32 = arith.constant 19 : i32
    %c2_i32_92 = arith.constant 2 : i32
    %c0_i32_93 = arith.constant 0 : i32
    %195 = tpu.memref_slice %arg2[%194, %c0_i32_93] : memref<512x32xf32, #tpu.memory_space<any>> -> memref<1x32xf32, #tpu.memory_space<any>>
    %196 = tpu.memref_squeeze %195 : memref<1x32xf32, #tpu.memory_space<any>> -> memref<32xf32, #tpu.memory_space<any>>
    %c0_i32_94 = arith.constant 0 : i32
    %197 = tpu.memref_slice %arg9[%c19_i32, %c0_i32_94] : memref<64x32xf32, #tpu.memory_space<vmem>> -> memref<1x32xf32, #tpu.memory_space<vmem>>
    %198 = tpu.memref_squeeze %197 : memref<1x32xf32, #tpu.memory_space<vmem>> -> memref<32xf32, #tpu.memory_space<vmem>>
    %199 = tpu.memref_slice %arg10[%c2_i32_92] : memref<8x!tpu.dma_semaphore, #tpu.memory_space<semaphore_mem>> -> memref<1x!tpu.dma_semaphore, #tpu.memory_space<semaphore_mem>>
    %200 = tpu.memref_squeeze %199 : memref<1x!tpu.dma_semaphore, #tpu.memory_space<semaphore_mem>> -> memref<!tpu.dma_semaphore, #tpu.memory_space<semaphore_mem>>
    tpu.enqueue_dma source(%196 : memref<32xf32, #tpu.memory_space<any>>) target(%198 : memref<32xf32, #tpu.memory_space<vmem>>) target_semaphore(%200 : memref<!tpu.dma_semaphore, #tpu.memory_space<semaphore_mem>>)
    %c32_i32_95 = arith.constant 32 : i32
    %201 = arith.addi %0, %c32_i32_95 : i32
    %c2_i32_96 = arith.constant 2 : i32
    %202 = arith.addi %201, %c2_i32_96 : i32
    %203 = arith.index_cast %202 : i32 to index
    %204 = memref.load %arg1[%203] : memref<64xi32, #tpu.memory_space<smem>>
    %c20_i32 = arith.constant 20 : i32
    %c2_i32_97 = arith.constant 2 : i32
    %c0_i32_98 = arith.constant 0 : i32
    %205 = tpu.memref_slice %arg2[%204, %c0_i32_98] : memref<512x32xf32, #tpu.memory_space<any>> -> memref<1x32xf32, #tpu.memory_space<any>>
    %206 = tpu.memref_squeeze %205 : memref<1x32xf32, #tpu.memory_space<any>> -> memref<32xf32, #tpu.memory_space<any>>
    %c0_i32_99 = arith.constant 0 : i32
    %207 = tpu.memref_slice %arg9[%c20_i32, %c0_i32_99] : memref<64x32xf32, #tpu.memory_space<vmem>> -> memref<1x32xf32, #tpu.memory_space<vmem>>
    %208 = tpu.memref_squeeze %207 : memref<1x32xf32, #tpu.memory_space<vmem>> -> memref<32xf32, #tpu.memory_space<vmem>>
    %209 = tpu.memref_slice %arg10[%c2_i32_97] : memref<8x!tpu.dma_semaphore, #tpu.memory_space<semaphore_mem>> -> memref<1x!tpu.dma_semaphore, #tpu.memory_space<semaphore_mem>>
    %210 = tpu.memref_squeeze %209 : memref<1x!tpu.dma_semaphore, #tpu.memory_space<semaphore_mem>> -> memref<!tpu.dma_semaphore, #tpu.memory_space<semaphore_mem>>
    tpu.enqueue_dma source(%206 : memref<32xf32, #tpu.memory_space<any>>) target(%208 : memref<32xf32, #tpu.memory_space<vmem>>) target_semaphore(%210 : memref<!tpu.dma_semaphore, #tpu.memory_space<semaphore_mem>>)
    %c40_i32_100 = arith.constant 40 : i32
    %211 = arith.addi %0, %c40_i32_100 : i32
    %c2_i32_101 = arith.constant 2 : i32
    %212 = arith.addi %211, %c2_i32_101 : i32
    %213 = arith.index_cast %212 : i32 to index
    %214 = memref.load %arg1[%213] : memref<64xi32, #tpu.memory_space<smem>>
    %c21_i32 = arith.constant 21 : i32
    %c2_i32_102 = arith.constant 2 : i32
    %c0_i32_103 = arith.constant 0 : i32
    %215 = tpu.memref_slice %arg2[%214, %c0_i32_103] : memref<512x32xf32, #tpu.memory_space<any>> -> memref<1x32xf32, #tpu.memory_space<any>>
    %216 = tpu.memref_squeeze %215 : memref<1x32xf32, #tpu.memory_space<any>> -> memref<32xf32, #tpu.memory_space<any>>
    %c0_i32_104 = arith.constant 0 : i32
    %217 = tpu.memref_slice %arg9[%c21_i32, %c0_i32_104] : memref<64x32xf32, #tpu.memory_space<vmem>> -> memref<1x32xf32, #tpu.memory_space<vmem>>
    %218 = tpu.memref_squeeze %217 : memref<1x32xf32, #tpu.memory_space<vmem>> -> memref<32xf32, #tpu.memory_space<vmem>>
    %219 = tpu.memref_slice %arg10[%c2_i32_102] : memref<8x!tpu.dma_semaphore, #tpu.memory_space<semaphore_mem>> -> memref<1x!tpu.dma_semaphore, #tpu.memory_space<semaphore_mem>>
    %220 = tpu.memref_squeeze %219 : memref<1x!tpu.dma_semaphore, #tpu.memory_space<semaphore_mem>> -> memref<!tpu.dma_semaphore, #tpu.memory_space<semaphore_mem>>
    tpu.enqueue_dma source(%216 : memref<32xf32, #tpu.memory_space<any>>) target(%218 : memref<32xf32, #tpu.memory_space<vmem>>) target_semaphore(%220 : memref<!tpu.dma_semaphore, #tpu.memory_space<semaphore_mem>>)
    %c48_i32_105 = arith.constant 48 : i32
    %221 = arith.addi %0, %c48_i32_105 : i32
    %c2_i32_106 = arith.constant 2 : i32
    %222 = arith.addi %221, %c2_i32_106 : i32
    %223 = arith.index_cast %222 : i32 to index
    %224 = memref.load %arg1[%223] : memref<64xi32, #tpu.memory_space<smem>>
    %c22_i32 = arith.constant 22 : i32
    %c2_i32_107 = arith.constant 2 : i32
    %c0_i32_108 = arith.constant 0 : i32
    %225 = tpu.memref_slice %arg2[%224, %c0_i32_108] : memref<512x32xf32, #tpu.memory_space<any>> -> memref<1x32xf32, #tpu.memory_space<any>>
    %226 = tpu.memref_squeeze %225 : memref<1x32xf32, #tpu.memory_space<any>> -> memref<32xf32, #tpu.memory_space<any>>
    %c0_i32_109 = arith.constant 0 : i32
    %227 = tpu.memref_slice %arg9[%c22_i32, %c0_i32_109] : memref<64x32xf32, #tpu.memory_space<vmem>> -> memref<1x32xf32, #tpu.memory_space<vmem>>
    %228 = tpu.memref_squeeze %227 : memref<1x32xf32, #tpu.memory_space<vmem>> -> memref<32xf32, #tpu.memory_space<vmem>>
    %229 = tpu.memref_slice %arg10[%c2_i32_107] : memref<8x!tpu.dma_semaphore, #tpu.memory_space<semaphore_mem>> -> memref<1x!tpu.dma_semaphore, #tpu.memory_space<semaphore_mem>>
    %230 = tpu.memref_squeeze %229 : memref<1x!tpu.dma_semaphore, #tpu.memory_space<semaphore_mem>> -> memref<!tpu.dma_semaphore, #tpu.memory_space<semaphore_mem>>
    tpu.enqueue_dma source(%226 : memref<32xf32, #tpu.memory_space<any>>) target(%228 : memref<32xf32, #tpu.memory_space<vmem>>) target_semaphore(%230 : memref<!tpu.dma_semaphore, #tpu.memory_space<semaphore_mem>>)
    %c56_i32_110 = arith.constant 56 : i32
    %231 = arith.addi %0, %c56_i32_110 : i32
    %c2_i32_111 = arith.constant 2 : i32
    %232 = arith.addi %231, %c2_i32_111 : i32
    %233 = arith.index_cast %232 : i32 to index
    %234 = memref.load %arg1[%233] : memref<64xi32, #tpu.memory_space<smem>>
    %c23_i32 = arith.constant 23 : i32
    %c2_i32_112 = arith.constant 2 : i32
    %c0_i32_113 = arith.constant 0 : i32
    %235 = tpu.memref_slice %arg2[%234, %c0_i32_113] : memref<512x32xf32, #tpu.memory_space<any>> -> memref<1x32xf32, #tpu.memory_space<any>>
    %236 = tpu.memref_squeeze %235 : memref<1x32xf32, #tpu.memory_space<any>> -> memref<32xf32, #tpu.memory_space<any>>
    %c0_i32_114 = arith.constant 0 : i32
    %237 = tpu.memref_slice %arg9[%c23_i32, %c0_i32_114] : memref<64x32xf32, #tpu.memory_space<vmem>> -> memref<1x32xf32, #tpu.memory_space<vmem>>
    %238 = tpu.memref_squeeze %237 : memref<1x32xf32, #tpu.memory_space<vmem>> -> memref<32xf32, #tpu.memory_space<vmem>>
    %239 = tpu.memref_slice %arg10[%c2_i32_112] : memref<8x!tpu.dma_semaphore, #tpu.memory_space<semaphore_mem>> -> memref<1x!tpu.dma_semaphore, #tpu.memory_space<semaphore_mem>>
    %240 = tpu.memref_squeeze %239 : memref<1x!tpu.dma_semaphore, #tpu.memory_space<semaphore_mem>> -> memref<!tpu.dma_semaphore, #tpu.memory_space<semaphore_mem>>
    tpu.enqueue_dma source(%236 : memref<32xf32, #tpu.memory_space<any>>) target(%238 : memref<32xf32, #tpu.memory_space<vmem>>) target_semaphore(%240 : memref<!tpu.dma_semaphore, #tpu.memory_space<semaphore_mem>>)
    %c0_i32_115 = arith.constant 0 : i32
    %241 = arith.addi %0, %c0_i32_115 : i32
    %c3_i32_116 = arith.constant 3 : i32
    %242 = arith.addi %241, %c3_i32_116 : i32
    %243 = arith.index_cast %242 : i32 to index
    %244 = memref.load %arg1[%243] : memref<64xi32, #tpu.memory_space<smem>>
    %c24_i32_117 = arith.constant 24 : i32
    %c3_i32_118 = arith.constant 3 : i32
    %c0_i32_119 = arith.constant 0 : i32
    %245 = tpu.memref_slice %arg2[%244, %c0_i32_119] : memref<512x32xf32, #tpu.memory_space<any>> -> memref<1x32xf32, #tpu.memory_space<any>>
    %246 = tpu.memref_squeeze %245 : memref<1x32xf32, #tpu.memory_space<any>> -> memref<32xf32, #tpu.memory_space<any>>
    %c0_i32_120 = arith.constant 0 : i32
    %247 = tpu.memref_slice %arg9[%c24_i32_117, %c0_i32_120] : memref<64x32xf32, #tpu.memory_space<vmem>> -> memref<1x32xf32, #tpu.memory_space<vmem>>
    %248 = tpu.memref_squeeze %247 : memref<1x32xf32, #tpu.memory_space<vmem>> -> memref<32xf32, #tpu.memory_space<vmem>>
    %249 = tpu.memref_slice %arg10[%c3_i32_118] : memref<8x!tpu.dma_semaphore, #tpu.memory_space<semaphore_mem>> -> memref<1x!tpu.dma_semaphore, #tpu.memory_space<semaphore_mem>>
    %250 = tpu.memref_squeeze %249 : memref<1x!tpu.dma_semaphore, #tpu.memory_space<semaphore_mem>> -> memref<!tpu.dma_semaphore, #tpu.memory_space<semaphore_mem>>
    tpu.enqueue_dma source(%246 : memref<32xf32, #tpu.memory_space<any>>) target(%248 : memref<32xf32, #tpu.memory_space<vmem>>) target_semaphore(%250 : memref<!tpu.dma_semaphore, #tpu.memory_space<semaphore_mem>>)
    %c8_i32_121 = arith.constant 8 : i32
    %251 = arith.addi %0, %c8_i32_121 : i32
    %c3_i32_122 = arith.constant 3 : i32
    %252 = arith.addi %251, %c3_i32_122 : i32
    %253 = arith.index_cast %252 : i32 to index
    %254 = memref.load %arg1[%253] : memref<64xi32, #tpu.memory_space<smem>>
    %c25_i32 = arith.constant 25 : i32
    %c3_i32_123 = arith.constant 3 : i32
    %c0_i32_124 = arith.constant 0 : i32
    %255 = tpu.memref_slice %arg2[%254, %c0_i32_124] : memref<512x32xf32, #tpu.memory_space<any>> -> memref<1x32xf32, #tpu.memory_space<any>>
    %256 = tpu.memref_squeeze %255 : memref<1x32xf32, #tpu.memory_space<any>> -> memref<32xf32, #tpu.memory_space<any>>
    %c0_i32_125 = arith.constant 0 : i32
    %257 = tpu.memref_slice %arg9[%c25_i32, %c0_i32_125] : memref<64x32xf32, #tpu.memory_space<vmem>> -> memref<1x32xf32, #tpu.memory_space<vmem>>
    %258 = tpu.memref_squeeze %257 : memref<1x32xf32, #tpu.memory_space<vmem>> -> memref<32xf32, #tpu.memory_space<vmem>>
    %259 = tpu.memref_slice %arg10[%c3_i32_123] : memref<8x!tpu.dma_semaphore, #tpu.memory_space<semaphore_mem>> -> memref<1x!tpu.dma_semaphore, #tpu.memory_space<semaphore_mem>>
    %260 = tpu.memref_squeeze %259 : memref<1x!tpu.dma_semaphore, #tpu.memory_space<semaphore_mem>> -> memref<!tpu.dma_semaphore, #tpu.memory_space<semaphore_mem>>
    tpu.enqueue_dma source(%256 : memref<32xf32, #tpu.memory_space<any>>) target(%258 : memref<32xf32, #tpu.memory_space<vmem>>) target_semaphore(%260 : memref<!tpu.dma_semaphore, #tpu.memory_space<semaphore_mem>>)
    %c16_i32_126 = arith.constant 16 : i32
    %261 = arith.addi %0, %c16_i32_126 : i32
    %c3_i32_127 = arith.constant 3 : i32
    %262 = arith.addi %261, %c3_i32_127 : i32
    %263 = arith.index_cast %262 : i32 to index
    %264 = memref.load %arg1[%263] : memref<64xi32, #tpu.memory_space<smem>>
    %c26_i32 = arith.constant 26 : i32
    %c3_i32_128 = arith.constant 3 : i32
    %c0_i32_129 = arith.constant 0 : i32
    %265 = tpu.memref_slice %arg2[%264, %c0_i32_129] : memref<512x32xf32, #tpu.memory_space<any>> -> memref<1x32xf32, #tpu.memory_space<any>>
    %266 = tpu.memref_squeeze %265 : memref<1x32xf32, #tpu.memory_space<any>> -> memref<32xf32, #tpu.memory_space<any>>
    %c0_i32_130 = arith.constant 0 : i32
    %267 = tpu.memref_slice %arg9[%c26_i32, %c0_i32_130] : memref<64x32xf32, #tpu.memory_space<vmem>> -> memref<1x32xf32, #tpu.memory_space<vmem>>
    %268 = tpu.memref_squeeze %267 : memref<1x32xf32, #tpu.memory_space<vmem>> -> memref<32xf32, #tpu.memory_space<vmem>>
    %269 = tpu.memref_slice %arg10[%c3_i32_128] : memref<8x!tpu.dma_semaphore, #tpu.memory_space<semaphore_mem>> -> memref<1x!tpu.dma_semaphore, #tpu.memory_space<semaphore_mem>>
    %270 = tpu.memref_squeeze %269 : memref<1x!tpu.dma_semaphore, #tpu.memory_space<semaphore_mem>> -> memref<!tpu.dma_semaphore, #tpu.memory_space<semaphore_mem>>
    tpu.enqueue_dma source(%266 : memref<32xf32, #tpu.memory_space<any>>) target(%268 : memref<32xf32, #tpu.memory_space<vmem>>) target_semaphore(%270 : memref<!tpu.dma_semaphore, #tpu.memory_space<semaphore_mem>>)
    %c24_i32_131 = arith.constant 24 : i32
    %271 = arith.addi %0, %c24_i32_131 : i32
    %c3_i32_132 = arith.constant 3 : i32
    %272 = arith.addi %271, %c3_i32_132 : i32
    %273 = arith.index_cast %272 : i32 to index
    %274 = memref.load %arg1[%273] : memref<64xi32, #tpu.memory_space<smem>>
    %c27_i32 = arith.constant 27 : i32
    %c3_i32_133 = arith.constant 3 : i32
    %c0_i32_134 = arith.constant 0 : i32
    %275 = tpu.memref_slice %arg2[%274, %c0_i32_134] : memref<512x32xf32, #tpu.memory_space<any>> -> memref<1x32xf32, #tpu.memory_space<any>>
    %276 = tpu.memref_squeeze %275 : memref<1x32xf32, #tpu.memory_space<any>> -> memref<32xf32, #tpu.memory_space<any>>
    %c0_i32_135 = arith.constant 0 : i32
    %277 = tpu.memref_slice %arg9[%c27_i32, %c0_i32_135] : memref<64x32xf32, #tpu.memory_space<vmem>> -> memref<1x32xf32, #tpu.memory_space<vmem>>
    %278 = tpu.memref_squeeze %277 : memref<1x32xf32, #tpu.memory_space<vmem>> -> memref<32xf32, #tpu.memory_space<vmem>>
    %279 = tpu.memref_slice %arg10[%c3_i32_133] : memref<8x!tpu.dma_semaphore, #tpu.memory_space<semaphore_mem>> -> memref<1x!tpu.dma_semaphore, #tpu.memory_space<semaphore_mem>>
    %280 = tpu.memref_squeeze %279 : memref<1x!tpu.dma_semaphore, #tpu.memory_space<semaphore_mem>> -> memref<!tpu.dma_semaphore, #tpu.memory_space<semaphore_mem>>
    tpu.enqueue_dma source(%276 : memref<32xf32, #tpu.memory_space<any>>) target(%278 : memref<32xf32, #tpu.memory_space<vmem>>) target_semaphore(%280 : memref<!tpu.dma_semaphore, #tpu.memory_space<semaphore_mem>>)
    %c32_i32_136 = arith.constant 32 : i32
    %281 = arith.addi %0, %c32_i32_136 : i32
    %c3_i32_137 = arith.constant 3 : i32
    %282 = arith.addi %281, %c3_i32_137 : i32
    %283 = arith.index_cast %282 : i32 to index
    %284 = memref.load %arg1[%283] : memref<64xi32, #tpu.memory_space<smem>>
    %c28_i32 = arith.constant 28 : i32
    %c3_i32_138 = arith.constant 3 : i32
    %c0_i32_139 = arith.constant 0 : i32
    %285 = tpu.memref_slice %arg2[%284, %c0_i32_139] : memref<512x32xf32, #tpu.memory_space<any>> -> memref<1x32xf32, #tpu.memory_space<any>>
    %286 = tpu.memref_squeeze %285 : memref<1x32xf32, #tpu.memory_space<any>> -> memref<32xf32, #tpu.memory_space<any>>
    %c0_i32_140 = arith.constant 0 : i32
    %287 = tpu.memref_slice %arg9[%c28_i32, %c0_i32_140] : memref<64x32xf32, #tpu.memory_space<vmem>> -> memref<1x32xf32, #tpu.memory_space<vmem>>
    %288 = tpu.memref_squeeze %287 : memref<1x32xf32, #tpu.memory_space<vmem>> -> memref<32xf32, #tpu.memory_space<vmem>>
    %289 = tpu.memref_slice %arg10[%c3_i32_138] : memref<8x!tpu.dma_semaphore, #tpu.memory_space<semaphore_mem>> -> memref<1x!tpu.dma_semaphore, #tpu.memory_space<semaphore_mem>>
    %290 = tpu.memref_squeeze %289 : memref<1x!tpu.dma_semaphore, #tpu.memory_space<semaphore_mem>> -> memref<!tpu.dma_semaphore, #tpu.memory_space<semaphore_mem>>
    tpu.enqueue_dma source(%286 : memref<32xf32, #tpu.memory_space<any>>) target(%288 : memref<32xf32, #tpu.memory_space<vmem>>) target_semaphore(%290 : memref<!tpu.dma_semaphore, #tpu.memory_space<semaphore_mem>>)
    %c40_i32_141 = arith.constant 40 : i32
    %291 = arith.addi %0, %c40_i32_141 : i32
    %c3_i32_142 = arith.constant 3 : i32
    %292 = arith.addi %291, %c3_i32_142 : i32
    %293 = arith.index_cast %292 : i32 to index
    %294 = memref.load %arg1[%293] : memref<64xi32, #tpu.memory_space<smem>>
    %c29_i32 = arith.constant 29 : i32
    %c3_i32_143 = arith.constant 3 : i32
    %c0_i32_144 = arith.constant 0 : i32
    %295 = tpu.memref_slice %arg2[%294, %c0_i32_144] : memref<512x32xf32, #tpu.memory_space<any>> -> memref<1x32xf32, #tpu.memory_space<any>>
    %296 = tpu.memref_squeeze %295 : memref<1x32xf32, #tpu.memory_space<any>> -> memref<32xf32, #tpu.memory_space<any>>
    %c0_i32_145 = arith.constant 0 : i32
    %297 = tpu.memref_slice %arg9[%c29_i32, %c0_i32_145] : memref<64x32xf32, #tpu.memory_space<vmem>> -> memref<1x32xf32, #tpu.memory_space<vmem>>
    %298 = tpu.memref_squeeze %297 : memref<1x32xf32, #tpu.memory_space<vmem>> -> memref<32xf32, #tpu.memory_space<vmem>>
    %299 = tpu.memref_slice %arg10[%c3_i32_143] : memref<8x!tpu.dma_semaphore, #tpu.memory_space<semaphore_mem>> -> memref<1x!tpu.dma_semaphore, #tpu.memory_space<semaphore_mem>>
    %300 = tpu.memref_squeeze %299 : memref<1x!tpu.dma_semaphore, #tpu.memory_space<semaphore_mem>> -> memref<!tpu.dma_semaphore, #tpu.memory_space<semaphore_mem>>
    tpu.enqueue_dma source(%296 : memref<32xf32, #tpu.memory_space<any>>) target(%298 : memref<32xf32, #tpu.memory_space<vmem>>) target_semaphore(%300 : memref<!tpu.dma_semaphore, #tpu.memory_space<semaphore_mem>>)
    %c48_i32_146 = arith.constant 48 : i32
    %301 = arith.addi %0, %c48_i32_146 : i32
    %c3_i32_147 = arith.constant 3 : i32
    %302 = arith.addi %301, %c3_i32_147 : i32
    %303 = arith.index_cast %302 : i32 to index
    %304 = memref.load %arg1[%303] : memref<64xi32, #tpu.memory_space<smem>>
    %c30_i32 = arith.constant 30 : i32
    %c3_i32_148 = arith.constant 3 : i32
    %c0_i32_149 = arith.constant 0 : i32
    %305 = tpu.memref_slice %arg2[%304, %c0_i32_149] : memref<512x32xf32, #tpu.memory_space<any>> -> memref<1x32xf32, #tpu.memory_space<any>>
    %306 = tpu.memref_squeeze %305 : memref<1x32xf32, #tpu.memory_space<any>> -> memref<32xf32, #tpu.memory_space<any>>
    %c0_i32_150 = arith.constant 0 : i32
    %307 = tpu.memref_slice %arg9[%c30_i32, %c0_i32_150] : memref<64x32xf32, #tpu.memory_space<vmem>> -> memref<1x32xf32, #tpu.memory_space<vmem>>
    %308 = tpu.memref_squeeze %307 : memref<1x32xf32, #tpu.memory_space<vmem>> -> memref<32xf32, #tpu.memory_space<vmem>>
    %309 = tpu.memref_slice %arg10[%c3_i32_148] : memref<8x!tpu.dma_semaphore, #tpu.memory_space<semaphore_mem>> -> memref<1x!tpu.dma_semaphore, #tpu.memory_space<semaphore_mem>>
    %310 = tpu.memref_squeeze %309 : memref<1x!tpu.dma_semaphore, #tpu.memory_space<semaphore_mem>> -> memref<!tpu.dma_semaphore, #tpu.memory_space<semaphore_mem>>
    tpu.enqueue_dma source(%306 : memref<32xf32, #tpu.memory_space<any>>) target(%308 : memref<32xf32, #tpu.memory_space<vmem>>) target_semaphore(%310 : memref<!tpu.dma_semaphore, #tpu.memory_space<semaphore_mem>>)
    %c56_i32_151 = arith.constant 56 : i32
    %311 = arith.addi %0, %c56_i32_151 : i32
    %c3_i32_152 = arith.constant 3 : i32
    %312 = arith.addi %311, %c3_i32_152 : i32
    %313 = arith.index_cast %312 : i32 to index
    %314 = memref.load %arg1[%313] : memref<64xi32, #tpu.memory_space<smem>>
    %c31_i32 = arith.constant 31 : i32
    %c3_i32_153 = arith.constant 3 : i32
    %c0_i32_154 = arith.constant 0 : i32
    %315 = tpu.memref_slice %arg2[%314, %c0_i32_154] : memref<512x32xf32, #tpu.memory_space<any>> -> memref<1x32xf32, #tpu.memory_space<any>>
    %316 = tpu.memref_squeeze %315 : memref<1x32xf32, #tpu.memory_space<any>> -> memref<32xf32, #tpu.memory_space<any>>
    %c0_i32_155 = arith.constant 0 : i32
    %317 = tpu.memref_slice %arg9[%c31_i32, %c0_i32_155] : memref<64x32xf32, #tpu.memory_space<vmem>> -> memref<1x32xf32, #tpu.memory_space<vmem>>
    %318 = tpu.memref_squeeze %317 : memref<1x32xf32, #tpu.memory_space<vmem>> -> memref<32xf32, #tpu.memory_space<vmem>>
    %319 = tpu.memref_slice %arg10[%c3_i32_153] : memref<8x!tpu.dma_semaphore, #tpu.memory_space<semaphore_mem>> -> memref<1x!tpu.dma_semaphore, #tpu.memory_space<semaphore_mem>>
    %320 = tpu.memref_squeeze %319 : memref<1x!tpu.dma_semaphore, #tpu.memory_space<semaphore_mem>> -> memref<!tpu.dma_semaphore, #tpu.memory_space<semaphore_mem>>
    tpu.enqueue_dma source(%316 : memref<32xf32, #tpu.memory_space<any>>) target(%318 : memref<32xf32, #tpu.memory_space<vmem>>) target_semaphore(%320 : memref<!tpu.dma_semaphore, #tpu.memory_space<semaphore_mem>>)
    %c0_i32_156 = arith.constant 0 : i32
    %321 = arith.addi %0, %c0_i32_156 : i32
    %c4_i32_157 = arith.constant 4 : i32
    %322 = arith.addi %321, %c4_i32_157 : i32
    %323 = arith.index_cast %322 : i32 to index
    %324 = memref.load %arg1[%323] : memref<64xi32, #tpu.memory_space<smem>>
    %c32_i32_158 = arith.constant 32 : i32
    %c4_i32_159 = arith.constant 4 : i32
    %c0_i32_160 = arith.constant 0 : i32
    %325 = tpu.memref_slice %arg2[%324, %c0_i32_160] : memref<512x32xf32, #tpu.memory_space<any>> -> memref<1x32xf32, #tpu.memory_space<any>>
    %326 = tpu.memref_squeeze %325 : memref<1x32xf32, #tpu.memory_space<any>> -> memref<32xf32, #tpu.memory_space<any>>
    %c0_i32_161 = arith.constant 0 : i32
    %327 = tpu.memref_slice %arg9[%c32_i32_158, %c0_i32_161] : memref<64x32xf32, #tpu.memory_space<vmem>> -> memref<1x32xf32, #tpu.memory_space<vmem>>
    %328 = tpu.memref_squeeze %327 : memref<1x32xf32, #tpu.memory_space<vmem>> -> memref<32xf32, #tpu.memory_space<vmem>>
    %329 = tpu.memref_slice %arg10[%c4_i32_159] : memref<8x!tpu.dma_semaphore, #tpu.memory_space<semaphore_mem>> -> memref<1x!tpu.dma_semaphore, #tpu.memory_space<semaphore_mem>>
    %330 = tpu.memref_squeeze %329 : memref<1x!tpu.dma_semaphore, #tpu.memory_space<semaphore_mem>> -> memref<!tpu.dma_semaphore, #tpu.memory_space<semaphore_mem>>
    tpu.enqueue_dma source(%326 : memref<32xf32, #tpu.memory_space<any>>) target(%328 : memref<32xf32, #tpu.memory_space<vmem>>) target_semaphore(%330 : memref<!tpu.dma_semaphore, #tpu.memory_space<semaphore_mem>>)
    %c8_i32_162 = arith.constant 8 : i32
    %331 = arith.addi %0, %c8_i32_162 : i32
    %c4_i32_163 = arith.constant 4 : i32
    %332 = arith.addi %331, %c4_i32_163 : i32
    %333 = arith.index_cast %332 : i32 to index
    %334 = memref.load %arg1[%333] : memref<64xi32, #tpu.memory_space<smem>>
    %c33_i32 = arith.constant 33 : i32
    %c4_i32_164 = arith.constant 4 : i32
    %c0_i32_165 = arith.constant 0 : i32
    %335 = tpu.memref_slice %arg2[%334, %c0_i32_165] : memref<512x32xf32, #tpu.memory_space<any>> -> memref<1x32xf32, #tpu.memory_space<any>>
    %336 = tpu.memref_squeeze %335 : memref<1x32xf32, #tpu.memory_space<any>> -> memref<32xf32, #tpu.memory_space<any>>
    %c0_i32_166 = arith.constant 0 : i32
    %337 = tpu.memref_slice %arg9[%c33_i32, %c0_i32_166] : memref<64x32xf32, #tpu.memory_space<vmem>> -> memref<1x32xf32, #tpu.memory_space<vmem>>
    %338 = tpu.memref_squeeze %337 : memref<1x32xf32, #tpu.memory_space<vmem>> -> memref<32xf32, #tpu.memory_space<vmem>>
    %339 = tpu.memref_slice %arg10[%c4_i32_164] : memref<8x!tpu.dma_semaphore, #tpu.memory_space<semaphore_mem>> -> memref<1x!tpu.dma_semaphore, #tpu.memory_space<semaphore_mem>>
    %340 = tpu.memref_squeeze %339 : memref<1x!tpu.dma_semaphore, #tpu.memory_space<semaphore_mem>> -> memref<!tpu.dma_semaphore, #tpu.memory_space<semaphore_mem>>
    tpu.enqueue_dma source(%336 : memref<32xf32, #tpu.memory_space<any>>) target(%338 : memref<32xf32, #tpu.memory_space<vmem>>) target_semaphore(%340 : memref<!tpu.dma_semaphore, #tpu.memory_space<semaphore_mem>>)
    %c16_i32_167 = arith.constant 16 : i32
    %341 = arith.addi %0, %c16_i32_167 : i32
    %c4_i32_168 = arith.constant 4 : i32
    %342 = arith.addi %341, %c4_i32_168 : i32
    %343 = arith.index_cast %342 : i32 to index
    %344 = memref.load %arg1[%343] : memref<64xi32, #tpu.memory_space<smem>>
    %c34_i32 = arith.constant 34 : i32
    %c4_i32_169 = arith.constant 4 : i32
    %c0_i32_170 = arith.constant 0 : i32
    %345 = tpu.memref_slice %arg2[%344, %c0_i32_170] : memref<512x32xf32, #tpu.memory_space<any>> -> memref<1x32xf32, #tpu.memory_space<any>>
    %346 = tpu.memref_squeeze %345 : memref<1x32xf32, #tpu.memory_space<any>> -> memref<32xf32, #tpu.memory_space<any>>
    %c0_i32_171 = arith.constant 0 : i32
    %347 = tpu.memref_slice %arg9[%c34_i32, %c0_i32_171] : memref<64x32xf32, #tpu.memory_space<vmem>> -> memref<1x32xf32, #tpu.memory_space<vmem>>
    %348 = tpu.memref_squeeze %347 : memref<1x32xf32, #tpu.memory_space<vmem>> -> memref<32xf32, #tpu.memory_space<vmem>>
    %349 = tpu.memref_slice %arg10[%c4_i32_169] : memref<8x!tpu.dma_semaphore, #tpu.memory_space<semaphore_mem>> -> memref<1x!tpu.dma_semaphore, #tpu.memory_space<semaphore_mem>>
    %350 = tpu.memref_squeeze %349 : memref<1x!tpu.dma_semaphore, #tpu.memory_space<semaphore_mem>> -> memref<!tpu.dma_semaphore, #tpu.memory_space<semaphore_mem>>
    tpu.enqueue_dma source(%346 : memref<32xf32, #tpu.memory_space<any>>) target(%348 : memref<32xf32, #tpu.memory_space<vmem>>) target_semaphore(%350 : memref<!tpu.dma_semaphore, #tpu.memory_space<semaphore_mem>>)
    %c24_i32_172 = arith.constant 24 : i32
    %351 = arith.addi %0, %c24_i32_172 : i32
    %c4_i32_173 = arith.constant 4 : i32
    %352 = arith.addi %351, %c4_i32_173 : i32
    %353 = arith.index_cast %352 : i32 to index
    %354 = memref.load %arg1[%353] : memref<64xi32, #tpu.memory_space<smem>>
    %c35_i32 = arith.constant 35 : i32
    %c4_i32_174 = arith.constant 4 : i32
    %c0_i32_175 = arith.constant 0 : i32
    %355 = tpu.memref_slice %arg2[%354, %c0_i32_175] : memref<512x32xf32, #tpu.memory_space<any>> -> memref<1x32xf32, #tpu.memory_space<any>>
    %356 = tpu.memref_squeeze %355 : memref<1x32xf32, #tpu.memory_space<any>> -> memref<32xf32, #tpu.memory_space<any>>
    %c0_i32_176 = arith.constant 0 : i32
    %357 = tpu.memref_slice %arg9[%c35_i32, %c0_i32_176] : memref<64x32xf32, #tpu.memory_space<vmem>> -> memref<1x32xf32, #tpu.memory_space<vmem>>
    %358 = tpu.memref_squeeze %357 : memref<1x32xf32, #tpu.memory_space<vmem>> -> memref<32xf32, #tpu.memory_space<vmem>>
    %359 = tpu.memref_slice %arg10[%c4_i32_174] : memref<8x!tpu.dma_semaphore, #tpu.memory_space<semaphore_mem>> -> memref<1x!tpu.dma_semaphore, #tpu.memory_space<semaphore_mem>>
    %360 = tpu.memref_squeeze %359 : memref<1x!tpu.dma_semaphore, #tpu.memory_space<semaphore_mem>> -> memref<!tpu.dma_semaphore, #tpu.memory_space<semaphore_mem>>
    tpu.enqueue_dma source(%356 : memref<32xf32, #tpu.memory_space<any>>) target(%358 : memref<32xf32, #tpu.memory_space<vmem>>) target_semaphore(%360 : memref<!tpu.dma_semaphore, #tpu.memory_space<semaphore_mem>>)
    %c32_i32_177 = arith.constant 32 : i32
    %361 = arith.addi %0, %c32_i32_177 : i32
    %c4_i32_178 = arith.constant 4 : i32
    %362 = arith.addi %361, %c4_i32_178 : i32
    %363 = arith.index_cast %362 : i32 to index
    %364 = memref.load %arg1[%363] : memref<64xi32, #tpu.memory_space<smem>>
    %c36_i32 = arith.constant 36 : i32
    %c4_i32_179 = arith.constant 4 : i32
    %c0_i32_180 = arith.constant 0 : i32
    %365 = tpu.memref_slice %arg2[%364, %c0_i32_180] : memref<512x32xf32, #tpu.memory_space<any>> -> memref<1x32xf32, #tpu.memory_space<any>>
    %366 = tpu.memref_squeeze %365 : memref<1x32xf32, #tpu.memory_space<any>> -> memref<32xf32, #tpu.memory_space<any>>
    %c0_i32_181 = arith.constant 0 : i32
    %367 = tpu.memref_slice %arg9[%c36_i32, %c0_i32_181] : memref<64x32xf32, #tpu.memory_space<vmem>> -> memref<1x32xf32, #tpu.memory_space<vmem>>
    %368 = tpu.memref_squeeze %367 : memref<1x32xf32, #tpu.memory_space<vmem>> -> memref<32xf32, #tpu.memory_space<vmem>>
    %369 = tpu.memref_slice %arg10[%c4_i32_179] : memref<8x!tpu.dma_semaphore, #tpu.memory_space<semaphore_mem>> -> memref<1x!tpu.dma_semaphore, #tpu.memory_space<semaphore_mem>>
    %370 = tpu.memref_squeeze %369 : memref<1x!tpu.dma_semaphore, #tpu.memory_space<semaphore_mem>> -> memref<!tpu.dma_semaphore, #tpu.memory_space<semaphore_mem>>
    tpu.enqueue_dma source(%366 : memref<32xf32, #tpu.memory_space<any>>) target(%368 : memref<32xf32, #tpu.memory_space<vmem>>) target_semaphore(%370 : memref<!tpu.dma_semaphore, #tpu.memory_space<semaphore_mem>>)
    %c40_i32_182 = arith.constant 40 : i32
    %371 = arith.addi %0, %c40_i32_182 : i32
    %c4_i32_183 = arith.constant 4 : i32
    %372 = arith.addi %371, %c4_i32_183 : i32
    %373 = arith.index_cast %372 : i32 to index
    %374 = memref.load %arg1[%373] : memref<64xi32, #tpu.memory_space<smem>>
    %c37_i32 = arith.constant 37 : i32
    %c4_i32_184 = arith.constant 4 : i32
    %c0_i32_185 = arith.constant 0 : i32
    %375 = tpu.memref_slice %arg2[%374, %c0_i32_185] : memref<512x32xf32, #tpu.memory_space<any>> -> memref<1x32xf32, #tpu.memory_space<any>>
    %376 = tpu.memref_squeeze %375 : memref<1x32xf32, #tpu.memory_space<any>> -> memref<32xf32, #tpu.memory_space<any>>
    %c0_i32_186 = arith.constant 0 : i32
    %377 = tpu.memref_slice %arg9[%c37_i32, %c0_i32_186] : memref<64x32xf32, #tpu.memory_space<vmem>> -> memref<1x32xf32, #tpu.memory_space<vmem>>
    %378 = tpu.memref_squeeze %377 : memref<1x32xf32, #tpu.memory_space<vmem>> -> memref<32xf32, #tpu.memory_space<vmem>>
    %379 = tpu.memref_slice %arg10[%c4_i32_184] : memref<8x!tpu.dma_semaphore, #tpu.memory_space<semaphore_mem>> -> memref<1x!tpu.dma_semaphore, #tpu.memory_space<semaphore_mem>>
    %380 = tpu.memref_squeeze %379 : memref<1x!tpu.dma_semaphore, #tpu.memory_space<semaphore_mem>> -> memref<!tpu.dma_semaphore, #tpu.memory_space<semaphore_mem>>
    tpu.enqueue_dma source(%376 : memref<32xf32, #tpu.memory_space<any>>) target(%378 : memref<32xf32, #tpu.memory_space<vmem>>) target_semaphore(%380 : memref<!tpu.dma_semaphore, #tpu.memory_space<semaphore_mem>>)
    %c48_i32_187 = arith.constant 48 : i32
    %381 = arith.addi %0, %c48_i32_187 : i32
    %c4_i32_188 = arith.constant 4 : i32
    %382 = arith.addi %381, %c4_i32_188 : i32
    %383 = arith.index_cast %382 : i32 to index
    %384 = memref.load %arg1[%383] : memref<64xi32, #tpu.memory_space<smem>>
    %c38_i32 = arith.constant 38 : i32
    %c4_i32_189 = arith.constant 4 : i32
    %c0_i32_190 = arith.constant 0 : i32
    %385 = tpu.memref_slice %arg2[%384, %c0_i32_190] : memref<512x32xf32, #tpu.memory_space<any>> -> memref<1x32xf32, #tpu.memory_space<any>>
    %386 = tpu.memref_squeeze %385 : memref<1x32xf32, #tpu.memory_space<any>> -> memref<32xf32, #tpu.memory_space<any>>
    %c0_i32_191 = arith.constant 0 : i32
    %387 = tpu.memref_slice %arg9[%c38_i32, %c0_i32_191] : memref<64x32xf32, #tpu.memory_space<vmem>> -> memref<1x32xf32, #tpu.memory_space<vmem>>
    %388 = tpu.memref_squeeze %387 : memref<1x32xf32, #tpu.memory_space<vmem>> -> memref<32xf32, #tpu.memory_space<vmem>>
    %389 = tpu.memref_slice %arg10[%c4_i32_189] : memref<8x!tpu.dma_semaphore, #tpu.memory_space<semaphore_mem>> -> memref<1x!tpu.dma_semaphore, #tpu.memory_space<semaphore_mem>>
    %390 = tpu.memref_squeeze %389 : memref<1x!tpu.dma_semaphore, #tpu.memory_space<semaphore_mem>> -> memref<!tpu.dma_semaphore, #tpu.memory_space<semaphore_mem>>
    tpu.enqueue_dma source(%386 : memref<32xf32, #tpu.memory_space<any>>) target(%388 : memref<32xf32, #tpu.memory_space<vmem>>) target_semaphore(%390 : memref<!tpu.dma_semaphore, #tpu.memory_space<semaphore_mem>>)
    %c56_i32_192 = arith.constant 56 : i32
    %391 = arith.addi %0, %c56_i32_192 : i32
    %c4_i32_193 = arith.constant 4 : i32
    %392 = arith.addi %391, %c4_i32_193 : i32
    %393 = arith.index_cast %392 : i32 to index
    %394 = memref.load %arg1[%393] : memref<64xi32, #tpu.memory_space<smem>>
    %c39_i32 = arith.constant 39 : i32
    %c4_i32_194 = arith.constant 4 : i32
    %c0_i32_195 = arith.constant 0 : i32
    %395 = tpu.memref_slice %arg2[%394, %c0_i32_195] : memref<512x32xf32, #tpu.memory_space<any>> -> memref<1x32xf32, #tpu.memory_space<any>>
    %396 = tpu.memref_squeeze %395 : memref<1x32xf32, #tpu.memory_space<any>> -> memref<32xf32, #tpu.memory_space<any>>
    %c0_i32_196 = arith.constant 0 : i32
    %397 = tpu.memref_slice %arg9[%c39_i32, %c0_i32_196] : memref<64x32xf32, #tpu.memory_space<vmem>> -> memref<1x32xf32, #tpu.memory_space<vmem>>
    %398 = tpu.memref_squeeze %397 : memref<1x32xf32, #tpu.memory_space<vmem>> -> memref<32xf32, #tpu.memory_space<vmem>>
    %399 = tpu.memref_slice %arg10[%c4_i32_194] : memref<8x!tpu.dma_semaphore, #tpu.memory_space<semaphore_mem>> -> memref<1x!tpu.dma_semaphore, #tpu.memory_space<semaphore_mem>>
    %400 = tpu.memref_squeeze %399 : memref<1x!tpu.dma_semaphore, #tpu.memory_space<semaphore_mem>> -> memref<!tpu.dma_semaphore, #tpu.memory_space<semaphore_mem>>
    tpu.enqueue_dma source(%396 : memref<32xf32, #tpu.memory_space<any>>) target(%398 : memref<32xf32, #tpu.memory_space<vmem>>) target_semaphore(%400 : memref<!tpu.dma_semaphore, #tpu.memory_space<semaphore_mem>>)
    %c0_i32_197 = arith.constant 0 : i32
    %401 = arith.addi %0, %c0_i32_197 : i32
    %c5_i32_198 = arith.constant 5 : i32
    %402 = arith.addi %401, %c5_i32_198 : i32
    %403 = arith.index_cast %402 : i32 to index
    %404 = memref.load %arg1[%403] : memref<64xi32, #tpu.memory_space<smem>>
    %c40_i32_199 = arith.constant 40 : i32
    %c5_i32_200 = arith.constant 5 : i32
    %c0_i32_201 = arith.constant 0 : i32
    %405 = tpu.memref_slice %arg2[%404, %c0_i32_201] : memref<512x32xf32, #tpu.memory_space<any>> -> memref<1x32xf32, #tpu.memory_space<any>>
    %406 = tpu.memref_squeeze %405 : memref<1x32xf32, #tpu.memory_space<any>> -> memref<32xf32, #tpu.memory_space<any>>
    %c0_i32_202 = arith.constant 0 : i32
    %407 = tpu.memref_slice %arg9[%c40_i32_199, %c0_i32_202] : memref<64x32xf32, #tpu.memory_space<vmem>> -> memref<1x32xf32, #tpu.memory_space<vmem>>
    %408 = tpu.memref_squeeze %407 : memref<1x32xf32, #tpu.memory_space<vmem>> -> memref<32xf32, #tpu.memory_space<vmem>>
    %409 = tpu.memref_slice %arg10[%c5_i32_200] : memref<8x!tpu.dma_semaphore, #tpu.memory_space<semaphore_mem>> -> memref<1x!tpu.dma_semaphore, #tpu.memory_space<semaphore_mem>>
    %410 = tpu.memref_squeeze %409 : memref<1x!tpu.dma_semaphore, #tpu.memory_space<semaphore_mem>> -> memref<!tpu.dma_semaphore, #tpu.memory_space<semaphore_mem>>
    tpu.enqueue_dma source(%406 : memref<32xf32, #tpu.memory_space<any>>) target(%408 : memref<32xf32, #tpu.memory_space<vmem>>) target_semaphore(%410 : memref<!tpu.dma_semaphore, #tpu.memory_space<semaphore_mem>>)
    %c8_i32_203 = arith.constant 8 : i32
    %411 = arith.addi %0, %c8_i32_203 : i32
    %c5_i32_204 = arith.constant 5 : i32
    %412 = arith.addi %411, %c5_i32_204 : i32
    %413 = arith.index_cast %412 : i32 to index
    %414 = memref.load %arg1[%413] : memref<64xi32, #tpu.memory_space<smem>>
    %c41_i32 = arith.constant 41 : i32
    %c5_i32_205 = arith.constant 5 : i32
    %c0_i32_206 = arith.constant 0 : i32
    %415 = tpu.memref_slice %arg2[%414, %c0_i32_206] : memref<512x32xf32, #tpu.memory_space<any>> -> memref<1x32xf32, #tpu.memory_space<any>>
    %416 = tpu.memref_squeeze %415 : memref<1x32xf32, #tpu.memory_space<any>> -> memref<32xf32, #tpu.memory_space<any>>
    %c0_i32_207 = arith.constant 0 : i32
    %417 = tpu.memref_slice %arg9[%c41_i32, %c0_i32_207] : memref<64x32xf32, #tpu.memory_space<vmem>> -> memref<1x32xf32, #tpu.memory_space<vmem>>
    %418 = tpu.memref_squeeze %417 : memref<1x32xf32, #tpu.memory_space<vmem>> -> memref<32xf32, #tpu.memory_space<vmem>>
    %419 = tpu.memref_slice %arg10[%c5_i32_205] : memref<8x!tpu.dma_semaphore, #tpu.memory_space<semaphore_mem>> -> memref<1x!tpu.dma_semaphore, #tpu.memory_space<semaphore_mem>>
    %420 = tpu.memref_squeeze %419 : memref<1x!tpu.dma_semaphore, #tpu.memory_space<semaphore_mem>> -> memref<!tpu.dma_semaphore, #tpu.memory_space<semaphore_mem>>
    tpu.enqueue_dma source(%416 : memref<32xf32, #tpu.memory_space<any>>) target(%418 : memref<32xf32, #tpu.memory_space<vmem>>) target_semaphore(%420 : memref<!tpu.dma_semaphore, #tpu.memory_space<semaphore_mem>>)
    %c16_i32_208 = arith.constant 16 : i32
    %421 = arith.addi %0, %c16_i32_208 : i32
    %c5_i32_209 = arith.constant 5 : i32
    %422 = arith.addi %421, %c5_i32_209 : i32
    %423 = arith.index_cast %422 : i32 to index
    %424 = memref.load %arg1[%423] : memref<64xi32, #tpu.memory_space<smem>>
    %c42_i32 = arith.constant 42 : i32
    %c5_i32_210 = arith.constant 5 : i32
    %c0_i32_211 = arith.constant 0 : i32
    %425 = tpu.memref_slice %arg2[%424, %c0_i32_211] : memref<512x32xf32, #tpu.memory_space<any>> -> memref<1x32xf32, #tpu.memory_space<any>>
    %426 = tpu.memref_squeeze %425 : memref<1x32xf32, #tpu.memory_space<any>> -> memref<32xf32, #tpu.memory_space<any>>
    %c0_i32_212 = arith.constant 0 : i32
    %427 = tpu.memref_slice %arg9[%c42_i32, %c0_i32_212] : memref<64x32xf32, #tpu.memory_space<vmem>> -> memref<1x32xf32, #tpu.memory_space<vmem>>
    %428 = tpu.memref_squeeze %427 : memref<1x32xf32, #tpu.memory_space<vmem>> -> memref<32xf32, #tpu.memory_space<vmem>>
    %429 = tpu.memref_slice %arg10[%c5_i32_210] : memref<8x!tpu.dma_semaphore, #tpu.memory_space<semaphore_mem>> -> memref<1x!tpu.dma_semaphore, #tpu.memory_space<semaphore_mem>>
    %430 = tpu.memref_squeeze %429 : memref<1x!tpu.dma_semaphore, #tpu.memory_space<semaphore_mem>> -> memref<!tpu.dma_semaphore, #tpu.memory_space<semaphore_mem>>
    tpu.enqueue_dma source(%426 : memref<32xf32, #tpu.memory_space<any>>) target(%428 : memref<32xf32, #tpu.memory_space<vmem>>) target_semaphore(%430 : memref<!tpu.dma_semaphore, #tpu.memory_space<semaphore_mem>>)
    %c24_i32_213 = arith.constant 24 : i32
    %431 = arith.addi %0, %c24_i32_213 : i32
    %c5_i32_214 = arith.constant 5 : i32
    %432 = arith.addi %431, %c5_i32_214 : i32
    %433 = arith.index_cast %432 : i32 to index
    %434 = memref.load %arg1[%433] : memref<64xi32, #tpu.memory_space<smem>>
    %c43_i32 = arith.constant 43 : i32
    %c5_i32_215 = arith.constant 5 : i32
    %c0_i32_216 = arith.constant 0 : i32
    %435 = tpu.memref_slice %arg2[%434, %c0_i32_216] : memref<512x32xf32, #tpu.memory_space<any>> -> memref<1x32xf32, #tpu.memory_space<any>>
    %436 = tpu.memref_squeeze %435 : memref<1x32xf32, #tpu.memory_space<any>> -> memref<32xf32, #tpu.memory_space<any>>
    %c0_i32_217 = arith.constant 0 : i32
    %437 = tpu.memref_slice %arg9[%c43_i32, %c0_i32_217] : memref<64x32xf32, #tpu.memory_space<vmem>> -> memref<1x32xf32, #tpu.memory_space<vmem>>
    %438 = tpu.memref_squeeze %437 : memref<1x32xf32, #tpu.memory_space<vmem>> -> memref<32xf32, #tpu.memory_space<vmem>>
    %439 = tpu.memref_slice %arg10[%c5_i32_215] : memref<8x!tpu.dma_semaphore, #tpu.memory_space<semaphore_mem>> -> memref<1x!tpu.dma_semaphore, #tpu.memory_space<semaphore_mem>>
    %440 = tpu.memref_squeeze %439 : memref<1x!tpu.dma_semaphore, #tpu.memory_space<semaphore_mem>> -> memref<!tpu.dma_semaphore, #tpu.memory_space<semaphore_mem>>
    tpu.enqueue_dma source(%436 : memref<32xf32, #tpu.memory_space<any>>) target(%438 : memref<32xf32, #tpu.memory_space<vmem>>) target_semaphore(%440 : memref<!tpu.dma_semaphore, #tpu.memory_space<semaphore_mem>>)
    %c32_i32_218 = arith.constant 32 : i32
    %441 = arith.addi %0, %c32_i32_218 : i32
    %c5_i32_219 = arith.constant 5 : i32
    %442 = arith.addi %441, %c5_i32_219 : i32
    %443 = arith.index_cast %442 : i32 to index
    %444 = memref.load %arg1[%443] : memref<64xi32, #tpu.memory_space<smem>>
    %c44_i32 = arith.constant 44 : i32
    %c5_i32_220 = arith.constant 5 : i32
    %c0_i32_221 = arith.constant 0 : i32
    %445 = tpu.memref_slice %arg2[%444, %c0_i32_221] : memref<512x32xf32, #tpu.memory_space<any>> -> memref<1x32xf32, #tpu.memory_space<any>>
    %446 = tpu.memref_squeeze %445 : memref<1x32xf32, #tpu.memory_space<any>> -> memref<32xf32, #tpu.memory_space<any>>
    %c0_i32_222 = arith.constant 0 : i32
    %447 = tpu.memref_slice %arg9[%c44_i32, %c0_i32_222] : memref<64x32xf32, #tpu.memory_space<vmem>> -> memref<1x32xf32, #tpu.memory_space<vmem>>
    %448 = tpu.memref_squeeze %447 : memref<1x32xf32, #tpu.memory_space<vmem>> -> memref<32xf32, #tpu.memory_space<vmem>>
    %449 = tpu.memref_slice %arg10[%c5_i32_220] : memref<8x!tpu.dma_semaphore, #tpu.memory_space<semaphore_mem>> -> memref<1x!tpu.dma_semaphore, #tpu.memory_space<semaphore_mem>>
    %450 = tpu.memref_squeeze %449 : memref<1x!tpu.dma_semaphore, #tpu.memory_space<semaphore_mem>> -> memref<!tpu.dma_semaphore, #tpu.memory_space<semaphore_mem>>
    tpu.enqueue_dma source(%446 : memref<32xf32, #tpu.memory_space<any>>) target(%448 : memref<32xf32, #tpu.memory_space<vmem>>) target_semaphore(%450 : memref<!tpu.dma_semaphore, #tpu.memory_space<semaphore_mem>>)
    %c40_i32_223 = arith.constant 40 : i32
    %451 = arith.addi %0, %c40_i32_223 : i32
    %c5_i32_224 = arith.constant 5 : i32
    %452 = arith.addi %451, %c5_i32_224 : i32
    %453 = arith.index_cast %452 : i32 to index
    %454 = memref.load %arg1[%453] : memref<64xi32, #tpu.memory_space<smem>>
    %c45_i32 = arith.constant 45 : i32
    %c5_i32_225 = arith.constant 5 : i32
    %c0_i32_226 = arith.constant 0 : i32
    %455 = tpu.memref_slice %arg2[%454, %c0_i32_226] : memref<512x32xf32, #tpu.memory_space<any>> -> memref<1x32xf32, #tpu.memory_space<any>>
    %456 = tpu.memref_squeeze %455 : memref<1x32xf32, #tpu.memory_space<any>> -> memref<32xf32, #tpu.memory_space<any>>
    %c0_i32_227 = arith.constant 0 : i32
    %457 = tpu.memref_slice %arg9[%c45_i32, %c0_i32_227] : memref<64x32xf32, #tpu.memory_space<vmem>> -> memref<1x32xf32, #tpu.memory_space<vmem>>
    %458 = tpu.memref_squeeze %457 : memref<1x32xf32, #tpu.memory_space<vmem>> -> memref<32xf32, #tpu.memory_space<vmem>>
    %459 = tpu.memref_slice %arg10[%c5_i32_225] : memref<8x!tpu.dma_semaphore, #tpu.memory_space<semaphore_mem>> -> memref<1x!tpu.dma_semaphore, #tpu.memory_space<semaphore_mem>>
    %460 = tpu.memref_squeeze %459 : memref<1x!tpu.dma_semaphore, #tpu.memory_space<semaphore_mem>> -> memref<!tpu.dma_semaphore, #tpu.memory_space<semaphore_mem>>
    tpu.enqueue_dma source(%456 : memref<32xf32, #tpu.memory_space<any>>) target(%458 : memref<32xf32, #tpu.memory_space<vmem>>) target_semaphore(%460 : memref<!tpu.dma_semaphore, #tpu.memory_space<semaphore_mem>>)
    %c48_i32_228 = arith.constant 48 : i32
    %461 = arith.addi %0, %c48_i32_228 : i32
    %c5_i32_229 = arith.constant 5 : i32
    %462 = arith.addi %461, %c5_i32_229 : i32
    %463 = arith.index_cast %462 : i32 to index
    %464 = memref.load %arg1[%463] : memref<64xi32, #tpu.memory_space<smem>>
    %c46_i32 = arith.constant 46 : i32
    %c5_i32_230 = arith.constant 5 : i32
    %c0_i32_231 = arith.constant 0 : i32
    %465 = tpu.memref_slice %arg2[%464, %c0_i32_231] : memref<512x32xf32, #tpu.memory_space<any>> -> memref<1x32xf32, #tpu.memory_space<any>>
    %466 = tpu.memref_squeeze %465 : memref<1x32xf32, #tpu.memory_space<any>> -> memref<32xf32, #tpu.memory_space<any>>
    %c0_i32_232 = arith.constant 0 : i32
    %467 = tpu.memref_slice %arg9[%c46_i32, %c0_i32_232] : memref<64x32xf32, #tpu.memory_space<vmem>> -> memref<1x32xf32, #tpu.memory_space<vmem>>
    %468 = tpu.memref_squeeze %467 : memref<1x32xf32, #tpu.memory_space<vmem>> -> memref<32xf32, #tpu.memory_space<vmem>>
    %469 = tpu.memref_slice %arg10[%c5_i32_230] : memref<8x!tpu.dma_semaphore, #tpu.memory_space<semaphore_mem>> -> memref<1x!tpu.dma_semaphore, #tpu.memory_space<semaphore_mem>>
    %470 = tpu.memref_squeeze %469 : memref<1x!tpu.dma_semaphore, #tpu.memory_space<semaphore_mem>> -> memref<!tpu.dma_semaphore, #tpu.memory_space<semaphore_mem>>
    tpu.enqueue_dma source(%466 : memref<32xf32, #tpu.memory_space<any>>) target(%468 : memref<32xf32, #tpu.memory_space<vmem>>) target_semaphore(%470 : memref<!tpu.dma_semaphore, #tpu.memory_space<semaphore_mem>>)
    %c56_i32_233 = arith.constant 56 : i32
    %471 = arith.addi %0, %c56_i32_233 : i32
    %c5_i32_234 = arith.constant 5 : i32
    %472 = arith.addi %471, %c5_i32_234 : i32
    %473 = arith.index_cast %472 : i32 to index
    %474 = memref.load %arg1[%473] : memref<64xi32, #tpu.memory_space<smem>>
    %c47_i32 = arith.constant 47 : i32
    %c5_i32_235 = arith.constant 5 : i32
    %c0_i32_236 = arith.constant 0 : i32
    %475 = tpu.memref_slice %arg2[%474, %c0_i32_236] : memref<512x32xf32, #tpu.memory_space<any>> -> memref<1x32xf32, #tpu.memory_space<any>>
    %476 = tpu.memref_squeeze %475 : memref<1x32xf32, #tpu.memory_space<any>> -> memref<32xf32, #tpu.memory_space<any>>
    %c0_i32_237 = arith.constant 0 : i32
    %477 = tpu.memref_slice %arg9[%c47_i32, %c0_i32_237] : memref<64x32xf32, #tpu.memory_space<vmem>> -> memref<1x32xf32, #tpu.memory_space<vmem>>
    %478 = tpu.memref_squeeze %477 : memref<1x32xf32, #tpu.memory_space<vmem>> -> memref<32xf32, #tpu.memory_space<vmem>>
    %479 = tpu.memref_slice %arg10[%c5_i32_235] : memref<8x!tpu.dma_semaphore, #tpu.memory_space<semaphore_mem>> -> memref<1x!tpu.dma_semaphore, #tpu.memory_space<semaphore_mem>>
    %480 = tpu.memref_squeeze %479 : memref<1x!tpu.dma_semaphore, #tpu.memory_space<semaphore_mem>> -> memref<!tpu.dma_semaphore, #tpu.memory_space<semaphore_mem>>
    tpu.enqueue_dma source(%476 : memref<32xf32, #tpu.memory_space<any>>) target(%478 : memref<32xf32, #tpu.memory_space<vmem>>) target_semaphore(%480 : memref<!tpu.dma_semaphore, #tpu.memory_space<semaphore_mem>>)
    %c0_i32_238 = arith.constant 0 : i32
    %481 = arith.addi %0, %c0_i32_238 : i32
    %c6_i32_239 = arith.constant 6 : i32
    %482 = arith.addi %481, %c6_i32_239 : i32
    %483 = arith.index_cast %482 : i32 to index
    %484 = memref.load %arg1[%483] : memref<64xi32, #tpu.memory_space<smem>>
    %c48_i32_240 = arith.constant 48 : i32
    %c6_i32_241 = arith.constant 6 : i32
    %c0_i32_242 = arith.constant 0 : i32
    %485 = tpu.memref_slice %arg2[%484, %c0_i32_242] : memref<512x32xf32, #tpu.memory_space<any>> -> memref<1x32xf32, #tpu.memory_space<any>>
    %486 = tpu.memref_squeeze %485 : memref<1x32xf32, #tpu.memory_space<any>> -> memref<32xf32, #tpu.memory_space<any>>
    %c0_i32_243 = arith.constant 0 : i32
    %487 = tpu.memref_slice %arg9[%c48_i32_240, %c0_i32_243] : memref<64x32xf32, #tpu.memory_space<vmem>> -> memref<1x32xf32, #tpu.memory_space<vmem>>
    %488 = tpu.memref_squeeze %487 : memref<1x32xf32, #tpu.memory_space<vmem>> -> memref<32xf32, #tpu.memory_space<vmem>>
    %489 = tpu.memref_slice %arg10[%c6_i32_241] : memref<8x!tpu.dma_semaphore, #tpu.memory_space<semaphore_mem>> -> memref<1x!tpu.dma_semaphore, #tpu.memory_space<semaphore_mem>>
    %490 = tpu.memref_squeeze %489 : memref<1x!tpu.dma_semaphore, #tpu.memory_space<semaphore_mem>> -> memref<!tpu.dma_semaphore, #tpu.memory_space<semaphore_mem>>
    tpu.enqueue_dma source(%486 : memref<32xf32, #tpu.memory_space<any>>) target(%488 : memref<32xf32, #tpu.memory_space<vmem>>) target_semaphore(%490 : memref<!tpu.dma_semaphore, #tpu.memory_space<semaphore_mem>>)
    %c8_i32_244 = arith.constant 8 : i32
    %491 = arith.addi %0, %c8_i32_244 : i32
    %c6_i32_245 = arith.constant 6 : i32
    %492 = arith.addi %491, %c6_i32_245 : i32
    %493 = arith.index_cast %492 : i32 to index
    %494 = memref.load %arg1[%493] : memref<64xi32, #tpu.memory_space<smem>>
    %c49_i32 = arith.constant 49 : i32
    %c6_i32_246 = arith.constant 6 : i32
    %c0_i32_247 = arith.constant 0 : i32
    %495 = tpu.memref_slice %arg2[%494, %c0_i32_247] : memref<512x32xf32, #tpu.memory_space<any>> -> memref<1x32xf32, #tpu.memory_space<any>>
    %496 = tpu.memref_squeeze %495 : memref<1x32xf32, #tpu.memory_space<any>> -> memref<32xf32, #tpu.memory_space<any>>
    %c0_i32_248 = arith.constant 0 : i32
    %497 = tpu.memref_slice %arg9[%c49_i32, %c0_i32_248] : memref<64x32xf32, #tpu.memory_space<vmem>> -> memref<1x32xf32, #tpu.memory_space<vmem>>
    %498 = tpu.memref_squeeze %497 : memref<1x32xf32, #tpu.memory_space<vmem>> -> memref<32xf32, #tpu.memory_space<vmem>>
    %499 = tpu.memref_slice %arg10[%c6_i32_246] : memref<8x!tpu.dma_semaphore, #tpu.memory_space<semaphore_mem>> -> memref<1x!tpu.dma_semaphore, #tpu.memory_space<semaphore_mem>>
    %500 = tpu.memref_squeeze %499 : memref<1x!tpu.dma_semaphore, #tpu.memory_space<semaphore_mem>> -> memref<!tpu.dma_semaphore, #tpu.memory_space<semaphore_mem>>
    tpu.enqueue_dma source(%496 : memref<32xf32, #tpu.memory_space<any>>) target(%498 : memref<32xf32, #tpu.memory_space<vmem>>) target_semaphore(%500 : memref<!tpu.dma_semaphore, #tpu.memory_space<semaphore_mem>>)
    %c16_i32_249 = arith.constant 16 : i32
    %501 = arith.addi %0, %c16_i32_249 : i32
    %c6_i32_250 = arith.constant 6 : i32
    %502 = arith.addi %501, %c6_i32_250 : i32
    %503 = arith.index_cast %502 : i32 to index
    %504 = memref.load %arg1[%503] : memref<64xi32, #tpu.memory_space<smem>>
    %c50_i32 = arith.constant 50 : i32
    %c6_i32_251 = arith.constant 6 : i32
    %c0_i32_252 = arith.constant 0 : i32
    %505 = tpu.memref_slice %arg2[%504, %c0_i32_252] : memref<512x32xf32, #tpu.memory_space<any>> -> memref<1x32xf32, #tpu.memory_space<any>>
    %506 = tpu.memref_squeeze %505 : memref<1x32xf32, #tpu.memory_space<any>> -> memref<32xf32, #tpu.memory_space<any>>
    %c0_i32_253 = arith.constant 0 : i32
    %507 = tpu.memref_slice %arg9[%c50_i32, %c0_i32_253] : memref<64x32xf32, #tpu.memory_space<vmem>> -> memref<1x32xf32, #tpu.memory_space<vmem>>
    %508 = tpu.memref_squeeze %507 : memref<1x32xf32, #tpu.memory_space<vmem>> -> memref<32xf32, #tpu.memory_space<vmem>>
    %509 = tpu.memref_slice %arg10[%c6_i32_251] : memref<8x!tpu.dma_semaphore, #tpu.memory_space<semaphore_mem>> -> memref<1x!tpu.dma_semaphore, #tpu.memory_space<semaphore_mem>>
    %510 = tpu.memref_squeeze %509 : memref<1x!tpu.dma_semaphore, #tpu.memory_space<semaphore_mem>> -> memref<!tpu.dma_semaphore, #tpu.memory_space<semaphore_mem>>
    tpu.enqueue_dma source(%506 : memref<32xf32, #tpu.memory_space<any>>) target(%508 : memref<32xf32, #tpu.memory_space<vmem>>) target_semaphore(%510 : memref<!tpu.dma_semaphore, #tpu.memory_space<semaphore_mem>>)
    %c24_i32_254 = arith.constant 24 : i32
    %511 = arith.addi %0, %c24_i32_254 : i32
    %c6_i32_255 = arith.constant 6 : i32
    %512 = arith.addi %511, %c6_i32_255 : i32
    %513 = arith.index_cast %512 : i32 to index
    %514 = memref.load %arg1[%513] : memref<64xi32, #tpu.memory_space<smem>>
    %c51_i32 = arith.constant 51 : i32
    %c6_i32_256 = arith.constant 6 : i32
    %c0_i32_257 = arith.constant 0 : i32
    %515 = tpu.memref_slice %arg2[%514, %c0_i32_257] : memref<512x32xf32, #tpu.memory_space<any>> -> memref<1x32xf32, #tpu.memory_space<any>>
    %516 = tpu.memref_squeeze %515 : memref<1x32xf32, #tpu.memory_space<any>> -> memref<32xf32, #tpu.memory_space<any>>
    %c0_i32_258 = arith.constant 0 : i32
    %517 = tpu.memref_slice %arg9[%c51_i32, %c0_i32_258] : memref<64x32xf32, #tpu.memory_space<vmem>> -> memref<1x32xf32, #tpu.memory_space<vmem>>
    %518 = tpu.memref_squeeze %517 : memref<1x32xf32, #tpu.memory_space<vmem>> -> memref<32xf32, #tpu.memory_space<vmem>>
    %519 = tpu.memref_slice %arg10[%c6_i32_256] : memref<8x!tpu.dma_semaphore, #tpu.memory_space<semaphore_mem>> -> memref<1x!tpu.dma_semaphore, #tpu.memory_space<semaphore_mem>>
    %520 = tpu.memref_squeeze %519 : memref<1x!tpu.dma_semaphore, #tpu.memory_space<semaphore_mem>> -> memref<!tpu.dma_semaphore, #tpu.memory_space<semaphore_mem>>
    tpu.enqueue_dma source(%516 : memref<32xf32, #tpu.memory_space<any>>) target(%518 : memref<32xf32, #tpu.memory_space<vmem>>) target_semaphore(%520 : memref<!tpu.dma_semaphore, #tpu.memory_space<semaphore_mem>>)
    %c32_i32_259 = arith.constant 32 : i32
    %521 = arith.addi %0, %c32_i32_259 : i32
    %c6_i32_260 = arith.constant 6 : i32
    %522 = arith.addi %521, %c6_i32_260 : i32
    %523 = arith.index_cast %522 : i32 to index
    %524 = memref.load %arg1[%523] : memref<64xi32, #tpu.memory_space<smem>>
    %c52_i32 = arith.constant 52 : i32
    %c6_i32_261 = arith.constant 6 : i32
    %c0_i32_262 = arith.constant 0 : i32
    %525 = tpu.memref_slice %arg2[%524, %c0_i32_262] : memref<512x32xf32, #tpu.memory_space<any>> -> memref<1x32xf32, #tpu.memory_space<any>>
    %526 = tpu.memref_squeeze %525 : memref<1x32xf32, #tpu.memory_space<any>> -> memref<32xf32, #tpu.memory_space<any>>
    %c0_i32_263 = arith.constant 0 : i32
    %527 = tpu.memref_slice %arg9[%c52_i32, %c0_i32_263] : memref<64x32xf32, #tpu.memory_space<vmem>> -> memref<1x32xf32, #tpu.memory_space<vmem>>
    %528 = tpu.memref_squeeze %527 : memref<1x32xf32, #tpu.memory_space<vmem>> -> memref<32xf32, #tpu.memory_space<vmem>>
    %529 = tpu.memref_slice %arg10[%c6_i32_261] : memref<8x!tpu.dma_semaphore, #tpu.memory_space<semaphore_mem>> -> memref<1x!tpu.dma_semaphore, #tpu.memory_space<semaphore_mem>>
    %530 = tpu.memref_squeeze %529 : memref<1x!tpu.dma_semaphore, #tpu.memory_space<semaphore_mem>> -> memref<!tpu.dma_semaphore, #tpu.memory_space<semaphore_mem>>
    tpu.enqueue_dma source(%526 : memref<32xf32, #tpu.memory_space<any>>) target(%528 : memref<32xf32, #tpu.memory_space<vmem>>) target_semaphore(%530 : memref<!tpu.dma_semaphore, #tpu.memory_space<semaphore_mem>>)
    %c40_i32_264 = arith.constant 40 : i32
    %531 = arith.addi %0, %c40_i32_264 : i32
    %c6_i32_265 = arith.constant 6 : i32
    %532 = arith.addi %531, %c6_i32_265 : i32
    %533 = arith.index_cast %532 : i32 to index
    %534 = memref.load %arg1[%533] : memref<64xi32, #tpu.memory_space<smem>>
    %c53_i32 = arith.constant 53 : i32
    %c6_i32_266 = arith.constant 6 : i32
    %c0_i32_267 = arith.constant 0 : i32
    %535 = tpu.memref_slice %arg2[%534, %c0_i32_267] : memref<512x32xf32, #tpu.memory_space<any>> -> memref<1x32xf32, #tpu.memory_space<any>>
    %536 = tpu.memref_squeeze %535 : memref<1x32xf32, #tpu.memory_space<any>> -> memref<32xf32, #tpu.memory_space<any>>
    %c0_i32_268 = arith.constant 0 : i32
    %537 = tpu.memref_slice %arg9[%c53_i32, %c0_i32_268] : memref<64x32xf32, #tpu.memory_space<vmem>> -> memref<1x32xf32, #tpu.memory_space<vmem>>
    %538 = tpu.memref_squeeze %537 : memref<1x32xf32, #tpu.memory_space<vmem>> -> memref<32xf32, #tpu.memory_space<vmem>>
    %539 = tpu.memref_slice %arg10[%c6_i32_266] : memref<8x!tpu.dma_semaphore, #tpu.memory_space<semaphore_mem>> -> memref<1x!tpu.dma_semaphore, #tpu.memory_space<semaphore_mem>>
    %540 = tpu.memref_squeeze %539 : memref<1x!tpu.dma_semaphore, #tpu.memory_space<semaphore_mem>> -> memref<!tpu.dma_semaphore, #tpu.memory_space<semaphore_mem>>
    tpu.enqueue_dma source(%536 : memref<32xf32, #tpu.memory_space<any>>) target(%538 : memref<32xf32, #tpu.memory_space<vmem>>) target_semaphore(%540 : memref<!tpu.dma_semaphore, #tpu.memory_space<semaphore_mem>>)
    %c48_i32_269 = arith.constant 48 : i32
    %541 = arith.addi %0, %c48_i32_269 : i32
    %c6_i32_270 = arith.constant 6 : i32
    %542 = arith.addi %541, %c6_i32_270 : i32
    %543 = arith.index_cast %542 : i32 to index
    %544 = memref.load %arg1[%543] : memref<64xi32, #tpu.memory_space<smem>>
    %c54_i32 = arith.constant 54 : i32
    %c6_i32_271 = arith.constant 6 : i32
    %c0_i32_272 = arith.constant 0 : i32
    %545 = tpu.memref_slice %arg2[%544, %c0_i32_272] : memref<512x32xf32, #tpu.memory_space<any>> -> memref<1x32xf32, #tpu.memory_space<any>>
    %546 = tpu.memref_squeeze %545 : memref<1x32xf32, #tpu.memory_space<any>> -> memref<32xf32, #tpu.memory_space<any>>
    %c0_i32_273 = arith.constant 0 : i32
    %547 = tpu.memref_slice %arg9[%c54_i32, %c0_i32_273] : memref<64x32xf32, #tpu.memory_space<vmem>> -> memref<1x32xf32, #tpu.memory_space<vmem>>
    %548 = tpu.memref_squeeze %547 : memref<1x32xf32, #tpu.memory_space<vmem>> -> memref<32xf32, #tpu.memory_space<vmem>>
    %549 = tpu.memref_slice %arg10[%c6_i32_271] : memref<8x!tpu.dma_semaphore, #tpu.memory_space<semaphore_mem>> -> memref<1x!tpu.dma_semaphore, #tpu.memory_space<semaphore_mem>>
    %550 = tpu.memref_squeeze %549 : memref<1x!tpu.dma_semaphore, #tpu.memory_space<semaphore_mem>> -> memref<!tpu.dma_semaphore, #tpu.memory_space<semaphore_mem>>
    tpu.enqueue_dma source(%546 : memref<32xf32, #tpu.memory_space<any>>) target(%548 : memref<32xf32, #tpu.memory_space<vmem>>) target_semaphore(%550 : memref<!tpu.dma_semaphore, #tpu.memory_space<semaphore_mem>>)
    %c56_i32_274 = arith.constant 56 : i32
    %551 = arith.addi %0, %c56_i32_274 : i32
    %c6_i32_275 = arith.constant 6 : i32
    %552 = arith.addi %551, %c6_i32_275 : i32
    %553 = arith.index_cast %552 : i32 to index
    %554 = memref.load %arg1[%553] : memref<64xi32, #tpu.memory_space<smem>>
    %c55_i32 = arith.constant 55 : i32
    %c6_i32_276 = arith.constant 6 : i32
    %c0_i32_277 = arith.constant 0 : i32
    %555 = tpu.memref_slice %arg2[%554, %c0_i32_277] : memref<512x32xf32, #tpu.memory_space<any>> -> memref<1x32xf32, #tpu.memory_space<any>>
    %556 = tpu.memref_squeeze %555 : memref<1x32xf32, #tpu.memory_space<any>> -> memref<32xf32, #tpu.memory_space<any>>
    %c0_i32_278 = arith.constant 0 : i32
    %557 = tpu.memref_slice %arg9[%c55_i32, %c0_i32_278] : memref<64x32xf32, #tpu.memory_space<vmem>> -> memref<1x32xf32, #tpu.memory_space<vmem>>
    %558 = tpu.memref_squeeze %557 : memref<1x32xf32, #tpu.memory_space<vmem>> -> memref<32xf32, #tpu.memory_space<vmem>>
    %559 = tpu.memref_slice %arg10[%c6_i32_276] : memref<8x!tpu.dma_semaphore, #tpu.memory_space<semaphore_mem>> -> memref<1x!tpu.dma_semaphore, #tpu.memory_space<semaphore_mem>>
    %560 = tpu.memref_squeeze %559 : memref<1x!tpu.dma_semaphore, #tpu.memory_space<semaphore_mem>> -> memref<!tpu.dma_semaphore, #tpu.memory_space<semaphore_mem>>
    tpu.enqueue_dma source(%556 : memref<32xf32, #tpu.memory_space<any>>) target(%558 : memref<32xf32, #tpu.memory_space<vmem>>) target_semaphore(%560 : memref<!tpu.dma_semaphore, #tpu.memory_space<semaphore_mem>>)
    %c0_i32_279 = arith.constant 0 : i32
    %c64_i32_280 = arith.constant 64 : i32
    %561 = arith.muli %c0_i32_279, %c64_i32_280 : i32
    %562 = arith.addi %0, %561 : i32
    %c8_i32_281 = arith.constant 8 : i32
    %563 = arith.muli %c0_i32_279, %c8_i32_281 : i32
    %cst = arith.constant 0.000000e+00 : f32
    %564 = vector.broadcast %cst : f32 to vector<8x32xf32>
    %c0_i32_282 = arith.constant 0 : i32
    %565 = arith.addi %563, %c0_i32_282 : i32
    %c7_i32_283 = arith.constant 7 : i32
    %566 = arith.andi %565, %c7_i32_283 : i32
    %c0_i32_284 = arith.constant 0 : i32
    %567 = arith.addi %562, %c0_i32_284 : i32
    %568 = arith.addi %567, %c0_i32_282 : i32
    %569 = arith.index_cast %568 : i32 to index
    %570 = memref.load %arg1[%569] : memref<64xi32, #tpu.memory_space<smem>>
    %c8_i32_285 = arith.constant 8 : i32
    %571 = arith.addi %562, %c8_i32_285 : i32
    %572 = arith.addi %571, %c0_i32_282 : i32
    %573 = arith.index_cast %572 : i32 to index
    %574 = memref.load %arg1[%573] : memref<64xi32, #tpu.memory_space<smem>>
    %c16_i32_286 = arith.constant 16 : i32
    %575 = arith.addi %562, %c16_i32_286 : i32
    %576 = arith.addi %575, %c0_i32_282 : i32
    %577 = arith.index_cast %576 : i32 to index
    %578 = memref.load %arg1[%577] : memref<64xi32, #tpu.memory_space<smem>>
    %c24_i32_287 = arith.constant 24 : i32
    %579 = arith.addi %562, %c24_i32_287 : i32
    %580 = arith.addi %579, %c0_i32_282 : i32
    %581 = arith.index_cast %580 : i32 to index
    %582 = memref.load %arg1[%581] : memref<64xi32, #tpu.memory_space<smem>>
    %c32_i32_288 = arith.constant 32 : i32
    %583 = arith.addi %562, %c32_i32_288 : i32
    %584 = arith.addi %583, %c0_i32_282 : i32
    %585 = arith.index_cast %584 : i32 to index
    %586 = memref.load %arg1[%585] : memref<64xi32, #tpu.memory_space<smem>>
    %c40_i32_289 = arith.constant 40 : i32
    %587 = arith.addi %562, %c40_i32_289 : i32
    %588 = arith.addi %587, %c0_i32_282 : i32
    %589 = arith.index_cast %588 : i32 to index
    %590 = memref.load %arg1[%589] : memref<64xi32, #tpu.memory_space<smem>>
    %c48_i32_290 = arith.constant 48 : i32
    %591 = arith.addi %562, %c48_i32_290 : i32
    %592 = arith.addi %591, %c0_i32_282 : i32
    %593 = arith.index_cast %592 : i32 to index
    %594 = memref.load %arg1[%593] : memref<64xi32, #tpu.memory_space<smem>>
    %c56_i32_291 = arith.constant 56 : i32
    %595 = arith.addi %562, %c56_i32_291 : i32
    %596 = arith.addi %595, %c0_i32_282 : i32
    %597 = arith.index_cast %596 : i32 to index
    %598 = memref.load %arg1[%597] : memref<64xi32, #tpu.memory_space<smem>>
    %c7_i32_292 = arith.constant 7 : i32
    %599 = arith.addi %c0_i32_282, %c7_i32_292 : i32
    %c8_i32_293 = arith.constant 8 : i32
    %600 = arith.cmpi sge, %599, %c8_i32_293 : i32
    %c8_i32_294 = arith.constant 8 : i32
    %601 = arith.subi %599, %c8_i32_294 : i32
    %602 = arith.select %600, %601, %599 : i32
    %603 = arith.extui %600 : i1 to i32
    %604 = arith.addi %c0_i32_279, %603 : i32
    %c0_i32_295 = arith.constant 0 : i32
    %605 = arith.minsi %604, %c0_i32_295 : i32
    %c64_i32_296 = arith.constant 64 : i32
    %606 = arith.muli %605, %c64_i32_296 : i32
    %607 = arith.addi %0, %606 : i32
    %c0_i32_297 = arith.constant 0 : i32
    %608 = arith.addi %607, %c0_i32_297 : i32
    %609 = arith.addi %608, %602 : i32
    %610 = arith.index_cast %609 : i32 to index
    %611 = memref.load %arg1[%610] : memref<64xi32, #tpu.memory_space<smem>>
    %c8_i32_298 = arith.constant 8 : i32
    %612 = arith.addi %607, %c8_i32_298 : i32
    %613 = arith.addi %612, %602 : i32
    %614 = arith.index_cast %613 : i32 to index
    %615 = memref.load %arg1[%614] : memref<64xi32, #tpu.memory_space<smem>>
    %c16_i32_299 = arith.constant 16 : i32
    %616 = arith.addi %607, %c16_i32_299 : i32
    %617 = arith.addi %616, %602 : i32
    %618 = arith.index_cast %617 : i32 to index
    %619 = memref.load %arg1[%618] : memref<64xi32, #tpu.memory_space<smem>>
    %c24_i32_300 = arith.constant 24 : i32
    %620 = arith.addi %607, %c24_i32_300 : i32
    %621 = arith.addi %620, %602 : i32
    %622 = arith.index_cast %621 : i32 to index
    %623 = memref.load %arg1[%622] : memref<64xi32, #tpu.memory_space<smem>>
    %c32_i32_301 = arith.constant 32 : i32
    %624 = arith.addi %607, %c32_i32_301 : i32
    %625 = arith.addi %624, %602 : i32
    %626 = arith.index_cast %625 : i32 to index
    %627 = memref.load %arg1[%626] : memref<64xi32, #tpu.memory_space<smem>>
    %c40_i32_302 = arith.constant 40 : i32
    %628 = arith.addi %607, %c40_i32_302 : i32
    %629 = arith.addi %628, %602 : i32
    %630 = arith.index_cast %629 : i32 to index
    %631 = memref.load %arg1[%630] : memref<64xi32, #tpu.memory_space<smem>>
    %c48_i32_303 = arith.constant 48 : i32
    %632 = arith.addi %607, %c48_i32_303 : i32
    %633 = arith.addi %632, %602 : i32
    %634 = arith.index_cast %633 : i32 to index
    %635 = memref.load %arg1[%634] : memref<64xi32, #tpu.memory_space<smem>>
    %c56_i32_304 = arith.constant 56 : i32
    %636 = arith.addi %607, %c56_i32_304 : i32
    %637 = arith.addi %636, %602 : i32
    %638 = arith.index_cast %637 : i32 to index
    %639 = memref.load %arg1[%638] : memref<64xi32, #tpu.memory_space<smem>>
    %c7_i32_305 = arith.constant 7 : i32
    %640 = arith.addi %565, %c7_i32_305 : i32
    %c7_i32_306 = arith.constant 7 : i32
    %641 = arith.andi %640, %c7_i32_306 : i32
    %c7_i32_307 = arith.constant 7 : i32
    %642 = arith.addi %565, %c7_i32_307 : i32
    %c8_i32_308 = arith.constant 8 : i32
    %643 = arith.cmpi slt, %642, %c8_i32_308 : i32
    %644 = arith.extui %643 : i1 to i32
    %c0_i32_309 = arith.constant 0 : i32
    %645 = arith.cmpi ne, %644, %c0_i32_309 : i32
    scf.if %645 {
      %c8_i32_796 = arith.constant 8 : i32
      %1783 = arith.muli %641, %c8_i32_796 : i32
      %c0_i32_797 = arith.constant 0 : i32
      %1784 = arith.addi %1783, %c0_i32_797 : i32
      %c0_i32_798 = arith.constant 0 : i32
      %1785 = tpu.memref_slice %arg2[%611, %c0_i32_798] : memref<512x32xf32, #tpu.memory_space<any>> -> memref<1x32xf32, #tpu.memory_space<any>>
      %1786 = tpu.memref_squeeze %1785 : memref<1x32xf32, #tpu.memory_space<any>> -> memref<32xf32, #tpu.memory_space<any>>
      %c0_i32_799 = arith.constant 0 : i32
      %1787 = tpu.memref_slice %arg9[%1784, %c0_i32_799] : memref<64x32xf32, #tpu.memory_space<vmem>> -> memref<1x32xf32, #tpu.memory_space<vmem>>
      %1788 = tpu.memref_squeeze %1787 : memref<1x32xf32, #tpu.memory_space<vmem>> -> memref<32xf32, #tpu.memory_space<vmem>>
      %1789 = tpu.memref_slice %arg10[%641] : memref<8x!tpu.dma_semaphore, #tpu.memory_space<semaphore_mem>> -> memref<1x!tpu.dma_semaphore, #tpu.memory_space<semaphore_mem>>
      %1790 = tpu.memref_squeeze %1789 : memref<1x!tpu.dma_semaphore, #tpu.memory_space<semaphore_mem>> -> memref<!tpu.dma_semaphore, #tpu.memory_space<semaphore_mem>>
      tpu.enqueue_dma source(%1786 : memref<32xf32, #tpu.memory_space<any>>) target(%1788 : memref<32xf32, #tpu.memory_space<vmem>>) target_semaphore(%1790 : memref<!tpu.dma_semaphore, #tpu.memory_space<semaphore_mem>>)
      %c8_i32_800 = arith.constant 8 : i32
      %1791 = arith.muli %641, %c8_i32_800 : i32
      %c1_i32_801 = arith.constant 1 : i32
      %1792 = arith.addi %1791, %c1_i32_801 : i32
      %c0_i32_802 = arith.constant 0 : i32
      %1793 = tpu.memref_slice %arg2[%615, %c0_i32_802] : memref<512x32xf32, #tpu.memory_space<any>> -> memref<1x32xf32, #tpu.memory_space<any>>
      %1794 = tpu.memref_squeeze %1793 : memref<1x32xf32, #tpu.memory_space<any>> -> memref<32xf32, #tpu.memory_space<any>>
      %c0_i32_803 = arith.constant 0 : i32
      %1795 = tpu.memref_slice %arg9[%1792, %c0_i32_803] : memref<64x32xf32, #tpu.memory_space<vmem>> -> memref<1x32xf32, #tpu.memory_space<vmem>>
      %1796 = tpu.memref_squeeze %1795 : memref<1x32xf32, #tpu.memory_space<vmem>> -> memref<32xf32, #tpu.memory_space<vmem>>
      %1797 = tpu.memref_slice %arg10[%641] : memref<8x!tpu.dma_semaphore, #tpu.memory_space<semaphore_mem>> -> memref<1x!tpu.dma_semaphore, #tpu.memory_space<semaphore_mem>>
      %1798 = tpu.memref_squeeze %1797 : memref<1x!tpu.dma_semaphore, #tpu.memory_space<semaphore_mem>> -> memref<!tpu.dma_semaphore, #tpu.memory_space<semaphore_mem>>
      tpu.enqueue_dma source(%1794 : memref<32xf32, #tpu.memory_space<any>>) target(%1796 : memref<32xf32, #tpu.memory_space<vmem>>) target_semaphore(%1798 : memref<!tpu.dma_semaphore, #tpu.memory_space<semaphore_mem>>)
      %c8_i32_804 = arith.constant 8 : i32
      %1799 = arith.muli %641, %c8_i32_804 : i32
      %c2_i32_805 = arith.constant 2 : i32
      %1800 = arith.addi %1799, %c2_i32_805 : i32
      %c0_i32_806 = arith.constant 0 : i32
      %1801 = tpu.memref_slice %arg2[%619, %c0_i32_806] : memref<512x32xf32, #tpu.memory_space<any>> -> memref<1x32xf32, #tpu.memory_space<any>>
      %1802 = tpu.memref_squeeze %1801 : memref<1x32xf32, #tpu.memory_space<any>> -> memref<32xf32, #tpu.memory_space<any>>
      %c0_i32_807 = arith.constant 0 : i32
      %1803 = tpu.memref_slice %arg9[%1800, %c0_i32_807] : memref<64x32xf32, #tpu.memory_space<vmem>> -> memref<1x32xf32, #tpu.memory_space<vmem>>
      %1804 = tpu.memref_squeeze %1803 : memref<1x32xf32, #tpu.memory_space<vmem>> -> memref<32xf32, #tpu.memory_space<vmem>>
      %1805 = tpu.memref_slice %arg10[%641] : memref<8x!tpu.dma_semaphore, #tpu.memory_space<semaphore_mem>> -> memref<1x!tpu.dma_semaphore, #tpu.memory_space<semaphore_mem>>
      %1806 = tpu.memref_squeeze %1805 : memref<1x!tpu.dma_semaphore, #tpu.memory_space<semaphore_mem>> -> memref<!tpu.dma_semaphore, #tpu.memory_space<semaphore_mem>>
      tpu.enqueue_dma source(%1802 : memref<32xf32, #tpu.memory_space<any>>) target(%1804 : memref<32xf32, #tpu.memory_space<vmem>>) target_semaphore(%1806 : memref<!tpu.dma_semaphore, #tpu.memory_space<semaphore_mem>>)
      %c8_i32_808 = arith.constant 8 : i32
      %1807 = arith.muli %641, %c8_i32_808 : i32
      %c3_i32_809 = arith.constant 3 : i32
      %1808 = arith.addi %1807, %c3_i32_809 : i32
      %c0_i32_810 = arith.constant 0 : i32
      %1809 = tpu.memref_slice %arg2[%623, %c0_i32_810] : memref<512x32xf32, #tpu.memory_space<any>> -> memref<1x32xf32, #tpu.memory_space<any>>
      %1810 = tpu.memref_squeeze %1809 : memref<1x32xf32, #tpu.memory_space<any>> -> memref<32xf32, #tpu.memory_space<any>>
      %c0_i32_811 = arith.constant 0 : i32
      %1811 = tpu.memref_slice %arg9[%1808, %c0_i32_811] : memref<64x32xf32, #tpu.memory_space<vmem>> -> memref<1x32xf32, #tpu.memory_space<vmem>>
      %1812 = tpu.memref_squeeze %1811 : memref<1x32xf32, #tpu.memory_space<vmem>> -> memref<32xf32, #tpu.memory_space<vmem>>
      %1813 = tpu.memref_slice %arg10[%641] : memref<8x!tpu.dma_semaphore, #tpu.memory_space<semaphore_mem>> -> memref<1x!tpu.dma_semaphore, #tpu.memory_space<semaphore_mem>>
      %1814 = tpu.memref_squeeze %1813 : memref<1x!tpu.dma_semaphore, #tpu.memory_space<semaphore_mem>> -> memref<!tpu.dma_semaphore, #tpu.memory_space<semaphore_mem>>
      tpu.enqueue_dma source(%1810 : memref<32xf32, #tpu.memory_space<any>>) target(%1812 : memref<32xf32, #tpu.memory_space<vmem>>) target_semaphore(%1814 : memref<!tpu.dma_semaphore, #tpu.memory_space<semaphore_mem>>)
      %c8_i32_812 = arith.constant 8 : i32
      %1815 = arith.muli %641, %c8_i32_812 : i32
      %c4_i32_813 = arith.constant 4 : i32
      %1816 = arith.addi %1815, %c4_i32_813 : i32
      %c0_i32_814 = arith.constant 0 : i32
      %1817 = tpu.memref_slice %arg2[%627, %c0_i32_814] : memref<512x32xf32, #tpu.memory_space<any>> -> memref<1x32xf32, #tpu.memory_space<any>>
      %1818 = tpu.memref_squeeze %1817 : memref<1x32xf32, #tpu.memory_space<any>> -> memref<32xf32, #tpu.memory_space<any>>
      %c0_i32_815 = arith.constant 0 : i32
      %1819 = tpu.memref_slice %arg9[%1816, %c0_i32_815] : memref<64x32xf32, #tpu.memory_space<vmem>> -> memref<1x32xf32, #tpu.memory_space<vmem>>
      %1820 = tpu.memref_squeeze %1819 : memref<1x32xf32, #tpu.memory_space<vmem>> -> memref<32xf32, #tpu.memory_space<vmem>>
      %1821 = tpu.memref_slice %arg10[%641] : memref<8x!tpu.dma_semaphore, #tpu.memory_space<semaphore_mem>> -> memref<1x!tpu.dma_semaphore, #tpu.memory_space<semaphore_mem>>
      %1822 = tpu.memref_squeeze %1821 : memref<1x!tpu.dma_semaphore, #tpu.memory_space<semaphore_mem>> -> memref<!tpu.dma_semaphore, #tpu.memory_space<semaphore_mem>>
      tpu.enqueue_dma source(%1818 : memref<32xf32, #tpu.memory_space<any>>) target(%1820 : memref<32xf32, #tpu.memory_space<vmem>>) target_semaphore(%1822 : memref<!tpu.dma_semaphore, #tpu.memory_space<semaphore_mem>>)
      %c8_i32_816 = arith.constant 8 : i32
      %1823 = arith.muli %641, %c8_i32_816 : i32
      %c5_i32_817 = arith.constant 5 : i32
      %1824 = arith.addi %1823, %c5_i32_817 : i32
      %c0_i32_818 = arith.constant 0 : i32
      %1825 = tpu.memref_slice %arg2[%631, %c0_i32_818] : memref<512x32xf32, #tpu.memory_space<any>> -> memref<1x32xf32, #tpu.memory_space<any>>
      %1826 = tpu.memref_squeeze %1825 : memref<1x32xf32, #tpu.memory_space<any>> -> memref<32xf32, #tpu.memory_space<any>>
      %c0_i32_819 = arith.constant 0 : i32
      %1827 = tpu.memref_slice %arg9[%1824, %c0_i32_819] : memref<64x32xf32, #tpu.memory_space<vmem>> -> memref<1x32xf32, #tpu.memory_space<vmem>>
      %1828 = tpu.memref_squeeze %1827 : memref<1x32xf32, #tpu.memory_space<vmem>> -> memref<32xf32, #tpu.memory_space<vmem>>
      %1829 = tpu.memref_slice %arg10[%641] : memref<8x!tpu.dma_semaphore, #tpu.memory_space<semaphore_mem>> -> memref<1x!tpu.dma_semaphore, #tpu.memory_space<semaphore_mem>>
      %1830 = tpu.memref_squeeze %1829 : memref<1x!tpu.dma_semaphore, #tpu.memory_space<semaphore_mem>> -> memref<!tpu.dma_semaphore, #tpu.memory_space<semaphore_mem>>
      tpu.enqueue_dma source(%1826 : memref<32xf32, #tpu.memory_space<any>>) target(%1828 : memref<32xf32, #tpu.memory_space<vmem>>) target_semaphore(%1830 : memref<!tpu.dma_semaphore, #tpu.memory_space<semaphore_mem>>)
      %c8_i32_820 = arith.constant 8 : i32
      %1831 = arith.muli %641, %c8_i32_820 : i32
      %c6_i32_821 = arith.constant 6 : i32
      %1832 = arith.addi %1831, %c6_i32_821 : i32
      %c0_i32_822 = arith.constant 0 : i32
      %1833 = tpu.memref_slice %arg2[%635, %c0_i32_822] : memref<512x32xf32, #tpu.memory_space<any>> -> memref<1x32xf32, #tpu.memory_space<any>>
      %1834 = tpu.memref_squeeze %1833 : memref<1x32xf32, #tpu.memory_space<any>> -> memref<32xf32, #tpu.memory_space<any>>
      %c0_i32_823 = arith.constant 0 : i32
      %1835 = tpu.memref_slice %arg9[%1832, %c0_i32_823] : memref<64x32xf32, #tpu.memory_space<vmem>> -> memref<1x32xf32, #tpu.memory_space<vmem>>
      %1836 = tpu.memref_squeeze %1835 : memref<1x32xf32, #tpu.memory_space<vmem>> -> memref<32xf32, #tpu.memory_space<vmem>>
      %1837 = tpu.memref_slice %arg10[%641] : memref<8x!tpu.dma_semaphore, #tpu.memory_space<semaphore_mem>> -> memref<1x!tpu.dma_semaphore, #tpu.memory_space<semaphore_mem>>
      %1838 = tpu.memref_squeeze %1837 : memref<1x!tpu.dma_semaphore, #tpu.memory_space<semaphore_mem>> -> memref<!tpu.dma_semaphore, #tpu.memory_space<semaphore_mem>>
      tpu.enqueue_dma source(%1834 : memref<32xf32, #tpu.memory_space<any>>) target(%1836 : memref<32xf32, #tpu.memory_space<vmem>>) target_semaphore(%1838 : memref<!tpu.dma_semaphore, #tpu.memory_space<semaphore_mem>>)
      %c8_i32_824 = arith.constant 8 : i32
      %1839 = arith.muli %641, %c8_i32_824 : i32
      %c7_i32_825 = arith.constant 7 : i32
      %1840 = arith.addi %1839, %c7_i32_825 : i32
      %c0_i32_826 = arith.constant 0 : i32
      %1841 = tpu.memref_slice %arg2[%639, %c0_i32_826] : memref<512x32xf32, #tpu.memory_space<any>> -> memref<1x32xf32, #tpu.memory_space<any>>
      %1842 = tpu.memref_squeeze %1841 : memref<1x32xf32, #tpu.memory_space<any>> -> memref<32xf32, #tpu.memory_space<any>>
      %c0_i32_827 = arith.constant 0 : i32
      %1843 = tpu.memref_slice %arg9[%1840, %c0_i32_827] : memref<64x32xf32, #tpu.memory_space<vmem>> -> memref<1x32xf32, #tpu.memory_space<vmem>>
      %1844 = tpu.memref_squeeze %1843 : memref<1x32xf32, #tpu.memory_space<vmem>> -> memref<32xf32, #tpu.memory_space<vmem>>
      %1845 = tpu.memref_slice %arg10[%641] : memref<8x!tpu.dma_semaphore, #tpu.memory_space<semaphore_mem>> -> memref<1x!tpu.dma_semaphore, #tpu.memory_space<semaphore_mem>>
      %1846 = tpu.memref_squeeze %1845 : memref<1x!tpu.dma_semaphore, #tpu.memory_space<semaphore_mem>> -> memref<!tpu.dma_semaphore, #tpu.memory_space<semaphore_mem>>
      tpu.enqueue_dma source(%1842 : memref<32xf32, #tpu.memory_space<any>>) target(%1844 : memref<32xf32, #tpu.memory_space<vmem>>) target_semaphore(%1846 : memref<!tpu.dma_semaphore, #tpu.memory_space<semaphore_mem>>)
    } else {
    }
    %c8_i32_310 = arith.constant 8 : i32
    %646 = arith.muli %566, %c8_i32_310 : i32
    %c0_i32_311 = arith.constant 0 : i32
    %647 = arith.addi %646, %c0_i32_311 : i32
    %c0_i32_312 = arith.constant 0 : i32
    %648 = tpu.memref_slice %arg2[%570, %c0_i32_312] : memref<512x32xf32, #tpu.memory_space<any>> -> memref<1x32xf32, #tpu.memory_space<any>>
    %649 = tpu.memref_squeeze %648 : memref<1x32xf32, #tpu.memory_space<any>> -> memref<32xf32, #tpu.memory_space<any>>
    %c0_i32_313 = arith.constant 0 : i32
    %650 = tpu.memref_slice %arg9[%647, %c0_i32_313] : memref<64x32xf32, #tpu.memory_space<vmem>> -> memref<1x32xf32, #tpu.memory_space<vmem>>
    %651 = tpu.memref_squeeze %650 : memref<1x32xf32, #tpu.memory_space<vmem>> -> memref<32xf32, #tpu.memory_space<vmem>>
    %652 = tpu.memref_slice %arg10[%566] : memref<8x!tpu.dma_semaphore, #tpu.memory_space<semaphore_mem>> -> memref<1x!tpu.dma_semaphore, #tpu.memory_space<semaphore_mem>>
    %653 = tpu.memref_squeeze %652 : memref<1x!tpu.dma_semaphore, #tpu.memory_space<semaphore_mem>> -> memref<!tpu.dma_semaphore, #tpu.memory_space<semaphore_mem>>
    tpu.wait_dma2 semaphore(%653 : memref<!tpu.dma_semaphore, #tpu.memory_space<semaphore_mem>>) src(%649 : memref<32xf32, #tpu.memory_space<any>>) dst(%651 : memref<32xf32, #tpu.memory_space<vmem>>)
    %c8_i32_314 = arith.constant 8 : i32
    %654 = arith.muli %566, %c8_i32_314 : i32
    %c1_i32_315 = arith.constant 1 : i32
    %655 = arith.addi %654, %c1_i32_315 : i32
    %c0_i32_316 = arith.constant 0 : i32
    %656 = tpu.memref_slice %arg2[%574, %c0_i32_316] : memref<512x32xf32, #tpu.memory_space<any>> -> memref<1x32xf32, #tpu.memory_space<any>>
    %657 = tpu.memref_squeeze %656 : memref<1x32xf32, #tpu.memory_space<any>> -> memref<32xf32, #tpu.memory_space<any>>
    %c0_i32_317 = arith.constant 0 : i32
    %658 = tpu.memref_slice %arg9[%655, %c0_i32_317] : memref<64x32xf32, #tpu.memory_space<vmem>> -> memref<1x32xf32, #tpu.memory_space<vmem>>
    %659 = tpu.memref_squeeze %658 : memref<1x32xf32, #tpu.memory_space<vmem>> -> memref<32xf32, #tpu.memory_space<vmem>>
    %660 = tpu.memref_slice %arg10[%566] : memref<8x!tpu.dma_semaphore, #tpu.memory_space<semaphore_mem>> -> memref<1x!tpu.dma_semaphore, #tpu.memory_space<semaphore_mem>>
    %661 = tpu.memref_squeeze %660 : memref<1x!tpu.dma_semaphore, #tpu.memory_space<semaphore_mem>> -> memref<!tpu.dma_semaphore, #tpu.memory_space<semaphore_mem>>
    tpu.wait_dma2 semaphore(%661 : memref<!tpu.dma_semaphore, #tpu.memory_space<semaphore_mem>>) src(%657 : memref<32xf32, #tpu.memory_space<any>>) dst(%659 : memref<32xf32, #tpu.memory_space<vmem>>)
    %c8_i32_318 = arith.constant 8 : i32
    %662 = arith.muli %566, %c8_i32_318 : i32
    %c2_i32_319 = arith.constant 2 : i32
    %663 = arith.addi %662, %c2_i32_319 : i32
    %c0_i32_320 = arith.constant 0 : i32
    %664 = tpu.memref_slice %arg2[%578, %c0_i32_320] : memref<512x32xf32, #tpu.memory_space<any>> -> memref<1x32xf32, #tpu.memory_space<any>>
    %665 = tpu.memref_squeeze %664 : memref<1x32xf32, #tpu.memory_space<any>> -> memref<32xf32, #tpu.memory_space<any>>
    %c0_i32_321 = arith.constant 0 : i32
    %666 = tpu.memref_slice %arg9[%663, %c0_i32_321] : memref<64x32xf32, #tpu.memory_space<vmem>> -> memref<1x32xf32, #tpu.memory_space<vmem>>
    %667 = tpu.memref_squeeze %666 : memref<1x32xf32, #tpu.memory_space<vmem>> -> memref<32xf32, #tpu.memory_space<vmem>>
    %668 = tpu.memref_slice %arg10[%566] : memref<8x!tpu.dma_semaphore, #tpu.memory_space<semaphore_mem>> -> memref<1x!tpu.dma_semaphore, #tpu.memory_space<semaphore_mem>>
    %669 = tpu.memref_squeeze %668 : memref<1x!tpu.dma_semaphore, #tpu.memory_space<semaphore_mem>> -> memref<!tpu.dma_semaphore, #tpu.memory_space<semaphore_mem>>
    tpu.wait_dma2 semaphore(%669 : memref<!tpu.dma_semaphore, #tpu.memory_space<semaphore_mem>>) src(%665 : memref<32xf32, #tpu.memory_space<any>>) dst(%667 : memref<32xf32, #tpu.memory_space<vmem>>)
    %c8_i32_322 = arith.constant 8 : i32
    %670 = arith.muli %566, %c8_i32_322 : i32
    %c3_i32_323 = arith.constant 3 : i32
    %671 = arith.addi %670, %c3_i32_323 : i32
    %c0_i32_324 = arith.constant 0 : i32
    %672 = tpu.memref_slice %arg2[%582, %c0_i32_324] : memref<512x32xf32, #tpu.memory_space<any>> -> memref<1x32xf32, #tpu.memory_space<any>>
    %673 = tpu.memref_squeeze %672 : memref<1x32xf32, #tpu.memory_space<any>> -> memref<32xf32, #tpu.memory_space<any>>
    %c0_i32_325 = arith.constant 0 : i32
    %674 = tpu.memref_slice %arg9[%671, %c0_i32_325] : memref<64x32xf32, #tpu.memory_space<vmem>> -> memref<1x32xf32, #tpu.memory_space<vmem>>
    %675 = tpu.memref_squeeze %674 : memref<1x32xf32, #tpu.memory_space<vmem>> -> memref<32xf32, #tpu.memory_space<vmem>>
    %676 = tpu.memref_slice %arg10[%566] : memref<8x!tpu.dma_semaphore, #tpu.memory_space<semaphore_mem>> -> memref<1x!tpu.dma_semaphore, #tpu.memory_space<semaphore_mem>>
    %677 = tpu.memref_squeeze %676 : memref<1x!tpu.dma_semaphore, #tpu.memory_space<semaphore_mem>> -> memref<!tpu.dma_semaphore, #tpu.memory_space<semaphore_mem>>
    tpu.wait_dma2 semaphore(%677 : memref<!tpu.dma_semaphore, #tpu.memory_space<semaphore_mem>>) src(%673 : memref<32xf32, #tpu.memory_space<any>>) dst(%675 : memref<32xf32, #tpu.memory_space<vmem>>)
    %c8_i32_326 = arith.constant 8 : i32
    %678 = arith.muli %566, %c8_i32_326 : i32
    %c4_i32_327 = arith.constant 4 : i32
    %679 = arith.addi %678, %c4_i32_327 : i32
    %c0_i32_328 = arith.constant 0 : i32
    %680 = tpu.memref_slice %arg2[%586, %c0_i32_328] : memref<512x32xf32, #tpu.memory_space<any>> -> memref<1x32xf32, #tpu.memory_space<any>>
    %681 = tpu.memref_squeeze %680 : memref<1x32xf32, #tpu.memory_space<any>> -> memref<32xf32, #tpu.memory_space<any>>
    %c0_i32_329 = arith.constant 0 : i32
    %682 = tpu.memref_slice %arg9[%679, %c0_i32_329] : memref<64x32xf32, #tpu.memory_space<vmem>> -> memref<1x32xf32, #tpu.memory_space<vmem>>
    %683 = tpu.memref_squeeze %682 : memref<1x32xf32, #tpu.memory_space<vmem>> -> memref<32xf32, #tpu.memory_space<vmem>>
    %684 = tpu.memref_slice %arg10[%566] : memref<8x!tpu.dma_semaphore, #tpu.memory_space<semaphore_mem>> -> memref<1x!tpu.dma_semaphore, #tpu.memory_space<semaphore_mem>>
    %685 = tpu.memref_squeeze %684 : memref<1x!tpu.dma_semaphore, #tpu.memory_space<semaphore_mem>> -> memref<!tpu.dma_semaphore, #tpu.memory_space<semaphore_mem>>
    tpu.wait_dma2 semaphore(%685 : memref<!tpu.dma_semaphore, #tpu.memory_space<semaphore_mem>>) src(%681 : memref<32xf32, #tpu.memory_space<any>>) dst(%683 : memref<32xf32, #tpu.memory_space<vmem>>)
    %c8_i32_330 = arith.constant 8 : i32
    %686 = arith.muli %566, %c8_i32_330 : i32
    %c5_i32_331 = arith.constant 5 : i32
    %687 = arith.addi %686, %c5_i32_331 : i32
    %c0_i32_332 = arith.constant 0 : i32
    %688 = tpu.memref_slice %arg2[%590, %c0_i32_332] : memref<512x32xf32, #tpu.memory_space<any>> -> memref<1x32xf32, #tpu.memory_space<any>>
    %689 = tpu.memref_squeeze %688 : memref<1x32xf32, #tpu.memory_space<any>> -> memref<32xf32, #tpu.memory_space<any>>
    %c0_i32_333 = arith.constant 0 : i32
    %690 = tpu.memref_slice %arg9[%687, %c0_i32_333] : memref<64x32xf32, #tpu.memory_space<vmem>> -> memref<1x32xf32, #tpu.memory_space<vmem>>
    %691 = tpu.memref_squeeze %690 : memref<1x32xf32, #tpu.memory_space<vmem>> -> memref<32xf32, #tpu.memory_space<vmem>>
    %692 = tpu.memref_slice %arg10[%566] : memref<8x!tpu.dma_semaphore, #tpu.memory_space<semaphore_mem>> -> memref<1x!tpu.dma_semaphore, #tpu.memory_space<semaphore_mem>>
    %693 = tpu.memref_squeeze %692 : memref<1x!tpu.dma_semaphore, #tpu.memory_space<semaphore_mem>> -> memref<!tpu.dma_semaphore, #tpu.memory_space<semaphore_mem>>
    tpu.wait_dma2 semaphore(%693 : memref<!tpu.dma_semaphore, #tpu.memory_space<semaphore_mem>>) src(%689 : memref<32xf32, #tpu.memory_space<any>>) dst(%691 : memref<32xf32, #tpu.memory_space<vmem>>)
    %c8_i32_334 = arith.constant 8 : i32
    %694 = arith.muli %566, %c8_i32_334 : i32
    %c6_i32_335 = arith.constant 6 : i32
    %695 = arith.addi %694, %c6_i32_335 : i32
    %c0_i32_336 = arith.constant 0 : i32
    %696 = tpu.memref_slice %arg2[%594, %c0_i32_336] : memref<512x32xf32, #tpu.memory_space<any>> -> memref<1x32xf32, #tpu.memory_space<any>>
    %697 = tpu.memref_squeeze %696 : memref<1x32xf32, #tpu.memory_space<any>> -> memref<32xf32, #tpu.memory_space<any>>
    %c0_i32_337 = arith.constant 0 : i32
    %698 = tpu.memref_slice %arg9[%695, %c0_i32_337] : memref<64x32xf32, #tpu.memory_space<vmem>> -> memref<1x32xf32, #tpu.memory_space<vmem>>
    %699 = tpu.memref_squeeze %698 : memref<1x32xf32, #tpu.memory_space<vmem>> -> memref<32xf32, #tpu.memory_space<vmem>>
    %700 = tpu.memref_slice %arg10[%566] : memref<8x!tpu.dma_semaphore, #tpu.memory_space<semaphore_mem>> -> memref<1x!tpu.dma_semaphore, #tpu.memory_space<semaphore_mem>>
    %701 = tpu.memref_squeeze %700 : memref<1x!tpu.dma_semaphore, #tpu.memory_space<semaphore_mem>> -> memref<!tpu.dma_semaphore, #tpu.memory_space<semaphore_mem>>
    tpu.wait_dma2 semaphore(%701 : memref<!tpu.dma_semaphore, #tpu.memory_space<semaphore_mem>>) src(%697 : memref<32xf32, #tpu.memory_space<any>>) dst(%699 : memref<32xf32, #tpu.memory_space<vmem>>)
    %c8_i32_338 = arith.constant 8 : i32
    %702 = arith.muli %566, %c8_i32_338 : i32
    %c7_i32_339 = arith.constant 7 : i32
    %703 = arith.addi %702, %c7_i32_339 : i32
    %c0_i32_340 = arith.constant 0 : i32
    %704 = tpu.memref_slice %arg2[%598, %c0_i32_340] : memref<512x32xf32, #tpu.memory_space<any>> -> memref<1x32xf32, #tpu.memory_space<any>>
    %705 = tpu.memref_squeeze %704 : memref<1x32xf32, #tpu.memory_space<any>> -> memref<32xf32, #tpu.memory_space<any>>
    %c0_i32_341 = arith.constant 0 : i32
    %706 = tpu.memref_slice %arg9[%703, %c0_i32_341] : memref<64x32xf32, #tpu.memory_space<vmem>> -> memref<1x32xf32, #tpu.memory_space<vmem>>
    %707 = tpu.memref_squeeze %706 : memref<1x32xf32, #tpu.memory_space<vmem>> -> memref<32xf32, #tpu.memory_space<vmem>>
    %708 = tpu.memref_slice %arg10[%566] : memref<8x!tpu.dma_semaphore, #tpu.memory_space<semaphore_mem>> -> memref<1x!tpu.dma_semaphore, #tpu.memory_space<semaphore_mem>>
    %709 = tpu.memref_squeeze %708 : memref<1x!tpu.dma_semaphore, #tpu.memory_space<semaphore_mem>> -> memref<!tpu.dma_semaphore, #tpu.memory_space<semaphore_mem>>
    tpu.wait_dma2 semaphore(%709 : memref<!tpu.dma_semaphore, #tpu.memory_space<semaphore_mem>>) src(%705 : memref<32xf32, #tpu.memory_space<any>>) dst(%707 : memref<32xf32, #tpu.memory_space<vmem>>)
    %c8_i32_342 = arith.constant 8 : i32
    %710 = arith.muli %566, %c8_i32_342 : i32
    %711 = tpu.assume_multiple %710, 8 : i32
    %712 = arith.index_cast %711 : i32 to index
    %c0 = arith.constant 0 : index
    %713 = vector.load %arg9[%712, %c0] : memref<64x32xf32, #tpu.memory_space<vmem>>, vector<8x32xf32>
    %714 = arith.addf %564, %713 : vector<8x32xf32>
    %c1_i32_343 = arith.constant 1 : i32
    %715 = arith.addi %563, %c1_i32_343 : i32
    %c7_i32_344 = arith.constant 7 : i32
    %716 = arith.andi %715, %c7_i32_344 : i32
    %c0_i32_345 = arith.constant 0 : i32
    %717 = arith.addi %562, %c0_i32_345 : i32
    %718 = arith.addi %717, %c1_i32_343 : i32
    %719 = arith.index_cast %718 : i32 to index
    %720 = memref.load %arg1[%719] : memref<64xi32, #tpu.memory_space<smem>>
    %c8_i32_346 = arith.constant 8 : i32
    %721 = arith.addi %562, %c8_i32_346 : i32
    %722 = arith.addi %721, %c1_i32_343 : i32
    %723 = arith.index_cast %722 : i32 to index
    %724 = memref.load %arg1[%723] : memref<64xi32, #tpu.memory_space<smem>>
    %c16_i32_347 = arith.constant 16 : i32
    %725 = arith.addi %562, %c16_i32_347 : i32
    %726 = arith.addi %725, %c1_i32_343 : i32
    %727 = arith.index_cast %726 : i32 to index
    %728 = memref.load %arg1[%727] : memref<64xi32, #tpu.memory_space<smem>>
    %c24_i32_348 = arith.constant 24 : i32
    %729 = arith.addi %562, %c24_i32_348 : i32
    %730 = arith.addi %729, %c1_i32_343 : i32
    %731 = arith.index_cast %730 : i32 to index
    %732 = memref.load %arg1[%731] : memref<64xi32, #tpu.memory_space<smem>>
    %c32_i32_349 = arith.constant 32 : i32
    %733 = arith.addi %562, %c32_i32_349 : i32
    %734 = arith.addi %733, %c1_i32_343 : i32
    %735 = arith.index_cast %734 : i32 to index
    %736 = memref.load %arg1[%735] : memref<64xi32, #tpu.memory_space<smem>>
    %c40_i32_350 = arith.constant 40 : i32
    %737 = arith.addi %562, %c40_i32_350 : i32
    %738 = arith.addi %737, %c1_i32_343 : i32
    %739 = arith.index_cast %738 : i32 to index
    %740 = memref.load %arg1[%739] : memref<64xi32, #tpu.memory_space<smem>>
    %c48_i32_351 = arith.constant 48 : i32
    %741 = arith.addi %562, %c48_i32_351 : i32
    %742 = arith.addi %741, %c1_i32_343 : i32
    %743 = arith.index_cast %742 : i32 to index
    %744 = memref.load %arg1[%743] : memref<64xi32, #tpu.memory_space<smem>>
    %c56_i32_352 = arith.constant 56 : i32
    %745 = arith.addi %562, %c56_i32_352 : i32
    %746 = arith.addi %745, %c1_i32_343 : i32
    %747 = arith.index_cast %746 : i32 to index
    %748 = memref.load %arg1[%747] : memref<64xi32, #tpu.memory_space<smem>>
    %c7_i32_353 = arith.constant 7 : i32
    %749 = arith.addi %c1_i32_343, %c7_i32_353 : i32
    %c8_i32_354 = arith.constant 8 : i32
    %750 = arith.cmpi sge, %749, %c8_i32_354 : i32
    %c8_i32_355 = arith.constant 8 : i32
    %751 = arith.subi %749, %c8_i32_355 : i32
    %752 = arith.select %750, %751, %749 : i32
    %753 = arith.extui %750 : i1 to i32
    %754 = arith.addi %c0_i32_279, %753 : i32
    %c0_i32_356 = arith.constant 0 : i32
    %755 = arith.minsi %754, %c0_i32_356 : i32
    %c64_i32_357 = arith.constant 64 : i32
    %756 = arith.muli %755, %c64_i32_357 : i32
    %757 = arith.addi %0, %756 : i32
    %c0_i32_358 = arith.constant 0 : i32
    %758 = arith.addi %757, %c0_i32_358 : i32
    %759 = arith.addi %758, %752 : i32
    %760 = arith.index_cast %759 : i32 to index
    %761 = memref.load %arg1[%760] : memref<64xi32, #tpu.memory_space<smem>>
    %c8_i32_359 = arith.constant 8 : i32
    %762 = arith.addi %757, %c8_i32_359 : i32
    %763 = arith.addi %762, %752 : i32
    %764 = arith.index_cast %763 : i32 to index
    %765 = memref.load %arg1[%764] : memref<64xi32, #tpu.memory_space<smem>>
    %c16_i32_360 = arith.constant 16 : i32
    %766 = arith.addi %757, %c16_i32_360 : i32
    %767 = arith.addi %766, %752 : i32
    %768 = arith.index_cast %767 : i32 to index
    %769 = memref.load %arg1[%768] : memref<64xi32, #tpu.memory_space<smem>>
    %c24_i32_361 = arith.constant 24 : i32
    %770 = arith.addi %757, %c24_i32_361 : i32
    %771 = arith.addi %770, %752 : i32
    %772 = arith.index_cast %771 : i32 to index
    %773 = memref.load %arg1[%772] : memref<64xi32, #tpu.memory_space<smem>>
    %c32_i32_362 = arith.constant 32 : i32
    %774 = arith.addi %757, %c32_i32_362 : i32
    %775 = arith.addi %774, %752 : i32
    %776 = arith.index_cast %775 : i32 to index
    %777 = memref.load %arg1[%776] : memref<64xi32, #tpu.memory_space<smem>>
    %c40_i32_363 = arith.constant 40 : i32
    %778 = arith.addi %757, %c40_i32_363 : i32
    %779 = arith.addi %778, %752 : i32
    %780 = arith.index_cast %779 : i32 to index
    %781 = memref.load %arg1[%780] : memref<64xi32, #tpu.memory_space<smem>>
    %c48_i32_364 = arith.constant 48 : i32
    %782 = arith.addi %757, %c48_i32_364 : i32
    %783 = arith.addi %782, %752 : i32
    %784 = arith.index_cast %783 : i32 to index
    %785 = memref.load %arg1[%784] : memref<64xi32, #tpu.memory_space<smem>>
    %c56_i32_365 = arith.constant 56 : i32
    %786 = arith.addi %757, %c56_i32_365 : i32
    %787 = arith.addi %786, %752 : i32
    %788 = arith.index_cast %787 : i32 to index
    %789 = memref.load %arg1[%788] : memref<64xi32, #tpu.memory_space<smem>>
    %c7_i32_366 = arith.constant 7 : i32
    %790 = arith.addi %715, %c7_i32_366 : i32
    %c7_i32_367 = arith.constant 7 : i32
    %791 = arith.andi %790, %c7_i32_367 : i32
    %c7_i32_368 = arith.constant 7 : i32
    %792 = arith.addi %715, %c7_i32_368 : i32
    %c8_i32_369 = arith.constant 8 : i32
    %793 = arith.cmpi slt, %792, %c8_i32_369 : i32
    %794 = arith.extui %793 : i1 to i32
    %c0_i32_370 = arith.constant 0 : i32
    %795 = arith.cmpi ne, %794, %c0_i32_370 : i32
    scf.if %795 {
      %c8_i32_796 = arith.constant 8 : i32
      %1783 = arith.muli %791, %c8_i32_796 : i32
      %c0_i32_797 = arith.constant 0 : i32
      %1784 = arith.addi %1783, %c0_i32_797 : i32
      %c0_i32_798 = arith.constant 0 : i32
      %1785 = tpu.memref_slice %arg2[%761, %c0_i32_798] : memref<512x32xf32, #tpu.memory_space<any>> -> memref<1x32xf32, #tpu.memory_space<any>>
      %1786 = tpu.memref_squeeze %1785 : memref<1x32xf32, #tpu.memory_space<any>> -> memref<32xf32, #tpu.memory_space<any>>
      %c0_i32_799 = arith.constant 0 : i32
      %1787 = tpu.memref_slice %arg9[%1784, %c0_i32_799] : memref<64x32xf32, #tpu.memory_space<vmem>> -> memref<1x32xf32, #tpu.memory_space<vmem>>
      %1788 = tpu.memref_squeeze %1787 : memref<1x32xf32, #tpu.memory_space<vmem>> -> memref<32xf32, #tpu.memory_space<vmem>>
      %1789 = tpu.memref_slice %arg10[%791] : memref<8x!tpu.dma_semaphore, #tpu.memory_space<semaphore_mem>> -> memref<1x!tpu.dma_semaphore, #tpu.memory_space<semaphore_mem>>
      %1790 = tpu.memref_squeeze %1789 : memref<1x!tpu.dma_semaphore, #tpu.memory_space<semaphore_mem>> -> memref<!tpu.dma_semaphore, #tpu.memory_space<semaphore_mem>>
      tpu.enqueue_dma source(%1786 : memref<32xf32, #tpu.memory_space<any>>) target(%1788 : memref<32xf32, #tpu.memory_space<vmem>>) target_semaphore(%1790 : memref<!tpu.dma_semaphore, #tpu.memory_space<semaphore_mem>>)
      %c8_i32_800 = arith.constant 8 : i32
      %1791 = arith.muli %791, %c8_i32_800 : i32
      %c1_i32_801 = arith.constant 1 : i32
      %1792 = arith.addi %1791, %c1_i32_801 : i32
      %c0_i32_802 = arith.constant 0 : i32
      %1793 = tpu.memref_slice %arg2[%765, %c0_i32_802] : memref<512x32xf32, #tpu.memory_space<any>> -> memref<1x32xf32, #tpu.memory_space<any>>
      %1794 = tpu.memref_squeeze %1793 : memref<1x32xf32, #tpu.memory_space<any>> -> memref<32xf32, #tpu.memory_space<any>>
      %c0_i32_803 = arith.constant 0 : i32
      %1795 = tpu.memref_slice %arg9[%1792, %c0_i32_803] : memref<64x32xf32, #tpu.memory_space<vmem>> -> memref<1x32xf32, #tpu.memory_space<vmem>>
      %1796 = tpu.memref_squeeze %1795 : memref<1x32xf32, #tpu.memory_space<vmem>> -> memref<32xf32, #tpu.memory_space<vmem>>
      %1797 = tpu.memref_slice %arg10[%791] : memref<8x!tpu.dma_semaphore, #tpu.memory_space<semaphore_mem>> -> memref<1x!tpu.dma_semaphore, #tpu.memory_space<semaphore_mem>>
      %1798 = tpu.memref_squeeze %1797 : memref<1x!tpu.dma_semaphore, #tpu.memory_space<semaphore_mem>> -> memref<!tpu.dma_semaphore, #tpu.memory_space<semaphore_mem>>
      tpu.enqueue_dma source(%1794 : memref<32xf32, #tpu.memory_space<any>>) target(%1796 : memref<32xf32, #tpu.memory_space<vmem>>) target_semaphore(%1798 : memref<!tpu.dma_semaphore, #tpu.memory_space<semaphore_mem>>)
      %c8_i32_804 = arith.constant 8 : i32
      %1799 = arith.muli %791, %c8_i32_804 : i32
      %c2_i32_805 = arith.constant 2 : i32
      %1800 = arith.addi %1799, %c2_i32_805 : i32
      %c0_i32_806 = arith.constant 0 : i32
      %1801 = tpu.memref_slice %arg2[%769, %c0_i32_806] : memref<512x32xf32, #tpu.memory_space<any>> -> memref<1x32xf32, #tpu.memory_space<any>>
      %1802 = tpu.memref_squeeze %1801 : memref<1x32xf32, #tpu.memory_space<any>> -> memref<32xf32, #tpu.memory_space<any>>
      %c0_i32_807 = arith.constant 0 : i32
      %1803 = tpu.memref_slice %arg9[%1800, %c0_i32_807] : memref<64x32xf32, #tpu.memory_space<vmem>> -> memref<1x32xf32, #tpu.memory_space<vmem>>
      %1804 = tpu.memref_squeeze %1803 : memref<1x32xf32, #tpu.memory_space<vmem>> -> memref<32xf32, #tpu.memory_space<vmem>>
      %1805 = tpu.memref_slice %arg10[%791] : memref<8x!tpu.dma_semaphore, #tpu.memory_space<semaphore_mem>> -> memref<1x!tpu.dma_semaphore, #tpu.memory_space<semaphore_mem>>
      %1806 = tpu.memref_squeeze %1805 : memref<1x!tpu.dma_semaphore, #tpu.memory_space<semaphore_mem>> -> memref<!tpu.dma_semaphore, #tpu.memory_space<semaphore_mem>>
      tpu.enqueue_dma source(%1802 : memref<32xf32, #tpu.memory_space<any>>) target(%1804 : memref<32xf32, #tpu.memory_space<vmem>>) target_semaphore(%1806 : memref<!tpu.dma_semaphore, #tpu.memory_space<semaphore_mem>>)
      %c8_i32_808 = arith.constant 8 : i32
      %1807 = arith.muli %791, %c8_i32_808 : i32
      %c3_i32_809 = arith.constant 3 : i32
      %1808 = arith.addi %1807, %c3_i32_809 : i32
      %c0_i32_810 = arith.constant 0 : i32
      %1809 = tpu.memref_slice %arg2[%773, %c0_i32_810] : memref<512x32xf32, #tpu.memory_space<any>> -> memref<1x32xf32, #tpu.memory_space<any>>
      %1810 = tpu.memref_squeeze %1809 : memref<1x32xf32, #tpu.memory_space<any>> -> memref<32xf32, #tpu.memory_space<any>>
      %c0_i32_811 = arith.constant 0 : i32
      %1811 = tpu.memref_slice %arg9[%1808, %c0_i32_811] : memref<64x32xf32, #tpu.memory_space<vmem>> -> memref<1x32xf32, #tpu.memory_space<vmem>>
      %1812 = tpu.memref_squeeze %1811 : memref<1x32xf32, #tpu.memory_space<vmem>> -> memref<32xf32, #tpu.memory_space<vmem>>
      %1813 = tpu.memref_slice %arg10[%791] : memref<8x!tpu.dma_semaphore, #tpu.memory_space<semaphore_mem>> -> memref<1x!tpu.dma_semaphore, #tpu.memory_space<semaphore_mem>>
      %1814 = tpu.memref_squeeze %1813 : memref<1x!tpu.dma_semaphore, #tpu.memory_space<semaphore_mem>> -> memref<!tpu.dma_semaphore, #tpu.memory_space<semaphore_mem>>
      tpu.enqueue_dma source(%1810 : memref<32xf32, #tpu.memory_space<any>>) target(%1812 : memref<32xf32, #tpu.memory_space<vmem>>) target_semaphore(%1814 : memref<!tpu.dma_semaphore, #tpu.memory_space<semaphore_mem>>)
      %c8_i32_812 = arith.constant 8 : i32
      %1815 = arith.muli %791, %c8_i32_812 : i32
      %c4_i32_813 = arith.constant 4 : i32
      %1816 = arith.addi %1815, %c4_i32_813 : i32
      %c0_i32_814 = arith.constant 0 : i32
      %1817 = tpu.memref_slice %arg2[%777, %c0_i32_814] : memref<512x32xf32, #tpu.memory_space<any>> -> memref<1x32xf32, #tpu.memory_space<any>>
      %1818 = tpu.memref_squeeze %1817 : memref<1x32xf32, #tpu.memory_space<any>> -> memref<32xf32, #tpu.memory_space<any>>
      %c0_i32_815 = arith.constant 0 : i32
      %1819 = tpu.memref_slice %arg9[%1816, %c0_i32_815] : memref<64x32xf32, #tpu.memory_space<vmem>> -> memref<1x32xf32, #tpu.memory_space<vmem>>
      %1820 = tpu.memref_squeeze %1819 : memref<1x32xf32, #tpu.memory_space<vmem>> -> memref<32xf32, #tpu.memory_space<vmem>>
      %1821 = tpu.memref_slice %arg10[%791] : memref<8x!tpu.dma_semaphore, #tpu.memory_space<semaphore_mem>> -> memref<1x!tpu.dma_semaphore, #tpu.memory_space<semaphore_mem>>
      %1822 = tpu.memref_squeeze %1821 : memref<1x!tpu.dma_semaphore, #tpu.memory_space<semaphore_mem>> -> memref<!tpu.dma_semaphore, #tpu.memory_space<semaphore_mem>>
      tpu.enqueue_dma source(%1818 : memref<32xf32, #tpu.memory_space<any>>) target(%1820 : memref<32xf32, #tpu.memory_space<vmem>>) target_semaphore(%1822 : memref<!tpu.dma_semaphore, #tpu.memory_space<semaphore_mem>>)
      %c8_i32_816 = arith.constant 8 : i32
      %1823 = arith.muli %791, %c8_i32_816 : i32
      %c5_i32_817 = arith.constant 5 : i32
      %1824 = arith.addi %1823, %c5_i32_817 : i32
      %c0_i32_818 = arith.constant 0 : i32
      %1825 = tpu.memref_slice %arg2[%781, %c0_i32_818] : memref<512x32xf32, #tpu.memory_space<any>> -> memref<1x32xf32, #tpu.memory_space<any>>
      %1826 = tpu.memref_squeeze %1825 : memref<1x32xf32, #tpu.memory_space<any>> -> memref<32xf32, #tpu.memory_space<any>>
      %c0_i32_819 = arith.constant 0 : i32
      %1827 = tpu.memref_slice %arg9[%1824, %c0_i32_819] : memref<64x32xf32, #tpu.memory_space<vmem>> -> memref<1x32xf32, #tpu.memory_space<vmem>>
      %1828 = tpu.memref_squeeze %1827 : memref<1x32xf32, #tpu.memory_space<vmem>> -> memref<32xf32, #tpu.memory_space<vmem>>
      %1829 = tpu.memref_slice %arg10[%791] : memref<8x!tpu.dma_semaphore, #tpu.memory_space<semaphore_mem>> -> memref<1x!tpu.dma_semaphore, #tpu.memory_space<semaphore_mem>>
      %1830 = tpu.memref_squeeze %1829 : memref<1x!tpu.dma_semaphore, #tpu.memory_space<semaphore_mem>> -> memref<!tpu.dma_semaphore, #tpu.memory_space<semaphore_mem>>
      tpu.enqueue_dma source(%1826 : memref<32xf32, #tpu.memory_space<any>>) target(%1828 : memref<32xf32, #tpu.memory_space<vmem>>) target_semaphore(%1830 : memref<!tpu.dma_semaphore, #tpu.memory_space<semaphore_mem>>)
      %c8_i32_820 = arith.constant 8 : i32
      %1831 = arith.muli %791, %c8_i32_820 : i32
      %c6_i32_821 = arith.constant 6 : i32
      %1832 = arith.addi %1831, %c6_i32_821 : i32
      %c0_i32_822 = arith.constant 0 : i32
      %1833 = tpu.memref_slice %arg2[%785, %c0_i32_822] : memref<512x32xf32, #tpu.memory_space<any>> -> memref<1x32xf32, #tpu.memory_space<any>>
      %1834 = tpu.memref_squeeze %1833 : memref<1x32xf32, #tpu.memory_space<any>> -> memref<32xf32, #tpu.memory_space<any>>
      %c0_i32_823 = arith.constant 0 : i32
      %1835 = tpu.memref_slice %arg9[%1832, %c0_i32_823] : memref<64x32xf32, #tpu.memory_space<vmem>> -> memref<1x32xf32, #tpu.memory_space<vmem>>
      %1836 = tpu.memref_squeeze %1835 : memref<1x32xf32, #tpu.memory_space<vmem>> -> memref<32xf32, #tpu.memory_space<vmem>>
      %1837 = tpu.memref_slice %arg10[%791] : memref<8x!tpu.dma_semaphore, #tpu.memory_space<semaphore_mem>> -> memref<1x!tpu.dma_semaphore, #tpu.memory_space<semaphore_mem>>
      %1838 = tpu.memref_squeeze %1837 : memref<1x!tpu.dma_semaphore, #tpu.memory_space<semaphore_mem>> -> memref<!tpu.dma_semaphore, #tpu.memory_space<semaphore_mem>>
      tpu.enqueue_dma source(%1834 : memref<32xf32, #tpu.memory_space<any>>) target(%1836 : memref<32xf32, #tpu.memory_space<vmem>>) target_semaphore(%1838 : memref<!tpu.dma_semaphore, #tpu.memory_space<semaphore_mem>>)
      %c8_i32_824 = arith.constant 8 : i32
      %1839 = arith.muli %791, %c8_i32_824 : i32
      %c7_i32_825 = arith.constant 7 : i32
      %1840 = arith.addi %1839, %c7_i32_825 : i32
      %c0_i32_826 = arith.constant 0 : i32
      %1841 = tpu.memref_slice %arg2[%789, %c0_i32_826] : memref<512x32xf32, #tpu.memory_space<any>> -> memref<1x32xf32, #tpu.memory_space<any>>
      %1842 = tpu.memref_squeeze %1841 : memref<1x32xf32, #tpu.memory_space<any>> -> memref<32xf32, #tpu.memory_space<any>>
      %c0_i32_827 = arith.constant 0 : i32
      %1843 = tpu.memref_slice %arg9[%1840, %c0_i32_827] : memref<64x32xf32, #tpu.memory_space<vmem>> -> memref<1x32xf32, #tpu.memory_space<vmem>>
      %1844 = tpu.memref_squeeze %1843 : memref<1x32xf32, #tpu.memory_space<vmem>> -> memref<32xf32, #tpu.memory_space<vmem>>
      %1845 = tpu.memref_slice %arg10[%791] : memref<8x!tpu.dma_semaphore, #tpu.memory_space<semaphore_mem>> -> memref<1x!tpu.dma_semaphore, #tpu.memory_space<semaphore_mem>>
      %1846 = tpu.memref_squeeze %1845 : memref<1x!tpu.dma_semaphore, #tpu.memory_space<semaphore_mem>> -> memref<!tpu.dma_semaphore, #tpu.memory_space<semaphore_mem>>
      tpu.enqueue_dma source(%1842 : memref<32xf32, #tpu.memory_space<any>>) target(%1844 : memref<32xf32, #tpu.memory_space<vmem>>) target_semaphore(%1846 : memref<!tpu.dma_semaphore, #tpu.memory_space<semaphore_mem>>)
    } else {
    }
    %c8_i32_371 = arith.constant 8 : i32
    %796 = arith.muli %716, %c8_i32_371 : i32
    %c0_i32_372 = arith.constant 0 : i32
    %797 = arith.addi %796, %c0_i32_372 : i32
    %c0_i32_373 = arith.constant 0 : i32
    %798 = tpu.memref_slice %arg2[%720, %c0_i32_373] : memref<512x32xf32, #tpu.memory_space<any>> -> memref<1x32xf32, #tpu.memory_space<any>>
    %799 = tpu.memref_squeeze %798 : memref<1x32xf32, #tpu.memory_space<any>> -> memref<32xf32, #tpu.memory_space<any>>
    %c0_i32_374 = arith.constant 0 : i32
    %800 = tpu.memref_slice %arg9[%797, %c0_i32_374] : memref<64x32xf32, #tpu.memory_space<vmem>> -> memref<1x32xf32, #tpu.memory_space<vmem>>
    %801 = tpu.memref_squeeze %800 : memref<1x32xf32, #tpu.memory_space<vmem>> -> memref<32xf32, #tpu.memory_space<vmem>>
    %802 = tpu.memref_slice %arg10[%716] : memref<8x!tpu.dma_semaphore, #tpu.memory_space<semaphore_mem>> -> memref<1x!tpu.dma_semaphore, #tpu.memory_space<semaphore_mem>>
    %803 = tpu.memref_squeeze %802 : memref<1x!tpu.dma_semaphore, #tpu.memory_space<semaphore_mem>> -> memref<!tpu.dma_semaphore, #tpu.memory_space<semaphore_mem>>
    tpu.wait_dma2 semaphore(%803 : memref<!tpu.dma_semaphore, #tpu.memory_space<semaphore_mem>>) src(%799 : memref<32xf32, #tpu.memory_space<any>>) dst(%801 : memref<32xf32, #tpu.memory_space<vmem>>)
    %c8_i32_375 = arith.constant 8 : i32
    %804 = arith.muli %716, %c8_i32_375 : i32
    %c1_i32_376 = arith.constant 1 : i32
    %805 = arith.addi %804, %c1_i32_376 : i32
    %c0_i32_377 = arith.constant 0 : i32
    %806 = tpu.memref_slice %arg2[%724, %c0_i32_377] : memref<512x32xf32, #tpu.memory_space<any>> -> memref<1x32xf32, #tpu.memory_space<any>>
    %807 = tpu.memref_squeeze %806 : memref<1x32xf32, #tpu.memory_space<any>> -> memref<32xf32, #tpu.memory_space<any>>
    %c0_i32_378 = arith.constant 0 : i32
    %808 = tpu.memref_slice %arg9[%805, %c0_i32_378] : memref<64x32xf32, #tpu.memory_space<vmem>> -> memref<1x32xf32, #tpu.memory_space<vmem>>
    %809 = tpu.memref_squeeze %808 : memref<1x32xf32, #tpu.memory_space<vmem>> -> memref<32xf32, #tpu.memory_space<vmem>>
    %810 = tpu.memref_slice %arg10[%716] : memref<8x!tpu.dma_semaphore, #tpu.memory_space<semaphore_mem>> -> memref<1x!tpu.dma_semaphore, #tpu.memory_space<semaphore_mem>>
    %811 = tpu.memref_squeeze %810 : memref<1x!tpu.dma_semaphore, #tpu.memory_space<semaphore_mem>> -> memref<!tpu.dma_semaphore, #tpu.memory_space<semaphore_mem>>
    tpu.wait_dma2 semaphore(%811 : memref<!tpu.dma_semaphore, #tpu.memory_space<semaphore_mem>>) src(%807 : memref<32xf32, #tpu.memory_space<any>>) dst(%809 : memref<32xf32, #tpu.memory_space<vmem>>)
    %c8_i32_379 = arith.constant 8 : i32
    %812 = arith.muli %716, %c8_i32_379 : i32
    %c2_i32_380 = arith.constant 2 : i32
    %813 = arith.addi %812, %c2_i32_380 : i32
    %c0_i32_381 = arith.constant 0 : i32
    %814 = tpu.memref_slice %arg2[%728, %c0_i32_381] : memref<512x32xf32, #tpu.memory_space<any>> -> memref<1x32xf32, #tpu.memory_space<any>>
    %815 = tpu.memref_squeeze %814 : memref<1x32xf32, #tpu.memory_space<any>> -> memref<32xf32, #tpu.memory_space<any>>
    %c0_i32_382 = arith.constant 0 : i32
    %816 = tpu.memref_slice %arg9[%813, %c0_i32_382] : memref<64x32xf32, #tpu.memory_space<vmem>> -> memref<1x32xf32, #tpu.memory_space<vmem>>
    %817 = tpu.memref_squeeze %816 : memref<1x32xf32, #tpu.memory_space<vmem>> -> memref<32xf32, #tpu.memory_space<vmem>>
    %818 = tpu.memref_slice %arg10[%716] : memref<8x!tpu.dma_semaphore, #tpu.memory_space<semaphore_mem>> -> memref<1x!tpu.dma_semaphore, #tpu.memory_space<semaphore_mem>>
    %819 = tpu.memref_squeeze %818 : memref<1x!tpu.dma_semaphore, #tpu.memory_space<semaphore_mem>> -> memref<!tpu.dma_semaphore, #tpu.memory_space<semaphore_mem>>
    tpu.wait_dma2 semaphore(%819 : memref<!tpu.dma_semaphore, #tpu.memory_space<semaphore_mem>>) src(%815 : memref<32xf32, #tpu.memory_space<any>>) dst(%817 : memref<32xf32, #tpu.memory_space<vmem>>)
    %c8_i32_383 = arith.constant 8 : i32
    %820 = arith.muli %716, %c8_i32_383 : i32
    %c3_i32_384 = arith.constant 3 : i32
    %821 = arith.addi %820, %c3_i32_384 : i32
    %c0_i32_385 = arith.constant 0 : i32
    %822 = tpu.memref_slice %arg2[%732, %c0_i32_385] : memref<512x32xf32, #tpu.memory_space<any>> -> memref<1x32xf32, #tpu.memory_space<any>>
    %823 = tpu.memref_squeeze %822 : memref<1x32xf32, #tpu.memory_space<any>> -> memref<32xf32, #tpu.memory_space<any>>
    %c0_i32_386 = arith.constant 0 : i32
    %824 = tpu.memref_slice %arg9[%821, %c0_i32_386] : memref<64x32xf32, #tpu.memory_space<vmem>> -> memref<1x32xf32, #tpu.memory_space<vmem>>
    %825 = tpu.memref_squeeze %824 : memref<1x32xf32, #tpu.memory_space<vmem>> -> memref<32xf32, #tpu.memory_space<vmem>>
    %826 = tpu.memref_slice %arg10[%716] : memref<8x!tpu.dma_semaphore, #tpu.memory_space<semaphore_mem>> -> memref<1x!tpu.dma_semaphore, #tpu.memory_space<semaphore_mem>>
    %827 = tpu.memref_squeeze %826 : memref<1x!tpu.dma_semaphore, #tpu.memory_space<semaphore_mem>> -> memref<!tpu.dma_semaphore, #tpu.memory_space<semaphore_mem>>
    tpu.wait_dma2 semaphore(%827 : memref<!tpu.dma_semaphore, #tpu.memory_space<semaphore_mem>>) src(%823 : memref<32xf32, #tpu.memory_space<any>>) dst(%825 : memref<32xf32, #tpu.memory_space<vmem>>)
    %c8_i32_387 = arith.constant 8 : i32
    %828 = arith.muli %716, %c8_i32_387 : i32
    %c4_i32_388 = arith.constant 4 : i32
    %829 = arith.addi %828, %c4_i32_388 : i32
    %c0_i32_389 = arith.constant 0 : i32
    %830 = tpu.memref_slice %arg2[%736, %c0_i32_389] : memref<512x32xf32, #tpu.memory_space<any>> -> memref<1x32xf32, #tpu.memory_space<any>>
    %831 = tpu.memref_squeeze %830 : memref<1x32xf32, #tpu.memory_space<any>> -> memref<32xf32, #tpu.memory_space<any>>
    %c0_i32_390 = arith.constant 0 : i32
    %832 = tpu.memref_slice %arg9[%829, %c0_i32_390] : memref<64x32xf32, #tpu.memory_space<vmem>> -> memref<1x32xf32, #tpu.memory_space<vmem>>
    %833 = tpu.memref_squeeze %832 : memref<1x32xf32, #tpu.memory_space<vmem>> -> memref<32xf32, #tpu.memory_space<vmem>>
    %834 = tpu.memref_slice %arg10[%716] : memref<8x!tpu.dma_semaphore, #tpu.memory_space<semaphore_mem>> -> memref<1x!tpu.dma_semaphore, #tpu.memory_space<semaphore_mem>>
    %835 = tpu.memref_squeeze %834 : memref<1x!tpu.dma_semaphore, #tpu.memory_space<semaphore_mem>> -> memref<!tpu.dma_semaphore, #tpu.memory_space<semaphore_mem>>
    tpu.wait_dma2 semaphore(%835 : memref<!tpu.dma_semaphore, #tpu.memory_space<semaphore_mem>>) src(%831 : memref<32xf32, #tpu.memory_space<any>>) dst(%833 : memref<32xf32, #tpu.memory_space<vmem>>)
    %c8_i32_391 = arith.constant 8 : i32
    %836 = arith.muli %716, %c8_i32_391 : i32
    %c5_i32_392 = arith.constant 5 : i32
    %837 = arith.addi %836, %c5_i32_392 : i32
    %c0_i32_393 = arith.constant 0 : i32
    %838 = tpu.memref_slice %arg2[%740, %c0_i32_393] : memref<512x32xf32, #tpu.memory_space<any>> -> memref<1x32xf32, #tpu.memory_space<any>>
    %839 = tpu.memref_squeeze %838 : memref<1x32xf32, #tpu.memory_space<any>> -> memref<32xf32, #tpu.memory_space<any>>
    %c0_i32_394 = arith.constant 0 : i32
    %840 = tpu.memref_slice %arg9[%837, %c0_i32_394] : memref<64x32xf32, #tpu.memory_space<vmem>> -> memref<1x32xf32, #tpu.memory_space<vmem>>
    %841 = tpu.memref_squeeze %840 : memref<1x32xf32, #tpu.memory_space<vmem>> -> memref<32xf32, #tpu.memory_space<vmem>>
    %842 = tpu.memref_slice %arg10[%716] : memref<8x!tpu.dma_semaphore, #tpu.memory_space<semaphore_mem>> -> memref<1x!tpu.dma_semaphore, #tpu.memory_space<semaphore_mem>>
    %843 = tpu.memref_squeeze %842 : memref<1x!tpu.dma_semaphore, #tpu.memory_space<semaphore_mem>> -> memref<!tpu.dma_semaphore, #tpu.memory_space<semaphore_mem>>
    tpu.wait_dma2 semaphore(%843 : memref<!tpu.dma_semaphore, #tpu.memory_space<semaphore_mem>>) src(%839 : memref<32xf32, #tpu.memory_space<any>>) dst(%841 : memref<32xf32, #tpu.memory_space<vmem>>)
    %c8_i32_395 = arith.constant 8 : i32
    %844 = arith.muli %716, %c8_i32_395 : i32
    %c6_i32_396 = arith.constant 6 : i32
    %845 = arith.addi %844, %c6_i32_396 : i32
    %c0_i32_397 = arith.constant 0 : i32
    %846 = tpu.memref_slice %arg2[%744, %c0_i32_397] : memref<512x32xf32, #tpu.memory_space<any>> -> memref<1x32xf32, #tpu.memory_space<any>>
    %847 = tpu.memref_squeeze %846 : memref<1x32xf32, #tpu.memory_space<any>> -> memref<32xf32, #tpu.memory_space<any>>
    %c0_i32_398 = arith.constant 0 : i32
    %848 = tpu.memref_slice %arg9[%845, %c0_i32_398] : memref<64x32xf32, #tpu.memory_space<vmem>> -> memref<1x32xf32, #tpu.memory_space<vmem>>
    %849 = tpu.memref_squeeze %848 : memref<1x32xf32, #tpu.memory_space<vmem>> -> memref<32xf32, #tpu.memory_space<vmem>>
    %850 = tpu.memref_slice %arg10[%716] : memref<8x!tpu.dma_semaphore, #tpu.memory_space<semaphore_mem>> -> memref<1x!tpu.dma_semaphore, #tpu.memory_space<semaphore_mem>>
    %851 = tpu.memref_squeeze %850 : memref<1x!tpu.dma_semaphore, #tpu.memory_space<semaphore_mem>> -> memref<!tpu.dma_semaphore, #tpu.memory_space<semaphore_mem>>
    tpu.wait_dma2 semaphore(%851 : memref<!tpu.dma_semaphore, #tpu.memory_space<semaphore_mem>>) src(%847 : memref<32xf32, #tpu.memory_space<any>>) dst(%849 : memref<32xf32, #tpu.memory_space<vmem>>)
    %c8_i32_399 = arith.constant 8 : i32
    %852 = arith.muli %716, %c8_i32_399 : i32
    %c7_i32_400 = arith.constant 7 : i32
    %853 = arith.addi %852, %c7_i32_400 : i32
    %c0_i32_401 = arith.constant 0 : i32
    %854 = tpu.memref_slice %arg2[%748, %c0_i32_401] : memref<512x32xf32, #tpu.memory_space<any>> -> memref<1x32xf32, #tpu.memory_space<any>>
    %855 = tpu.memref_squeeze %854 : memref<1x32xf32, #tpu.memory_space<any>> -> memref<32xf32, #tpu.memory_space<any>>
    %c0_i32_402 = arith.constant 0 : i32
    %856 = tpu.memref_slice %arg9[%853, %c0_i32_402] : memref<64x32xf32, #tpu.memory_space<vmem>> -> memref<1x32xf32, #tpu.memory_space<vmem>>
    %857 = tpu.memref_squeeze %856 : memref<1x32xf32, #tpu.memory_space<vmem>> -> memref<32xf32, #tpu.memory_space<vmem>>
    %858 = tpu.memref_slice %arg10[%716] : memref<8x!tpu.dma_semaphore, #tpu.memory_space<semaphore_mem>> -> memref<1x!tpu.dma_semaphore, #tpu.memory_space<semaphore_mem>>
    %859 = tpu.memref_squeeze %858 : memref<1x!tpu.dma_semaphore, #tpu.memory_space<semaphore_mem>> -> memref<!tpu.dma_semaphore, #tpu.memory_space<semaphore_mem>>
    tpu.wait_dma2 semaphore(%859 : memref<!tpu.dma_semaphore, #tpu.memory_space<semaphore_mem>>) src(%855 : memref<32xf32, #tpu.memory_space<any>>) dst(%857 : memref<32xf32, #tpu.memory_space<vmem>>)
    %c8_i32_403 = arith.constant 8 : i32
    %860 = arith.muli %716, %c8_i32_403 : i32
    %861 = tpu.assume_multiple %860, 8 : i32
    %862 = arith.index_cast %861 : i32 to index
    %c0_404 = arith.constant 0 : index
    %863 = vector.load %arg9[%862, %c0_404] : memref<64x32xf32, #tpu.memory_space<vmem>>, vector<8x32xf32>
    %864 = arith.addf %714, %863 : vector<8x32xf32>
    %c2_i32_405 = arith.constant 2 : i32
    %865 = arith.addi %563, %c2_i32_405 : i32
    %c7_i32_406 = arith.constant 7 : i32
    %866 = arith.andi %865, %c7_i32_406 : i32
    %c0_i32_407 = arith.constant 0 : i32
    %867 = arith.addi %562, %c0_i32_407 : i32
    %868 = arith.addi %867, %c2_i32_405 : i32
    %869 = arith.index_cast %868 : i32 to index
    %870 = memref.load %arg1[%869] : memref<64xi32, #tpu.memory_space<smem>>
    %c8_i32_408 = arith.constant 8 : i32
    %871 = arith.addi %562, %c8_i32_408 : i32
    %872 = arith.addi %871, %c2_i32_405 : i32
    %873 = arith.index_cast %872 : i32 to index
    %874 = memref.load %arg1[%873] : memref<64xi32, #tpu.memory_space<smem>>
    %c16_i32_409 = arith.constant 16 : i32
    %875 = arith.addi %562, %c16_i32_409 : i32
    %876 = arith.addi %875, %c2_i32_405 : i32
    %877 = arith.index_cast %876 : i32 to index
    %878 = memref.load %arg1[%877] : memref<64xi32, #tpu.memory_space<smem>>
    %c24_i32_410 = arith.constant 24 : i32
    %879 = arith.addi %562, %c24_i32_410 : i32
    %880 = arith.addi %879, %c2_i32_405 : i32
    %881 = arith.index_cast %880 : i32 to index
    %882 = memref.load %arg1[%881] : memref<64xi32, #tpu.memory_space<smem>>
    %c32_i32_411 = arith.constant 32 : i32
    %883 = arith.addi %562, %c32_i32_411 : i32
    %884 = arith.addi %883, %c2_i32_405 : i32
    %885 = arith.index_cast %884 : i32 to index
    %886 = memref.load %arg1[%885] : memref<64xi32, #tpu.memory_space<smem>>
    %c40_i32_412 = arith.constant 40 : i32
    %887 = arith.addi %562, %c40_i32_412 : i32
    %888 = arith.addi %887, %c2_i32_405 : i32
    %889 = arith.index_cast %888 : i32 to index
    %890 = memref.load %arg1[%889] : memref<64xi32, #tpu.memory_space<smem>>
    %c48_i32_413 = arith.constant 48 : i32
    %891 = arith.addi %562, %c48_i32_413 : i32
    %892 = arith.addi %891, %c2_i32_405 : i32
    %893 = arith.index_cast %892 : i32 to index
    %894 = memref.load %arg1[%893] : memref<64xi32, #tpu.memory_space<smem>>
    %c56_i32_414 = arith.constant 56 : i32
    %895 = arith.addi %562, %c56_i32_414 : i32
    %896 = arith.addi %895, %c2_i32_405 : i32
    %897 = arith.index_cast %896 : i32 to index
    %898 = memref.load %arg1[%897] : memref<64xi32, #tpu.memory_space<smem>>
    %c7_i32_415 = arith.constant 7 : i32
    %899 = arith.addi %c2_i32_405, %c7_i32_415 : i32
    %c8_i32_416 = arith.constant 8 : i32
    %900 = arith.cmpi sge, %899, %c8_i32_416 : i32
    %c8_i32_417 = arith.constant 8 : i32
    %901 = arith.subi %899, %c8_i32_417 : i32
    %902 = arith.select %900, %901, %899 : i32
    %903 = arith.extui %900 : i1 to i32
    %904 = arith.addi %c0_i32_279, %903 : i32
    %c0_i32_418 = arith.constant 0 : i32
    %905 = arith.minsi %904, %c0_i32_418 : i32
    %c64_i32_419 = arith.constant 64 : i32
    %906 = arith.muli %905, %c64_i32_419 : i32
    %907 = arith.addi %0, %906 : i32
    %c0_i32_420 = arith.constant 0 : i32
    %908 = arith.addi %907, %c0_i32_420 : i32
    %909 = arith.addi %908, %902 : i32
    %910 = arith.index_cast %909 : i32 to index
    %911 = memref.load %arg1[%910] : memref<64xi32, #tpu.memory_space<smem>>
    %c8_i32_421 = arith.constant 8 : i32
    %912 = arith.addi %907, %c8_i32_421 : i32
    %913 = arith.addi %912, %902 : i32
    %914 = arith.index_cast %913 : i32 to index
    %915 = memref.load %arg1[%914] : memref<64xi32, #tpu.memory_space<smem>>
    %c16_i32_422 = arith.constant 16 : i32
    %916 = arith.addi %907, %c16_i32_422 : i32
    %917 = arith.addi %916, %902 : i32
    %918 = arith.index_cast %917 : i32 to index
    %919 = memref.load %arg1[%918] : memref<64xi32, #tpu.memory_space<smem>>
    %c24_i32_423 = arith.constant 24 : i32
    %920 = arith.addi %907, %c24_i32_423 : i32
    %921 = arith.addi %920, %902 : i32
    %922 = arith.index_cast %921 : i32 to index
    %923 = memref.load %arg1[%922] : memref<64xi32, #tpu.memory_space<smem>>
    %c32_i32_424 = arith.constant 32 : i32
    %924 = arith.addi %907, %c32_i32_424 : i32
    %925 = arith.addi %924, %902 : i32
    %926 = arith.index_cast %925 : i32 to index
    %927 = memref.load %arg1[%926] : memref<64xi32, #tpu.memory_space<smem>>
    %c40_i32_425 = arith.constant 40 : i32
    %928 = arith.addi %907, %c40_i32_425 : i32
    %929 = arith.addi %928, %902 : i32
    %930 = arith.index_cast %929 : i32 to index
    %931 = memref.load %arg1[%930] : memref<64xi32, #tpu.memory_space<smem>>
    %c48_i32_426 = arith.constant 48 : i32
    %932 = arith.addi %907, %c48_i32_426 : i32
    %933 = arith.addi %932, %902 : i32
    %934 = arith.index_cast %933 : i32 to index
    %935 = memref.load %arg1[%934] : memref<64xi32, #tpu.memory_space<smem>>
    %c56_i32_427 = arith.constant 56 : i32
    %936 = arith.addi %907, %c56_i32_427 : i32
    %937 = arith.addi %936, %902 : i32
    %938 = arith.index_cast %937 : i32 to index
    %939 = memref.load %arg1[%938] : memref<64xi32, #tpu.memory_space<smem>>
    %c7_i32_428 = arith.constant 7 : i32
    %940 = arith.addi %865, %c7_i32_428 : i32
    %c7_i32_429 = arith.constant 7 : i32
    %941 = arith.andi %940, %c7_i32_429 : i32
    %c7_i32_430 = arith.constant 7 : i32
    %942 = arith.addi %865, %c7_i32_430 : i32
    %c8_i32_431 = arith.constant 8 : i32
    %943 = arith.cmpi slt, %942, %c8_i32_431 : i32
    %944 = arith.extui %943 : i1 to i32
    %c0_i32_432 = arith.constant 0 : i32
    %945 = arith.cmpi ne, %944, %c0_i32_432 : i32
    scf.if %945 {
      %c8_i32_796 = arith.constant 8 : i32
      %1783 = arith.muli %941, %c8_i32_796 : i32
      %c0_i32_797 = arith.constant 0 : i32
      %1784 = arith.addi %1783, %c0_i32_797 : i32
      %c0_i32_798 = arith.constant 0 : i32
      %1785 = tpu.memref_slice %arg2[%911, %c0_i32_798] : memref<512x32xf32, #tpu.memory_space<any>> -> memref<1x32xf32, #tpu.memory_space<any>>
      %1786 = tpu.memref_squeeze %1785 : memref<1x32xf32, #tpu.memory_space<any>> -> memref<32xf32, #tpu.memory_space<any>>
      %c0_i32_799 = arith.constant 0 : i32
      %1787 = tpu.memref_slice %arg9[%1784, %c0_i32_799] : memref<64x32xf32, #tpu.memory_space<vmem>> -> memref<1x32xf32, #tpu.memory_space<vmem>>
      %1788 = tpu.memref_squeeze %1787 : memref<1x32xf32, #tpu.memory_space<vmem>> -> memref<32xf32, #tpu.memory_space<vmem>>
      %1789 = tpu.memref_slice %arg10[%941] : memref<8x!tpu.dma_semaphore, #tpu.memory_space<semaphore_mem>> -> memref<1x!tpu.dma_semaphore, #tpu.memory_space<semaphore_mem>>
      %1790 = tpu.memref_squeeze %1789 : memref<1x!tpu.dma_semaphore, #tpu.memory_space<semaphore_mem>> -> memref<!tpu.dma_semaphore, #tpu.memory_space<semaphore_mem>>
      tpu.enqueue_dma source(%1786 : memref<32xf32, #tpu.memory_space<any>>) target(%1788 : memref<32xf32, #tpu.memory_space<vmem>>) target_semaphore(%1790 : memref<!tpu.dma_semaphore, #tpu.memory_space<semaphore_mem>>)
      %c8_i32_800 = arith.constant 8 : i32
      %1791 = arith.muli %941, %c8_i32_800 : i32
      %c1_i32_801 = arith.constant 1 : i32
      %1792 = arith.addi %1791, %c1_i32_801 : i32
      %c0_i32_802 = arith.constant 0 : i32
      %1793 = tpu.memref_slice %arg2[%915, %c0_i32_802] : memref<512x32xf32, #tpu.memory_space<any>> -> memref<1x32xf32, #tpu.memory_space<any>>
      %1794 = tpu.memref_squeeze %1793 : memref<1x32xf32, #tpu.memory_space<any>> -> memref<32xf32, #tpu.memory_space<any>>
      %c0_i32_803 = arith.constant 0 : i32
      %1795 = tpu.memref_slice %arg9[%1792, %c0_i32_803] : memref<64x32xf32, #tpu.memory_space<vmem>> -> memref<1x32xf32, #tpu.memory_space<vmem>>
      %1796 = tpu.memref_squeeze %1795 : memref<1x32xf32, #tpu.memory_space<vmem>> -> memref<32xf32, #tpu.memory_space<vmem>>
      %1797 = tpu.memref_slice %arg10[%941] : memref<8x!tpu.dma_semaphore, #tpu.memory_space<semaphore_mem>> -> memref<1x!tpu.dma_semaphore, #tpu.memory_space<semaphore_mem>>
      %1798 = tpu.memref_squeeze %1797 : memref<1x!tpu.dma_semaphore, #tpu.memory_space<semaphore_mem>> -> memref<!tpu.dma_semaphore, #tpu.memory_space<semaphore_mem>>
      tpu.enqueue_dma source(%1794 : memref<32xf32, #tpu.memory_space<any>>) target(%1796 : memref<32xf32, #tpu.memory_space<vmem>>) target_semaphore(%1798 : memref<!tpu.dma_semaphore, #tpu.memory_space<semaphore_mem>>)
      %c8_i32_804 = arith.constant 8 : i32
      %1799 = arith.muli %941, %c8_i32_804 : i32
      %c2_i32_805 = arith.constant 2 : i32
      %1800 = arith.addi %1799, %c2_i32_805 : i32
      %c0_i32_806 = arith.constant 0 : i32
      %1801 = tpu.memref_slice %arg2[%919, %c0_i32_806] : memref<512x32xf32, #tpu.memory_space<any>> -> memref<1x32xf32, #tpu.memory_space<any>>
      %1802 = tpu.memref_squeeze %1801 : memref<1x32xf32, #tpu.memory_space<any>> -> memref<32xf32, #tpu.memory_space<any>>
      %c0_i32_807 = arith.constant 0 : i32
      %1803 = tpu.memref_slice %arg9[%1800, %c0_i32_807] : memref<64x32xf32, #tpu.memory_space<vmem>> -> memref<1x32xf32, #tpu.memory_space<vmem>>
      %1804 = tpu.memref_squeeze %1803 : memref<1x32xf32, #tpu.memory_space<vmem>> -> memref<32xf32, #tpu.memory_space<vmem>>
      %1805 = tpu.memref_slice %arg10[%941] : memref<8x!tpu.dma_semaphore, #tpu.memory_space<semaphore_mem>> -> memref<1x!tpu.dma_semaphore, #tpu.memory_space<semaphore_mem>>
      %1806 = tpu.memref_squeeze %1805 : memref<1x!tpu.dma_semaphore, #tpu.memory_space<semaphore_mem>> -> memref<!tpu.dma_semaphore, #tpu.memory_space<semaphore_mem>>
      tpu.enqueue_dma source(%1802 : memref<32xf32, #tpu.memory_space<any>>) target(%1804 : memref<32xf32, #tpu.memory_space<vmem>>) target_semaphore(%1806 : memref<!tpu.dma_semaphore, #tpu.memory_space<semaphore_mem>>)
      %c8_i32_808 = arith.constant 8 : i32
      %1807 = arith.muli %941, %c8_i32_808 : i32
      %c3_i32_809 = arith.constant 3 : i32
      %1808 = arith.addi %1807, %c3_i32_809 : i32
      %c0_i32_810 = arith.constant 0 : i32
      %1809 = tpu.memref_slice %arg2[%923, %c0_i32_810] : memref<512x32xf32, #tpu.memory_space<any>> -> memref<1x32xf32, #tpu.memory_space<any>>
      %1810 = tpu.memref_squeeze %1809 : memref<1x32xf32, #tpu.memory_space<any>> -> memref<32xf32, #tpu.memory_space<any>>
      %c0_i32_811 = arith.constant 0 : i32
      %1811 = tpu.memref_slice %arg9[%1808, %c0_i32_811] : memref<64x32xf32, #tpu.memory_space<vmem>> -> memref<1x32xf32, #tpu.memory_space<vmem>>
      %1812 = tpu.memref_squeeze %1811 : memref<1x32xf32, #tpu.memory_space<vmem>> -> memref<32xf32, #tpu.memory_space<vmem>>
      %1813 = tpu.memref_slice %arg10[%941] : memref<8x!tpu.dma_semaphore, #tpu.memory_space<semaphore_mem>> -> memref<1x!tpu.dma_semaphore, #tpu.memory_space<semaphore_mem>>
      %1814 = tpu.memref_squeeze %1813 : memref<1x!tpu.dma_semaphore, #tpu.memory_space<semaphore_mem>> -> memref<!tpu.dma_semaphore, #tpu.memory_space<semaphore_mem>>
      tpu.enqueue_dma source(%1810 : memref<32xf32, #tpu.memory_space<any>>) target(%1812 : memref<32xf32, #tpu.memory_space<vmem>>) target_semaphore(%1814 : memref<!tpu.dma_semaphore, #tpu.memory_space<semaphore_mem>>)
      %c8_i32_812 = arith.constant 8 : i32
      %1815 = arith.muli %941, %c8_i32_812 : i32
      %c4_i32_813 = arith.constant 4 : i32
      %1816 = arith.addi %1815, %c4_i32_813 : i32
      %c0_i32_814 = arith.constant 0 : i32
      %1817 = tpu.memref_slice %arg2[%927, %c0_i32_814] : memref<512x32xf32, #tpu.memory_space<any>> -> memref<1x32xf32, #tpu.memory_space<any>>
      %1818 = tpu.memref_squeeze %1817 : memref<1x32xf32, #tpu.memory_space<any>> -> memref<32xf32, #tpu.memory_space<any>>
      %c0_i32_815 = arith.constant 0 : i32
      %1819 = tpu.memref_slice %arg9[%1816, %c0_i32_815] : memref<64x32xf32, #tpu.memory_space<vmem>> -> memref<1x32xf32, #tpu.memory_space<vmem>>
      %1820 = tpu.memref_squeeze %1819 : memref<1x32xf32, #tpu.memory_space<vmem>> -> memref<32xf32, #tpu.memory_space<vmem>>
      %1821 = tpu.memref_slice %arg10[%941] : memref<8x!tpu.dma_semaphore, #tpu.memory_space<semaphore_mem>> -> memref<1x!tpu.dma_semaphore, #tpu.memory_space<semaphore_mem>>
      %1822 = tpu.memref_squeeze %1821 : memref<1x!tpu.dma_semaphore, #tpu.memory_space<semaphore_mem>> -> memref<!tpu.dma_semaphore, #tpu.memory_space<semaphore_mem>>
      tpu.enqueue_dma source(%1818 : memref<32xf32, #tpu.memory_space<any>>) target(%1820 : memref<32xf32, #tpu.memory_space<vmem>>) target_semaphore(%1822 : memref<!tpu.dma_semaphore, #tpu.memory_space<semaphore_mem>>)
      %c8_i32_816 = arith.constant 8 : i32
      %1823 = arith.muli %941, %c8_i32_816 : i32
      %c5_i32_817 = arith.constant 5 : i32
      %1824 = arith.addi %1823, %c5_i32_817 : i32
      %c0_i32_818 = arith.constant 0 : i32
      %1825 = tpu.memref_slice %arg2[%931, %c0_i32_818] : memref<512x32xf32, #tpu.memory_space<any>> -> memref<1x32xf32, #tpu.memory_space<any>>
      %1826 = tpu.memref_squeeze %1825 : memref<1x32xf32, #tpu.memory_space<any>> -> memref<32xf32, #tpu.memory_space<any>>
      %c0_i32_819 = arith.constant 0 : i32
      %1827 = tpu.memref_slice %arg9[%1824, %c0_i32_819] : memref<64x32xf32, #tpu.memory_space<vmem>> -> memref<1x32xf32, #tpu.memory_space<vmem>>
      %1828 = tpu.memref_squeeze %1827 : memref<1x32xf32, #tpu.memory_space<vmem>> -> memref<32xf32, #tpu.memory_space<vmem>>
      %1829 = tpu.memref_slice %arg10[%941] : memref<8x!tpu.dma_semaphore, #tpu.memory_space<semaphore_mem>> -> memref<1x!tpu.dma_semaphore, #tpu.memory_space<semaphore_mem>>
      %1830 = tpu.memref_squeeze %1829 : memref<1x!tpu.dma_semaphore, #tpu.memory_space<semaphore_mem>> -> memref<!tpu.dma_semaphore, #tpu.memory_space<semaphore_mem>>
      tpu.enqueue_dma source(%1826 : memref<32xf32, #tpu.memory_space<any>>) target(%1828 : memref<32xf32, #tpu.memory_space<vmem>>) target_semaphore(%1830 : memref<!tpu.dma_semaphore, #tpu.memory_space<semaphore_mem>>)
      %c8_i32_820 = arith.constant 8 : i32
      %1831 = arith.muli %941, %c8_i32_820 : i32
      %c6_i32_821 = arith.constant 6 : i32
      %1832 = arith.addi %1831, %c6_i32_821 : i32
      %c0_i32_822 = arith.constant 0 : i32
      %1833 = tpu.memref_slice %arg2[%935, %c0_i32_822] : memref<512x32xf32, #tpu.memory_space<any>> -> memref<1x32xf32, #tpu.memory_space<any>>
      %1834 = tpu.memref_squeeze %1833 : memref<1x32xf32, #tpu.memory_space<any>> -> memref<32xf32, #tpu.memory_space<any>>
      %c0_i32_823 = arith.constant 0 : i32
      %1835 = tpu.memref_slice %arg9[%1832, %c0_i32_823] : memref<64x32xf32, #tpu.memory_space<vmem>> -> memref<1x32xf32, #tpu.memory_space<vmem>>
      %1836 = tpu.memref_squeeze %1835 : memref<1x32xf32, #tpu.memory_space<vmem>> -> memref<32xf32, #tpu.memory_space<vmem>>
      %1837 = tpu.memref_slice %arg10[%941] : memref<8x!tpu.dma_semaphore, #tpu.memory_space<semaphore_mem>> -> memref<1x!tpu.dma_semaphore, #tpu.memory_space<semaphore_mem>>
      %1838 = tpu.memref_squeeze %1837 : memref<1x!tpu.dma_semaphore, #tpu.memory_space<semaphore_mem>> -> memref<!tpu.dma_semaphore, #tpu.memory_space<semaphore_mem>>
      tpu.enqueue_dma source(%1834 : memref<32xf32, #tpu.memory_space<any>>) target(%1836 : memref<32xf32, #tpu.memory_space<vmem>>) target_semaphore(%1838 : memref<!tpu.dma_semaphore, #tpu.memory_space<semaphore_mem>>)
      %c8_i32_824 = arith.constant 8 : i32
      %1839 = arith.muli %941, %c8_i32_824 : i32
      %c7_i32_825 = arith.constant 7 : i32
      %1840 = arith.addi %1839, %c7_i32_825 : i32
      %c0_i32_826 = arith.constant 0 : i32
      %1841 = tpu.memref_slice %arg2[%939, %c0_i32_826] : memref<512x32xf32, #tpu.memory_space<any>> -> memref<1x32xf32, #tpu.memory_space<any>>
      %1842 = tpu.memref_squeeze %1841 : memref<1x32xf32, #tpu.memory_space<any>> -> memref<32xf32, #tpu.memory_space<any>>
      %c0_i32_827 = arith.constant 0 : i32
      %1843 = tpu.memref_slice %arg9[%1840, %c0_i32_827] : memref<64x32xf32, #tpu.memory_space<vmem>> -> memref<1x32xf32, #tpu.memory_space<vmem>>
      %1844 = tpu.memref_squeeze %1843 : memref<1x32xf32, #tpu.memory_space<vmem>> -> memref<32xf32, #tpu.memory_space<vmem>>
      %1845 = tpu.memref_slice %arg10[%941] : memref<8x!tpu.dma_semaphore, #tpu.memory_space<semaphore_mem>> -> memref<1x!tpu.dma_semaphore, #tpu.memory_space<semaphore_mem>>
      %1846 = tpu.memref_squeeze %1845 : memref<1x!tpu.dma_semaphore, #tpu.memory_space<semaphore_mem>> -> memref<!tpu.dma_semaphore, #tpu.memory_space<semaphore_mem>>
      tpu.enqueue_dma source(%1842 : memref<32xf32, #tpu.memory_space<any>>) target(%1844 : memref<32xf32, #tpu.memory_space<vmem>>) target_semaphore(%1846 : memref<!tpu.dma_semaphore, #tpu.memory_space<semaphore_mem>>)
    } else {
    }
    %c8_i32_433 = arith.constant 8 : i32
    %946 = arith.muli %866, %c8_i32_433 : i32
    %c0_i32_434 = arith.constant 0 : i32
    %947 = arith.addi %946, %c0_i32_434 : i32
    %c0_i32_435 = arith.constant 0 : i32
    %948 = tpu.memref_slice %arg2[%870, %c0_i32_435] : memref<512x32xf32, #tpu.memory_space<any>> -> memref<1x32xf32, #tpu.memory_space<any>>
    %949 = tpu.memref_squeeze %948 : memref<1x32xf32, #tpu.memory_space<any>> -> memref<32xf32, #tpu.memory_space<any>>
    %c0_i32_436 = arith.constant 0 : i32
    %950 = tpu.memref_slice %arg9[%947, %c0_i32_436] : memref<64x32xf32, #tpu.memory_space<vmem>> -> memref<1x32xf32, #tpu.memory_space<vmem>>
    %951 = tpu.memref_squeeze %950 : memref<1x32xf32, #tpu.memory_space<vmem>> -> memref<32xf32, #tpu.memory_space<vmem>>
    %952 = tpu.memref_slice %arg10[%866] : memref<8x!tpu.dma_semaphore, #tpu.memory_space<semaphore_mem>> -> memref<1x!tpu.dma_semaphore, #tpu.memory_space<semaphore_mem>>
    %953 = tpu.memref_squeeze %952 : memref<1x!tpu.dma_semaphore, #tpu.memory_space<semaphore_mem>> -> memref<!tpu.dma_semaphore, #tpu.memory_space<semaphore_mem>>
    tpu.wait_dma2 semaphore(%953 : memref<!tpu.dma_semaphore, #tpu.memory_space<semaphore_mem>>) src(%949 : memref<32xf32, #tpu.memory_space<any>>) dst(%951 : memref<32xf32, #tpu.memory_space<vmem>>)
    %c8_i32_437 = arith.constant 8 : i32
    %954 = arith.muli %866, %c8_i32_437 : i32
    %c1_i32_438 = arith.constant 1 : i32
    %955 = arith.addi %954, %c1_i32_438 : i32
    %c0_i32_439 = arith.constant 0 : i32
    %956 = tpu.memref_slice %arg2[%874, %c0_i32_439] : memref<512x32xf32, #tpu.memory_space<any>> -> memref<1x32xf32, #tpu.memory_space<any>>
    %957 = tpu.memref_squeeze %956 : memref<1x32xf32, #tpu.memory_space<any>> -> memref<32xf32, #tpu.memory_space<any>>
    %c0_i32_440 = arith.constant 0 : i32
    %958 = tpu.memref_slice %arg9[%955, %c0_i32_440] : memref<64x32xf32, #tpu.memory_space<vmem>> -> memref<1x32xf32, #tpu.memory_space<vmem>>
    %959 = tpu.memref_squeeze %958 : memref<1x32xf32, #tpu.memory_space<vmem>> -> memref<32xf32, #tpu.memory_space<vmem>>
    %960 = tpu.memref_slice %arg10[%866] : memref<8x!tpu.dma_semaphore, #tpu.memory_space<semaphore_mem>> -> memref<1x!tpu.dma_semaphore, #tpu.memory_space<semaphore_mem>>
    %961 = tpu.memref_squeeze %960 : memref<1x!tpu.dma_semaphore, #tpu.memory_space<semaphore_mem>> -> memref<!tpu.dma_semaphore, #tpu.memory_space<semaphore_mem>>
    tpu.wait_dma2 semaphore(%961 : memref<!tpu.dma_semaphore, #tpu.memory_space<semaphore_mem>>) src(%957 : memref<32xf32, #tpu.memory_space<any>>) dst(%959 : memref<32xf32, #tpu.memory_space<vmem>>)
    %c8_i32_441 = arith.constant 8 : i32
    %962 = arith.muli %866, %c8_i32_441 : i32
    %c2_i32_442 = arith.constant 2 : i32
    %963 = arith.addi %962, %c2_i32_442 : i32
    %c0_i32_443 = arith.constant 0 : i32
    %964 = tpu.memref_slice %arg2[%878, %c0_i32_443] : memref<512x32xf32, #tpu.memory_space<any>> -> memref<1x32xf32, #tpu.memory_space<any>>
    %965 = tpu.memref_squeeze %964 : memref<1x32xf32, #tpu.memory_space<any>> -> memref<32xf32, #tpu.memory_space<any>>
    %c0_i32_444 = arith.constant 0 : i32
    %966 = tpu.memref_slice %arg9[%963, %c0_i32_444] : memref<64x32xf32, #tpu.memory_space<vmem>> -> memref<1x32xf32, #tpu.memory_space<vmem>>
    %967 = tpu.memref_squeeze %966 : memref<1x32xf32, #tpu.memory_space<vmem>> -> memref<32xf32, #tpu.memory_space<vmem>>
    %968 = tpu.memref_slice %arg10[%866] : memref<8x!tpu.dma_semaphore, #tpu.memory_space<semaphore_mem>> -> memref<1x!tpu.dma_semaphore, #tpu.memory_space<semaphore_mem>>
    %969 = tpu.memref_squeeze %968 : memref<1x!tpu.dma_semaphore, #tpu.memory_space<semaphore_mem>> -> memref<!tpu.dma_semaphore, #tpu.memory_space<semaphore_mem>>
    tpu.wait_dma2 semaphore(%969 : memref<!tpu.dma_semaphore, #tpu.memory_space<semaphore_mem>>) src(%965 : memref<32xf32, #tpu.memory_space<any>>) dst(%967 : memref<32xf32, #tpu.memory_space<vmem>>)
    %c8_i32_445 = arith.constant 8 : i32
    %970 = arith.muli %866, %c8_i32_445 : i32
    %c3_i32_446 = arith.constant 3 : i32
    %971 = arith.addi %970, %c3_i32_446 : i32
    %c0_i32_447 = arith.constant 0 : i32
    %972 = tpu.memref_slice %arg2[%882, %c0_i32_447] : memref<512x32xf32, #tpu.memory_space<any>> -> memref<1x32xf32, #tpu.memory_space<any>>
    %973 = tpu.memref_squeeze %972 : memref<1x32xf32, #tpu.memory_space<any>> -> memref<32xf32, #tpu.memory_space<any>>
    %c0_i32_448 = arith.constant 0 : i32
    %974 = tpu.memref_slice %arg9[%971, %c0_i32_448] : memref<64x32xf32, #tpu.memory_space<vmem>> -> memref<1x32xf32, #tpu.memory_space<vmem>>
    %975 = tpu.memref_squeeze %974 : memref<1x32xf32, #tpu.memory_space<vmem>> -> memref<32xf32, #tpu.memory_space<vmem>>
    %976 = tpu.memref_slice %arg10[%866] : memref<8x!tpu.dma_semaphore, #tpu.memory_space<semaphore_mem>> -> memref<1x!tpu.dma_semaphore, #tpu.memory_space<semaphore_mem>>
    %977 = tpu.memref_squeeze %976 : memref<1x!tpu.dma_semaphore, #tpu.memory_space<semaphore_mem>> -> memref<!tpu.dma_semaphore, #tpu.memory_space<semaphore_mem>>
    tpu.wait_dma2 semaphore(%977 : memref<!tpu.dma_semaphore, #tpu.memory_space<semaphore_mem>>) src(%973 : memref<32xf32, #tpu.memory_space<any>>) dst(%975 : memref<32xf32, #tpu.memory_space<vmem>>)
    %c8_i32_449 = arith.constant 8 : i32
    %978 = arith.muli %866, %c8_i32_449 : i32
    %c4_i32_450 = arith.constant 4 : i32
    %979 = arith.addi %978, %c4_i32_450 : i32
    %c0_i32_451 = arith.constant 0 : i32
    %980 = tpu.memref_slice %arg2[%886, %c0_i32_451] : memref<512x32xf32, #tpu.memory_space<any>> -> memref<1x32xf32, #tpu.memory_space<any>>
    %981 = tpu.memref_squeeze %980 : memref<1x32xf32, #tpu.memory_space<any>> -> memref<32xf32, #tpu.memory_space<any>>
    %c0_i32_452 = arith.constant 0 : i32
    %982 = tpu.memref_slice %arg9[%979, %c0_i32_452] : memref<64x32xf32, #tpu.memory_space<vmem>> -> memref<1x32xf32, #tpu.memory_space<vmem>>
    %983 = tpu.memref_squeeze %982 : memref<1x32xf32, #tpu.memory_space<vmem>> -> memref<32xf32, #tpu.memory_space<vmem>>
    %984 = tpu.memref_slice %arg10[%866] : memref<8x!tpu.dma_semaphore, #tpu.memory_space<semaphore_mem>> -> memref<1x!tpu.dma_semaphore, #tpu.memory_space<semaphore_mem>>
    %985 = tpu.memref_squeeze %984 : memref<1x!tpu.dma_semaphore, #tpu.memory_space<semaphore_mem>> -> memref<!tpu.dma_semaphore, #tpu.memory_space<semaphore_mem>>
    tpu.wait_dma2 semaphore(%985 : memref<!tpu.dma_semaphore, #tpu.memory_space<semaphore_mem>>) src(%981 : memref<32xf32, #tpu.memory_space<any>>) dst(%983 : memref<32xf32, #tpu.memory_space<vmem>>)
    %c8_i32_453 = arith.constant 8 : i32
    %986 = arith.muli %866, %c8_i32_453 : i32
    %c5_i32_454 = arith.constant 5 : i32
    %987 = arith.addi %986, %c5_i32_454 : i32
    %c0_i32_455 = arith.constant 0 : i32
    %988 = tpu.memref_slice %arg2[%890, %c0_i32_455] : memref<512x32xf32, #tpu.memory_space<any>> -> memref<1x32xf32, #tpu.memory_space<any>>
    %989 = tpu.memref_squeeze %988 : memref<1x32xf32, #tpu.memory_space<any>> -> memref<32xf32, #tpu.memory_space<any>>
    %c0_i32_456 = arith.constant 0 : i32
    %990 = tpu.memref_slice %arg9[%987, %c0_i32_456] : memref<64x32xf32, #tpu.memory_space<vmem>> -> memref<1x32xf32, #tpu.memory_space<vmem>>
    %991 = tpu.memref_squeeze %990 : memref<1x32xf32, #tpu.memory_space<vmem>> -> memref<32xf32, #tpu.memory_space<vmem>>
    %992 = tpu.memref_slice %arg10[%866] : memref<8x!tpu.dma_semaphore, #tpu.memory_space<semaphore_mem>> -> memref<1x!tpu.dma_semaphore, #tpu.memory_space<semaphore_mem>>
    %993 = tpu.memref_squeeze %992 : memref<1x!tpu.dma_semaphore, #tpu.memory_space<semaphore_mem>> -> memref<!tpu.dma_semaphore, #tpu.memory_space<semaphore_mem>>
    tpu.wait_dma2 semaphore(%993 : memref<!tpu.dma_semaphore, #tpu.memory_space<semaphore_mem>>) src(%989 : memref<32xf32, #tpu.memory_space<any>>) dst(%991 : memref<32xf32, #tpu.memory_space<vmem>>)
    %c8_i32_457 = arith.constant 8 : i32
    %994 = arith.muli %866, %c8_i32_457 : i32
    %c6_i32_458 = arith.constant 6 : i32
    %995 = arith.addi %994, %c6_i32_458 : i32
    %c0_i32_459 = arith.constant 0 : i32
    %996 = tpu.memref_slice %arg2[%894, %c0_i32_459] : memref<512x32xf32, #tpu.memory_space<any>> -> memref<1x32xf32, #tpu.memory_space<any>>
    %997 = tpu.memref_squeeze %996 : memref<1x32xf32, #tpu.memory_space<any>> -> memref<32xf32, #tpu.memory_space<any>>
    %c0_i32_460 = arith.constant 0 : i32
    %998 = tpu.memref_slice %arg9[%995, %c0_i32_460] : memref<64x32xf32, #tpu.memory_space<vmem>> -> memref<1x32xf32, #tpu.memory_space<vmem>>
    %999 = tpu.memref_squeeze %998 : memref<1x32xf32, #tpu.memory_space<vmem>> -> memref<32xf32, #tpu.memory_space<vmem>>
    %1000 = tpu.memref_slice %arg10[%866] : memref<8x!tpu.dma_semaphore, #tpu.memory_space<semaphore_mem>> -> memref<1x!tpu.dma_semaphore, #tpu.memory_space<semaphore_mem>>
    %1001 = tpu.memref_squeeze %1000 : memref<1x!tpu.dma_semaphore, #tpu.memory_space<semaphore_mem>> -> memref<!tpu.dma_semaphore, #tpu.memory_space<semaphore_mem>>
    tpu.wait_dma2 semaphore(%1001 : memref<!tpu.dma_semaphore, #tpu.memory_space<semaphore_mem>>) src(%997 : memref<32xf32, #tpu.memory_space<any>>) dst(%999 : memref<32xf32, #tpu.memory_space<vmem>>)
    %c8_i32_461 = arith.constant 8 : i32
    %1002 = arith.muli %866, %c8_i32_461 : i32
    %c7_i32_462 = arith.constant 7 : i32
    %1003 = arith.addi %1002, %c7_i32_462 : i32
    %c0_i32_463 = arith.constant 0 : i32
    %1004 = tpu.memref_slice %arg2[%898, %c0_i32_463] : memref<512x32xf32, #tpu.memory_space<any>> -> memref<1x32xf32, #tpu.memory_space<any>>
    %1005 = tpu.memref_squeeze %1004 : memref<1x32xf32, #tpu.memory_space<any>> -> memref<32xf32, #tpu.memory_space<any>>
    %c0_i32_464 = arith.constant 0 : i32
    %1006 = tpu.memref_slice %arg9[%1003, %c0_i32_464] : memref<64x32xf32, #tpu.memory_space<vmem>> -> memref<1x32xf32, #tpu.memory_space<vmem>>
    %1007 = tpu.memref_squeeze %1006 : memref<1x32xf32, #tpu.memory_space<vmem>> -> memref<32xf32, #tpu.memory_space<vmem>>
    %1008 = tpu.memref_slice %arg10[%866] : memref<8x!tpu.dma_semaphore, #tpu.memory_space<semaphore_mem>> -> memref<1x!tpu.dma_semaphore, #tpu.memory_space<semaphore_mem>>
    %1009 = tpu.memref_squeeze %1008 : memref<1x!tpu.dma_semaphore, #tpu.memory_space<semaphore_mem>> -> memref<!tpu.dma_semaphore, #tpu.memory_space<semaphore_mem>>
    tpu.wait_dma2 semaphore(%1009 : memref<!tpu.dma_semaphore, #tpu.memory_space<semaphore_mem>>) src(%1005 : memref<32xf32, #tpu.memory_space<any>>) dst(%1007 : memref<32xf32, #tpu.memory_space<vmem>>)
    %c8_i32_465 = arith.constant 8 : i32
    %1010 = arith.muli %866, %c8_i32_465 : i32
    %1011 = tpu.assume_multiple %1010, 8 : i32
    %1012 = arith.index_cast %1011 : i32 to index
    %c0_466 = arith.constant 0 : index
    %1013 = vector.load %arg9[%1012, %c0_466] : memref<64x32xf32, #tpu.memory_space<vmem>>, vector<8x32xf32>
    %1014 = arith.addf %864, %1013 : vector<8x32xf32>
    %c3_i32_467 = arith.constant 3 : i32
    %1015 = arith.addi %563, %c3_i32_467 : i32
    %c7_i32_468 = arith.constant 7 : i32
    %1016 = arith.andi %1015, %c7_i32_468 : i32
    %c0_i32_469 = arith.constant 0 : i32
    %1017 = arith.addi %562, %c0_i32_469 : i32
    %1018 = arith.addi %1017, %c3_i32_467 : i32
    %1019 = arith.index_cast %1018 : i32 to index
    %1020 = memref.load %arg1[%1019] : memref<64xi32, #tpu.memory_space<smem>>
    %c8_i32_470 = arith.constant 8 : i32
    %1021 = arith.addi %562, %c8_i32_470 : i32
    %1022 = arith.addi %1021, %c3_i32_467 : i32
    %1023 = arith.index_cast %1022 : i32 to index
    %1024 = memref.load %arg1[%1023] : memref<64xi32, #tpu.memory_space<smem>>
    %c16_i32_471 = arith.constant 16 : i32
    %1025 = arith.addi %562, %c16_i32_471 : i32
    %1026 = arith.addi %1025, %c3_i32_467 : i32
    %1027 = arith.index_cast %1026 : i32 to index
    %1028 = memref.load %arg1[%1027] : memref<64xi32, #tpu.memory_space<smem>>
    %c24_i32_472 = arith.constant 24 : i32
    %1029 = arith.addi %562, %c24_i32_472 : i32
    %1030 = arith.addi %1029, %c3_i32_467 : i32
    %1031 = arith.index_cast %1030 : i32 to index
    %1032 = memref.load %arg1[%1031] : memref<64xi32, #tpu.memory_space<smem>>
    %c32_i32_473 = arith.constant 32 : i32
    %1033 = arith.addi %562, %c32_i32_473 : i32
    %1034 = arith.addi %1033, %c3_i32_467 : i32
    %1035 = arith.index_cast %1034 : i32 to index
    %1036 = memref.load %arg1[%1035] : memref<64xi32, #tpu.memory_space<smem>>
    %c40_i32_474 = arith.constant 40 : i32
    %1037 = arith.addi %562, %c40_i32_474 : i32
    %1038 = arith.addi %1037, %c3_i32_467 : i32
    %1039 = arith.index_cast %1038 : i32 to index
    %1040 = memref.load %arg1[%1039] : memref<64xi32, #tpu.memory_space<smem>>
    %c48_i32_475 = arith.constant 48 : i32
    %1041 = arith.addi %562, %c48_i32_475 : i32
    %1042 = arith.addi %1041, %c3_i32_467 : i32
    %1043 = arith.index_cast %1042 : i32 to index
    %1044 = memref.load %arg1[%1043] : memref<64xi32, #tpu.memory_space<smem>>
    %c56_i32_476 = arith.constant 56 : i32
    %1045 = arith.addi %562, %c56_i32_476 : i32
    %1046 = arith.addi %1045, %c3_i32_467 : i32
    %1047 = arith.index_cast %1046 : i32 to index
    %1048 = memref.load %arg1[%1047] : memref<64xi32, #tpu.memory_space<smem>>
    %c7_i32_477 = arith.constant 7 : i32
    %1049 = arith.addi %c3_i32_467, %c7_i32_477 : i32
    %c8_i32_478 = arith.constant 8 : i32
    %1050 = arith.cmpi sge, %1049, %c8_i32_478 : i32
    %c8_i32_479 = arith.constant 8 : i32
    %1051 = arith.subi %1049, %c8_i32_479 : i32
    %1052 = arith.select %1050, %1051, %1049 : i32
    %1053 = arith.extui %1050 : i1 to i32
    %1054 = arith.addi %c0_i32_279, %1053 : i32
    %c0_i32_480 = arith.constant 0 : i32
    %1055 = arith.minsi %1054, %c0_i32_480 : i32
    %c64_i32_481 = arith.constant 64 : i32
    %1056 = arith.muli %1055, %c64_i32_481 : i32
    %1057 = arith.addi %0, %1056 : i32
    %c0_i32_482 = arith.constant 0 : i32
    %1058 = arith.addi %1057, %c0_i32_482 : i32
    %1059 = arith.addi %1058, %1052 : i32
    %1060 = arith.index_cast %1059 : i32 to index
    %1061 = memref.load %arg1[%1060] : memref<64xi32, #tpu.memory_space<smem>>
    %c8_i32_483 = arith.constant 8 : i32
    %1062 = arith.addi %1057, %c8_i32_483 : i32
    %1063 = arith.addi %1062, %1052 : i32
    %1064 = arith.index_cast %1063 : i32 to index
    %1065 = memref.load %arg1[%1064] : memref<64xi32, #tpu.memory_space<smem>>
    %c16_i32_484 = arith.constant 16 : i32
    %1066 = arith.addi %1057, %c16_i32_484 : i32
    %1067 = arith.addi %1066, %1052 : i32
    %1068 = arith.index_cast %1067 : i32 to index
    %1069 = memref.load %arg1[%1068] : memref<64xi32, #tpu.memory_space<smem>>
    %c24_i32_485 = arith.constant 24 : i32
    %1070 = arith.addi %1057, %c24_i32_485 : i32
    %1071 = arith.addi %1070, %1052 : i32
    %1072 = arith.index_cast %1071 : i32 to index
    %1073 = memref.load %arg1[%1072] : memref<64xi32, #tpu.memory_space<smem>>
    %c32_i32_486 = arith.constant 32 : i32
    %1074 = arith.addi %1057, %c32_i32_486 : i32
    %1075 = arith.addi %1074, %1052 : i32
    %1076 = arith.index_cast %1075 : i32 to index
    %1077 = memref.load %arg1[%1076] : memref<64xi32, #tpu.memory_space<smem>>
    %c40_i32_487 = arith.constant 40 : i32
    %1078 = arith.addi %1057, %c40_i32_487 : i32
    %1079 = arith.addi %1078, %1052 : i32
    %1080 = arith.index_cast %1079 : i32 to index
    %1081 = memref.load %arg1[%1080] : memref<64xi32, #tpu.memory_space<smem>>
    %c48_i32_488 = arith.constant 48 : i32
    %1082 = arith.addi %1057, %c48_i32_488 : i32
    %1083 = arith.addi %1082, %1052 : i32
    %1084 = arith.index_cast %1083 : i32 to index
    %1085 = memref.load %arg1[%1084] : memref<64xi32, #tpu.memory_space<smem>>
    %c56_i32_489 = arith.constant 56 : i32
    %1086 = arith.addi %1057, %c56_i32_489 : i32
    %1087 = arith.addi %1086, %1052 : i32
    %1088 = arith.index_cast %1087 : i32 to index
    %1089 = memref.load %arg1[%1088] : memref<64xi32, #tpu.memory_space<smem>>
    %c7_i32_490 = arith.constant 7 : i32
    %1090 = arith.addi %1015, %c7_i32_490 : i32
    %c7_i32_491 = arith.constant 7 : i32
    %1091 = arith.andi %1090, %c7_i32_491 : i32
    %c7_i32_492 = arith.constant 7 : i32
    %1092 = arith.addi %1015, %c7_i32_492 : i32
    %c8_i32_493 = arith.constant 8 : i32
    %1093 = arith.cmpi slt, %1092, %c8_i32_493 : i32
    %1094 = arith.extui %1093 : i1 to i32
    %c0_i32_494 = arith.constant 0 : i32
    %1095 = arith.cmpi ne, %1094, %c0_i32_494 : i32
    scf.if %1095 {
      %c8_i32_796 = arith.constant 8 : i32
      %1783 = arith.muli %1091, %c8_i32_796 : i32
      %c0_i32_797 = arith.constant 0 : i32
      %1784 = arith.addi %1783, %c0_i32_797 : i32
      %c0_i32_798 = arith.constant 0 : i32
      %1785 = tpu.memref_slice %arg2[%1061, %c0_i32_798] : memref<512x32xf32, #tpu.memory_space<any>> -> memref<1x32xf32, #tpu.memory_space<any>>
      %1786 = tpu.memref_squeeze %1785 : memref<1x32xf32, #tpu.memory_space<any>> -> memref<32xf32, #tpu.memory_space<any>>
      %c0_i32_799 = arith.constant 0 : i32
      %1787 = tpu.memref_slice %arg9[%1784, %c0_i32_799] : memref<64x32xf32, #tpu.memory_space<vmem>> -> memref<1x32xf32, #tpu.memory_space<vmem>>
      %1788 = tpu.memref_squeeze %1787 : memref<1x32xf32, #tpu.memory_space<vmem>> -> memref<32xf32, #tpu.memory_space<vmem>>
      %1789 = tpu.memref_slice %arg10[%1091] : memref<8x!tpu.dma_semaphore, #tpu.memory_space<semaphore_mem>> -> memref<1x!tpu.dma_semaphore, #tpu.memory_space<semaphore_mem>>
      %1790 = tpu.memref_squeeze %1789 : memref<1x!tpu.dma_semaphore, #tpu.memory_space<semaphore_mem>> -> memref<!tpu.dma_semaphore, #tpu.memory_space<semaphore_mem>>
      tpu.enqueue_dma source(%1786 : memref<32xf32, #tpu.memory_space<any>>) target(%1788 : memref<32xf32, #tpu.memory_space<vmem>>) target_semaphore(%1790 : memref<!tpu.dma_semaphore, #tpu.memory_space<semaphore_mem>>)
      %c8_i32_800 = arith.constant 8 : i32
      %1791 = arith.muli %1091, %c8_i32_800 : i32
      %c1_i32_801 = arith.constant 1 : i32
      %1792 = arith.addi %1791, %c1_i32_801 : i32
      %c0_i32_802 = arith.constant 0 : i32
      %1793 = tpu.memref_slice %arg2[%1065, %c0_i32_802] : memref<512x32xf32, #tpu.memory_space<any>> -> memref<1x32xf32, #tpu.memory_space<any>>
      %1794 = tpu.memref_squeeze %1793 : memref<1x32xf32, #tpu.memory_space<any>> -> memref<32xf32, #tpu.memory_space<any>>
      %c0_i32_803 = arith.constant 0 : i32
      %1795 = tpu.memref_slice %arg9[%1792, %c0_i32_803] : memref<64x32xf32, #tpu.memory_space<vmem>> -> memref<1x32xf32, #tpu.memory_space<vmem>>
      %1796 = tpu.memref_squeeze %1795 : memref<1x32xf32, #tpu.memory_space<vmem>> -> memref<32xf32, #tpu.memory_space<vmem>>
      %1797 = tpu.memref_slice %arg10[%1091] : memref<8x!tpu.dma_semaphore, #tpu.memory_space<semaphore_mem>> -> memref<1x!tpu.dma_semaphore, #tpu.memory_space<semaphore_mem>>
      %1798 = tpu.memref_squeeze %1797 : memref<1x!tpu.dma_semaphore, #tpu.memory_space<semaphore_mem>> -> memref<!tpu.dma_semaphore, #tpu.memory_space<semaphore_mem>>
      tpu.enqueue_dma source(%1794 : memref<32xf32, #tpu.memory_space<any>>) target(%1796 : memref<32xf32, #tpu.memory_space<vmem>>) target_semaphore(%1798 : memref<!tpu.dma_semaphore, #tpu.memory_space<semaphore_mem>>)
      %c8_i32_804 = arith.constant 8 : i32
      %1799 = arith.muli %1091, %c8_i32_804 : i32
      %c2_i32_805 = arith.constant 2 : i32
      %1800 = arith.addi %1799, %c2_i32_805 : i32
      %c0_i32_806 = arith.constant 0 : i32
      %1801 = tpu.memref_slice %arg2[%1069, %c0_i32_806] : memref<512x32xf32, #tpu.memory_space<any>> -> memref<1x32xf32, #tpu.memory_space<any>>
      %1802 = tpu.memref_squeeze %1801 : memref<1x32xf32, #tpu.memory_space<any>> -> memref<32xf32, #tpu.memory_space<any>>
      %c0_i32_807 = arith.constant 0 : i32
      %1803 = tpu.memref_slice %arg9[%1800, %c0_i32_807] : memref<64x32xf32, #tpu.memory_space<vmem>> -> memref<1x32xf32, #tpu.memory_space<vmem>>
      %1804 = tpu.memref_squeeze %1803 : memref<1x32xf32, #tpu.memory_space<vmem>> -> memref<32xf32, #tpu.memory_space<vmem>>
      %1805 = tpu.memref_slice %arg10[%1091] : memref<8x!tpu.dma_semaphore, #tpu.memory_space<semaphore_mem>> -> memref<1x!tpu.dma_semaphore, #tpu.memory_space<semaphore_mem>>
      %1806 = tpu.memref_squeeze %1805 : memref<1x!tpu.dma_semaphore, #tpu.memory_space<semaphore_mem>> -> memref<!tpu.dma_semaphore, #tpu.memory_space<semaphore_mem>>
      tpu.enqueue_dma source(%1802 : memref<32xf32, #tpu.memory_space<any>>) target(%1804 : memref<32xf32, #tpu.memory_space<vmem>>) target_semaphore(%1806 : memref<!tpu.dma_semaphore, #tpu.memory_space<semaphore_mem>>)
      %c8_i32_808 = arith.constant 8 : i32
      %1807 = arith.muli %1091, %c8_i32_808 : i32
      %c3_i32_809 = arith.constant 3 : i32
      %1808 = arith.addi %1807, %c3_i32_809 : i32
      %c0_i32_810 = arith.constant 0 : i32
      %1809 = tpu.memref_slice %arg2[%1073, %c0_i32_810] : memref<512x32xf32, #tpu.memory_space<any>> -> memref<1x32xf32, #tpu.memory_space<any>>
      %1810 = tpu.memref_squeeze %1809 : memref<1x32xf32, #tpu.memory_space<any>> -> memref<32xf32, #tpu.memory_space<any>>
      %c0_i32_811 = arith.constant 0 : i32
      %1811 = tpu.memref_slice %arg9[%1808, %c0_i32_811] : memref<64x32xf32, #tpu.memory_space<vmem>> -> memref<1x32xf32, #tpu.memory_space<vmem>>
      %1812 = tpu.memref_squeeze %1811 : memref<1x32xf32, #tpu.memory_space<vmem>> -> memref<32xf32, #tpu.memory_space<vmem>>
      %1813 = tpu.memref_slice %arg10[%1091] : memref<8x!tpu.dma_semaphore, #tpu.memory_space<semaphore_mem>> -> memref<1x!tpu.dma_semaphore, #tpu.memory_space<semaphore_mem>>
      %1814 = tpu.memref_squeeze %1813 : memref<1x!tpu.dma_semaphore, #tpu.memory_space<semaphore_mem>> -> memref<!tpu.dma_semaphore, #tpu.memory_space<semaphore_mem>>
      tpu.enqueue_dma source(%1810 : memref<32xf32, #tpu.memory_space<any>>) target(%1812 : memref<32xf32, #tpu.memory_space<vmem>>) target_semaphore(%1814 : memref<!tpu.dma_semaphore, #tpu.memory_space<semaphore_mem>>)
      %c8_i32_812 = arith.constant 8 : i32
      %1815 = arith.muli %1091, %c8_i32_812 : i32
      %c4_i32_813 = arith.constant 4 : i32
      %1816 = arith.addi %1815, %c4_i32_813 : i32
      %c0_i32_814 = arith.constant 0 : i32
      %1817 = tpu.memref_slice %arg2[%1077, %c0_i32_814] : memref<512x32xf32, #tpu.memory_space<any>> -> memref<1x32xf32, #tpu.memory_space<any>>
      %1818 = tpu.memref_squeeze %1817 : memref<1x32xf32, #tpu.memory_space<any>> -> memref<32xf32, #tpu.memory_space<any>>
      %c0_i32_815 = arith.constant 0 : i32
      %1819 = tpu.memref_slice %arg9[%1816, %c0_i32_815] : memref<64x32xf32, #tpu.memory_space<vmem>> -> memref<1x32xf32, #tpu.memory_space<vmem>>
      %1820 = tpu.memref_squeeze %1819 : memref<1x32xf32, #tpu.memory_space<vmem>> -> memref<32xf32, #tpu.memory_space<vmem>>
      %1821 = tpu.memref_slice %arg10[%1091] : memref<8x!tpu.dma_semaphore, #tpu.memory_space<semaphore_mem>> -> memref<1x!tpu.dma_semaphore, #tpu.memory_space<semaphore_mem>>
      %1822 = tpu.memref_squeeze %1821 : memref<1x!tpu.dma_semaphore, #tpu.memory_space<semaphore_mem>> -> memref<!tpu.dma_semaphore, #tpu.memory_space<semaphore_mem>>
      tpu.enqueue_dma source(%1818 : memref<32xf32, #tpu.memory_space<any>>) target(%1820 : memref<32xf32, #tpu.memory_space<vmem>>) target_semaphore(%1822 : memref<!tpu.dma_semaphore, #tpu.memory_space<semaphore_mem>>)
      %c8_i32_816 = arith.constant 8 : i32
      %1823 = arith.muli %1091, %c8_i32_816 : i32
      %c5_i32_817 = arith.constant 5 : i32
      %1824 = arith.addi %1823, %c5_i32_817 : i32
      %c0_i32_818 = arith.constant 0 : i32
      %1825 = tpu.memref_slice %arg2[%1081, %c0_i32_818] : memref<512x32xf32, #tpu.memory_space<any>> -> memref<1x32xf32, #tpu.memory_space<any>>
      %1826 = tpu.memref_squeeze %1825 : memref<1x32xf32, #tpu.memory_space<any>> -> memref<32xf32, #tpu.memory_space<any>>
      %c0_i32_819 = arith.constant 0 : i32
      %1827 = tpu.memref_slice %arg9[%1824, %c0_i32_819] : memref<64x32xf32, #tpu.memory_space<vmem>> -> memref<1x32xf32, #tpu.memory_space<vmem>>
      %1828 = tpu.memref_squeeze %1827 : memref<1x32xf32, #tpu.memory_space<vmem>> -> memref<32xf32, #tpu.memory_space<vmem>>
      %1829 = tpu.memref_slice %arg10[%1091] : memref<8x!tpu.dma_semaphore, #tpu.memory_space<semaphore_mem>> -> memref<1x!tpu.dma_semaphore, #tpu.memory_space<semaphore_mem>>
      %1830 = tpu.memref_squeeze %1829 : memref<1x!tpu.dma_semaphore, #tpu.memory_space<semaphore_mem>> -> memref<!tpu.dma_semaphore, #tpu.memory_space<semaphore_mem>>
      tpu.enqueue_dma source(%1826 : memref<32xf32, #tpu.memory_space<any>>) target(%1828 : memref<32xf32, #tpu.memory_space<vmem>>) target_semaphore(%1830 : memref<!tpu.dma_semaphore, #tpu.memory_space<semaphore_mem>>)
      %c8_i32_820 = arith.constant 8 : i32
      %1831 = arith.muli %1091, %c8_i32_820 : i32
      %c6_i32_821 = arith.constant 6 : i32
      %1832 = arith.addi %1831, %c6_i32_821 : i32
      %c0_i32_822 = arith.constant 0 : i32
      %1833 = tpu.memref_slice %arg2[%1085, %c0_i32_822] : memref<512x32xf32, #tpu.memory_space<any>> -> memref<1x32xf32, #tpu.memory_space<any>>
      %1834 = tpu.memref_squeeze %1833 : memref<1x32xf32, #tpu.memory_space<any>> -> memref<32xf32, #tpu.memory_space<any>>
      %c0_i32_823 = arith.constant 0 : i32
      %1835 = tpu.memref_slice %arg9[%1832, %c0_i32_823] : memref<64x32xf32, #tpu.memory_space<vmem>> -> memref<1x32xf32, #tpu.memory_space<vmem>>
      %1836 = tpu.memref_squeeze %1835 : memref<1x32xf32, #tpu.memory_space<vmem>> -> memref<32xf32, #tpu.memory_space<vmem>>
      %1837 = tpu.memref_slice %arg10[%1091] : memref<8x!tpu.dma_semaphore, #tpu.memory_space<semaphore_mem>> -> memref<1x!tpu.dma_semaphore, #tpu.memory_space<semaphore_mem>>
      %1838 = tpu.memref_squeeze %1837 : memref<1x!tpu.dma_semaphore, #tpu.memory_space<semaphore_mem>> -> memref<!tpu.dma_semaphore, #tpu.memory_space<semaphore_mem>>
      tpu.enqueue_dma source(%1834 : memref<32xf32, #tpu.memory_space<any>>) target(%1836 : memref<32xf32, #tpu.memory_space<vmem>>) target_semaphore(%1838 : memref<!tpu.dma_semaphore, #tpu.memory_space<semaphore_mem>>)
      %c8_i32_824 = arith.constant 8 : i32
      %1839 = arith.muli %1091, %c8_i32_824 : i32
      %c7_i32_825 = arith.constant 7 : i32
      %1840 = arith.addi %1839, %c7_i32_825 : i32
      %c0_i32_826 = arith.constant 0 : i32
      %1841 = tpu.memref_slice %arg2[%1089, %c0_i32_826] : memref<512x32xf32, #tpu.memory_space<any>> -> memref<1x32xf32, #tpu.memory_space<any>>
      %1842 = tpu.memref_squeeze %1841 : memref<1x32xf32, #tpu.memory_space<any>> -> memref<32xf32, #tpu.memory_space<any>>
      %c0_i32_827 = arith.constant 0 : i32
      %1843 = tpu.memref_slice %arg9[%1840, %c0_i32_827] : memref<64x32xf32, #tpu.memory_space<vmem>> -> memref<1x32xf32, #tpu.memory_space<vmem>>
      %1844 = tpu.memref_squeeze %1843 : memref<1x32xf32, #tpu.memory_space<vmem>> -> memref<32xf32, #tpu.memory_space<vmem>>
      %1845 = tpu.memref_slice %arg10[%1091] : memref<8x!tpu.dma_semaphore, #tpu.memory_space<semaphore_mem>> -> memref<1x!tpu.dma_semaphore, #tpu.memory_space<semaphore_mem>>
      %1846 = tpu.memref_squeeze %1845 : memref<1x!tpu.dma_semaphore, #tpu.memory_space<semaphore_mem>> -> memref<!tpu.dma_semaphore, #tpu.memory_space<semaphore_mem>>
      tpu.enqueue_dma source(%1842 : memref<32xf32, #tpu.memory_space<any>>) target(%1844 : memref<32xf32, #tpu.memory_space<vmem>>) target_semaphore(%1846 : memref<!tpu.dma_semaphore, #tpu.memory_space<semaphore_mem>>)
    } else {
    }
    %c8_i32_495 = arith.constant 8 : i32
    %1096 = arith.muli %1016, %c8_i32_495 : i32
    %c0_i32_496 = arith.constant 0 : i32
    %1097 = arith.addi %1096, %c0_i32_496 : i32
    %c0_i32_497 = arith.constant 0 : i32
    %1098 = tpu.memref_slice %arg2[%1020, %c0_i32_497] : memref<512x32xf32, #tpu.memory_space<any>> -> memref<1x32xf32, #tpu.memory_space<any>>
    %1099 = tpu.memref_squeeze %1098 : memref<1x32xf32, #tpu.memory_space<any>> -> memref<32xf32, #tpu.memory_space<any>>
    %c0_i32_498 = arith.constant 0 : i32
    %1100 = tpu.memref_slice %arg9[%1097, %c0_i32_498] : memref<64x32xf32, #tpu.memory_space<vmem>> -> memref<1x32xf32, #tpu.memory_space<vmem>>
    %1101 = tpu.memref_squeeze %1100 : memref<1x32xf32, #tpu.memory_space<vmem>> -> memref<32xf32, #tpu.memory_space<vmem>>
    %1102 = tpu.memref_slice %arg10[%1016] : memref<8x!tpu.dma_semaphore, #tpu.memory_space<semaphore_mem>> -> memref<1x!tpu.dma_semaphore, #tpu.memory_space<semaphore_mem>>
    %1103 = tpu.memref_squeeze %1102 : memref<1x!tpu.dma_semaphore, #tpu.memory_space<semaphore_mem>> -> memref<!tpu.dma_semaphore, #tpu.memory_space<semaphore_mem>>
    tpu.wait_dma2 semaphore(%1103 : memref<!tpu.dma_semaphore, #tpu.memory_space<semaphore_mem>>) src(%1099 : memref<32xf32, #tpu.memory_space<any>>) dst(%1101 : memref<32xf32, #tpu.memory_space<vmem>>)
    %c8_i32_499 = arith.constant 8 : i32
    %1104 = arith.muli %1016, %c8_i32_499 : i32
    %c1_i32_500 = arith.constant 1 : i32
    %1105 = arith.addi %1104, %c1_i32_500 : i32
    %c0_i32_501 = arith.constant 0 : i32
    %1106 = tpu.memref_slice %arg2[%1024, %c0_i32_501] : memref<512x32xf32, #tpu.memory_space<any>> -> memref<1x32xf32, #tpu.memory_space<any>>
    %1107 = tpu.memref_squeeze %1106 : memref<1x32xf32, #tpu.memory_space<any>> -> memref<32xf32, #tpu.memory_space<any>>
    %c0_i32_502 = arith.constant 0 : i32
    %1108 = tpu.memref_slice %arg9[%1105, %c0_i32_502] : memref<64x32xf32, #tpu.memory_space<vmem>> -> memref<1x32xf32, #tpu.memory_space<vmem>>
    %1109 = tpu.memref_squeeze %1108 : memref<1x32xf32, #tpu.memory_space<vmem>> -> memref<32xf32, #tpu.memory_space<vmem>>
    %1110 = tpu.memref_slice %arg10[%1016] : memref<8x!tpu.dma_semaphore, #tpu.memory_space<semaphore_mem>> -> memref<1x!tpu.dma_semaphore, #tpu.memory_space<semaphore_mem>>
    %1111 = tpu.memref_squeeze %1110 : memref<1x!tpu.dma_semaphore, #tpu.memory_space<semaphore_mem>> -> memref<!tpu.dma_semaphore, #tpu.memory_space<semaphore_mem>>
    tpu.wait_dma2 semaphore(%1111 : memref<!tpu.dma_semaphore, #tpu.memory_space<semaphore_mem>>) src(%1107 : memref<32xf32, #tpu.memory_space<any>>) dst(%1109 : memref<32xf32, #tpu.memory_space<vmem>>)
    %c8_i32_503 = arith.constant 8 : i32
    %1112 = arith.muli %1016, %c8_i32_503 : i32
    %c2_i32_504 = arith.constant 2 : i32
    %1113 = arith.addi %1112, %c2_i32_504 : i32
    %c0_i32_505 = arith.constant 0 : i32
    %1114 = tpu.memref_slice %arg2[%1028, %c0_i32_505] : memref<512x32xf32, #tpu.memory_space<any>> -> memref<1x32xf32, #tpu.memory_space<any>>
    %1115 = tpu.memref_squeeze %1114 : memref<1x32xf32, #tpu.memory_space<any>> -> memref<32xf32, #tpu.memory_space<any>>
    %c0_i32_506 = arith.constant 0 : i32
    %1116 = tpu.memref_slice %arg9[%1113, %c0_i32_506] : memref<64x32xf32, #tpu.memory_space<vmem>> -> memref<1x32xf32, #tpu.memory_space<vmem>>
    %1117 = tpu.memref_squeeze %1116 : memref<1x32xf32, #tpu.memory_space<vmem>> -> memref<32xf32, #tpu.memory_space<vmem>>
    %1118 = tpu.memref_slice %arg10[%1016] : memref<8x!tpu.dma_semaphore, #tpu.memory_space<semaphore_mem>> -> memref<1x!tpu.dma_semaphore, #tpu.memory_space<semaphore_mem>>
    %1119 = tpu.memref_squeeze %1118 : memref<1x!tpu.dma_semaphore, #tpu.memory_space<semaphore_mem>> -> memref<!tpu.dma_semaphore, #tpu.memory_space<semaphore_mem>>
    tpu.wait_dma2 semaphore(%1119 : memref<!tpu.dma_semaphore, #tpu.memory_space<semaphore_mem>>) src(%1115 : memref<32xf32, #tpu.memory_space<any>>) dst(%1117 : memref<32xf32, #tpu.memory_space<vmem>>)
    %c8_i32_507 = arith.constant 8 : i32
    %1120 = arith.muli %1016, %c8_i32_507 : i32
    %c3_i32_508 = arith.constant 3 : i32
    %1121 = arith.addi %1120, %c3_i32_508 : i32
    %c0_i32_509 = arith.constant 0 : i32
    %1122 = tpu.memref_slice %arg2[%1032, %c0_i32_509] : memref<512x32xf32, #tpu.memory_space<any>> -> memref<1x32xf32, #tpu.memory_space<any>>
    %1123 = tpu.memref_squeeze %1122 : memref<1x32xf32, #tpu.memory_space<any>> -> memref<32xf32, #tpu.memory_space<any>>
    %c0_i32_510 = arith.constant 0 : i32
    %1124 = tpu.memref_slice %arg9[%1121, %c0_i32_510] : memref<64x32xf32, #tpu.memory_space<vmem>> -> memref<1x32xf32, #tpu.memory_space<vmem>>
    %1125 = tpu.memref_squeeze %1124 : memref<1x32xf32, #tpu.memory_space<vmem>> -> memref<32xf32, #tpu.memory_space<vmem>>
    %1126 = tpu.memref_slice %arg10[%1016] : memref<8x!tpu.dma_semaphore, #tpu.memory_space<semaphore_mem>> -> memref<1x!tpu.dma_semaphore, #tpu.memory_space<semaphore_mem>>
    %1127 = tpu.memref_squeeze %1126 : memref<1x!tpu.dma_semaphore, #tpu.memory_space<semaphore_mem>> -> memref<!tpu.dma_semaphore, #tpu.memory_space<semaphore_mem>>
    tpu.wait_dma2 semaphore(%1127 : memref<!tpu.dma_semaphore, #tpu.memory_space<semaphore_mem>>) src(%1123 : memref<32xf32, #tpu.memory_space<any>>) dst(%1125 : memref<32xf32, #tpu.memory_space<vmem>>)
    %c8_i32_511 = arith.constant 8 : i32
    %1128 = arith.muli %1016, %c8_i32_511 : i32
    %c4_i32_512 = arith.constant 4 : i32
    %1129 = arith.addi %1128, %c4_i32_512 : i32
    %c0_i32_513 = arith.constant 0 : i32
    %1130 = tpu.memref_slice %arg2[%1036, %c0_i32_513] : memref<512x32xf32, #tpu.memory_space<any>> -> memref<1x32xf32, #tpu.memory_space<any>>
    %1131 = tpu.memref_squeeze %1130 : memref<1x32xf32, #tpu.memory_space<any>> -> memref<32xf32, #tpu.memory_space<any>>
    %c0_i32_514 = arith.constant 0 : i32
    %1132 = tpu.memref_slice %arg9[%1129, %c0_i32_514] : memref<64x32xf32, #tpu.memory_space<vmem>> -> memref<1x32xf32, #tpu.memory_space<vmem>>
    %1133 = tpu.memref_squeeze %1132 : memref<1x32xf32, #tpu.memory_space<vmem>> -> memref<32xf32, #tpu.memory_space<vmem>>
    %1134 = tpu.memref_slice %arg10[%1016] : memref<8x!tpu.dma_semaphore, #tpu.memory_space<semaphore_mem>> -> memref<1x!tpu.dma_semaphore, #tpu.memory_space<semaphore_mem>>
    %1135 = tpu.memref_squeeze %1134 : memref<1x!tpu.dma_semaphore, #tpu.memory_space<semaphore_mem>> -> memref<!tpu.dma_semaphore, #tpu.memory_space<semaphore_mem>>
    tpu.wait_dma2 semaphore(%1135 : memref<!tpu.dma_semaphore, #tpu.memory_space<semaphore_mem>>) src(%1131 : memref<32xf32, #tpu.memory_space<any>>) dst(%1133 : memref<32xf32, #tpu.memory_space<vmem>>)
    %c8_i32_515 = arith.constant 8 : i32
    %1136 = arith.muli %1016, %c8_i32_515 : i32
    %c5_i32_516 = arith.constant 5 : i32
    %1137 = arith.addi %1136, %c5_i32_516 : i32
    %c0_i32_517 = arith.constant 0 : i32
    %1138 = tpu.memref_slice %arg2[%1040, %c0_i32_517] : memref<512x32xf32, #tpu.memory_space<any>> -> memref<1x32xf32, #tpu.memory_space<any>>
    %1139 = tpu.memref_squeeze %1138 : memref<1x32xf32, #tpu.memory_space<any>> -> memref<32xf32, #tpu.memory_space<any>>
    %c0_i32_518 = arith.constant 0 : i32
    %1140 = tpu.memref_slice %arg9[%1137, %c0_i32_518] : memref<64x32xf32, #tpu.memory_space<vmem>> -> memref<1x32xf32, #tpu.memory_space<vmem>>
    %1141 = tpu.memref_squeeze %1140 : memref<1x32xf32, #tpu.memory_space<vmem>> -> memref<32xf32, #tpu.memory_space<vmem>>
    %1142 = tpu.memref_slice %arg10[%1016] : memref<8x!tpu.dma_semaphore, #tpu.memory_space<semaphore_mem>> -> memref<1x!tpu.dma_semaphore, #tpu.memory_space<semaphore_mem>>
    %1143 = tpu.memref_squeeze %1142 : memref<1x!tpu.dma_semaphore, #tpu.memory_space<semaphore_mem>> -> memref<!tpu.dma_semaphore, #tpu.memory_space<semaphore_mem>>
    tpu.wait_dma2 semaphore(%1143 : memref<!tpu.dma_semaphore, #tpu.memory_space<semaphore_mem>>) src(%1139 : memref<32xf32, #tpu.memory_space<any>>) dst(%1141 : memref<32xf32, #tpu.memory_space<vmem>>)
    %c8_i32_519 = arith.constant 8 : i32
    %1144 = arith.muli %1016, %c8_i32_519 : i32
    %c6_i32_520 = arith.constant 6 : i32
    %1145 = arith.addi %1144, %c6_i32_520 : i32
    %c0_i32_521 = arith.constant 0 : i32
    %1146 = tpu.memref_slice %arg2[%1044, %c0_i32_521] : memref<512x32xf32, #tpu.memory_space<any>> -> memref<1x32xf32, #tpu.memory_space<any>>
    %1147 = tpu.memref_squeeze %1146 : memref<1x32xf32, #tpu.memory_space<any>> -> memref<32xf32, #tpu.memory_space<any>>
    %c0_i32_522 = arith.constant 0 : i32
    %1148 = tpu.memref_slice %arg9[%1145, %c0_i32_522] : memref<64x32xf32, #tpu.memory_space<vmem>> -> memref<1x32xf32, #tpu.memory_space<vmem>>
    %1149 = tpu.memref_squeeze %1148 : memref<1x32xf32, #tpu.memory_space<vmem>> -> memref<32xf32, #tpu.memory_space<vmem>>
    %1150 = tpu.memref_slice %arg10[%1016] : memref<8x!tpu.dma_semaphore, #tpu.memory_space<semaphore_mem>> -> memref<1x!tpu.dma_semaphore, #tpu.memory_space<semaphore_mem>>
    %1151 = tpu.memref_squeeze %1150 : memref<1x!tpu.dma_semaphore, #tpu.memory_space<semaphore_mem>> -> memref<!tpu.dma_semaphore, #tpu.memory_space<semaphore_mem>>
    tpu.wait_dma2 semaphore(%1151 : memref<!tpu.dma_semaphore, #tpu.memory_space<semaphore_mem>>) src(%1147 : memref<32xf32, #tpu.memory_space<any>>) dst(%1149 : memref<32xf32, #tpu.memory_space<vmem>>)
    %c8_i32_523 = arith.constant 8 : i32
    %1152 = arith.muli %1016, %c8_i32_523 : i32
    %c7_i32_524 = arith.constant 7 : i32
    %1153 = arith.addi %1152, %c7_i32_524 : i32
    %c0_i32_525 = arith.constant 0 : i32
    %1154 = tpu.memref_slice %arg2[%1048, %c0_i32_525] : memref<512x32xf32, #tpu.memory_space<any>> -> memref<1x32xf32, #tpu.memory_space<any>>
    %1155 = tpu.memref_squeeze %1154 : memref<1x32xf32, #tpu.memory_space<any>> -> memref<32xf32, #tpu.memory_space<any>>
    %c0_i32_526 = arith.constant 0 : i32
    %1156 = tpu.memref_slice %arg9[%1153, %c0_i32_526] : memref<64x32xf32, #tpu.memory_space<vmem>> -> memref<1x32xf32, #tpu.memory_space<vmem>>
    %1157 = tpu.memref_squeeze %1156 : memref<1x32xf32, #tpu.memory_space<vmem>> -> memref<32xf32, #tpu.memory_space<vmem>>
    %1158 = tpu.memref_slice %arg10[%1016] : memref<8x!tpu.dma_semaphore, #tpu.memory_space<semaphore_mem>> -> memref<1x!tpu.dma_semaphore, #tpu.memory_space<semaphore_mem>>
    %1159 = tpu.memref_squeeze %1158 : memref<1x!tpu.dma_semaphore, #tpu.memory_space<semaphore_mem>> -> memref<!tpu.dma_semaphore, #tpu.memory_space<semaphore_mem>>
    tpu.wait_dma2 semaphore(%1159 : memref<!tpu.dma_semaphore, #tpu.memory_space<semaphore_mem>>) src(%1155 : memref<32xf32, #tpu.memory_space<any>>) dst(%1157 : memref<32xf32, #tpu.memory_space<vmem>>)
    %c8_i32_527 = arith.constant 8 : i32
    %1160 = arith.muli %1016, %c8_i32_527 : i32
    %1161 = tpu.assume_multiple %1160, 8 : i32
    %1162 = arith.index_cast %1161 : i32 to index
    %c0_528 = arith.constant 0 : index
    %1163 = vector.load %arg9[%1162, %c0_528] : memref<64x32xf32, #tpu.memory_space<vmem>>, vector<8x32xf32>
    %1164 = arith.addf %1014, %1163 : vector<8x32xf32>
    %c4_i32_529 = arith.constant 4 : i32
    %1165 = arith.addi %563, %c4_i32_529 : i32
    %c7_i32_530 = arith.constant 7 : i32
    %1166 = arith.andi %1165, %c7_i32_530 : i32
    %c0_i32_531 = arith.constant 0 : i32
    %1167 = arith.addi %562, %c0_i32_531 : i32
    %1168 = arith.addi %1167, %c4_i32_529 : i32
    %1169 = arith.index_cast %1168 : i32 to index
    %1170 = memref.load %arg1[%1169] : memref<64xi32, #tpu.memory_space<smem>>
    %c8_i32_532 = arith.constant 8 : i32
    %1171 = arith.addi %562, %c8_i32_532 : i32
    %1172 = arith.addi %1171, %c4_i32_529 : i32
    %1173 = arith.index_cast %1172 : i32 to index
    %1174 = memref.load %arg1[%1173] : memref<64xi32, #tpu.memory_space<smem>>
    %c16_i32_533 = arith.constant 16 : i32
    %1175 = arith.addi %562, %c16_i32_533 : i32
    %1176 = arith.addi %1175, %c4_i32_529 : i32
    %1177 = arith.index_cast %1176 : i32 to index
    %1178 = memref.load %arg1[%1177] : memref<64xi32, #tpu.memory_space<smem>>
    %c24_i32_534 = arith.constant 24 : i32
    %1179 = arith.addi %562, %c24_i32_534 : i32
    %1180 = arith.addi %1179, %c4_i32_529 : i32
    %1181 = arith.index_cast %1180 : i32 to index
    %1182 = memref.load %arg1[%1181] : memref<64xi32, #tpu.memory_space<smem>>
    %c32_i32_535 = arith.constant 32 : i32
    %1183 = arith.addi %562, %c32_i32_535 : i32
    %1184 = arith.addi %1183, %c4_i32_529 : i32
    %1185 = arith.index_cast %1184 : i32 to index
    %1186 = memref.load %arg1[%1185] : memref<64xi32, #tpu.memory_space<smem>>
    %c40_i32_536 = arith.constant 40 : i32
    %1187 = arith.addi %562, %c40_i32_536 : i32
    %1188 = arith.addi %1187, %c4_i32_529 : i32
    %1189 = arith.index_cast %1188 : i32 to index
    %1190 = memref.load %arg1[%1189] : memref<64xi32, #tpu.memory_space<smem>>
    %c48_i32_537 = arith.constant 48 : i32
    %1191 = arith.addi %562, %c48_i32_537 : i32
    %1192 = arith.addi %1191, %c4_i32_529 : i32
    %1193 = arith.index_cast %1192 : i32 to index
    %1194 = memref.load %arg1[%1193] : memref<64xi32, #tpu.memory_space<smem>>
    %c56_i32_538 = arith.constant 56 : i32
    %1195 = arith.addi %562, %c56_i32_538 : i32
    %1196 = arith.addi %1195, %c4_i32_529 : i32
    %1197 = arith.index_cast %1196 : i32 to index
    %1198 = memref.load %arg1[%1197] : memref<64xi32, #tpu.memory_space<smem>>
    %c7_i32_539 = arith.constant 7 : i32
    %1199 = arith.addi %c4_i32_529, %c7_i32_539 : i32
    %c8_i32_540 = arith.constant 8 : i32
    %1200 = arith.cmpi sge, %1199, %c8_i32_540 : i32
    %c8_i32_541 = arith.constant 8 : i32
    %1201 = arith.subi %1199, %c8_i32_541 : i32
    %1202 = arith.select %1200, %1201, %1199 : i32
    %1203 = arith.extui %1200 : i1 to i32
    %1204 = arith.addi %c0_i32_279, %1203 : i32
    %c0_i32_542 = arith.constant 0 : i32
    %1205 = arith.minsi %1204, %c0_i32_542 : i32
    %c64_i32_543 = arith.constant 64 : i32
    %1206 = arith.muli %1205, %c64_i32_543 : i32
    %1207 = arith.addi %0, %1206 : i32
    %c0_i32_544 = arith.constant 0 : i32
    %1208 = arith.addi %1207, %c0_i32_544 : i32
    %1209 = arith.addi %1208, %1202 : i32
    %1210 = arith.index_cast %1209 : i32 to index
    %1211 = memref.load %arg1[%1210] : memref<64xi32, #tpu.memory_space<smem>>
    %c8_i32_545 = arith.constant 8 : i32
    %1212 = arith.addi %1207, %c8_i32_545 : i32
    %1213 = arith.addi %1212, %1202 : i32
    %1214 = arith.index_cast %1213 : i32 to index
    %1215 = memref.load %arg1[%1214] : memref<64xi32, #tpu.memory_space<smem>>
    %c16_i32_546 = arith.constant 16 : i32
    %1216 = arith.addi %1207, %c16_i32_546 : i32
    %1217 = arith.addi %1216, %1202 : i32
    %1218 = arith.index_cast %1217 : i32 to index
    %1219 = memref.load %arg1[%1218] : memref<64xi32, #tpu.memory_space<smem>>
    %c24_i32_547 = arith.constant 24 : i32
    %1220 = arith.addi %1207, %c24_i32_547 : i32
    %1221 = arith.addi %1220, %1202 : i32
    %1222 = arith.index_cast %1221 : i32 to index
    %1223 = memref.load %arg1[%1222] : memref<64xi32, #tpu.memory_space<smem>>
    %c32_i32_548 = arith.constant 32 : i32
    %1224 = arith.addi %1207, %c32_i32_548 : i32
    %1225 = arith.addi %1224, %1202 : i32
    %1226 = arith.index_cast %1225 : i32 to index
    %1227 = memref.load %arg1[%1226] : memref<64xi32, #tpu.memory_space<smem>>
    %c40_i32_549 = arith.constant 40 : i32
    %1228 = arith.addi %1207, %c40_i32_549 : i32
    %1229 = arith.addi %1228, %1202 : i32
    %1230 = arith.index_cast %1229 : i32 to index
    %1231 = memref.load %arg1[%1230] : memref<64xi32, #tpu.memory_space<smem>>
    %c48_i32_550 = arith.constant 48 : i32
    %1232 = arith.addi %1207, %c48_i32_550 : i32
    %1233 = arith.addi %1232, %1202 : i32
    %1234 = arith.index_cast %1233 : i32 to index
    %1235 = memref.load %arg1[%1234] : memref<64xi32, #tpu.memory_space<smem>>
    %c56_i32_551 = arith.constant 56 : i32
    %1236 = arith.addi %1207, %c56_i32_551 : i32
    %1237 = arith.addi %1236, %1202 : i32
    %1238 = arith.index_cast %1237 : i32 to index
    %1239 = memref.load %arg1[%1238] : memref<64xi32, #tpu.memory_space<smem>>
    %c7_i32_552 = arith.constant 7 : i32
    %1240 = arith.addi %1165, %c7_i32_552 : i32
    %c7_i32_553 = arith.constant 7 : i32
    %1241 = arith.andi %1240, %c7_i32_553 : i32
    %c7_i32_554 = arith.constant 7 : i32
    %1242 = arith.addi %1165, %c7_i32_554 : i32
    %c8_i32_555 = arith.constant 8 : i32
    %1243 = arith.cmpi slt, %1242, %c8_i32_555 : i32
    %1244 = arith.extui %1243 : i1 to i32
    %c0_i32_556 = arith.constant 0 : i32
    %1245 = arith.cmpi ne, %1244, %c0_i32_556 : i32
    scf.if %1245 {
      %c8_i32_796 = arith.constant 8 : i32
      %1783 = arith.muli %1241, %c8_i32_796 : i32
      %c0_i32_797 = arith.constant 0 : i32
      %1784 = arith.addi %1783, %c0_i32_797 : i32
      %c0_i32_798 = arith.constant 0 : i32
      %1785 = tpu.memref_slice %arg2[%1211, %c0_i32_798] : memref<512x32xf32, #tpu.memory_space<any>> -> memref<1x32xf32, #tpu.memory_space<any>>
      %1786 = tpu.memref_squeeze %1785 : memref<1x32xf32, #tpu.memory_space<any>> -> memref<32xf32, #tpu.memory_space<any>>
      %c0_i32_799 = arith.constant 0 : i32
      %1787 = tpu.memref_slice %arg9[%1784, %c0_i32_799] : memref<64x32xf32, #tpu.memory_space<vmem>> -> memref<1x32xf32, #tpu.memory_space<vmem>>
      %1788 = tpu.memref_squeeze %1787 : memref<1x32xf32, #tpu.memory_space<vmem>> -> memref<32xf32, #tpu.memory_space<vmem>>
      %1789 = tpu.memref_slice %arg10[%1241] : memref<8x!tpu.dma_semaphore, #tpu.memory_space<semaphore_mem>> -> memref<1x!tpu.dma_semaphore, #tpu.memory_space<semaphore_mem>>
      %1790 = tpu.memref_squeeze %1789 : memref<1x!tpu.dma_semaphore, #tpu.memory_space<semaphore_mem>> -> memref<!tpu.dma_semaphore, #tpu.memory_space<semaphore_mem>>
      tpu.enqueue_dma source(%1786 : memref<32xf32, #tpu.memory_space<any>>) target(%1788 : memref<32xf32, #tpu.memory_space<vmem>>) target_semaphore(%1790 : memref<!tpu.dma_semaphore, #tpu.memory_space<semaphore_mem>>)
      %c8_i32_800 = arith.constant 8 : i32
      %1791 = arith.muli %1241, %c8_i32_800 : i32
      %c1_i32_801 = arith.constant 1 : i32
      %1792 = arith.addi %1791, %c1_i32_801 : i32
      %c0_i32_802 = arith.constant 0 : i32
      %1793 = tpu.memref_slice %arg2[%1215, %c0_i32_802] : memref<512x32xf32, #tpu.memory_space<any>> -> memref<1x32xf32, #tpu.memory_space<any>>
      %1794 = tpu.memref_squeeze %1793 : memref<1x32xf32, #tpu.memory_space<any>> -> memref<32xf32, #tpu.memory_space<any>>
      %c0_i32_803 = arith.constant 0 : i32
      %1795 = tpu.memref_slice %arg9[%1792, %c0_i32_803] : memref<64x32xf32, #tpu.memory_space<vmem>> -> memref<1x32xf32, #tpu.memory_space<vmem>>
      %1796 = tpu.memref_squeeze %1795 : memref<1x32xf32, #tpu.memory_space<vmem>> -> memref<32xf32, #tpu.memory_space<vmem>>
      %1797 = tpu.memref_slice %arg10[%1241] : memref<8x!tpu.dma_semaphore, #tpu.memory_space<semaphore_mem>> -> memref<1x!tpu.dma_semaphore, #tpu.memory_space<semaphore_mem>>
      %1798 = tpu.memref_squeeze %1797 : memref<1x!tpu.dma_semaphore, #tpu.memory_space<semaphore_mem>> -> memref<!tpu.dma_semaphore, #tpu.memory_space<semaphore_mem>>
      tpu.enqueue_dma source(%1794 : memref<32xf32, #tpu.memory_space<any>>) target(%1796 : memref<32xf32, #tpu.memory_space<vmem>>) target_semaphore(%1798 : memref<!tpu.dma_semaphore, #tpu.memory_space<semaphore_mem>>)
      %c8_i32_804 = arith.constant 8 : i32
      %1799 = arith.muli %1241, %c8_i32_804 : i32
      %c2_i32_805 = arith.constant 2 : i32
      %1800 = arith.addi %1799, %c2_i32_805 : i32
      %c0_i32_806 = arith.constant 0 : i32
      %1801 = tpu.memref_slice %arg2[%1219, %c0_i32_806] : memref<512x32xf32, #tpu.memory_space<any>> -> memref<1x32xf32, #tpu.memory_space<any>>
      %1802 = tpu.memref_squeeze %1801 : memref<1x32xf32, #tpu.memory_space<any>> -> memref<32xf32, #tpu.memory_space<any>>
      %c0_i32_807 = arith.constant 0 : i32
      %1803 = tpu.memref_slice %arg9[%1800, %c0_i32_807] : memref<64x32xf32, #tpu.memory_space<vmem>> -> memref<1x32xf32, #tpu.memory_space<vmem>>
      %1804 = tpu.memref_squeeze %1803 : memref<1x32xf32, #tpu.memory_space<vmem>> -> memref<32xf32, #tpu.memory_space<vmem>>
      %1805 = tpu.memref_slice %arg10[%1241] : memref<8x!tpu.dma_semaphore, #tpu.memory_space<semaphore_mem>> -> memref<1x!tpu.dma_semaphore, #tpu.memory_space<semaphore_mem>>
      %1806 = tpu.memref_squeeze %1805 : memref<1x!tpu.dma_semaphore, #tpu.memory_space<semaphore_mem>> -> memref<!tpu.dma_semaphore, #tpu.memory_space<semaphore_mem>>
      tpu.enqueue_dma source(%1802 : memref<32xf32, #tpu.memory_space<any>>) target(%1804 : memref<32xf32, #tpu.memory_space<vmem>>) target_semaphore(%1806 : memref<!tpu.dma_semaphore, #tpu.memory_space<semaphore_mem>>)
      %c8_i32_808 = arith.constant 8 : i32
      %1807 = arith.muli %1241, %c8_i32_808 : i32
      %c3_i32_809 = arith.constant 3 : i32
      %1808 = arith.addi %1807, %c3_i32_809 : i32
      %c0_i32_810 = arith.constant 0 : i32
      %1809 = tpu.memref_slice %arg2[%1223, %c0_i32_810] : memref<512x32xf32, #tpu.memory_space<any>> -> memref<1x32xf32, #tpu.memory_space<any>>
      %1810 = tpu.memref_squeeze %1809 : memref<1x32xf32, #tpu.memory_space<any>> -> memref<32xf32, #tpu.memory_space<any>>
      %c0_i32_811 = arith.constant 0 : i32
      %1811 = tpu.memref_slice %arg9[%1808, %c0_i32_811] : memref<64x32xf32, #tpu.memory_space<vmem>> -> memref<1x32xf32, #tpu.memory_space<vmem>>
      %1812 = tpu.memref_squeeze %1811 : memref<1x32xf32, #tpu.memory_space<vmem>> -> memref<32xf32, #tpu.memory_space<vmem>>
      %1813 = tpu.memref_slice %arg10[%1241] : memref<8x!tpu.dma_semaphore, #tpu.memory_space<semaphore_mem>> -> memref<1x!tpu.dma_semaphore, #tpu.memory_space<semaphore_mem>>
      %1814 = tpu.memref_squeeze %1813 : memref<1x!tpu.dma_semaphore, #tpu.memory_space<semaphore_mem>> -> memref<!tpu.dma_semaphore, #tpu.memory_space<semaphore_mem>>
      tpu.enqueue_dma source(%1810 : memref<32xf32, #tpu.memory_space<any>>) target(%1812 : memref<32xf32, #tpu.memory_space<vmem>>) target_semaphore(%1814 : memref<!tpu.dma_semaphore, #tpu.memory_space<semaphore_mem>>)
      %c8_i32_812 = arith.constant 8 : i32
      %1815 = arith.muli %1241, %c8_i32_812 : i32
      %c4_i32_813 = arith.constant 4 : i32
      %1816 = arith.addi %1815, %c4_i32_813 : i32
      %c0_i32_814 = arith.constant 0 : i32
      %1817 = tpu.memref_slice %arg2[%1227, %c0_i32_814] : memref<512x32xf32, #tpu.memory_space<any>> -> memref<1x32xf32, #tpu.memory_space<any>>
      %1818 = tpu.memref_squeeze %1817 : memref<1x32xf32, #tpu.memory_space<any>> -> memref<32xf32, #tpu.memory_space<any>>
      %c0_i32_815 = arith.constant 0 : i32
      %1819 = tpu.memref_slice %arg9[%1816, %c0_i32_815] : memref<64x32xf32, #tpu.memory_space<vmem>> -> memref<1x32xf32, #tpu.memory_space<vmem>>
      %1820 = tpu.memref_squeeze %1819 : memref<1x32xf32, #tpu.memory_space<vmem>> -> memref<32xf32, #tpu.memory_space<vmem>>
      %1821 = tpu.memref_slice %arg10[%1241] : memref<8x!tpu.dma_semaphore, #tpu.memory_space<semaphore_mem>> -> memref<1x!tpu.dma_semaphore, #tpu.memory_space<semaphore_mem>>
      %1822 = tpu.memref_squeeze %1821 : memref<1x!tpu.dma_semaphore, #tpu.memory_space<semaphore_mem>> -> memref<!tpu.dma_semaphore, #tpu.memory_space<semaphore_mem>>
      tpu.enqueue_dma source(%1818 : memref<32xf32, #tpu.memory_space<any>>) target(%1820 : memref<32xf32, #tpu.memory_space<vmem>>) target_semaphore(%1822 : memref<!tpu.dma_semaphore, #tpu.memory_space<semaphore_mem>>)
      %c8_i32_816 = arith.constant 8 : i32
      %1823 = arith.muli %1241, %c8_i32_816 : i32
      %c5_i32_817 = arith.constant 5 : i32
      %1824 = arith.addi %1823, %c5_i32_817 : i32
      %c0_i32_818 = arith.constant 0 : i32
      %1825 = tpu.memref_slice %arg2[%1231, %c0_i32_818] : memref<512x32xf32, #tpu.memory_space<any>> -> memref<1x32xf32, #tpu.memory_space<any>>
      %1826 = tpu.memref_squeeze %1825 : memref<1x32xf32, #tpu.memory_space<any>> -> memref<32xf32, #tpu.memory_space<any>>
      %c0_i32_819 = arith.constant 0 : i32
      %1827 = tpu.memref_slice %arg9[%1824, %c0_i32_819] : memref<64x32xf32, #tpu.memory_space<vmem>> -> memref<1x32xf32, #tpu.memory_space<vmem>>
      %1828 = tpu.memref_squeeze %1827 : memref<1x32xf32, #tpu.memory_space<vmem>> -> memref<32xf32, #tpu.memory_space<vmem>>
      %1829 = tpu.memref_slice %arg10[%1241] : memref<8x!tpu.dma_semaphore, #tpu.memory_space<semaphore_mem>> -> memref<1x!tpu.dma_semaphore, #tpu.memory_space<semaphore_mem>>
      %1830 = tpu.memref_squeeze %1829 : memref<1x!tpu.dma_semaphore, #tpu.memory_space<semaphore_mem>> -> memref<!tpu.dma_semaphore, #tpu.memory_space<semaphore_mem>>
      tpu.enqueue_dma source(%1826 : memref<32xf32, #tpu.memory_space<any>>) target(%1828 : memref<32xf32, #tpu.memory_space<vmem>>) target_semaphore(%1830 : memref<!tpu.dma_semaphore, #tpu.memory_space<semaphore_mem>>)
      %c8_i32_820 = arith.constant 8 : i32
      %1831 = arith.muli %1241, %c8_i32_820 : i32
      %c6_i32_821 = arith.constant 6 : i32
      %1832 = arith.addi %1831, %c6_i32_821 : i32
      %c0_i32_822 = arith.constant 0 : i32
      %1833 = tpu.memref_slice %arg2[%1235, %c0_i32_822] : memref<512x32xf32, #tpu.memory_space<any>> -> memref<1x32xf32, #tpu.memory_space<any>>
      %1834 = tpu.memref_squeeze %1833 : memref<1x32xf32, #tpu.memory_space<any>> -> memref<32xf32, #tpu.memory_space<any>>
      %c0_i32_823 = arith.constant 0 : i32
      %1835 = tpu.memref_slice %arg9[%1832, %c0_i32_823] : memref<64x32xf32, #tpu.memory_space<vmem>> -> memref<1x32xf32, #tpu.memory_space<vmem>>
      %1836 = tpu.memref_squeeze %1835 : memref<1x32xf32, #tpu.memory_space<vmem>> -> memref<32xf32, #tpu.memory_space<vmem>>
      %1837 = tpu.memref_slice %arg10[%1241] : memref<8x!tpu.dma_semaphore, #tpu.memory_space<semaphore_mem>> -> memref<1x!tpu.dma_semaphore, #tpu.memory_space<semaphore_mem>>
      %1838 = tpu.memref_squeeze %1837 : memref<1x!tpu.dma_semaphore, #tpu.memory_space<semaphore_mem>> -> memref<!tpu.dma_semaphore, #tpu.memory_space<semaphore_mem>>
      tpu.enqueue_dma source(%1834 : memref<32xf32, #tpu.memory_space<any>>) target(%1836 : memref<32xf32, #tpu.memory_space<vmem>>) target_semaphore(%1838 : memref<!tpu.dma_semaphore, #tpu.memory_space<semaphore_mem>>)
      %c8_i32_824 = arith.constant 8 : i32
      %1839 = arith.muli %1241, %c8_i32_824 : i32
      %c7_i32_825 = arith.constant 7 : i32
      %1840 = arith.addi %1839, %c7_i32_825 : i32
      %c0_i32_826 = arith.constant 0 : i32
      %1841 = tpu.memref_slice %arg2[%1239, %c0_i32_826] : memref<512x32xf32, #tpu.memory_space<any>> -> memref<1x32xf32, #tpu.memory_space<any>>
      %1842 = tpu.memref_squeeze %1841 : memref<1x32xf32, #tpu.memory_space<any>> -> memref<32xf32, #tpu.memory_space<any>>
      %c0_i32_827 = arith.constant 0 : i32
      %1843 = tpu.memref_slice %arg9[%1840, %c0_i32_827] : memref<64x32xf32, #tpu.memory_space<vmem>> -> memref<1x32xf32, #tpu.memory_space<vmem>>
      %1844 = tpu.memref_squeeze %1843 : memref<1x32xf32, #tpu.memory_space<vmem>> -> memref<32xf32, #tpu.memory_space<vmem>>
      %1845 = tpu.memref_slice %arg10[%1241] : memref<8x!tpu.dma_semaphore, #tpu.memory_space<semaphore_mem>> -> memref<1x!tpu.dma_semaphore, #tpu.memory_space<semaphore_mem>>
      %1846 = tpu.memref_squeeze %1845 : memref<1x!tpu.dma_semaphore, #tpu.memory_space<semaphore_mem>> -> memref<!tpu.dma_semaphore, #tpu.memory_space<semaphore_mem>>
      tpu.enqueue_dma source(%1842 : memref<32xf32, #tpu.memory_space<any>>) target(%1844 : memref<32xf32, #tpu.memory_space<vmem>>) target_semaphore(%1846 : memref<!tpu.dma_semaphore, #tpu.memory_space<semaphore_mem>>)
    } else {
    }
    %c8_i32_557 = arith.constant 8 : i32
    %1246 = arith.muli %1166, %c8_i32_557 : i32
    %c0_i32_558 = arith.constant 0 : i32
    %1247 = arith.addi %1246, %c0_i32_558 : i32
    %c0_i32_559 = arith.constant 0 : i32
    %1248 = tpu.memref_slice %arg2[%1170, %c0_i32_559] : memref<512x32xf32, #tpu.memory_space<any>> -> memref<1x32xf32, #tpu.memory_space<any>>
    %1249 = tpu.memref_squeeze %1248 : memref<1x32xf32, #tpu.memory_space<any>> -> memref<32xf32, #tpu.memory_space<any>>
    %c0_i32_560 = arith.constant 0 : i32
    %1250 = tpu.memref_slice %arg9[%1247, %c0_i32_560] : memref<64x32xf32, #tpu.memory_space<vmem>> -> memref<1x32xf32, #tpu.memory_space<vmem>>
    %1251 = tpu.memref_squeeze %1250 : memref<1x32xf32, #tpu.memory_space<vmem>> -> memref<32xf32, #tpu.memory_space<vmem>>
    %1252 = tpu.memref_slice %arg10[%1166] : memref<8x!tpu.dma_semaphore, #tpu.memory_space<semaphore_mem>> -> memref<1x!tpu.dma_semaphore, #tpu.memory_space<semaphore_mem>>
    %1253 = tpu.memref_squeeze %1252 : memref<1x!tpu.dma_semaphore, #tpu.memory_space<semaphore_mem>> -> memref<!tpu.dma_semaphore, #tpu.memory_space<semaphore_mem>>
    tpu.wait_dma2 semaphore(%1253 : memref<!tpu.dma_semaphore, #tpu.memory_space<semaphore_mem>>) src(%1249 : memref<32xf32, #tpu.memory_space<any>>) dst(%1251 : memref<32xf32, #tpu.memory_space<vmem>>)
    %c8_i32_561 = arith.constant 8 : i32
    %1254 = arith.muli %1166, %c8_i32_561 : i32
    %c1_i32_562 = arith.constant 1 : i32
    %1255 = arith.addi %1254, %c1_i32_562 : i32
    %c0_i32_563 = arith.constant 0 : i32
    %1256 = tpu.memref_slice %arg2[%1174, %c0_i32_563] : memref<512x32xf32, #tpu.memory_space<any>> -> memref<1x32xf32, #tpu.memory_space<any>>
    %1257 = tpu.memref_squeeze %1256 : memref<1x32xf32, #tpu.memory_space<any>> -> memref<32xf32, #tpu.memory_space<any>>
    %c0_i32_564 = arith.constant 0 : i32
    %1258 = tpu.memref_slice %arg9[%1255, %c0_i32_564] : memref<64x32xf32, #tpu.memory_space<vmem>> -> memref<1x32xf32, #tpu.memory_space<vmem>>
    %1259 = tpu.memref_squeeze %1258 : memref<1x32xf32, #tpu.memory_space<vmem>> -> memref<32xf32, #tpu.memory_space<vmem>>
    %1260 = tpu.memref_slice %arg10[%1166] : memref<8x!tpu.dma_semaphore, #tpu.memory_space<semaphore_mem>> -> memref<1x!tpu.dma_semaphore, #tpu.memory_space<semaphore_mem>>
    %1261 = tpu.memref_squeeze %1260 : memref<1x!tpu.dma_semaphore, #tpu.memory_space<semaphore_mem>> -> memref<!tpu.dma_semaphore, #tpu.memory_space<semaphore_mem>>
    tpu.wait_dma2 semaphore(%1261 : memref<!tpu.dma_semaphore, #tpu.memory_space<semaphore_mem>>) src(%1257 : memref<32xf32, #tpu.memory_space<any>>) dst(%1259 : memref<32xf32, #tpu.memory_space<vmem>>)
    %c8_i32_565 = arith.constant 8 : i32
    %1262 = arith.muli %1166, %c8_i32_565 : i32
    %c2_i32_566 = arith.constant 2 : i32
    %1263 = arith.addi %1262, %c2_i32_566 : i32
    %c0_i32_567 = arith.constant 0 : i32
    %1264 = tpu.memref_slice %arg2[%1178, %c0_i32_567] : memref<512x32xf32, #tpu.memory_space<any>> -> memref<1x32xf32, #tpu.memory_space<any>>
    %1265 = tpu.memref_squeeze %1264 : memref<1x32xf32, #tpu.memory_space<any>> -> memref<32xf32, #tpu.memory_space<any>>
    %c0_i32_568 = arith.constant 0 : i32
    %1266 = tpu.memref_slice %arg9[%1263, %c0_i32_568] : memref<64x32xf32, #tpu.memory_space<vmem>> -> memref<1x32xf32, #tpu.memory_space<vmem>>
    %1267 = tpu.memref_squeeze %1266 : memref<1x32xf32, #tpu.memory_space<vmem>> -> memref<32xf32, #tpu.memory_space<vmem>>
    %1268 = tpu.memref_slice %arg10[%1166] : memref<8x!tpu.dma_semaphore, #tpu.memory_space<semaphore_mem>> -> memref<1x!tpu.dma_semaphore, #tpu.memory_space<semaphore_mem>>
    %1269 = tpu.memref_squeeze %1268 : memref<1x!tpu.dma_semaphore, #tpu.memory_space<semaphore_mem>> -> memref<!tpu.dma_semaphore, #tpu.memory_space<semaphore_mem>>
    tpu.wait_dma2 semaphore(%1269 : memref<!tpu.dma_semaphore, #tpu.memory_space<semaphore_mem>>) src(%1265 : memref<32xf32, #tpu.memory_space<any>>) dst(%1267 : memref<32xf32, #tpu.memory_space<vmem>>)
    %c8_i32_569 = arith.constant 8 : i32
    %1270 = arith.muli %1166, %c8_i32_569 : i32
    %c3_i32_570 = arith.constant 3 : i32
    %1271 = arith.addi %1270, %c3_i32_570 : i32
    %c0_i32_571 = arith.constant 0 : i32
    %1272 = tpu.memref_slice %arg2[%1182, %c0_i32_571] : memref<512x32xf32, #tpu.memory_space<any>> -> memref<1x32xf32, #tpu.memory_space<any>>
    %1273 = tpu.memref_squeeze %1272 : memref<1x32xf32, #tpu.memory_space<any>> -> memref<32xf32, #tpu.memory_space<any>>
    %c0_i32_572 = arith.constant 0 : i32
    %1274 = tpu.memref_slice %arg9[%1271, %c0_i32_572] : memref<64x32xf32, #tpu.memory_space<vmem>> -> memref<1x32xf32, #tpu.memory_space<vmem>>
    %1275 = tpu.memref_squeeze %1274 : memref<1x32xf32, #tpu.memory_space<vmem>> -> memref<32xf32, #tpu.memory_space<vmem>>
    %1276 = tpu.memref_slice %arg10[%1166] : memref<8x!tpu.dma_semaphore, #tpu.memory_space<semaphore_mem>> -> memref<1x!tpu.dma_semaphore, #tpu.memory_space<semaphore_mem>>
    %1277 = tpu.memref_squeeze %1276 : memref<1x!tpu.dma_semaphore, #tpu.memory_space<semaphore_mem>> -> memref<!tpu.dma_semaphore, #tpu.memory_space<semaphore_mem>>
    tpu.wait_dma2 semaphore(%1277 : memref<!tpu.dma_semaphore, #tpu.memory_space<semaphore_mem>>) src(%1273 : memref<32xf32, #tpu.memory_space<any>>) dst(%1275 : memref<32xf32, #tpu.memory_space<vmem>>)
    %c8_i32_573 = arith.constant 8 : i32
    %1278 = arith.muli %1166, %c8_i32_573 : i32
    %c4_i32_574 = arith.constant 4 : i32
    %1279 = arith.addi %1278, %c4_i32_574 : i32
    %c0_i32_575 = arith.constant 0 : i32
    %1280 = tpu.memref_slice %arg2[%1186, %c0_i32_575] : memref<512x32xf32, #tpu.memory_space<any>> -> memref<1x32xf32, #tpu.memory_space<any>>
    %1281 = tpu.memref_squeeze %1280 : memref<1x32xf32, #tpu.memory_space<any>> -> memref<32xf32, #tpu.memory_space<any>>
    %c0_i32_576 = arith.constant 0 : i32
    %1282 = tpu.memref_slice %arg9[%1279, %c0_i32_576] : memref<64x32xf32, #tpu.memory_space<vmem>> -> memref<1x32xf32, #tpu.memory_space<vmem>>
    %1283 = tpu.memref_squeeze %1282 : memref<1x32xf32, #tpu.memory_space<vmem>> -> memref<32xf32, #tpu.memory_space<vmem>>
    %1284 = tpu.memref_slice %arg10[%1166] : memref<8x!tpu.dma_semaphore, #tpu.memory_space<semaphore_mem>> -> memref<1x!tpu.dma_semaphore, #tpu.memory_space<semaphore_mem>>
    %1285 = tpu.memref_squeeze %1284 : memref<1x!tpu.dma_semaphore, #tpu.memory_space<semaphore_mem>> -> memref<!tpu.dma_semaphore, #tpu.memory_space<semaphore_mem>>
    tpu.wait_dma2 semaphore(%1285 : memref<!tpu.dma_semaphore, #tpu.memory_space<semaphore_mem>>) src(%1281 : memref<32xf32, #tpu.memory_space<any>>) dst(%1283 : memref<32xf32, #tpu.memory_space<vmem>>)
    %c8_i32_577 = arith.constant 8 : i32
    %1286 = arith.muli %1166, %c8_i32_577 : i32
    %c5_i32_578 = arith.constant 5 : i32
    %1287 = arith.addi %1286, %c5_i32_578 : i32
    %c0_i32_579 = arith.constant 0 : i32
    %1288 = tpu.memref_slice %arg2[%1190, %c0_i32_579] : memref<512x32xf32, #tpu.memory_space<any>> -> memref<1x32xf32, #tpu.memory_space<any>>
    %1289 = tpu.memref_squeeze %1288 : memref<1x32xf32, #tpu.memory_space<any>> -> memref<32xf32, #tpu.memory_space<any>>
    %c0_i32_580 = arith.constant 0 : i32
    %1290 = tpu.memref_slice %arg9[%1287, %c0_i32_580] : memref<64x32xf32, #tpu.memory_space<vmem>> -> memref<1x32xf32, #tpu.memory_space<vmem>>
    %1291 = tpu.memref_squeeze %1290 : memref<1x32xf32, #tpu.memory_space<vmem>> -> memref<32xf32, #tpu.memory_space<vmem>>
    %1292 = tpu.memref_slice %arg10[%1166] : memref<8x!tpu.dma_semaphore, #tpu.memory_space<semaphore_mem>> -> memref<1x!tpu.dma_semaphore, #tpu.memory_space<semaphore_mem>>
    %1293 = tpu.memref_squeeze %1292 : memref<1x!tpu.dma_semaphore, #tpu.memory_space<semaphore_mem>> -> memref<!tpu.dma_semaphore, #tpu.memory_space<semaphore_mem>>
    tpu.wait_dma2 semaphore(%1293 : memref<!tpu.dma_semaphore, #tpu.memory_space<semaphore_mem>>) src(%1289 : memref<32xf32, #tpu.memory_space<any>>) dst(%1291 : memref<32xf32, #tpu.memory_space<vmem>>)
    %c8_i32_581 = arith.constant 8 : i32
    %1294 = arith.muli %1166, %c8_i32_581 : i32
    %c6_i32_582 = arith.constant 6 : i32
    %1295 = arith.addi %1294, %c6_i32_582 : i32
    %c0_i32_583 = arith.constant 0 : i32
    %1296 = tpu.memref_slice %arg2[%1194, %c0_i32_583] : memref<512x32xf32, #tpu.memory_space<any>> -> memref<1x32xf32, #tpu.memory_space<any>>
    %1297 = tpu.memref_squeeze %1296 : memref<1x32xf32, #tpu.memory_space<any>> -> memref<32xf32, #tpu.memory_space<any>>
    %c0_i32_584 = arith.constant 0 : i32
    %1298 = tpu.memref_slice %arg9[%1295, %c0_i32_584] : memref<64x32xf32, #tpu.memory_space<vmem>> -> memref<1x32xf32, #tpu.memory_space<vmem>>
    %1299 = tpu.memref_squeeze %1298 : memref<1x32xf32, #tpu.memory_space<vmem>> -> memref<32xf32, #tpu.memory_space<vmem>>
    %1300 = tpu.memref_slice %arg10[%1166] : memref<8x!tpu.dma_semaphore, #tpu.memory_space<semaphore_mem>> -> memref<1x!tpu.dma_semaphore, #tpu.memory_space<semaphore_mem>>
    %1301 = tpu.memref_squeeze %1300 : memref<1x!tpu.dma_semaphore, #tpu.memory_space<semaphore_mem>> -> memref<!tpu.dma_semaphore, #tpu.memory_space<semaphore_mem>>
    tpu.wait_dma2 semaphore(%1301 : memref<!tpu.dma_semaphore, #tpu.memory_space<semaphore_mem>>) src(%1297 : memref<32xf32, #tpu.memory_space<any>>) dst(%1299 : memref<32xf32, #tpu.memory_space<vmem>>)
    %c8_i32_585 = arith.constant 8 : i32
    %1302 = arith.muli %1166, %c8_i32_585 : i32
    %c7_i32_586 = arith.constant 7 : i32
    %1303 = arith.addi %1302, %c7_i32_586 : i32
    %c0_i32_587 = arith.constant 0 : i32
    %1304 = tpu.memref_slice %arg2[%1198, %c0_i32_587] : memref<512x32xf32, #tpu.memory_space<any>> -> memref<1x32xf32, #tpu.memory_space<any>>
    %1305 = tpu.memref_squeeze %1304 : memref<1x32xf32, #tpu.memory_space<any>> -> memref<32xf32, #tpu.memory_space<any>>
    %c0_i32_588 = arith.constant 0 : i32
    %1306 = tpu.memref_slice %arg9[%1303, %c0_i32_588] : memref<64x32xf32, #tpu.memory_space<vmem>> -> memref<1x32xf32, #tpu.memory_space<vmem>>
    %1307 = tpu.memref_squeeze %1306 : memref<1x32xf32, #tpu.memory_space<vmem>> -> memref<32xf32, #tpu.memory_space<vmem>>
    %1308 = tpu.memref_slice %arg10[%1166] : memref<8x!tpu.dma_semaphore, #tpu.memory_space<semaphore_mem>> -> memref<1x!tpu.dma_semaphore, #tpu.memory_space<semaphore_mem>>
    %1309 = tpu.memref_squeeze %1308 : memref<1x!tpu.dma_semaphore, #tpu.memory_space<semaphore_mem>> -> memref<!tpu.dma_semaphore, #tpu.memory_space<semaphore_mem>>
    tpu.wait_dma2 semaphore(%1309 : memref<!tpu.dma_semaphore, #tpu.memory_space<semaphore_mem>>) src(%1305 : memref<32xf32, #tpu.memory_space<any>>) dst(%1307 : memref<32xf32, #tpu.memory_space<vmem>>)
    %c8_i32_589 = arith.constant 8 : i32
    %1310 = arith.muli %1166, %c8_i32_589 : i32
    %1311 = tpu.assume_multiple %1310, 8 : i32
    %1312 = arith.index_cast %1311 : i32 to index
    %c0_590 = arith.constant 0 : index
    %1313 = vector.load %arg9[%1312, %c0_590] : memref<64x32xf32, #tpu.memory_space<vmem>>, vector<8x32xf32>
    %1314 = arith.addf %1164, %1313 : vector<8x32xf32>
    %c5_i32_591 = arith.constant 5 : i32
    %1315 = arith.addi %563, %c5_i32_591 : i32
    %c7_i32_592 = arith.constant 7 : i32
    %1316 = arith.andi %1315, %c7_i32_592 : i32
    %c0_i32_593 = arith.constant 0 : i32
    %1317 = arith.addi %562, %c0_i32_593 : i32
    %1318 = arith.addi %1317, %c5_i32_591 : i32
    %1319 = arith.index_cast %1318 : i32 to index
    %1320 = memref.load %arg1[%1319] : memref<64xi32, #tpu.memory_space<smem>>
    %c8_i32_594 = arith.constant 8 : i32
    %1321 = arith.addi %562, %c8_i32_594 : i32
    %1322 = arith.addi %1321, %c5_i32_591 : i32
    %1323 = arith.index_cast %1322 : i32 to index
    %1324 = memref.load %arg1[%1323] : memref<64xi32, #tpu.memory_space<smem>>
    %c16_i32_595 = arith.constant 16 : i32
    %1325 = arith.addi %562, %c16_i32_595 : i32
    %1326 = arith.addi %1325, %c5_i32_591 : i32
    %1327 = arith.index_cast %1326 : i32 to index
    %1328 = memref.load %arg1[%1327] : memref<64xi32, #tpu.memory_space<smem>>
    %c24_i32_596 = arith.constant 24 : i32
    %1329 = arith.addi %562, %c24_i32_596 : i32
    %1330 = arith.addi %1329, %c5_i32_591 : i32
    %1331 = arith.index_cast %1330 : i32 to index
    %1332 = memref.load %arg1[%1331] : memref<64xi32, #tpu.memory_space<smem>>
    %c32_i32_597 = arith.constant 32 : i32
    %1333 = arith.addi %562, %c32_i32_597 : i32
    %1334 = arith.addi %1333, %c5_i32_591 : i32
    %1335 = arith.index_cast %1334 : i32 to index
    %1336 = memref.load %arg1[%1335] : memref<64xi32, #tpu.memory_space<smem>>
    %c40_i32_598 = arith.constant 40 : i32
    %1337 = arith.addi %562, %c40_i32_598 : i32
    %1338 = arith.addi %1337, %c5_i32_591 : i32
    %1339 = arith.index_cast %1338 : i32 to index
    %1340 = memref.load %arg1[%1339] : memref<64xi32, #tpu.memory_space<smem>>
    %c48_i32_599 = arith.constant 48 : i32
    %1341 = arith.addi %562, %c48_i32_599 : i32
    %1342 = arith.addi %1341, %c5_i32_591 : i32
    %1343 = arith.index_cast %1342 : i32 to index
    %1344 = memref.load %arg1[%1343] : memref<64xi32, #tpu.memory_space<smem>>
    %c56_i32_600 = arith.constant 56 : i32
    %1345 = arith.addi %562, %c56_i32_600 : i32
    %1346 = arith.addi %1345, %c5_i32_591 : i32
    %1347 = arith.index_cast %1346 : i32 to index
    %1348 = memref.load %arg1[%1347] : memref<64xi32, #tpu.memory_space<smem>>
    %c7_i32_601 = arith.constant 7 : i32
    %1349 = arith.addi %c5_i32_591, %c7_i32_601 : i32
    %c8_i32_602 = arith.constant 8 : i32
    %1350 = arith.cmpi sge, %1349, %c8_i32_602 : i32
    %c8_i32_603 = arith.constant 8 : i32
    %1351 = arith.subi %1349, %c8_i32_603 : i32
    %1352 = arith.select %1350, %1351, %1349 : i32
    %1353 = arith.extui %1350 : i1 to i32
    %1354 = arith.addi %c0_i32_279, %1353 : i32
    %c0_i32_604 = arith.constant 0 : i32
    %1355 = arith.minsi %1354, %c0_i32_604 : i32
    %c64_i32_605 = arith.constant 64 : i32
    %1356 = arith.muli %1355, %c64_i32_605 : i32
    %1357 = arith.addi %0, %1356 : i32
    %c0_i32_606 = arith.constant 0 : i32
    %1358 = arith.addi %1357, %c0_i32_606 : i32
    %1359 = arith.addi %1358, %1352 : i32
    %1360 = arith.index_cast %1359 : i32 to index
    %1361 = memref.load %arg1[%1360] : memref<64xi32, #tpu.memory_space<smem>>
    %c8_i32_607 = arith.constant 8 : i32
    %1362 = arith.addi %1357, %c8_i32_607 : i32
    %1363 = arith.addi %1362, %1352 : i32
    %1364 = arith.index_cast %1363 : i32 to index
    %1365 = memref.load %arg1[%1364] : memref<64xi32, #tpu.memory_space<smem>>
    %c16_i32_608 = arith.constant 16 : i32
    %1366 = arith.addi %1357, %c16_i32_608 : i32
    %1367 = arith.addi %1366, %1352 : i32
    %1368 = arith.index_cast %1367 : i32 to index
    %1369 = memref.load %arg1[%1368] : memref<64xi32, #tpu.memory_space<smem>>
    %c24_i32_609 = arith.constant 24 : i32
    %1370 = arith.addi %1357, %c24_i32_609 : i32
    %1371 = arith.addi %1370, %1352 : i32
    %1372 = arith.index_cast %1371 : i32 to index
    %1373 = memref.load %arg1[%1372] : memref<64xi32, #tpu.memory_space<smem>>
    %c32_i32_610 = arith.constant 32 : i32
    %1374 = arith.addi %1357, %c32_i32_610 : i32
    %1375 = arith.addi %1374, %1352 : i32
    %1376 = arith.index_cast %1375 : i32 to index
    %1377 = memref.load %arg1[%1376] : memref<64xi32, #tpu.memory_space<smem>>
    %c40_i32_611 = arith.constant 40 : i32
    %1378 = arith.addi %1357, %c40_i32_611 : i32
    %1379 = arith.addi %1378, %1352 : i32
    %1380 = arith.index_cast %1379 : i32 to index
    %1381 = memref.load %arg1[%1380] : memref<64xi32, #tpu.memory_space<smem>>
    %c48_i32_612 = arith.constant 48 : i32
    %1382 = arith.addi %1357, %c48_i32_612 : i32
    %1383 = arith.addi %1382, %1352 : i32
    %1384 = arith.index_cast %1383 : i32 to index
    %1385 = memref.load %arg1[%1384] : memref<64xi32, #tpu.memory_space<smem>>
    %c56_i32_613 = arith.constant 56 : i32
    %1386 = arith.addi %1357, %c56_i32_613 : i32
    %1387 = arith.addi %1386, %1352 : i32
    %1388 = arith.index_cast %1387 : i32 to index
    %1389 = memref.load %arg1[%1388] : memref<64xi32, #tpu.memory_space<smem>>
    %c7_i32_614 = arith.constant 7 : i32
    %1390 = arith.addi %1315, %c7_i32_614 : i32
    %c7_i32_615 = arith.constant 7 : i32
    %1391 = arith.andi %1390, %c7_i32_615 : i32
    %c7_i32_616 = arith.constant 7 : i32
    %1392 = arith.addi %1315, %c7_i32_616 : i32
    %c8_i32_617 = arith.constant 8 : i32
    %1393 = arith.cmpi slt, %1392, %c8_i32_617 : i32
    %1394 = arith.extui %1393 : i1 to i32
    %c0_i32_618 = arith.constant 0 : i32
    %1395 = arith.cmpi ne, %1394, %c0_i32_618 : i32
    scf.if %1395 {
      %c8_i32_796 = arith.constant 8 : i32
      %1783 = arith.muli %1391, %c8_i32_796 : i32
      %c0_i32_797 = arith.constant 0 : i32
      %1784 = arith.addi %1783, %c0_i32_797 : i32
      %c0_i32_798 = arith.constant 0 : i32
      %1785 = tpu.memref_slice %arg2[%1361, %c0_i32_798] : memref<512x32xf32, #tpu.memory_space<any>> -> memref<1x32xf32, #tpu.memory_space<any>>
      %1786 = tpu.memref_squeeze %1785 : memref<1x32xf32, #tpu.memory_space<any>> -> memref<32xf32, #tpu.memory_space<any>>
      %c0_i32_799 = arith.constant 0 : i32
      %1787 = tpu.memref_slice %arg9[%1784, %c0_i32_799] : memref<64x32xf32, #tpu.memory_space<vmem>> -> memref<1x32xf32, #tpu.memory_space<vmem>>
      %1788 = tpu.memref_squeeze %1787 : memref<1x32xf32, #tpu.memory_space<vmem>> -> memref<32xf32, #tpu.memory_space<vmem>>
      %1789 = tpu.memref_slice %arg10[%1391] : memref<8x!tpu.dma_semaphore, #tpu.memory_space<semaphore_mem>> -> memref<1x!tpu.dma_semaphore, #tpu.memory_space<semaphore_mem>>
      %1790 = tpu.memref_squeeze %1789 : memref<1x!tpu.dma_semaphore, #tpu.memory_space<semaphore_mem>> -> memref<!tpu.dma_semaphore, #tpu.memory_space<semaphore_mem>>
      tpu.enqueue_dma source(%1786 : memref<32xf32, #tpu.memory_space<any>>) target(%1788 : memref<32xf32, #tpu.memory_space<vmem>>) target_semaphore(%1790 : memref<!tpu.dma_semaphore, #tpu.memory_space<semaphore_mem>>)
      %c8_i32_800 = arith.constant 8 : i32
      %1791 = arith.muli %1391, %c8_i32_800 : i32
      %c1_i32_801 = arith.constant 1 : i32
      %1792 = arith.addi %1791, %c1_i32_801 : i32
      %c0_i32_802 = arith.constant 0 : i32
      %1793 = tpu.memref_slice %arg2[%1365, %c0_i32_802] : memref<512x32xf32, #tpu.memory_space<any>> -> memref<1x32xf32, #tpu.memory_space<any>>
      %1794 = tpu.memref_squeeze %1793 : memref<1x32xf32, #tpu.memory_space<any>> -> memref<32xf32, #tpu.memory_space<any>>
      %c0_i32_803 = arith.constant 0 : i32
      %1795 = tpu.memref_slice %arg9[%1792, %c0_i32_803] : memref<64x32xf32, #tpu.memory_space<vmem>> -> memref<1x32xf32, #tpu.memory_space<vmem>>
      %1796 = tpu.memref_squeeze %1795 : memref<1x32xf32, #tpu.memory_space<vmem>> -> memref<32xf32, #tpu.memory_space<vmem>>
      %1797 = tpu.memref_slice %arg10[%1391] : memref<8x!tpu.dma_semaphore, #tpu.memory_space<semaphore_mem>> -> memref<1x!tpu.dma_semaphore, #tpu.memory_space<semaphore_mem>>
      %1798 = tpu.memref_squeeze %1797 : memref<1x!tpu.dma_semaphore, #tpu.memory_space<semaphore_mem>> -> memref<!tpu.dma_semaphore, #tpu.memory_space<semaphore_mem>>
      tpu.enqueue_dma source(%1794 : memref<32xf32, #tpu.memory_space<any>>) target(%1796 : memref<32xf32, #tpu.memory_space<vmem>>) target_semaphore(%1798 : memref<!tpu.dma_semaphore, #tpu.memory_space<semaphore_mem>>)
      %c8_i32_804 = arith.constant 8 : i32
      %1799 = arith.muli %1391, %c8_i32_804 : i32
      %c2_i32_805 = arith.constant 2 : i32
      %1800 = arith.addi %1799, %c2_i32_805 : i32
      %c0_i32_806 = arith.constant 0 : i32
      %1801 = tpu.memref_slice %arg2[%1369, %c0_i32_806] : memref<512x32xf32, #tpu.memory_space<any>> -> memref<1x32xf32, #tpu.memory_space<any>>
      %1802 = tpu.memref_squeeze %1801 : memref<1x32xf32, #tpu.memory_space<any>> -> memref<32xf32, #tpu.memory_space<any>>
      %c0_i32_807 = arith.constant 0 : i32
      %1803 = tpu.memref_slice %arg9[%1800, %c0_i32_807] : memref<64x32xf32, #tpu.memory_space<vmem>> -> memref<1x32xf32, #tpu.memory_space<vmem>>
      %1804 = tpu.memref_squeeze %1803 : memref<1x32xf32, #tpu.memory_space<vmem>> -> memref<32xf32, #tpu.memory_space<vmem>>
      %1805 = tpu.memref_slice %arg10[%1391] : memref<8x!tpu.dma_semaphore, #tpu.memory_space<semaphore_mem>> -> memref<1x!tpu.dma_semaphore, #tpu.memory_space<semaphore_mem>>
      %1806 = tpu.memref_squeeze %1805 : memref<1x!tpu.dma_semaphore, #tpu.memory_space<semaphore_mem>> -> memref<!tpu.dma_semaphore, #tpu.memory_space<semaphore_mem>>
      tpu.enqueue_dma source(%1802 : memref<32xf32, #tpu.memory_space<any>>) target(%1804 : memref<32xf32, #tpu.memory_space<vmem>>) target_semaphore(%1806 : memref<!tpu.dma_semaphore, #tpu.memory_space<semaphore_mem>>)
      %c8_i32_808 = arith.constant 8 : i32
      %1807 = arith.muli %1391, %c8_i32_808 : i32
      %c3_i32_809 = arith.constant 3 : i32
      %1808 = arith.addi %1807, %c3_i32_809 : i32
      %c0_i32_810 = arith.constant 0 : i32
      %1809 = tpu.memref_slice %arg2[%1373, %c0_i32_810] : memref<512x32xf32, #tpu.memory_space<any>> -> memref<1x32xf32, #tpu.memory_space<any>>
      %1810 = tpu.memref_squeeze %1809 : memref<1x32xf32, #tpu.memory_space<any>> -> memref<32xf32, #tpu.memory_space<any>>
      %c0_i32_811 = arith.constant 0 : i32
      %1811 = tpu.memref_slice %arg9[%1808, %c0_i32_811] : memref<64x32xf32, #tpu.memory_space<vmem>> -> memref<1x32xf32, #tpu.memory_space<vmem>>
      %1812 = tpu.memref_squeeze %1811 : memref<1x32xf32, #tpu.memory_space<vmem>> -> memref<32xf32, #tpu.memory_space<vmem>>
      %1813 = tpu.memref_slice %arg10[%1391] : memref<8x!tpu.dma_semaphore, #tpu.memory_space<semaphore_mem>> -> memref<1x!tpu.dma_semaphore, #tpu.memory_space<semaphore_mem>>
      %1814 = tpu.memref_squeeze %1813 : memref<1x!tpu.dma_semaphore, #tpu.memory_space<semaphore_mem>> -> memref<!tpu.dma_semaphore, #tpu.memory_space<semaphore_mem>>
      tpu.enqueue_dma source(%1810 : memref<32xf32, #tpu.memory_space<any>>) target(%1812 : memref<32xf32, #tpu.memory_space<vmem>>) target_semaphore(%1814 : memref<!tpu.dma_semaphore, #tpu.memory_space<semaphore_mem>>)
      %c8_i32_812 = arith.constant 8 : i32
      %1815 = arith.muli %1391, %c8_i32_812 : i32
      %c4_i32_813 = arith.constant 4 : i32
      %1816 = arith.addi %1815, %c4_i32_813 : i32
      %c0_i32_814 = arith.constant 0 : i32
      %1817 = tpu.memref_slice %arg2[%1377, %c0_i32_814] : memref<512x32xf32, #tpu.memory_space<any>> -> memref<1x32xf32, #tpu.memory_space<any>>
      %1818 = tpu.memref_squeeze %1817 : memref<1x32xf32, #tpu.memory_space<any>> -> memref<32xf32, #tpu.memory_space<any>>
      %c0_i32_815 = arith.constant 0 : i32
      %1819 = tpu.memref_slice %arg9[%1816, %c0_i32_815] : memref<64x32xf32, #tpu.memory_space<vmem>> -> memref<1x32xf32, #tpu.memory_space<vmem>>
      %1820 = tpu.memref_squeeze %1819 : memref<1x32xf32, #tpu.memory_space<vmem>> -> memref<32xf32, #tpu.memory_space<vmem>>
      %1821 = tpu.memref_slice %arg10[%1391] : memref<8x!tpu.dma_semaphore, #tpu.memory_space<semaphore_mem>> -> memref<1x!tpu.dma_semaphore, #tpu.memory_space<semaphore_mem>>
      %1822 = tpu.memref_squeeze %1821 : memref<1x!tpu.dma_semaphore, #tpu.memory_space<semaphore_mem>> -> memref<!tpu.dma_semaphore, #tpu.memory_space<semaphore_mem>>
      tpu.enqueue_dma source(%1818 : memref<32xf32, #tpu.memory_space<any>>) target(%1820 : memref<32xf32, #tpu.memory_space<vmem>>) target_semaphore(%1822 : memref<!tpu.dma_semaphore, #tpu.memory_space<semaphore_mem>>)
      %c8_i32_816 = arith.constant 8 : i32
      %1823 = arith.muli %1391, %c8_i32_816 : i32
      %c5_i32_817 = arith.constant 5 : i32
      %1824 = arith.addi %1823, %c5_i32_817 : i32
      %c0_i32_818 = arith.constant 0 : i32
      %1825 = tpu.memref_slice %arg2[%1381, %c0_i32_818] : memref<512x32xf32, #tpu.memory_space<any>> -> memref<1x32xf32, #tpu.memory_space<any>>
      %1826 = tpu.memref_squeeze %1825 : memref<1x32xf32, #tpu.memory_space<any>> -> memref<32xf32, #tpu.memory_space<any>>
      %c0_i32_819 = arith.constant 0 : i32
      %1827 = tpu.memref_slice %arg9[%1824, %c0_i32_819] : memref<64x32xf32, #tpu.memory_space<vmem>> -> memref<1x32xf32, #tpu.memory_space<vmem>>
      %1828 = tpu.memref_squeeze %1827 : memref<1x32xf32, #tpu.memory_space<vmem>> -> memref<32xf32, #tpu.memory_space<vmem>>
      %1829 = tpu.memref_slice %arg10[%1391] : memref<8x!tpu.dma_semaphore, #tpu.memory_space<semaphore_mem>> -> memref<1x!tpu.dma_semaphore, #tpu.memory_space<semaphore_mem>>
      %1830 = tpu.memref_squeeze %1829 : memref<1x!tpu.dma_semaphore, #tpu.memory_space<semaphore_mem>> -> memref<!tpu.dma_semaphore, #tpu.memory_space<semaphore_mem>>
      tpu.enqueue_dma source(%1826 : memref<32xf32, #tpu.memory_space<any>>) target(%1828 : memref<32xf32, #tpu.memory_space<vmem>>) target_semaphore(%1830 : memref<!tpu.dma_semaphore, #tpu.memory_space<semaphore_mem>>)
      %c8_i32_820 = arith.constant 8 : i32
      %1831 = arith.muli %1391, %c8_i32_820 : i32
      %c6_i32_821 = arith.constant 6 : i32
      %1832 = arith.addi %1831, %c6_i32_821 : i32
      %c0_i32_822 = arith.constant 0 : i32
      %1833 = tpu.memref_slice %arg2[%1385, %c0_i32_822] : memref<512x32xf32, #tpu.memory_space<any>> -> memref<1x32xf32, #tpu.memory_space<any>>
      %1834 = tpu.memref_squeeze %1833 : memref<1x32xf32, #tpu.memory_space<any>> -> memref<32xf32, #tpu.memory_space<any>>
      %c0_i32_823 = arith.constant 0 : i32
      %1835 = tpu.memref_slice %arg9[%1832, %c0_i32_823] : memref<64x32xf32, #tpu.memory_space<vmem>> -> memref<1x32xf32, #tpu.memory_space<vmem>>
      %1836 = tpu.memref_squeeze %1835 : memref<1x32xf32, #tpu.memory_space<vmem>> -> memref<32xf32, #tpu.memory_space<vmem>>
      %1837 = tpu.memref_slice %arg10[%1391] : memref<8x!tpu.dma_semaphore, #tpu.memory_space<semaphore_mem>> -> memref<1x!tpu.dma_semaphore, #tpu.memory_space<semaphore_mem>>
      %1838 = tpu.memref_squeeze %1837 : memref<1x!tpu.dma_semaphore, #tpu.memory_space<semaphore_mem>> -> memref<!tpu.dma_semaphore, #tpu.memory_space<semaphore_mem>>
      tpu.enqueue_dma source(%1834 : memref<32xf32, #tpu.memory_space<any>>) target(%1836 : memref<32xf32, #tpu.memory_space<vmem>>) target_semaphore(%1838 : memref<!tpu.dma_semaphore, #tpu.memory_space<semaphore_mem>>)
      %c8_i32_824 = arith.constant 8 : i32
      %1839 = arith.muli %1391, %c8_i32_824 : i32
      %c7_i32_825 = arith.constant 7 : i32
      %1840 = arith.addi %1839, %c7_i32_825 : i32
      %c0_i32_826 = arith.constant 0 : i32
      %1841 = tpu.memref_slice %arg2[%1389, %c0_i32_826] : memref<512x32xf32, #tpu.memory_space<any>> -> memref<1x32xf32, #tpu.memory_space<any>>
      %1842 = tpu.memref_squeeze %1841 : memref<1x32xf32, #tpu.memory_space<any>> -> memref<32xf32, #tpu.memory_space<any>>
      %c0_i32_827 = arith.constant 0 : i32
      %1843 = tpu.memref_slice %arg9[%1840, %c0_i32_827] : memref<64x32xf32, #tpu.memory_space<vmem>> -> memref<1x32xf32, #tpu.memory_space<vmem>>
      %1844 = tpu.memref_squeeze %1843 : memref<1x32xf32, #tpu.memory_space<vmem>> -> memref<32xf32, #tpu.memory_space<vmem>>
      %1845 = tpu.memref_slice %arg10[%1391] : memref<8x!tpu.dma_semaphore, #tpu.memory_space<semaphore_mem>> -> memref<1x!tpu.dma_semaphore, #tpu.memory_space<semaphore_mem>>
      %1846 = tpu.memref_squeeze %1845 : memref<1x!tpu.dma_semaphore, #tpu.memory_space<semaphore_mem>> -> memref<!tpu.dma_semaphore, #tpu.memory_space<semaphore_mem>>
      tpu.enqueue_dma source(%1842 : memref<32xf32, #tpu.memory_space<any>>) target(%1844 : memref<32xf32, #tpu.memory_space<vmem>>) target_semaphore(%1846 : memref<!tpu.dma_semaphore, #tpu.memory_space<semaphore_mem>>)
    } else {
    }
    %c8_i32_619 = arith.constant 8 : i32
    %1396 = arith.muli %1316, %c8_i32_619 : i32
    %c0_i32_620 = arith.constant 0 : i32
    %1397 = arith.addi %1396, %c0_i32_620 : i32
    %c0_i32_621 = arith.constant 0 : i32
    %1398 = tpu.memref_slice %arg2[%1320, %c0_i32_621] : memref<512x32xf32, #tpu.memory_space<any>> -> memref<1x32xf32, #tpu.memory_space<any>>
    %1399 = tpu.memref_squeeze %1398 : memref<1x32xf32, #tpu.memory_space<any>> -> memref<32xf32, #tpu.memory_space<any>>
    %c0_i32_622 = arith.constant 0 : i32
    %1400 = tpu.memref_slice %arg9[%1397, %c0_i32_622] : memref<64x32xf32, #tpu.memory_space<vmem>> -> memref<1x32xf32, #tpu.memory_space<vmem>>
    %1401 = tpu.memref_squeeze %1400 : memref<1x32xf32, #tpu.memory_space<vmem>> -> memref<32xf32, #tpu.memory_space<vmem>>
    %1402 = tpu.memref_slice %arg10[%1316] : memref<8x!tpu.dma_semaphore, #tpu.memory_space<semaphore_mem>> -> memref<1x!tpu.dma_semaphore, #tpu.memory_space<semaphore_mem>>
    %1403 = tpu.memref_squeeze %1402 : memref<1x!tpu.dma_semaphore, #tpu.memory_space<semaphore_mem>> -> memref<!tpu.dma_semaphore, #tpu.memory_space<semaphore_mem>>
    tpu.wait_dma2 semaphore(%1403 : memref<!tpu.dma_semaphore, #tpu.memory_space<semaphore_mem>>) src(%1399 : memref<32xf32, #tpu.memory_space<any>>) dst(%1401 : memref<32xf32, #tpu.memory_space<vmem>>)
    %c8_i32_623 = arith.constant 8 : i32
    %1404 = arith.muli %1316, %c8_i32_623 : i32
    %c1_i32_624 = arith.constant 1 : i32
    %1405 = arith.addi %1404, %c1_i32_624 : i32
    %c0_i32_625 = arith.constant 0 : i32
    %1406 = tpu.memref_slice %arg2[%1324, %c0_i32_625] : memref<512x32xf32, #tpu.memory_space<any>> -> memref<1x32xf32, #tpu.memory_space<any>>
    %1407 = tpu.memref_squeeze %1406 : memref<1x32xf32, #tpu.memory_space<any>> -> memref<32xf32, #tpu.memory_space<any>>
    %c0_i32_626 = arith.constant 0 : i32
    %1408 = tpu.memref_slice %arg9[%1405, %c0_i32_626] : memref<64x32xf32, #tpu.memory_space<vmem>> -> memref<1x32xf32, #tpu.memory_space<vmem>>
    %1409 = tpu.memref_squeeze %1408 : memref<1x32xf32, #tpu.memory_space<vmem>> -> memref<32xf32, #tpu.memory_space<vmem>>
    %1410 = tpu.memref_slice %arg10[%1316] : memref<8x!tpu.dma_semaphore, #tpu.memory_space<semaphore_mem>> -> memref<1x!tpu.dma_semaphore, #tpu.memory_space<semaphore_mem>>
    %1411 = tpu.memref_squeeze %1410 : memref<1x!tpu.dma_semaphore, #tpu.memory_space<semaphore_mem>> -> memref<!tpu.dma_semaphore, #tpu.memory_space<semaphore_mem>>
    tpu.wait_dma2 semaphore(%1411 : memref<!tpu.dma_semaphore, #tpu.memory_space<semaphore_mem>>) src(%1407 : memref<32xf32, #tpu.memory_space<any>>) dst(%1409 : memref<32xf32, #tpu.memory_space<vmem>>)
    %c8_i32_627 = arith.constant 8 : i32
    %1412 = arith.muli %1316, %c8_i32_627 : i32
    %c2_i32_628 = arith.constant 2 : i32
    %1413 = arith.addi %1412, %c2_i32_628 : i32
    %c0_i32_629 = arith.constant 0 : i32
    %1414 = tpu.memref_slice %arg2[%1328, %c0_i32_629] : memref<512x32xf32, #tpu.memory_space<any>> -> memref<1x32xf32, #tpu.memory_space<any>>
    %1415 = tpu.memref_squeeze %1414 : memref<1x32xf32, #tpu.memory_space<any>> -> memref<32xf32, #tpu.memory_space<any>>
    %c0_i32_630 = arith.constant 0 : i32
    %1416 = tpu.memref_slice %arg9[%1413, %c0_i32_630] : memref<64x32xf32, #tpu.memory_space<vmem>> -> memref<1x32xf32, #tpu.memory_space<vmem>>
    %1417 = tpu.memref_squeeze %1416 : memref<1x32xf32, #tpu.memory_space<vmem>> -> memref<32xf32, #tpu.memory_space<vmem>>
    %1418 = tpu.memref_slice %arg10[%1316] : memref<8x!tpu.dma_semaphore, #tpu.memory_space<semaphore_mem>> -> memref<1x!tpu.dma_semaphore, #tpu.memory_space<semaphore_mem>>
    %1419 = tpu.memref_squeeze %1418 : memref<1x!tpu.dma_semaphore, #tpu.memory_space<semaphore_mem>> -> memref<!tpu.dma_semaphore, #tpu.memory_space<semaphore_mem>>
    tpu.wait_dma2 semaphore(%1419 : memref<!tpu.dma_semaphore, #tpu.memory_space<semaphore_mem>>) src(%1415 : memref<32xf32, #tpu.memory_space<any>>) dst(%1417 : memref<32xf32, #tpu.memory_space<vmem>>)
    %c8_i32_631 = arith.constant 8 : i32
    %1420 = arith.muli %1316, %c8_i32_631 : i32
    %c3_i32_632 = arith.constant 3 : i32
    %1421 = arith.addi %1420, %c3_i32_632 : i32
    %c0_i32_633 = arith.constant 0 : i32
    %1422 = tpu.memref_slice %arg2[%1332, %c0_i32_633] : memref<512x32xf32, #tpu.memory_space<any>> -> memref<1x32xf32, #tpu.memory_space<any>>
    %1423 = tpu.memref_squeeze %1422 : memref<1x32xf32, #tpu.memory_space<any>> -> memref<32xf32, #tpu.memory_space<any>>
    %c0_i32_634 = arith.constant 0 : i32
    %1424 = tpu.memref_slice %arg9[%1421, %c0_i32_634] : memref<64x32xf32, #tpu.memory_space<vmem>> -> memref<1x32xf32, #tpu.memory_space<vmem>>
    %1425 = tpu.memref_squeeze %1424 : memref<1x32xf32, #tpu.memory_space<vmem>> -> memref<32xf32, #tpu.memory_space<vmem>>
    %1426 = tpu.memref_slice %arg10[%1316] : memref<8x!tpu.dma_semaphore, #tpu.memory_space<semaphore_mem>> -> memref<1x!tpu.dma_semaphore, #tpu.memory_space<semaphore_mem>>
    %1427 = tpu.memref_squeeze %1426 : memref<1x!tpu.dma_semaphore, #tpu.memory_space<semaphore_mem>> -> memref<!tpu.dma_semaphore, #tpu.memory_space<semaphore_mem>>
    tpu.wait_dma2 semaphore(%1427 : memref<!tpu.dma_semaphore, #tpu.memory_space<semaphore_mem>>) src(%1423 : memref<32xf32, #tpu.memory_space<any>>) dst(%1425 : memref<32xf32, #tpu.memory_space<vmem>>)
    %c8_i32_635 = arith.constant 8 : i32
    %1428 = arith.muli %1316, %c8_i32_635 : i32
    %c4_i32_636 = arith.constant 4 : i32
    %1429 = arith.addi %1428, %c4_i32_636 : i32
    %c0_i32_637 = arith.constant 0 : i32
    %1430 = tpu.memref_slice %arg2[%1336, %c0_i32_637] : memref<512x32xf32, #tpu.memory_space<any>> -> memref<1x32xf32, #tpu.memory_space<any>>
    %1431 = tpu.memref_squeeze %1430 : memref<1x32xf32, #tpu.memory_space<any>> -> memref<32xf32, #tpu.memory_space<any>>
    %c0_i32_638 = arith.constant 0 : i32
    %1432 = tpu.memref_slice %arg9[%1429, %c0_i32_638] : memref<64x32xf32, #tpu.memory_space<vmem>> -> memref<1x32xf32, #tpu.memory_space<vmem>>
    %1433 = tpu.memref_squeeze %1432 : memref<1x32xf32, #tpu.memory_space<vmem>> -> memref<32xf32, #tpu.memory_space<vmem>>
    %1434 = tpu.memref_slice %arg10[%1316] : memref<8x!tpu.dma_semaphore, #tpu.memory_space<semaphore_mem>> -> memref<1x!tpu.dma_semaphore, #tpu.memory_space<semaphore_mem>>
    %1435 = tpu.memref_squeeze %1434 : memref<1x!tpu.dma_semaphore, #tpu.memory_space<semaphore_mem>> -> memref<!tpu.dma_semaphore, #tpu.memory_space<semaphore_mem>>
    tpu.wait_dma2 semaphore(%1435 : memref<!tpu.dma_semaphore, #tpu.memory_space<semaphore_mem>>) src(%1431 : memref<32xf32, #tpu.memory_space<any>>) dst(%1433 : memref<32xf32, #tpu.memory_space<vmem>>)
    %c8_i32_639 = arith.constant 8 : i32
    %1436 = arith.muli %1316, %c8_i32_639 : i32
    %c5_i32_640 = arith.constant 5 : i32
    %1437 = arith.addi %1436, %c5_i32_640 : i32
    %c0_i32_641 = arith.constant 0 : i32
    %1438 = tpu.memref_slice %arg2[%1340, %c0_i32_641] : memref<512x32xf32, #tpu.memory_space<any>> -> memref<1x32xf32, #tpu.memory_space<any>>
    %1439 = tpu.memref_squeeze %1438 : memref<1x32xf32, #tpu.memory_space<any>> -> memref<32xf32, #tpu.memory_space<any>>
    %c0_i32_642 = arith.constant 0 : i32
    %1440 = tpu.memref_slice %arg9[%1437, %c0_i32_642] : memref<64x32xf32, #tpu.memory_space<vmem>> -> memref<1x32xf32, #tpu.memory_space<vmem>>
    %1441 = tpu.memref_squeeze %1440 : memref<1x32xf32, #tpu.memory_space<vmem>> -> memref<32xf32, #tpu.memory_space<vmem>>
    %1442 = tpu.memref_slice %arg10[%1316] : memref<8x!tpu.dma_semaphore, #tpu.memory_space<semaphore_mem>> -> memref<1x!tpu.dma_semaphore, #tpu.memory_space<semaphore_mem>>
    %1443 = tpu.memref_squeeze %1442 : memref<1x!tpu.dma_semaphore, #tpu.memory_space<semaphore_mem>> -> memref<!tpu.dma_semaphore, #tpu.memory_space<semaphore_mem>>
    tpu.wait_dma2 semaphore(%1443 : memref<!tpu.dma_semaphore, #tpu.memory_space<semaphore_mem>>) src(%1439 : memref<32xf32, #tpu.memory_space<any>>) dst(%1441 : memref<32xf32, #tpu.memory_space<vmem>>)
    %c8_i32_643 = arith.constant 8 : i32
    %1444 = arith.muli %1316, %c8_i32_643 : i32
    %c6_i32_644 = arith.constant 6 : i32
    %1445 = arith.addi %1444, %c6_i32_644 : i32
    %c0_i32_645 = arith.constant 0 : i32
    %1446 = tpu.memref_slice %arg2[%1344, %c0_i32_645] : memref<512x32xf32, #tpu.memory_space<any>> -> memref<1x32xf32, #tpu.memory_space<any>>
    %1447 = tpu.memref_squeeze %1446 : memref<1x32xf32, #tpu.memory_space<any>> -> memref<32xf32, #tpu.memory_space<any>>
    %c0_i32_646 = arith.constant 0 : i32
    %1448 = tpu.memref_slice %arg9[%1445, %c0_i32_646] : memref<64x32xf32, #tpu.memory_space<vmem>> -> memref<1x32xf32, #tpu.memory_space<vmem>>
    %1449 = tpu.memref_squeeze %1448 : memref<1x32xf32, #tpu.memory_space<vmem>> -> memref<32xf32, #tpu.memory_space<vmem>>
    %1450 = tpu.memref_slice %arg10[%1316] : memref<8x!tpu.dma_semaphore, #tpu.memory_space<semaphore_mem>> -> memref<1x!tpu.dma_semaphore, #tpu.memory_space<semaphore_mem>>
    %1451 = tpu.memref_squeeze %1450 : memref<1x!tpu.dma_semaphore, #tpu.memory_space<semaphore_mem>> -> memref<!tpu.dma_semaphore, #tpu.memory_space<semaphore_mem>>
    tpu.wait_dma2 semaphore(%1451 : memref<!tpu.dma_semaphore, #tpu.memory_space<semaphore_mem>>) src(%1447 : memref<32xf32, #tpu.memory_space<any>>) dst(%1449 : memref<32xf32, #tpu.memory_space<vmem>>)
    %c8_i32_647 = arith.constant 8 : i32
    %1452 = arith.muli %1316, %c8_i32_647 : i32
    %c7_i32_648 = arith.constant 7 : i32
    %1453 = arith.addi %1452, %c7_i32_648 : i32
    %c0_i32_649 = arith.constant 0 : i32
    %1454 = tpu.memref_slice %arg2[%1348, %c0_i32_649] : memref<512x32xf32, #tpu.memory_space<any>> -> memref<1x32xf32, #tpu.memory_space<any>>
    %1455 = tpu.memref_squeeze %1454 : memref<1x32xf32, #tpu.memory_space<any>> -> memref<32xf32, #tpu.memory_space<any>>
    %c0_i32_650 = arith.constant 0 : i32
    %1456 = tpu.memref_slice %arg9[%1453, %c0_i32_650] : memref<64x32xf32, #tpu.memory_space<vmem>> -> memref<1x32xf32, #tpu.memory_space<vmem>>
    %1457 = tpu.memref_squeeze %1456 : memref<1x32xf32, #tpu.memory_space<vmem>> -> memref<32xf32, #tpu.memory_space<vmem>>
    %1458 = tpu.memref_slice %arg10[%1316] : memref<8x!tpu.dma_semaphore, #tpu.memory_space<semaphore_mem>> -> memref<1x!tpu.dma_semaphore, #tpu.memory_space<semaphore_mem>>
    %1459 = tpu.memref_squeeze %1458 : memref<1x!tpu.dma_semaphore, #tpu.memory_space<semaphore_mem>> -> memref<!tpu.dma_semaphore, #tpu.memory_space<semaphore_mem>>
    tpu.wait_dma2 semaphore(%1459 : memref<!tpu.dma_semaphore, #tpu.memory_space<semaphore_mem>>) src(%1455 : memref<32xf32, #tpu.memory_space<any>>) dst(%1457 : memref<32xf32, #tpu.memory_space<vmem>>)
    %c8_i32_651 = arith.constant 8 : i32
    %1460 = arith.muli %1316, %c8_i32_651 : i32
    %1461 = tpu.assume_multiple %1460, 8 : i32
    %1462 = arith.index_cast %1461 : i32 to index
    %c0_652 = arith.constant 0 : index
    %1463 = vector.load %arg9[%1462, %c0_652] : memref<64x32xf32, #tpu.memory_space<vmem>>, vector<8x32xf32>
    %1464 = arith.addf %1314, %1463 : vector<8x32xf32>
    %c6_i32_653 = arith.constant 6 : i32
    %1465 = arith.addi %563, %c6_i32_653 : i32
    %c7_i32_654 = arith.constant 7 : i32
    %1466 = arith.andi %1465, %c7_i32_654 : i32
    %c0_i32_655 = arith.constant 0 : i32
    %1467 = arith.addi %562, %c0_i32_655 : i32
    %1468 = arith.addi %1467, %c6_i32_653 : i32
    %1469 = arith.index_cast %1468 : i32 to index
    %1470 = memref.load %arg1[%1469] : memref<64xi32, #tpu.memory_space<smem>>
    %c8_i32_656 = arith.constant 8 : i32
    %1471 = arith.addi %562, %c8_i32_656 : i32
    %1472 = arith.addi %1471, %c6_i32_653 : i32
    %1473 = arith.index_cast %1472 : i32 to index
    %1474 = memref.load %arg1[%1473] : memref<64xi32, #tpu.memory_space<smem>>
    %c16_i32_657 = arith.constant 16 : i32
    %1475 = arith.addi %562, %c16_i32_657 : i32
    %1476 = arith.addi %1475, %c6_i32_653 : i32
    %1477 = arith.index_cast %1476 : i32 to index
    %1478 = memref.load %arg1[%1477] : memref<64xi32, #tpu.memory_space<smem>>
    %c24_i32_658 = arith.constant 24 : i32
    %1479 = arith.addi %562, %c24_i32_658 : i32
    %1480 = arith.addi %1479, %c6_i32_653 : i32
    %1481 = arith.index_cast %1480 : i32 to index
    %1482 = memref.load %arg1[%1481] : memref<64xi32, #tpu.memory_space<smem>>
    %c32_i32_659 = arith.constant 32 : i32
    %1483 = arith.addi %562, %c32_i32_659 : i32
    %1484 = arith.addi %1483, %c6_i32_653 : i32
    %1485 = arith.index_cast %1484 : i32 to index
    %1486 = memref.load %arg1[%1485] : memref<64xi32, #tpu.memory_space<smem>>
    %c40_i32_660 = arith.constant 40 : i32
    %1487 = arith.addi %562, %c40_i32_660 : i32
    %1488 = arith.addi %1487, %c6_i32_653 : i32
    %1489 = arith.index_cast %1488 : i32 to index
    %1490 = memref.load %arg1[%1489] : memref<64xi32, #tpu.memory_space<smem>>
    %c48_i32_661 = arith.constant 48 : i32
    %1491 = arith.addi %562, %c48_i32_661 : i32
    %1492 = arith.addi %1491, %c6_i32_653 : i32
    %1493 = arith.index_cast %1492 : i32 to index
    %1494 = memref.load %arg1[%1493] : memref<64xi32, #tpu.memory_space<smem>>
    %c56_i32_662 = arith.constant 56 : i32
    %1495 = arith.addi %562, %c56_i32_662 : i32
    %1496 = arith.addi %1495, %c6_i32_653 : i32
    %1497 = arith.index_cast %1496 : i32 to index
    %1498 = memref.load %arg1[%1497] : memref<64xi32, #tpu.memory_space<smem>>
    %c7_i32_663 = arith.constant 7 : i32
    %1499 = arith.addi %c6_i32_653, %c7_i32_663 : i32
    %c8_i32_664 = arith.constant 8 : i32
    %1500 = arith.cmpi sge, %1499, %c8_i32_664 : i32
    %c8_i32_665 = arith.constant 8 : i32
    %1501 = arith.subi %1499, %c8_i32_665 : i32
    %1502 = arith.select %1500, %1501, %1499 : i32
    %1503 = arith.extui %1500 : i1 to i32
    %1504 = arith.addi %c0_i32_279, %1503 : i32
    %c0_i32_666 = arith.constant 0 : i32
    %1505 = arith.minsi %1504, %c0_i32_666 : i32
    %c64_i32_667 = arith.constant 64 : i32
    %1506 = arith.muli %1505, %c64_i32_667 : i32
    %1507 = arith.addi %0, %1506 : i32
    %c0_i32_668 = arith.constant 0 : i32
    %1508 = arith.addi %1507, %c0_i32_668 : i32
    %1509 = arith.addi %1508, %1502 : i32
    %1510 = arith.index_cast %1509 : i32 to index
    %1511 = memref.load %arg1[%1510] : memref<64xi32, #tpu.memory_space<smem>>
    %c8_i32_669 = arith.constant 8 : i32
    %1512 = arith.addi %1507, %c8_i32_669 : i32
    %1513 = arith.addi %1512, %1502 : i32
    %1514 = arith.index_cast %1513 : i32 to index
    %1515 = memref.load %arg1[%1514] : memref<64xi32, #tpu.memory_space<smem>>
    %c16_i32_670 = arith.constant 16 : i32
    %1516 = arith.addi %1507, %c16_i32_670 : i32
    %1517 = arith.addi %1516, %1502 : i32
    %1518 = arith.index_cast %1517 : i32 to index
    %1519 = memref.load %arg1[%1518] : memref<64xi32, #tpu.memory_space<smem>>
    %c24_i32_671 = arith.constant 24 : i32
    %1520 = arith.addi %1507, %c24_i32_671 : i32
    %1521 = arith.addi %1520, %1502 : i32
    %1522 = arith.index_cast %1521 : i32 to index
    %1523 = memref.load %arg1[%1522] : memref<64xi32, #tpu.memory_space<smem>>
    %c32_i32_672 = arith.constant 32 : i32
    %1524 = arith.addi %1507, %c32_i32_672 : i32
    %1525 = arith.addi %1524, %1502 : i32
    %1526 = arith.index_cast %1525 : i32 to index
    %1527 = memref.load %arg1[%1526] : memref<64xi32, #tpu.memory_space<smem>>
    %c40_i32_673 = arith.constant 40 : i32
    %1528 = arith.addi %1507, %c40_i32_673 : i32
    %1529 = arith.addi %1528, %1502 : i32
    %1530 = arith.index_cast %1529 : i32 to index
    %1531 = memref.load %arg1[%1530] : memref<64xi32, #tpu.memory_space<smem>>
    %c48_i32_674 = arith.constant 48 : i32
    %1532 = arith.addi %1507, %c48_i32_674 : i32
    %1533 = arith.addi %1532, %1502 : i32
    %1534 = arith.index_cast %1533 : i32 to index
    %1535 = memref.load %arg1[%1534] : memref<64xi32, #tpu.memory_space<smem>>
    %c56_i32_675 = arith.constant 56 : i32
    %1536 = arith.addi %1507, %c56_i32_675 : i32
    %1537 = arith.addi %1536, %1502 : i32
    %1538 = arith.index_cast %1537 : i32 to index
    %1539 = memref.load %arg1[%1538] : memref<64xi32, #tpu.memory_space<smem>>
    %c7_i32_676 = arith.constant 7 : i32
    %1540 = arith.addi %1465, %c7_i32_676 : i32
    %c7_i32_677 = arith.constant 7 : i32
    %1541 = arith.andi %1540, %c7_i32_677 : i32
    %c7_i32_678 = arith.constant 7 : i32
    %1542 = arith.addi %1465, %c7_i32_678 : i32
    %c8_i32_679 = arith.constant 8 : i32
    %1543 = arith.cmpi slt, %1542, %c8_i32_679 : i32
    %1544 = arith.extui %1543 : i1 to i32
    %c0_i32_680 = arith.constant 0 : i32
    %1545 = arith.cmpi ne, %1544, %c0_i32_680 : i32
    scf.if %1545 {
      %c8_i32_796 = arith.constant 8 : i32
      %1783 = arith.muli %1541, %c8_i32_796 : i32
      %c0_i32_797 = arith.constant 0 : i32
      %1784 = arith.addi %1783, %c0_i32_797 : i32
      %c0_i32_798 = arith.constant 0 : i32
      %1785 = tpu.memref_slice %arg2[%1511, %c0_i32_798] : memref<512x32xf32, #tpu.memory_space<any>> -> memref<1x32xf32, #tpu.memory_space<any>>
      %1786 = tpu.memref_squeeze %1785 : memref<1x32xf32, #tpu.memory_space<any>> -> memref<32xf32, #tpu.memory_space<any>>
      %c0_i32_799 = arith.constant 0 : i32
      %1787 = tpu.memref_slice %arg9[%1784, %c0_i32_799] : memref<64x32xf32, #tpu.memory_space<vmem>> -> memref<1x32xf32, #tpu.memory_space<vmem>>
      %1788 = tpu.memref_squeeze %1787 : memref<1x32xf32, #tpu.memory_space<vmem>> -> memref<32xf32, #tpu.memory_space<vmem>>
      %1789 = tpu.memref_slice %arg10[%1541] : memref<8x!tpu.dma_semaphore, #tpu.memory_space<semaphore_mem>> -> memref<1x!tpu.dma_semaphore, #tpu.memory_space<semaphore_mem>>
      %1790 = tpu.memref_squeeze %1789 : memref<1x!tpu.dma_semaphore, #tpu.memory_space<semaphore_mem>> -> memref<!tpu.dma_semaphore, #tpu.memory_space<semaphore_mem>>
      tpu.enqueue_dma source(%1786 : memref<32xf32, #tpu.memory_space<any>>) target(%1788 : memref<32xf32, #tpu.memory_space<vmem>>) target_semaphore(%1790 : memref<!tpu.dma_semaphore, #tpu.memory_space<semaphore_mem>>)
      %c8_i32_800 = arith.constant 8 : i32
      %1791 = arith.muli %1541, %c8_i32_800 : i32
      %c1_i32_801 = arith.constant 1 : i32
      %1792 = arith.addi %1791, %c1_i32_801 : i32
      %c0_i32_802 = arith.constant 0 : i32
      %1793 = tpu.memref_slice %arg2[%1515, %c0_i32_802] : memref<512x32xf32, #tpu.memory_space<any>> -> memref<1x32xf32, #tpu.memory_space<any>>
      %1794 = tpu.memref_squeeze %1793 : memref<1x32xf32, #tpu.memory_space<any>> -> memref<32xf32, #tpu.memory_space<any>>
      %c0_i32_803 = arith.constant 0 : i32
      %1795 = tpu.memref_slice %arg9[%1792, %c0_i32_803] : memref<64x32xf32, #tpu.memory_space<vmem>> -> memref<1x32xf32, #tpu.memory_space<vmem>>
      %1796 = tpu.memref_squeeze %1795 : memref<1x32xf32, #tpu.memory_space<vmem>> -> memref<32xf32, #tpu.memory_space<vmem>>
      %1797 = tpu.memref_slice %arg10[%1541] : memref<8x!tpu.dma_semaphore, #tpu.memory_space<semaphore_mem>> -> memref<1x!tpu.dma_semaphore, #tpu.memory_space<semaphore_mem>>
      %1798 = tpu.memref_squeeze %1797 : memref<1x!tpu.dma_semaphore, #tpu.memory_space<semaphore_mem>> -> memref<!tpu.dma_semaphore, #tpu.memory_space<semaphore_mem>>
      tpu.enqueue_dma source(%1794 : memref<32xf32, #tpu.memory_space<any>>) target(%1796 : memref<32xf32, #tpu.memory_space<vmem>>) target_semaphore(%1798 : memref<!tpu.dma_semaphore, #tpu.memory_space<semaphore_mem>>)
      %c8_i32_804 = arith.constant 8 : i32
      %1799 = arith.muli %1541, %c8_i32_804 : i32
      %c2_i32_805 = arith.constant 2 : i32
      %1800 = arith.addi %1799, %c2_i32_805 : i32
      %c0_i32_806 = arith.constant 0 : i32
      %1801 = tpu.memref_slice %arg2[%1519, %c0_i32_806] : memref<512x32xf32, #tpu.memory_space<any>> -> memref<1x32xf32, #tpu.memory_space<any>>
      %1802 = tpu.memref_squeeze %1801 : memref<1x32xf32, #tpu.memory_space<any>> -> memref<32xf32, #tpu.memory_space<any>>
      %c0_i32_807 = arith.constant 0 : i32
      %1803 = tpu.memref_slice %arg9[%1800, %c0_i32_807] : memref<64x32xf32, #tpu.memory_space<vmem>> -> memref<1x32xf32, #tpu.memory_space<vmem>>
      %1804 = tpu.memref_squeeze %1803 : memref<1x32xf32, #tpu.memory_space<vmem>> -> memref<32xf32, #tpu.memory_space<vmem>>
      %1805 = tpu.memref_slice %arg10[%1541] : memref<8x!tpu.dma_semaphore, #tpu.memory_space<semaphore_mem>> -> memref<1x!tpu.dma_semaphore, #tpu.memory_space<semaphore_mem>>
      %1806 = tpu.memref_squeeze %1805 : memref<1x!tpu.dma_semaphore, #tpu.memory_space<semaphore_mem>> -> memref<!tpu.dma_semaphore, #tpu.memory_space<semaphore_mem>>
      tpu.enqueue_dma source(%1802 : memref<32xf32, #tpu.memory_space<any>>) target(%1804 : memref<32xf32, #tpu.memory_space<vmem>>) target_semaphore(%1806 : memref<!tpu.dma_semaphore, #tpu.memory_space<semaphore_mem>>)
      %c8_i32_808 = arith.constant 8 : i32
      %1807 = arith.muli %1541, %c8_i32_808 : i32
      %c3_i32_809 = arith.constant 3 : i32
      %1808 = arith.addi %1807, %c3_i32_809 : i32
      %c0_i32_810 = arith.constant 0 : i32
      %1809 = tpu.memref_slice %arg2[%1523, %c0_i32_810] : memref<512x32xf32, #tpu.memory_space<any>> -> memref<1x32xf32, #tpu.memory_space<any>>
      %1810 = tpu.memref_squeeze %1809 : memref<1x32xf32, #tpu.memory_space<any>> -> memref<32xf32, #tpu.memory_space<any>>
      %c0_i32_811 = arith.constant 0 : i32
      %1811 = tpu.memref_slice %arg9[%1808, %c0_i32_811] : memref<64x32xf32, #tpu.memory_space<vmem>> -> memref<1x32xf32, #tpu.memory_space<vmem>>
      %1812 = tpu.memref_squeeze %1811 : memref<1x32xf32, #tpu.memory_space<vmem>> -> memref<32xf32, #tpu.memory_space<vmem>>
      %1813 = tpu.memref_slice %arg10[%1541] : memref<8x!tpu.dma_semaphore, #tpu.memory_space<semaphore_mem>> -> memref<1x!tpu.dma_semaphore, #tpu.memory_space<semaphore_mem>>
      %1814 = tpu.memref_squeeze %1813 : memref<1x!tpu.dma_semaphore, #tpu.memory_space<semaphore_mem>> -> memref<!tpu.dma_semaphore, #tpu.memory_space<semaphore_mem>>
      tpu.enqueue_dma source(%1810 : memref<32xf32, #tpu.memory_space<any>>) target(%1812 : memref<32xf32, #tpu.memory_space<vmem>>) target_semaphore(%1814 : memref<!tpu.dma_semaphore, #tpu.memory_space<semaphore_mem>>)
      %c8_i32_812 = arith.constant 8 : i32
      %1815 = arith.muli %1541, %c8_i32_812 : i32
      %c4_i32_813 = arith.constant 4 : i32
      %1816 = arith.addi %1815, %c4_i32_813 : i32
      %c0_i32_814 = arith.constant 0 : i32
      %1817 = tpu.memref_slice %arg2[%1527, %c0_i32_814] : memref<512x32xf32, #tpu.memory_space<any>> -> memref<1x32xf32, #tpu.memory_space<any>>
      %1818 = tpu.memref_squeeze %1817 : memref<1x32xf32, #tpu.memory_space<any>> -> memref<32xf32, #tpu.memory_space<any>>
      %c0_i32_815 = arith.constant 0 : i32
      %1819 = tpu.memref_slice %arg9[%1816, %c0_i32_815] : memref<64x32xf32, #tpu.memory_space<vmem>> -> memref<1x32xf32, #tpu.memory_space<vmem>>
      %1820 = tpu.memref_squeeze %1819 : memref<1x32xf32, #tpu.memory_space<vmem>> -> memref<32xf32, #tpu.memory_space<vmem>>
      %1821 = tpu.memref_slice %arg10[%1541] : memref<8x!tpu.dma_semaphore, #tpu.memory_space<semaphore_mem>> -> memref<1x!tpu.dma_semaphore, #tpu.memory_space<semaphore_mem>>
      %1822 = tpu.memref_squeeze %1821 : memref<1x!tpu.dma_semaphore, #tpu.memory_space<semaphore_mem>> -> memref<!tpu.dma_semaphore, #tpu.memory_space<semaphore_mem>>
      tpu.enqueue_dma source(%1818 : memref<32xf32, #tpu.memory_space<any>>) target(%1820 : memref<32xf32, #tpu.memory_space<vmem>>) target_semaphore(%1822 : memref<!tpu.dma_semaphore, #tpu.memory_space<semaphore_mem>>)
      %c8_i32_816 = arith.constant 8 : i32
      %1823 = arith.muli %1541, %c8_i32_816 : i32
      %c5_i32_817 = arith.constant 5 : i32
      %1824 = arith.addi %1823, %c5_i32_817 : i32
      %c0_i32_818 = arith.constant 0 : i32
      %1825 = tpu.memref_slice %arg2[%1531, %c0_i32_818] : memref<512x32xf32, #tpu.memory_space<any>> -> memref<1x32xf32, #tpu.memory_space<any>>
      %1826 = tpu.memref_squeeze %1825 : memref<1x32xf32, #tpu.memory_space<any>> -> memref<32xf32, #tpu.memory_space<any>>
      %c0_i32_819 = arith.constant 0 : i32
      %1827 = tpu.memref_slice %arg9[%1824, %c0_i32_819] : memref<64x32xf32, #tpu.memory_space<vmem>> -> memref<1x32xf32, #tpu.memory_space<vmem>>
      %1828 = tpu.memref_squeeze %1827 : memref<1x32xf32, #tpu.memory_space<vmem>> -> memref<32xf32, #tpu.memory_space<vmem>>
      %1829 = tpu.memref_slice %arg10[%1541] : memref<8x!tpu.dma_semaphore, #tpu.memory_space<semaphore_mem>> -> memref<1x!tpu.dma_semaphore, #tpu.memory_space<semaphore_mem>>
      %1830 = tpu.memref_squeeze %1829 : memref<1x!tpu.dma_semaphore, #tpu.memory_space<semaphore_mem>> -> memref<!tpu.dma_semaphore, #tpu.memory_space<semaphore_mem>>
      tpu.enqueue_dma source(%1826 : memref<32xf32, #tpu.memory_space<any>>) target(%1828 : memref<32xf32, #tpu.memory_space<vmem>>) target_semaphore(%1830 : memref<!tpu.dma_semaphore, #tpu.memory_space<semaphore_mem>>)
      %c8_i32_820 = arith.constant 8 : i32
      %1831 = arith.muli %1541, %c8_i32_820 : i32
      %c6_i32_821 = arith.constant 6 : i32
      %1832 = arith.addi %1831, %c6_i32_821 : i32
      %c0_i32_822 = arith.constant 0 : i32
      %1833 = tpu.memref_slice %arg2[%1535, %c0_i32_822] : memref<512x32xf32, #tpu.memory_space<any>> -> memref<1x32xf32, #tpu.memory_space<any>>
      %1834 = tpu.memref_squeeze %1833 : memref<1x32xf32, #tpu.memory_space<any>> -> memref<32xf32, #tpu.memory_space<any>>
      %c0_i32_823 = arith.constant 0 : i32
      %1835 = tpu.memref_slice %arg9[%1832, %c0_i32_823] : memref<64x32xf32, #tpu.memory_space<vmem>> -> memref<1x32xf32, #tpu.memory_space<vmem>>
      %1836 = tpu.memref_squeeze %1835 : memref<1x32xf32, #tpu.memory_space<vmem>> -> memref<32xf32, #tpu.memory_space<vmem>>
      %1837 = tpu.memref_slice %arg10[%1541] : memref<8x!tpu.dma_semaphore, #tpu.memory_space<semaphore_mem>> -> memref<1x!tpu.dma_semaphore, #tpu.memory_space<semaphore_mem>>
      %1838 = tpu.memref_squeeze %1837 : memref<1x!tpu.dma_semaphore, #tpu.memory_space<semaphore_mem>> -> memref<!tpu.dma_semaphore, #tpu.memory_space<semaphore_mem>>
      tpu.enqueue_dma source(%1834 : memref<32xf32, #tpu.memory_space<any>>) target(%1836 : memref<32xf32, #tpu.memory_space<vmem>>) target_semaphore(%1838 : memref<!tpu.dma_semaphore, #tpu.memory_space<semaphore_mem>>)
      %c8_i32_824 = arith.constant 8 : i32
      %1839 = arith.muli %1541, %c8_i32_824 : i32
      %c7_i32_825 = arith.constant 7 : i32
      %1840 = arith.addi %1839, %c7_i32_825 : i32
      %c0_i32_826 = arith.constant 0 : i32
      %1841 = tpu.memref_slice %arg2[%1539, %c0_i32_826] : memref<512x32xf32, #tpu.memory_space<any>> -> memref<1x32xf32, #tpu.memory_space<any>>
      %1842 = tpu.memref_squeeze %1841 : memref<1x32xf32, #tpu.memory_space<any>> -> memref<32xf32, #tpu.memory_space<any>>
      %c0_i32_827 = arith.constant 0 : i32
      %1843 = tpu.memref_slice %arg9[%1840, %c0_i32_827] : memref<64x32xf32, #tpu.memory_space<vmem>> -> memref<1x32xf32, #tpu.memory_space<vmem>>
      %1844 = tpu.memref_squeeze %1843 : memref<1x32xf32, #tpu.memory_space<vmem>> -> memref<32xf32, #tpu.memory_space<vmem>>
      %1845 = tpu.memref_slice %arg10[%1541] : memref<8x!tpu.dma_semaphore, #tpu.memory_space<semaphore_mem>> -> memref<1x!tpu.dma_semaphore, #tpu.memory_space<semaphore_mem>>
      %1846 = tpu.memref_squeeze %1845 : memref<1x!tpu.dma_semaphore, #tpu.memory_space<semaphore_mem>> -> memref<!tpu.dma_semaphore, #tpu.memory_space<semaphore_mem>>
      tpu.enqueue_dma source(%1842 : memref<32xf32, #tpu.memory_space<any>>) target(%1844 : memref<32xf32, #tpu.memory_space<vmem>>) target_semaphore(%1846 : memref<!tpu.dma_semaphore, #tpu.memory_space<semaphore_mem>>)
    } else {
    }
    %c8_i32_681 = arith.constant 8 : i32
    %1546 = arith.muli %1466, %c8_i32_681 : i32
    %c0_i32_682 = arith.constant 0 : i32
    %1547 = arith.addi %1546, %c0_i32_682 : i32
    %c0_i32_683 = arith.constant 0 : i32
    %1548 = tpu.memref_slice %arg2[%1470, %c0_i32_683] : memref<512x32xf32, #tpu.memory_space<any>> -> memref<1x32xf32, #tpu.memory_space<any>>
    %1549 = tpu.memref_squeeze %1548 : memref<1x32xf32, #tpu.memory_space<any>> -> memref<32xf32, #tpu.memory_space<any>>
    %c0_i32_684 = arith.constant 0 : i32
    %1550 = tpu.memref_slice %arg9[%1547, %c0_i32_684] : memref<64x32xf32, #tpu.memory_space<vmem>> -> memref<1x32xf32, #tpu.memory_space<vmem>>
    %1551 = tpu.memref_squeeze %1550 : memref<1x32xf32, #tpu.memory_space<vmem>> -> memref<32xf32, #tpu.memory_space<vmem>>
    %1552 = tpu.memref_slice %arg10[%1466] : memref<8x!tpu.dma_semaphore, #tpu.memory_space<semaphore_mem>> -> memref<1x!tpu.dma_semaphore, #tpu.memory_space<semaphore_mem>>
    %1553 = tpu.memref_squeeze %1552 : memref<1x!tpu.dma_semaphore, #tpu.memory_space<semaphore_mem>> -> memref<!tpu.dma_semaphore, #tpu.memory_space<semaphore_mem>>
    tpu.wait_dma2 semaphore(%1553 : memref<!tpu.dma_semaphore, #tpu.memory_space<semaphore_mem>>) src(%1549 : memref<32xf32, #tpu.memory_space<any>>) dst(%1551 : memref<32xf32, #tpu.memory_space<vmem>>)
    %c8_i32_685 = arith.constant 8 : i32
    %1554 = arith.muli %1466, %c8_i32_685 : i32
    %c1_i32_686 = arith.constant 1 : i32
    %1555 = arith.addi %1554, %c1_i32_686 : i32
    %c0_i32_687 = arith.constant 0 : i32
    %1556 = tpu.memref_slice %arg2[%1474, %c0_i32_687] : memref<512x32xf32, #tpu.memory_space<any>> -> memref<1x32xf32, #tpu.memory_space<any>>
    %1557 = tpu.memref_squeeze %1556 : memref<1x32xf32, #tpu.memory_space<any>> -> memref<32xf32, #tpu.memory_space<any>>
    %c0_i32_688 = arith.constant 0 : i32
    %1558 = tpu.memref_slice %arg9[%1555, %c0_i32_688] : memref<64x32xf32, #tpu.memory_space<vmem>> -> memref<1x32xf32, #tpu.memory_space<vmem>>
    %1559 = tpu.memref_squeeze %1558 : memref<1x32xf32, #tpu.memory_space<vmem>> -> memref<32xf32, #tpu.memory_space<vmem>>
    %1560 = tpu.memref_slice %arg10[%1466] : memref<8x!tpu.dma_semaphore, #tpu.memory_space<semaphore_mem>> -> memref<1x!tpu.dma_semaphore, #tpu.memory_space<semaphore_mem>>
    %1561 = tpu.memref_squeeze %1560 : memref<1x!tpu.dma_semaphore, #tpu.memory_space<semaphore_mem>> -> memref<!tpu.dma_semaphore, #tpu.memory_space<semaphore_mem>>
    tpu.wait_dma2 semaphore(%1561 : memref<!tpu.dma_semaphore, #tpu.memory_space<semaphore_mem>>) src(%1557 : memref<32xf32, #tpu.memory_space<any>>) dst(%1559 : memref<32xf32, #tpu.memory_space<vmem>>)
    %c8_i32_689 = arith.constant 8 : i32
    %1562 = arith.muli %1466, %c8_i32_689 : i32
    %c2_i32_690 = arith.constant 2 : i32
    %1563 = arith.addi %1562, %c2_i32_690 : i32
    %c0_i32_691 = arith.constant 0 : i32
    %1564 = tpu.memref_slice %arg2[%1478, %c0_i32_691] : memref<512x32xf32, #tpu.memory_space<any>> -> memref<1x32xf32, #tpu.memory_space<any>>
    %1565 = tpu.memref_squeeze %1564 : memref<1x32xf32, #tpu.memory_space<any>> -> memref<32xf32, #tpu.memory_space<any>>
    %c0_i32_692 = arith.constant 0 : i32
    %1566 = tpu.memref_slice %arg9[%1563, %c0_i32_692] : memref<64x32xf32, #tpu.memory_space<vmem>> -> memref<1x32xf32, #tpu.memory_space<vmem>>
    %1567 = tpu.memref_squeeze %1566 : memref<1x32xf32, #tpu.memory_space<vmem>> -> memref<32xf32, #tpu.memory_space<vmem>>
    %1568 = tpu.memref_slice %arg10[%1466] : memref<8x!tpu.dma_semaphore, #tpu.memory_space<semaphore_mem>> -> memref<1x!tpu.dma_semaphore, #tpu.memory_space<semaphore_mem>>
    %1569 = tpu.memref_squeeze %1568 : memref<1x!tpu.dma_semaphore, #tpu.memory_space<semaphore_mem>> -> memref<!tpu.dma_semaphore, #tpu.memory_space<semaphore_mem>>
    tpu.wait_dma2 semaphore(%1569 : memref<!tpu.dma_semaphore, #tpu.memory_space<semaphore_mem>>) src(%1565 : memref<32xf32, #tpu.memory_space<any>>) dst(%1567 : memref<32xf32, #tpu.memory_space<vmem>>)
    %c8_i32_693 = arith.constant 8 : i32
    %1570 = arith.muli %1466, %c8_i32_693 : i32
    %c3_i32_694 = arith.constant 3 : i32
    %1571 = arith.addi %1570, %c3_i32_694 : i32
    %c0_i32_695 = arith.constant 0 : i32
    %1572 = tpu.memref_slice %arg2[%1482, %c0_i32_695] : memref<512x32xf32, #tpu.memory_space<any>> -> memref<1x32xf32, #tpu.memory_space<any>>
    %1573 = tpu.memref_squeeze %1572 : memref<1x32xf32, #tpu.memory_space<any>> -> memref<32xf32, #tpu.memory_space<any>>
    %c0_i32_696 = arith.constant 0 : i32
    %1574 = tpu.memref_slice %arg9[%1571, %c0_i32_696] : memref<64x32xf32, #tpu.memory_space<vmem>> -> memref<1x32xf32, #tpu.memory_space<vmem>>
    %1575 = tpu.memref_squeeze %1574 : memref<1x32xf32, #tpu.memory_space<vmem>> -> memref<32xf32, #tpu.memory_space<vmem>>
    %1576 = tpu.memref_slice %arg10[%1466] : memref<8x!tpu.dma_semaphore, #tpu.memory_space<semaphore_mem>> -> memref<1x!tpu.dma_semaphore, #tpu.memory_space<semaphore_mem>>
    %1577 = tpu.memref_squeeze %1576 : memref<1x!tpu.dma_semaphore, #tpu.memory_space<semaphore_mem>> -> memref<!tpu.dma_semaphore, #tpu.memory_space<semaphore_mem>>
    tpu.wait_dma2 semaphore(%1577 : memref<!tpu.dma_semaphore, #tpu.memory_space<semaphore_mem>>) src(%1573 : memref<32xf32, #tpu.memory_space<any>>) dst(%1575 : memref<32xf32, #tpu.memory_space<vmem>>)
    %c8_i32_697 = arith.constant 8 : i32
    %1578 = arith.muli %1466, %c8_i32_697 : i32
    %c4_i32_698 = arith.constant 4 : i32
    %1579 = arith.addi %1578, %c4_i32_698 : i32
    %c0_i32_699 = arith.constant 0 : i32
    %1580 = tpu.memref_slice %arg2[%1486, %c0_i32_699] : memref<512x32xf32, #tpu.memory_space<any>> -> memref<1x32xf32, #tpu.memory_space<any>>
    %1581 = tpu.memref_squeeze %1580 : memref<1x32xf32, #tpu.memory_space<any>> -> memref<32xf32, #tpu.memory_space<any>>
    %c0_i32_700 = arith.constant 0 : i32
    %1582 = tpu.memref_slice %arg9[%1579, %c0_i32_700] : memref<64x32xf32, #tpu.memory_space<vmem>> -> memref<1x32xf32, #tpu.memory_space<vmem>>
    %1583 = tpu.memref_squeeze %1582 : memref<1x32xf32, #tpu.memory_space<vmem>> -> memref<32xf32, #tpu.memory_space<vmem>>
    %1584 = tpu.memref_slice %arg10[%1466] : memref<8x!tpu.dma_semaphore, #tpu.memory_space<semaphore_mem>> -> memref<1x!tpu.dma_semaphore, #tpu.memory_space<semaphore_mem>>
    %1585 = tpu.memref_squeeze %1584 : memref<1x!tpu.dma_semaphore, #tpu.memory_space<semaphore_mem>> -> memref<!tpu.dma_semaphore, #tpu.memory_space<semaphore_mem>>
    tpu.wait_dma2 semaphore(%1585 : memref<!tpu.dma_semaphore, #tpu.memory_space<semaphore_mem>>) src(%1581 : memref<32xf32, #tpu.memory_space<any>>) dst(%1583 : memref<32xf32, #tpu.memory_space<vmem>>)
    %c8_i32_701 = arith.constant 8 : i32
    %1586 = arith.muli %1466, %c8_i32_701 : i32
    %c5_i32_702 = arith.constant 5 : i32
    %1587 = arith.addi %1586, %c5_i32_702 : i32
    %c0_i32_703 = arith.constant 0 : i32
    %1588 = tpu.memref_slice %arg2[%1490, %c0_i32_703] : memref<512x32xf32, #tpu.memory_space<any>> -> memref<1x32xf32, #tpu.memory_space<any>>
    %1589 = tpu.memref_squeeze %1588 : memref<1x32xf32, #tpu.memory_space<any>> -> memref<32xf32, #tpu.memory_space<any>>
    %c0_i32_704 = arith.constant 0 : i32
    %1590 = tpu.memref_slice %arg9[%1587, %c0_i32_704] : memref<64x32xf32, #tpu.memory_space<vmem>> -> memref<1x32xf32, #tpu.memory_space<vmem>>
    %1591 = tpu.memref_squeeze %1590 : memref<1x32xf32, #tpu.memory_space<vmem>> -> memref<32xf32, #tpu.memory_space<vmem>>
    %1592 = tpu.memref_slice %arg10[%1466] : memref<8x!tpu.dma_semaphore, #tpu.memory_space<semaphore_mem>> -> memref<1x!tpu.dma_semaphore, #tpu.memory_space<semaphore_mem>>
    %1593 = tpu.memref_squeeze %1592 : memref<1x!tpu.dma_semaphore, #tpu.memory_space<semaphore_mem>> -> memref<!tpu.dma_semaphore, #tpu.memory_space<semaphore_mem>>
    tpu.wait_dma2 semaphore(%1593 : memref<!tpu.dma_semaphore, #tpu.memory_space<semaphore_mem>>) src(%1589 : memref<32xf32, #tpu.memory_space<any>>) dst(%1591 : memref<32xf32, #tpu.memory_space<vmem>>)
    %c8_i32_705 = arith.constant 8 : i32
    %1594 = arith.muli %1466, %c8_i32_705 : i32
    %c6_i32_706 = arith.constant 6 : i32
    %1595 = arith.addi %1594, %c6_i32_706 : i32
    %c0_i32_707 = arith.constant 0 : i32
    %1596 = tpu.memref_slice %arg2[%1494, %c0_i32_707] : memref<512x32xf32, #tpu.memory_space<any>> -> memref<1x32xf32, #tpu.memory_space<any>>
    %1597 = tpu.memref_squeeze %1596 : memref<1x32xf32, #tpu.memory_space<any>> -> memref<32xf32, #tpu.memory_space<any>>
    %c0_i32_708 = arith.constant 0 : i32
    %1598 = tpu.memref_slice %arg9[%1595, %c0_i32_708] : memref<64x32xf32, #tpu.memory_space<vmem>> -> memref<1x32xf32, #tpu.memory_space<vmem>>
    %1599 = tpu.memref_squeeze %1598 : memref<1x32xf32, #tpu.memory_space<vmem>> -> memref<32xf32, #tpu.memory_space<vmem>>
    %1600 = tpu.memref_slice %arg10[%1466] : memref<8x!tpu.dma_semaphore, #tpu.memory_space<semaphore_mem>> -> memref<1x!tpu.dma_semaphore, #tpu.memory_space<semaphore_mem>>
    %1601 = tpu.memref_squeeze %1600 : memref<1x!tpu.dma_semaphore, #tpu.memory_space<semaphore_mem>> -> memref<!tpu.dma_semaphore, #tpu.memory_space<semaphore_mem>>
    tpu.wait_dma2 semaphore(%1601 : memref<!tpu.dma_semaphore, #tpu.memory_space<semaphore_mem>>) src(%1597 : memref<32xf32, #tpu.memory_space<any>>) dst(%1599 : memref<32xf32, #tpu.memory_space<vmem>>)
    %c8_i32_709 = arith.constant 8 : i32
    %1602 = arith.muli %1466, %c8_i32_709 : i32
    %c7_i32_710 = arith.constant 7 : i32
    %1603 = arith.addi %1602, %c7_i32_710 : i32
    %c0_i32_711 = arith.constant 0 : i32
    %1604 = tpu.memref_slice %arg2[%1498, %c0_i32_711] : memref<512x32xf32, #tpu.memory_space<any>> -> memref<1x32xf32, #tpu.memory_space<any>>
    %1605 = tpu.memref_squeeze %1604 : memref<1x32xf32, #tpu.memory_space<any>> -> memref<32xf32, #tpu.memory_space<any>>
    %c0_i32_712 = arith.constant 0 : i32
    %1606 = tpu.memref_slice %arg9[%1603, %c0_i32_712] : memref<64x32xf32, #tpu.memory_space<vmem>> -> memref<1x32xf32, #tpu.memory_space<vmem>>
    %1607 = tpu.memref_squeeze %1606 : memref<1x32xf32, #tpu.memory_space<vmem>> -> memref<32xf32, #tpu.memory_space<vmem>>
    %1608 = tpu.memref_slice %arg10[%1466] : memref<8x!tpu.dma_semaphore, #tpu.memory_space<semaphore_mem>> -> memref<1x!tpu.dma_semaphore, #tpu.memory_space<semaphore_mem>>
    %1609 = tpu.memref_squeeze %1608 : memref<1x!tpu.dma_semaphore, #tpu.memory_space<semaphore_mem>> -> memref<!tpu.dma_semaphore, #tpu.memory_space<semaphore_mem>>
    tpu.wait_dma2 semaphore(%1609 : memref<!tpu.dma_semaphore, #tpu.memory_space<semaphore_mem>>) src(%1605 : memref<32xf32, #tpu.memory_space<any>>) dst(%1607 : memref<32xf32, #tpu.memory_space<vmem>>)
    %c8_i32_713 = arith.constant 8 : i32
    %1610 = arith.muli %1466, %c8_i32_713 : i32
    %1611 = tpu.assume_multiple %1610, 8 : i32
    %1612 = arith.index_cast %1611 : i32 to index
    %c0_714 = arith.constant 0 : index
    %1613 = vector.load %arg9[%1612, %c0_714] : memref<64x32xf32, #tpu.memory_space<vmem>>, vector<8x32xf32>
    %1614 = arith.addf %1464, %1613 : vector<8x32xf32>
    %c7_i32_715 = arith.constant 7 : i32
    %1615 = arith.addi %563, %c7_i32_715 : i32
    %c7_i32_716 = arith.constant 7 : i32
    %1616 = arith.andi %1615, %c7_i32_716 : i32
    %c0_i32_717 = arith.constant 0 : i32
    %1617 = arith.addi %562, %c0_i32_717 : i32
    %1618 = arith.addi %1617, %c7_i32_715 : i32
    %1619 = arith.index_cast %1618 : i32 to index
    %1620 = memref.load %arg1[%1619] : memref<64xi32, #tpu.memory_space<smem>>
    %c8_i32_718 = arith.constant 8 : i32
    %1621 = arith.addi %562, %c8_i32_718 : i32
    %1622 = arith.addi %1621, %c7_i32_715 : i32
    %1623 = arith.index_cast %1622 : i32 to index
    %1624 = memref.load %arg1[%1623] : memref<64xi32, #tpu.memory_space<smem>>
    %c16_i32_719 = arith.constant 16 : i32
    %1625 = arith.addi %562, %c16_i32_719 : i32
    %1626 = arith.addi %1625, %c7_i32_715 : i32
    %1627 = arith.index_cast %1626 : i32 to index
    %1628 = memref.load %arg1[%1627] : memref<64xi32, #tpu.memory_space<smem>>
    %c24_i32_720 = arith.constant 24 : i32
    %1629 = arith.addi %562, %c24_i32_720 : i32
    %1630 = arith.addi %1629, %c7_i32_715 : i32
    %1631 = arith.index_cast %1630 : i32 to index
    %1632 = memref.load %arg1[%1631] : memref<64xi32, #tpu.memory_space<smem>>
    %c32_i32_721 = arith.constant 32 : i32
    %1633 = arith.addi %562, %c32_i32_721 : i32
    %1634 = arith.addi %1633, %c7_i32_715 : i32
    %1635 = arith.index_cast %1634 : i32 to index
    %1636 = memref.load %arg1[%1635] : memref<64xi32, #tpu.memory_space<smem>>
    %c40_i32_722 = arith.constant 40 : i32
    %1637 = arith.addi %562, %c40_i32_722 : i32
    %1638 = arith.addi %1637, %c7_i32_715 : i32
    %1639 = arith.index_cast %1638 : i32 to index
    %1640 = memref.load %arg1[%1639] : memref<64xi32, #tpu.memory_space<smem>>
    %c48_i32_723 = arith.constant 48 : i32
    %1641 = arith.addi %562, %c48_i32_723 : i32
    %1642 = arith.addi %1641, %c7_i32_715 : i32
    %1643 = arith.index_cast %1642 : i32 to index
    %1644 = memref.load %arg1[%1643] : memref<64xi32, #tpu.memory_space<smem>>
    %c56_i32_724 = arith.constant 56 : i32
    %1645 = arith.addi %562, %c56_i32_724 : i32
    %1646 = arith.addi %1645, %c7_i32_715 : i32
    %1647 = arith.index_cast %1646 : i32 to index
    %1648 = memref.load %arg1[%1647] : memref<64xi32, #tpu.memory_space<smem>>
    %c7_i32_725 = arith.constant 7 : i32
    %1649 = arith.addi %c7_i32_715, %c7_i32_725 : i32
    %c8_i32_726 = arith.constant 8 : i32
    %1650 = arith.cmpi sge, %1649, %c8_i32_726 : i32
    %c8_i32_727 = arith.constant 8 : i32
    %1651 = arith.subi %1649, %c8_i32_727 : i32
    %1652 = arith.select %1650, %1651, %1649 : i32
    %1653 = arith.extui %1650 : i1 to i32
    %1654 = arith.addi %c0_i32_279, %1653 : i32
    %c0_i32_728 = arith.constant 0 : i32
    %1655 = arith.minsi %1654, %c0_i32_728 : i32
    %c64_i32_729 = arith.constant 64 : i32
    %1656 = arith.muli %1655, %c64_i32_729 : i32
    %1657 = arith.addi %0, %1656 : i32
    %c0_i32_730 = arith.constant 0 : i32
    %1658 = arith.addi %1657, %c0_i32_730 : i32
    %1659 = arith.addi %1658, %1652 : i32
    %1660 = arith.index_cast %1659 : i32 to index
    %1661 = memref.load %arg1[%1660] : memref<64xi32, #tpu.memory_space<smem>>
    %c8_i32_731 = arith.constant 8 : i32
    %1662 = arith.addi %1657, %c8_i32_731 : i32
    %1663 = arith.addi %1662, %1652 : i32
    %1664 = arith.index_cast %1663 : i32 to index
    %1665 = memref.load %arg1[%1664] : memref<64xi32, #tpu.memory_space<smem>>
    %c16_i32_732 = arith.constant 16 : i32
    %1666 = arith.addi %1657, %c16_i32_732 : i32
    %1667 = arith.addi %1666, %1652 : i32
    %1668 = arith.index_cast %1667 : i32 to index
    %1669 = memref.load %arg1[%1668] : memref<64xi32, #tpu.memory_space<smem>>
    %c24_i32_733 = arith.constant 24 : i32
    %1670 = arith.addi %1657, %c24_i32_733 : i32
    %1671 = arith.addi %1670, %1652 : i32
    %1672 = arith.index_cast %1671 : i32 to index
    %1673 = memref.load %arg1[%1672] : memref<64xi32, #tpu.memory_space<smem>>
    %c32_i32_734 = arith.constant 32 : i32
    %1674 = arith.addi %1657, %c32_i32_734 : i32
    %1675 = arith.addi %1674, %1652 : i32
    %1676 = arith.index_cast %1675 : i32 to index
    %1677 = memref.load %arg1[%1676] : memref<64xi32, #tpu.memory_space<smem>>
    %c40_i32_735 = arith.constant 40 : i32
    %1678 = arith.addi %1657, %c40_i32_735 : i32
    %1679 = arith.addi %1678, %1652 : i32
    %1680 = arith.index_cast %1679 : i32 to index
    %1681 = memref.load %arg1[%1680] : memref<64xi32, #tpu.memory_space<smem>>
    %c48_i32_736 = arith.constant 48 : i32
    %1682 = arith.addi %1657, %c48_i32_736 : i32
    %1683 = arith.addi %1682, %1652 : i32
    %1684 = arith.index_cast %1683 : i32 to index
    %1685 = memref.load %arg1[%1684] : memref<64xi32, #tpu.memory_space<smem>>
    %c56_i32_737 = arith.constant 56 : i32
    %1686 = arith.addi %1657, %c56_i32_737 : i32
    %1687 = arith.addi %1686, %1652 : i32
    %1688 = arith.index_cast %1687 : i32 to index
    %1689 = memref.load %arg1[%1688] : memref<64xi32, #tpu.memory_space<smem>>
    %c7_i32_738 = arith.constant 7 : i32
    %1690 = arith.addi %1615, %c7_i32_738 : i32
    %c7_i32_739 = arith.constant 7 : i32
    %1691 = arith.andi %1690, %c7_i32_739 : i32
    %c7_i32_740 = arith.constant 7 : i32
    %1692 = arith.addi %1615, %c7_i32_740 : i32
    %c8_i32_741 = arith.constant 8 : i32
    %1693 = arith.cmpi slt, %1692, %c8_i32_741 : i32
    %1694 = arith.extui %1693 : i1 to i32
    %c0_i32_742 = arith.constant 0 : i32
    %1695 = arith.cmpi ne, %1694, %c0_i32_742 : i32
    scf.if %1695 {
      %c8_i32_796 = arith.constant 8 : i32
      %1783 = arith.muli %1691, %c8_i32_796 : i32
      %c0_i32_797 = arith.constant 0 : i32
      %1784 = arith.addi %1783, %c0_i32_797 : i32
      %c0_i32_798 = arith.constant 0 : i32
      %1785 = tpu.memref_slice %arg2[%1661, %c0_i32_798] : memref<512x32xf32, #tpu.memory_space<any>> -> memref<1x32xf32, #tpu.memory_space<any>>
      %1786 = tpu.memref_squeeze %1785 : memref<1x32xf32, #tpu.memory_space<any>> -> memref<32xf32, #tpu.memory_space<any>>
      %c0_i32_799 = arith.constant 0 : i32
      %1787 = tpu.memref_slice %arg9[%1784, %c0_i32_799] : memref<64x32xf32, #tpu.memory_space<vmem>> -> memref<1x32xf32, #tpu.memory_space<vmem>>
      %1788 = tpu.memref_squeeze %1787 : memref<1x32xf32, #tpu.memory_space<vmem>> -> memref<32xf32, #tpu.memory_space<vmem>>
      %1789 = tpu.memref_slice %arg10[%1691] : memref<8x!tpu.dma_semaphore, #tpu.memory_space<semaphore_mem>> -> memref<1x!tpu.dma_semaphore, #tpu.memory_space<semaphore_mem>>
      %1790 = tpu.memref_squeeze %1789 : memref<1x!tpu.dma_semaphore, #tpu.memory_space<semaphore_mem>> -> memref<!tpu.dma_semaphore, #tpu.memory_space<semaphore_mem>>
      tpu.enqueue_dma source(%1786 : memref<32xf32, #tpu.memory_space<any>>) target(%1788 : memref<32xf32, #tpu.memory_space<vmem>>) target_semaphore(%1790 : memref<!tpu.dma_semaphore, #tpu.memory_space<semaphore_mem>>)
      %c8_i32_800 = arith.constant 8 : i32
      %1791 = arith.muli %1691, %c8_i32_800 : i32
      %c1_i32_801 = arith.constant 1 : i32
      %1792 = arith.addi %1791, %c1_i32_801 : i32
      %c0_i32_802 = arith.constant 0 : i32
      %1793 = tpu.memref_slice %arg2[%1665, %c0_i32_802] : memref<512x32xf32, #tpu.memory_space<any>> -> memref<1x32xf32, #tpu.memory_space<any>>
      %1794 = tpu.memref_squeeze %1793 : memref<1x32xf32, #tpu.memory_space<any>> -> memref<32xf32, #tpu.memory_space<any>>
      %c0_i32_803 = arith.constant 0 : i32
      %1795 = tpu.memref_slice %arg9[%1792, %c0_i32_803] : memref<64x32xf32, #tpu.memory_space<vmem>> -> memref<1x32xf32, #tpu.memory_space<vmem>>
      %1796 = tpu.memref_squeeze %1795 : memref<1x32xf32, #tpu.memory_space<vmem>> -> memref<32xf32, #tpu.memory_space<vmem>>
      %1797 = tpu.memref_slice %arg10[%1691] : memref<8x!tpu.dma_semaphore, #tpu.memory_space<semaphore_mem>> -> memref<1x!tpu.dma_semaphore, #tpu.memory_space<semaphore_mem>>
      %1798 = tpu.memref_squeeze %1797 : memref<1x!tpu.dma_semaphore, #tpu.memory_space<semaphore_mem>> -> memref<!tpu.dma_semaphore, #tpu.memory_space<semaphore_mem>>
      tpu.enqueue_dma source(%1794 : memref<32xf32, #tpu.memory_space<any>>) target(%1796 : memref<32xf32, #tpu.memory_space<vmem>>) target_semaphore(%1798 : memref<!tpu.dma_semaphore, #tpu.memory_space<semaphore_mem>>)
      %c8_i32_804 = arith.constant 8 : i32
      %1799 = arith.muli %1691, %c8_i32_804 : i32
      %c2_i32_805 = arith.constant 2 : i32
      %1800 = arith.addi %1799, %c2_i32_805 : i32
      %c0_i32_806 = arith.constant 0 : i32
      %1801 = tpu.memref_slice %arg2[%1669, %c0_i32_806] : memref<512x32xf32, #tpu.memory_space<any>> -> memref<1x32xf32, #tpu.memory_space<any>>
      %1802 = tpu.memref_squeeze %1801 : memref<1x32xf32, #tpu.memory_space<any>> -> memref<32xf32, #tpu.memory_space<any>>
      %c0_i32_807 = arith.constant 0 : i32
      %1803 = tpu.memref_slice %arg9[%1800, %c0_i32_807] : memref<64x32xf32, #tpu.memory_space<vmem>> -> memref<1x32xf32, #tpu.memory_space<vmem>>
      %1804 = tpu.memref_squeeze %1803 : memref<1x32xf32, #tpu.memory_space<vmem>> -> memref<32xf32, #tpu.memory_space<vmem>>
      %1805 = tpu.memref_slice %arg10[%1691] : memref<8x!tpu.dma_semaphore, #tpu.memory_space<semaphore_mem>> -> memref<1x!tpu.dma_semaphore, #tpu.memory_space<semaphore_mem>>
      %1806 = tpu.memref_squeeze %1805 : memref<1x!tpu.dma_semaphore, #tpu.memory_space<semaphore_mem>> -> memref<!tpu.dma_semaphore, #tpu.memory_space<semaphore_mem>>
      tpu.enqueue_dma source(%1802 : memref<32xf32, #tpu.memory_space<any>>) target(%1804 : memref<32xf32, #tpu.memory_space<vmem>>) target_semaphore(%1806 : memref<!tpu.dma_semaphore, #tpu.memory_space<semaphore_mem>>)
      %c8_i32_808 = arith.constant 8 : i32
      %1807 = arith.muli %1691, %c8_i32_808 : i32
      %c3_i32_809 = arith.constant 3 : i32
      %1808 = arith.addi %1807, %c3_i32_809 : i32
      %c0_i32_810 = arith.constant 0 : i32
      %1809 = tpu.memref_slice %arg2[%1673, %c0_i32_810] : memref<512x32xf32, #tpu.memory_space<any>> -> memref<1x32xf32, #tpu.memory_space<any>>
      %1810 = tpu.memref_squeeze %1809 : memref<1x32xf32, #tpu.memory_space<any>> -> memref<32xf32, #tpu.memory_space<any>>
      %c0_i32_811 = arith.constant 0 : i32
      %1811 = tpu.memref_slice %arg9[%1808, %c0_i32_811] : memref<64x32xf32, #tpu.memory_space<vmem>> -> memref<1x32xf32, #tpu.memory_space<vmem>>
      %1812 = tpu.memref_squeeze %1811 : memref<1x32xf32, #tpu.memory_space<vmem>> -> memref<32xf32, #tpu.memory_space<vmem>>
      %1813 = tpu.memref_slice %arg10[%1691] : memref<8x!tpu.dma_semaphore, #tpu.memory_space<semaphore_mem>> -> memref<1x!tpu.dma_semaphore, #tpu.memory_space<semaphore_mem>>
      %1814 = tpu.memref_squeeze %1813 : memref<1x!tpu.dma_semaphore, #tpu.memory_space<semaphore_mem>> -> memref<!tpu.dma_semaphore, #tpu.memory_space<semaphore_mem>>
      tpu.enqueue_dma source(%1810 : memref<32xf32, #tpu.memory_space<any>>) target(%1812 : memref<32xf32, #tpu.memory_space<vmem>>) target_semaphore(%1814 : memref<!tpu.dma_semaphore, #tpu.memory_space<semaphore_mem>>)
      %c8_i32_812 = arith.constant 8 : i32
      %1815 = arith.muli %1691, %c8_i32_812 : i32
      %c4_i32_813 = arith.constant 4 : i32
      %1816 = arith.addi %1815, %c4_i32_813 : i32
      %c0_i32_814 = arith.constant 0 : i32
      %1817 = tpu.memref_slice %arg2[%1677, %c0_i32_814] : memref<512x32xf32, #tpu.memory_space<any>> -> memref<1x32xf32, #tpu.memory_space<any>>
      %1818 = tpu.memref_squeeze %1817 : memref<1x32xf32, #tpu.memory_space<any>> -> memref<32xf32, #tpu.memory_space<any>>
      %c0_i32_815 = arith.constant 0 : i32
      %1819 = tpu.memref_slice %arg9[%1816, %c0_i32_815] : memref<64x32xf32, #tpu.memory_space<vmem>> -> memref<1x32xf32, #tpu.memory_space<vmem>>
      %1820 = tpu.memref_squeeze %1819 : memref<1x32xf32, #tpu.memory_space<vmem>> -> memref<32xf32, #tpu.memory_space<vmem>>
      %1821 = tpu.memref_slice %arg10[%1691] : memref<8x!tpu.dma_semaphore, #tpu.memory_space<semaphore_mem>> -> memref<1x!tpu.dma_semaphore, #tpu.memory_space<semaphore_mem>>
      %1822 = tpu.memref_squeeze %1821 : memref<1x!tpu.dma_semaphore, #tpu.memory_space<semaphore_mem>> -> memref<!tpu.dma_semaphore, #tpu.memory_space<semaphore_mem>>
      tpu.enqueue_dma source(%1818 : memref<32xf32, #tpu.memory_space<any>>) target(%1820 : memref<32xf32, #tpu.memory_space<vmem>>) target_semaphore(%1822 : memref<!tpu.dma_semaphore, #tpu.memory_space<semaphore_mem>>)
      %c8_i32_816 = arith.constant 8 : i32
      %1823 = arith.muli %1691, %c8_i32_816 : i32
      %c5_i32_817 = arith.constant 5 : i32
      %1824 = arith.addi %1823, %c5_i32_817 : i32
      %c0_i32_818 = arith.constant 0 : i32
      %1825 = tpu.memref_slice %arg2[%1681, %c0_i32_818] : memref<512x32xf32, #tpu.memory_space<any>> -> memref<1x32xf32, #tpu.memory_space<any>>
      %1826 = tpu.memref_squeeze %1825 : memref<1x32xf32, #tpu.memory_space<any>> -> memref<32xf32, #tpu.memory_space<any>>
      %c0_i32_819 = arith.constant 0 : i32
      %1827 = tpu.memref_slice %arg9[%1824, %c0_i32_819] : memref<64x32xf32, #tpu.memory_space<vmem>> -> memref<1x32xf32, #tpu.memory_space<vmem>>
      %1828 = tpu.memref_squeeze %1827 : memref<1x32xf32, #tpu.memory_space<vmem>> -> memref<32xf32, #tpu.memory_space<vmem>>
      %1829 = tpu.memref_slice %arg10[%1691] : memref<8x!tpu.dma_semaphore, #tpu.memory_space<semaphore_mem>> -> memref<1x!tpu.dma_semaphore, #tpu.memory_space<semaphore_mem>>
      %1830 = tpu.memref_squeeze %1829 : memref<1x!tpu.dma_semaphore, #tpu.memory_space<semaphore_mem>> -> memref<!tpu.dma_semaphore, #tpu.memory_space<semaphore_mem>>
      tpu.enqueue_dma source(%1826 : memref<32xf32, #tpu.memory_space<any>>) target(%1828 : memref<32xf32, #tpu.memory_space<vmem>>) target_semaphore(%1830 : memref<!tpu.dma_semaphore, #tpu.memory_space<semaphore_mem>>)
      %c8_i32_820 = arith.constant 8 : i32
      %1831 = arith.muli %1691, %c8_i32_820 : i32
      %c6_i32_821 = arith.constant 6 : i32
      %1832 = arith.addi %1831, %c6_i32_821 : i32
      %c0_i32_822 = arith.constant 0 : i32
      %1833 = tpu.memref_slice %arg2[%1685, %c0_i32_822] : memref<512x32xf32, #tpu.memory_space<any>> -> memref<1x32xf32, #tpu.memory_space<any>>
      %1834 = tpu.memref_squeeze %1833 : memref<1x32xf32, #tpu.memory_space<any>> -> memref<32xf32, #tpu.memory_space<any>>
      %c0_i32_823 = arith.constant 0 : i32
      %1835 = tpu.memref_slice %arg9[%1832, %c0_i32_823] : memref<64x32xf32, #tpu.memory_space<vmem>> -> memref<1x32xf32, #tpu.memory_space<vmem>>
      %1836 = tpu.memref_squeeze %1835 : memref<1x32xf32, #tpu.memory_space<vmem>> -> memref<32xf32, #tpu.memory_space<vmem>>
      %1837 = tpu.memref_slice %arg10[%1691] : memref<8x!tpu.dma_semaphore, #tpu.memory_space<semaphore_mem>> -> memref<1x!tpu.dma_semaphore, #tpu.memory_space<semaphore_mem>>
      %1838 = tpu.memref_squeeze %1837 : memref<1x!tpu.dma_semaphore, #tpu.memory_space<semaphore_mem>> -> memref<!tpu.dma_semaphore, #tpu.memory_space<semaphore_mem>>
      tpu.enqueue_dma source(%1834 : memref<32xf32, #tpu.memory_space<any>>) target(%1836 : memref<32xf32, #tpu.memory_space<vmem>>) target_semaphore(%1838 : memref<!tpu.dma_semaphore, #tpu.memory_space<semaphore_mem>>)
      %c8_i32_824 = arith.constant 8 : i32
      %1839 = arith.muli %1691, %c8_i32_824 : i32
      %c7_i32_825 = arith.constant 7 : i32
      %1840 = arith.addi %1839, %c7_i32_825 : i32
      %c0_i32_826 = arith.constant 0 : i32
      %1841 = tpu.memref_slice %arg2[%1689, %c0_i32_826] : memref<512x32xf32, #tpu.memory_space<any>> -> memref<1x32xf32, #tpu.memory_space<any>>
      %1842 = tpu.memref_squeeze %1841 : memref<1x32xf32, #tpu.memory_space<any>> -> memref<32xf32, #tpu.memory_space<any>>
      %c0_i32_827 = arith.constant 0 : i32
      %1843 = tpu.memref_slice %arg9[%1840, %c0_i32_827] : memref<64x32xf32, #tpu.memory_space<vmem>> -> memref<1x32xf32, #tpu.memory_space<vmem>>
      %1844 = tpu.memref_squeeze %1843 : memref<1x32xf32, #tpu.memory_space<vmem>> -> memref<32xf32, #tpu.memory_space<vmem>>
      %1845 = tpu.memref_slice %arg10[%1691] : memref<8x!tpu.dma_semaphore, #tpu.memory_space<semaphore_mem>> -> memref<1x!tpu.dma_semaphore, #tpu.memory_space<semaphore_mem>>
      %1846 = tpu.memref_squeeze %1845 : memref<1x!tpu.dma_semaphore, #tpu.memory_space<semaphore_mem>> -> memref<!tpu.dma_semaphore, #tpu.memory_space<semaphore_mem>>
      tpu.enqueue_dma source(%1842 : memref<32xf32, #tpu.memory_space<any>>) target(%1844 : memref<32xf32, #tpu.memory_space<vmem>>) target_semaphore(%1846 : memref<!tpu.dma_semaphore, #tpu.memory_space<semaphore_mem>>)
    } else {
    }
    %c8_i32_743 = arith.constant 8 : i32
    %1696 = arith.muli %1616, %c8_i32_743 : i32
    %c0_i32_744 = arith.constant 0 : i32
    %1697 = arith.addi %1696, %c0_i32_744 : i32
    %c0_i32_745 = arith.constant 0 : i32
    %1698 = tpu.memref_slice %arg2[%1620, %c0_i32_745] : memref<512x32xf32, #tpu.memory_space<any>> -> memref<1x32xf32, #tpu.memory_space<any>>
    %1699 = tpu.memref_squeeze %1698 : memref<1x32xf32, #tpu.memory_space<any>> -> memref<32xf32, #tpu.memory_space<any>>
    %c0_i32_746 = arith.constant 0 : i32
    %1700 = tpu.memref_slice %arg9[%1697, %c0_i32_746] : memref<64x32xf32, #tpu.memory_space<vmem>> -> memref<1x32xf32, #tpu.memory_space<vmem>>
    %1701 = tpu.memref_squeeze %1700 : memref<1x32xf32, #tpu.memory_space<vmem>> -> memref<32xf32, #tpu.memory_space<vmem>>
    %1702 = tpu.memref_slice %arg10[%1616] : memref<8x!tpu.dma_semaphore, #tpu.memory_space<semaphore_mem>> -> memref<1x!tpu.dma_semaphore, #tpu.memory_space<semaphore_mem>>
    %1703 = tpu.memref_squeeze %1702 : memref<1x!tpu.dma_semaphore, #tpu.memory_space<semaphore_mem>> -> memref<!tpu.dma_semaphore, #tpu.memory_space<semaphore_mem>>
    tpu.wait_dma2 semaphore(%1703 : memref<!tpu.dma_semaphore, #tpu.memory_space<semaphore_mem>>) src(%1699 : memref<32xf32, #tpu.memory_space<any>>) dst(%1701 : memref<32xf32, #tpu.memory_space<vmem>>)
    %c8_i32_747 = arith.constant 8 : i32
    %1704 = arith.muli %1616, %c8_i32_747 : i32
    %c1_i32_748 = arith.constant 1 : i32
    %1705 = arith.addi %1704, %c1_i32_748 : i32
    %c0_i32_749 = arith.constant 0 : i32
    %1706 = tpu.memref_slice %arg2[%1624, %c0_i32_749] : memref<512x32xf32, #tpu.memory_space<any>> -> memref<1x32xf32, #tpu.memory_space<any>>
    %1707 = tpu.memref_squeeze %1706 : memref<1x32xf32, #tpu.memory_space<any>> -> memref<32xf32, #tpu.memory_space<any>>
    %c0_i32_750 = arith.constant 0 : i32
    %1708 = tpu.memref_slice %arg9[%1705, %c0_i32_750] : memref<64x32xf32, #tpu.memory_space<vmem>> -> memref<1x32xf32, #tpu.memory_space<vmem>>
    %1709 = tpu.memref_squeeze %1708 : memref<1x32xf32, #tpu.memory_space<vmem>> -> memref<32xf32, #tpu.memory_space<vmem>>
    %1710 = tpu.memref_slice %arg10[%1616] : memref<8x!tpu.dma_semaphore, #tpu.memory_space<semaphore_mem>> -> memref<1x!tpu.dma_semaphore, #tpu.memory_space<semaphore_mem>>
    %1711 = tpu.memref_squeeze %1710 : memref<1x!tpu.dma_semaphore, #tpu.memory_space<semaphore_mem>> -> memref<!tpu.dma_semaphore, #tpu.memory_space<semaphore_mem>>
    tpu.wait_dma2 semaphore(%1711 : memref<!tpu.dma_semaphore, #tpu.memory_space<semaphore_mem>>) src(%1707 : memref<32xf32, #tpu.memory_space<any>>) dst(%1709 : memref<32xf32, #tpu.memory_space<vmem>>)
    %c8_i32_751 = arith.constant 8 : i32
    %1712 = arith.muli %1616, %c8_i32_751 : i32
    %c2_i32_752 = arith.constant 2 : i32
    %1713 = arith.addi %1712, %c2_i32_752 : i32
    %c0_i32_753 = arith.constant 0 : i32
    %1714 = tpu.memref_slice %arg2[%1628, %c0_i32_753] : memref<512x32xf32, #tpu.memory_space<any>> -> memref<1x32xf32, #tpu.memory_space<any>>
    %1715 = tpu.memref_squeeze %1714 : memref<1x32xf32, #tpu.memory_space<any>> -> memref<32xf32, #tpu.memory_space<any>>
    %c0_i32_754 = arith.constant 0 : i32
    %1716 = tpu.memref_slice %arg9[%1713, %c0_i32_754] : memref<64x32xf32, #tpu.memory_space<vmem>> -> memref<1x32xf32, #tpu.memory_space<vmem>>
    %1717 = tpu.memref_squeeze %1716 : memref<1x32xf32, #tpu.memory_space<vmem>> -> memref<32xf32, #tpu.memory_space<vmem>>
    %1718 = tpu.memref_slice %arg10[%1616] : memref<8x!tpu.dma_semaphore, #tpu.memory_space<semaphore_mem>> -> memref<1x!tpu.dma_semaphore, #tpu.memory_space<semaphore_mem>>
    %1719 = tpu.memref_squeeze %1718 : memref<1x!tpu.dma_semaphore, #tpu.memory_space<semaphore_mem>> -> memref<!tpu.dma_semaphore, #tpu.memory_space<semaphore_mem>>
    tpu.wait_dma2 semaphore(%1719 : memref<!tpu.dma_semaphore, #tpu.memory_space<semaphore_mem>>) src(%1715 : memref<32xf32, #tpu.memory_space<any>>) dst(%1717 : memref<32xf32, #tpu.memory_space<vmem>>)
    %c8_i32_755 = arith.constant 8 : i32
    %1720 = arith.muli %1616, %c8_i32_755 : i32
    %c3_i32_756 = arith.constant 3 : i32
    %1721 = arith.addi %1720, %c3_i32_756 : i32
    %c0_i32_757 = arith.constant 0 : i32
    %1722 = tpu.memref_slice %arg2[%1632, %c0_i32_757] : memref<512x32xf32, #tpu.memory_space<any>> -> memref<1x32xf32, #tpu.memory_space<any>>
    %1723 = tpu.memref_squeeze %1722 : memref<1x32xf32, #tpu.memory_space<any>> -> memref<32xf32, #tpu.memory_space<any>>
    %c0_i32_758 = arith.constant 0 : i32
    %1724 = tpu.memref_slice %arg9[%1721, %c0_i32_758] : memref<64x32xf32, #tpu.memory_space<vmem>> -> memref<1x32xf32, #tpu.memory_space<vmem>>
    %1725 = tpu.memref_squeeze %1724 : memref<1x32xf32, #tpu.memory_space<vmem>> -> memref<32xf32, #tpu.memory_space<vmem>>
    %1726 = tpu.memref_slice %arg10[%1616] : memref<8x!tpu.dma_semaphore, #tpu.memory_space<semaphore_mem>> -> memref<1x!tpu.dma_semaphore, #tpu.memory_space<semaphore_mem>>
    %1727 = tpu.memref_squeeze %1726 : memref<1x!tpu.dma_semaphore, #tpu.memory_space<semaphore_mem>> -> memref<!tpu.dma_semaphore, #tpu.memory_space<semaphore_mem>>
    tpu.wait_dma2 semaphore(%1727 : memref<!tpu.dma_semaphore, #tpu.memory_space<semaphore_mem>>) src(%1723 : memref<32xf32, #tpu.memory_space<any>>) dst(%1725 : memref<32xf32, #tpu.memory_space<vmem>>)
    %c8_i32_759 = arith.constant 8 : i32
    %1728 = arith.muli %1616, %c8_i32_759 : i32
    %c4_i32_760 = arith.constant 4 : i32
    %1729 = arith.addi %1728, %c4_i32_760 : i32
    %c0_i32_761 = arith.constant 0 : i32
    %1730 = tpu.memref_slice %arg2[%1636, %c0_i32_761] : memref<512x32xf32, #tpu.memory_space<any>> -> memref<1x32xf32, #tpu.memory_space<any>>
    %1731 = tpu.memref_squeeze %1730 : memref<1x32xf32, #tpu.memory_space<any>> -> memref<32xf32, #tpu.memory_space<any>>
    %c0_i32_762 = arith.constant 0 : i32
    %1732 = tpu.memref_slice %arg9[%1729, %c0_i32_762] : memref<64x32xf32, #tpu.memory_space<vmem>> -> memref<1x32xf32, #tpu.memory_space<vmem>>
    %1733 = tpu.memref_squeeze %1732 : memref<1x32xf32, #tpu.memory_space<vmem>> -> memref<32xf32, #tpu.memory_space<vmem>>
    %1734 = tpu.memref_slice %arg10[%1616] : memref<8x!tpu.dma_semaphore, #tpu.memory_space<semaphore_mem>> -> memref<1x!tpu.dma_semaphore, #tpu.memory_space<semaphore_mem>>
    %1735 = tpu.memref_squeeze %1734 : memref<1x!tpu.dma_semaphore, #tpu.memory_space<semaphore_mem>> -> memref<!tpu.dma_semaphore, #tpu.memory_space<semaphore_mem>>
    tpu.wait_dma2 semaphore(%1735 : memref<!tpu.dma_semaphore, #tpu.memory_space<semaphore_mem>>) src(%1731 : memref<32xf32, #tpu.memory_space<any>>) dst(%1733 : memref<32xf32, #tpu.memory_space<vmem>>)
    %c8_i32_763 = arith.constant 8 : i32
    %1736 = arith.muli %1616, %c8_i32_763 : i32
    %c5_i32_764 = arith.constant 5 : i32
    %1737 = arith.addi %1736, %c5_i32_764 : i32
    %c0_i32_765 = arith.constant 0 : i32
    %1738 = tpu.memref_slice %arg2[%1640, %c0_i32_765] : memref<512x32xf32, #tpu.memory_space<any>> -> memref<1x32xf32, #tpu.memory_space<any>>
    %1739 = tpu.memref_squeeze %1738 : memref<1x32xf32, #tpu.memory_space<any>> -> memref<32xf32, #tpu.memory_space<any>>
    %c0_i32_766 = arith.constant 0 : i32
    %1740 = tpu.memref_slice %arg9[%1737, %c0_i32_766] : memref<64x32xf32, #tpu.memory_space<vmem>> -> memref<1x32xf32, #tpu.memory_space<vmem>>
    %1741 = tpu.memref_squeeze %1740 : memref<1x32xf32, #tpu.memory_space<vmem>> -> memref<32xf32, #tpu.memory_space<vmem>>
    %1742 = tpu.memref_slice %arg10[%1616] : memref<8x!tpu.dma_semaphore, #tpu.memory_space<semaphore_mem>> -> memref<1x!tpu.dma_semaphore, #tpu.memory_space<semaphore_mem>>
    %1743 = tpu.memref_squeeze %1742 : memref<1x!tpu.dma_semaphore, #tpu.memory_space<semaphore_mem>> -> memref<!tpu.dma_semaphore, #tpu.memory_space<semaphore_mem>>
    tpu.wait_dma2 semaphore(%1743 : memref<!tpu.dma_semaphore, #tpu.memory_space<semaphore_mem>>) src(%1739 : memref<32xf32, #tpu.memory_space<any>>) dst(%1741 : memref<32xf32, #tpu.memory_space<vmem>>)
    %c8_i32_767 = arith.constant 8 : i32
    %1744 = arith.muli %1616, %c8_i32_767 : i32
    %c6_i32_768 = arith.constant 6 : i32
    %1745 = arith.addi %1744, %c6_i32_768 : i32
    %c0_i32_769 = arith.constant 0 : i32
    %1746 = tpu.memref_slice %arg2[%1644, %c0_i32_769] : memref<512x32xf32, #tpu.memory_space<any>> -> memref<1x32xf32, #tpu.memory_space<any>>
    %1747 = tpu.memref_squeeze %1746 : memref<1x32xf32, #tpu.memory_space<any>> -> memref<32xf32, #tpu.memory_space<any>>
    %c0_i32_770 = arith.constant 0 : i32
    %1748 = tpu.memref_slice %arg9[%1745, %c0_i32_770] : memref<64x32xf32, #tpu.memory_space<vmem>> -> memref<1x32xf32, #tpu.memory_space<vmem>>
    %1749 = tpu.memref_squeeze %1748 : memref<1x32xf32, #tpu.memory_space<vmem>> -> memref<32xf32, #tpu.memory_space<vmem>>
    %1750 = tpu.memref_slice %arg10[%1616] : memref<8x!tpu.dma_semaphore, #tpu.memory_space<semaphore_mem>> -> memref<1x!tpu.dma_semaphore, #tpu.memory_space<semaphore_mem>>
    %1751 = tpu.memref_squeeze %1750 : memref<1x!tpu.dma_semaphore, #tpu.memory_space<semaphore_mem>> -> memref<!tpu.dma_semaphore, #tpu.memory_space<semaphore_mem>>
    tpu.wait_dma2 semaphore(%1751 : memref<!tpu.dma_semaphore, #tpu.memory_space<semaphore_mem>>) src(%1747 : memref<32xf32, #tpu.memory_space<any>>) dst(%1749 : memref<32xf32, #tpu.memory_space<vmem>>)
    %c8_i32_771 = arith.constant 8 : i32
    %1752 = arith.muli %1616, %c8_i32_771 : i32
    %c7_i32_772 = arith.constant 7 : i32
    %1753 = arith.addi %1752, %c7_i32_772 : i32
    %c0_i32_773 = arith.constant 0 : i32
    %1754 = tpu.memref_slice %arg2[%1648, %c0_i32_773] : memref<512x32xf32, #tpu.memory_space<any>> -> memref<1x32xf32, #tpu.memory_space<any>>
    %1755 = tpu.memref_squeeze %1754 : memref<1x32xf32, #tpu.memory_space<any>> -> memref<32xf32, #tpu.memory_space<any>>
    %c0_i32_774 = arith.constant 0 : i32
    %1756 = tpu.memref_slice %arg9[%1753, %c0_i32_774] : memref<64x32xf32, #tpu.memory_space<vmem>> -> memref<1x32xf32, #tpu.memory_space<vmem>>
    %1757 = tpu.memref_squeeze %1756 : memref<1x32xf32, #tpu.memory_space<vmem>> -> memref<32xf32, #tpu.memory_space<vmem>>
    %1758 = tpu.memref_slice %arg10[%1616] : memref<8x!tpu.dma_semaphore, #tpu.memory_space<semaphore_mem>> -> memref<1x!tpu.dma_semaphore, #tpu.memory_space<semaphore_mem>>
    %1759 = tpu.memref_squeeze %1758 : memref<1x!tpu.dma_semaphore, #tpu.memory_space<semaphore_mem>> -> memref<!tpu.dma_semaphore, #tpu.memory_space<semaphore_mem>>
    tpu.wait_dma2 semaphore(%1759 : memref<!tpu.dma_semaphore, #tpu.memory_space<semaphore_mem>>) src(%1755 : memref<32xf32, #tpu.memory_space<any>>) dst(%1757 : memref<32xf32, #tpu.memory_space<vmem>>)
    %c8_i32_775 = arith.constant 8 : i32
    %1760 = arith.muli %1616, %c8_i32_775 : i32
    %1761 = tpu.assume_multiple %1760, 8 : i32
    %1762 = arith.index_cast %1761 : i32 to index
    %c0_776 = arith.constant 0 : index
    %1763 = vector.load %arg9[%1762, %c0_776] : memref<64x32xf32, #tpu.memory_space<vmem>>, vector<8x32xf32>
    %1764 = arith.addf %1614, %1763 : vector<8x32xf32>
    %c8_i32_777 = arith.constant 8 : i32
    %c8_i32_778 = arith.constant 8 : i32
    %1765 = arith.muli %c0_i32_279, %c8_i32_778 : i32
    %1766 = tpu.assume_multiple %1765, 8 : i32
    %1767 = arith.index_cast %1766 : i32 to index
    %c0_779 = arith.constant 0 : index
    %1768 = vector.load %arg8[%1767, %c0_779] : memref<8x32xf32, #tpu.memory_space<vmem>>, vector<8x32xf32>
    tpu.vector_store %arg8[%1767, %c0_779], %1764 {strides = array<i32>} : memref<8x32xf32, #tpu.memory_space<vmem>>, vector<8x32xf32>,
    %c1_i32_780 = arith.constant 1 : i32
    %c0_781 = arith.constant 0 : index
    %c0_782 = arith.constant 0 : index
    %1769 = vector.load %arg8[%c0_781, %c0_782] : memref<8x32xf32, #tpu.memory_space<vmem>>, vector<8x32xf32>
    %cst_783 = arith.constant 1.250000e-01 : f32
    %1770 = vector.broadcast %cst_783 : f32 to vector<8x32xf32>
    %1771 = arith.mulf %1769, %1770 : vector<8x32xf32>
    %c0_784 = arith.constant 0 : index
    %c0_785 = arith.constant 0 : index
    %1772 = vector.load %arg3[%c0_784, %c0_785] : memref<32x32xf32, #tpu.memory_space<vmem>>, vector<32x32xf32>
    %cst_786 = arith.constant dense<0.000000e+00> : vector<8x32xf32>
    %1773 = tpu.matmul %1771, %1772, %cst_786 {dimension_numbers = #tpu.dot_dimension_numbers<[1], [0], [0], [1], [0, 0, 1, 1], [], []>} : vector<8x32xf32>, vector<32x32xf32>, vector<8x32xf32> -> vector<8x32xf32>
    %c0_787 = arith.constant 0 : index
    %c0_788 = arith.constant 0 : index
    %1774 = vector.load %arg4[%c0_787, %c0_788] : memref<1x32xf32, #tpu.memory_space<vmem>>, vector<1x32xf32>
    %1775 = vector.broadcast %1774 : vector<1x32xf32> to vector<8x32xf32>
    %1776 = arith.addf %1773, %1775 : vector<8x32xf32>
    %c0_789 = arith.constant 0 : index
    %c0_790 = arith.constant 0 : index
    %1777 = vector.load %arg5[%c0_789, %c0_790] : memref<32x128xf32, #tpu.memory_space<vmem>>, vector<32x128xf32>
    %cst_791 = arith.constant dense<0.000000e+00> : vector<8x128xf32>
    %1778 = tpu.matmul %1776, %1777, %cst_791 {dimension_numbers = #tpu.dot_dimension_numbers<[1], [0], [0], [1], [0, 0, 1, 1], [], []>} : vector<8x32xf32>, vector<32x128xf32>, vector<8x128xf32> -> vector<8x128xf32>
    %c0_792 = arith.constant 0 : index
    %c0_793 = arith.constant 0 : index
    %1779 = vector.load %arg6[%c0_792, %c0_793] : memref<1x128xf32, #tpu.memory_space<vmem>>, vector<1x128xf32>
    %1780 = vector.broadcast %1779 : vector<1x128xf32> to vector<8x128xf32>
    %1781 = arith.addf %1778, %1780 : vector<8x128xf32>
    %c0_794 = arith.constant 0 : index
    %c0_795 = arith.constant 0 : index
    %1782 = vector.load %arg7[%c0_794, %c0_795] : memref<8x128xf32, #tpu.memory_space<vmem>>, vector<8x128xf32>
    tpu.vector_store %arg7[%c0_794, %c0_795], %1781 {strides = array<i32>} : memref<8x128xf32, #tpu.memory_space<vmem>>, vector<8x128xf32>,
    return
  }
  func.func @transform_1(%arg0: i32, %arg1: memref<64xi32, #tpu.memory_space<smem>>) -> (i32, i32) {
    %c0_i32 = arith.constant 0 : i32
    %c0_i32_0 = arith.constant 0 : i32
    %c0_i32_1 = arith.constant 0 : i32
    return %c0_i32, %c0_i32_0 : i32, i32
  }
  func.func @transform_2(%arg0: i32, %arg1: memref<64xi32, #tpu.memory_space<smem>>) -> (i32, i32) {
    %c0_i32 = arith.constant 0 : i32
    %c0_i32_0 = arith.constant 0 : i32
    %c0_i32_1 = arith.constant 0 : i32
    return %c0_i32, %c0_i32_0 : i32, i32
  }
  func.func @transform_3(%arg0: i32, %arg1: memref<64xi32, #tpu.memory_space<smem>>) -> (i32, i32) {
    %c0_i32 = arith.constant 0 : i32
    %c0_i32_0 = arith.constant 0 : i32
    %c0_i32_1 = arith.constant 0 : i32
    return %c0_i32, %c0_i32_0 : i32, i32
  }
  func.func @transform_4(%arg0: i32, %arg1: memref<64xi32, #tpu.memory_space<smem>>) -> (i32, i32) {
    %c0_i32 = arith.constant 0 : i32
    %c0_i32_0 = arith.constant 0 : i32
    %c0_i32_1 = arith.constant 0 : i32
    return %c0_i32, %c0_i32_0 : i32, i32
  }
  func.func @transform_5(%arg0: i32, %arg1: memref<64xi32, #tpu.memory_space<smem>>) -> (i32, i32) {
    %c0_i32 = arith.constant 0 : i32
    %c0_i32_0 = arith.constant 0 : i32
    return %arg0, %c0_i32 : i32, i32
  }
}

</mosaic_0001>

<bundles_post_ra>
// kernel: tpu_custom_call.1
= control target key start
LH: loop header
LB: loop body
LE: loop exit
PB: predicated region body
PF: predicated region fallthrough
CT: control target
= control target key end

     0   :  { %s3272_s24 = smov [#allocation6]   ;;  %s3543_s0 = inlined_call_operand.vmem [shape: s32[64], index: 0, kind: input, shape index: {}]   ;;  %s3544_s1 = inlined_call_operand.vmem [shape: f32[512,32], index: 1, kind: input, shape index: {}]   ;;  %s3545_s2 = inlined_call_operand.vmem [shape: f32[32,32], index: 2, kind: input, shape index: {}]   ;;  %s3546_s3 = inlined_call_operand.vmem [shape: f32[1,32], index: 3, kind: input, shape index: {}]   ;;  %s3547_s4 = inlined_call_operand.vmem [shape: f32[32,128], index: 4, kind: input, shape index: {}]   ;;  %s3548_s5 = inlined_call_operand.vmem [shape: f32[1,128], index: 5, kind: input, shape index: {}]   ;;  %s3549_s6 = inlined_call_operand.hbm [shape: f32[8,128], index: 6, kind: output, shape index: {}]  }
   0x1   :  { %s12_s23 = sshll.u32 %s3543_s0, 4  ;;  %s13_s23 = int_to_ptr.vmem [resolvable:$true] %s12_s23 }
   0x2   :  { %15 = dma.vmem_to_smem %s13_s23, 16, %s3272_s24, [#allocation5] }
   0x3   :  { %3252 = dma.done.wait [#allocation5], 16 }
   0x4   :  { %3253 = vsyncadd [#allocation5], 4294967280 }
   0x5   :  { %18 = sfence }
   0x6   :  { %19 = vsyncpa [#allocation8], 0  ;;  %s29_s25 = sld [smem:[#allocation6]] }
   0xc   :  { %s30_s28 = scalar_lea.vmem %s3544_s1, %s29_s25 }
   0xd   :  { %v45_v0 = vld [vmem:[%s30_s28] sm:$0x1] }
   0xe   :  { %46 = vst [vmem:[#allocation3] sm:$0x1] %v45_v0 }
   0xf   :  { %64 = vsyncadd [#allocation4], 16  ;;  %s3139_s29 = sld [smem:[#allocation6 + $0x8]] }
  0x15   :  { %s67_s0 = scalar_lea.vmem %s3544_s1, %s3139_s29 }
  0x16   :  { %v83_v1 = vld [vmem:[%s67_s0] sm:$0x1] }
  0x17   :  { %84 = vst [vmem:[#allocation3 + $0x1] sm:$0x1] %v83_v1 }
  0x18   :  { %102 = vsyncadd [#allocation4], 16  ;;  %s3140_s8 = sld [smem:[#allocation6 + $0x10]] }
  0x1e   :  { %s105_s11 = scalar_lea.vmem %s3544_s1, %s3140_s8 }
  0x1f   :  { %v121_v2 = vld [vmem:[%s105_s11] sm:$0x1] }
  0x20   :  { %122 = vst [vmem:[#allocation3 + $0x2] sm:$0x1] %v121_v2 }
  0x21   :  { %140 = vsyncadd [#allocation4], 16  ;;  %s3141_s12 = sld [smem:[#allocation6 + $0x18]] }
  0x27   :  { %s143_s15 = scalar_lea.vmem %s3544_s1, %s3141_s12 }
  0x28   :  { %v159_v3 = vld [vmem:[%s143_s15] sm:$0x1] }
  0x29   :  { %160 = vst [vmem:[#allocation3 + $0x3] sm:$0x1] %v159_v3 }
  0x2a   :  { %178 = vsyncadd [#allocation4], 16  ;;  %s3142_s16 = sld [smem:[#allocation6 + $0x20]] }
  0x30   :  { %s181_s19 = scalar_lea.vmem %s3544_s1, %s3142_s16 }
  0x31   :  { %v197_v4 = vld [vmem:[%s181_s19] sm:$0x1] }
  0x32   :  { %198 = vst [vmem:[#allocation3 + $0x4] sm:$0x1] %v197_v4 }
  0x33   :  { %216 = vsyncadd [#allocation4], 16  ;;  %s3143_s20 = sld [smem:[#allocation6 + $0x28]] }
  0x39   :  { %s219_s23 = scalar_lea.vmem %s3544_s1, %s3143_s20 }
  0x3a   :  { %v235_v5 = vld [vmem:[%s219_s23] sm:$0x1] }
  0x3b   :  { %236 = vst [vmem:[#allocation3 + $0x5] sm:$0x1] %v235_v5 }
  0x3c   :  { %254 = vsyncadd [#allocation4], 16  ;;  %s3144_s24 = sld [smem:[#allocation6 + $0x30]] }
  0x42   :  { %s257_s27 = scalar_lea.vmem %s3544_s1, %s3144_s24 }
  0x43   :  { %v273_v6 = vld [vmem:[%s257_s27] sm:$0x1] }
  0x44   :  { %274 = vst [vmem:[#allocation3 + $0x6] sm:$0x1] %v273_v6 }
  0x45   :  { %292 = vsyncadd [#allocation4], 16  ;;  %s3145_s28 = sld [smem:[#allocation6 + $0x38]] }
  0x4b   :  { %s295_s7 = scalar_lea.vmem %s3544_s1, %s3145_s28 }
  0x4c   :  { %v311_v7 = vld [vmem:[%s295_s7] sm:$0x1] }
  0x4d   :  { %312 = vst [vmem:[#allocation3 + $0x7] sm:$0x1] %v311_v7 }
  0x4e   :  { %330 = vsyncadd [#allocation4], 16  ;;  %s3146_s0 = sld [smem:[#allocation6 + $0x1]] }
  0x54   :  { %s333_s10 = scalar_lea.vmem %s3544_s1, %s3146_s0 }
  0x55   :  { %v350_v8 = vld [vmem:[%s333_s10] sm:$0x1] }
  0x56   :  { %351 = vst [vmem:[#allocation3 + $0x8] sm:$0x1] %v350_v8 }
  0x57   :  { %369 = vsyncadd [#allocation4 + $0x1], 16  ;;  %s3147_s11 = sld [smem:[#allocation6 + $0x9]] }
  0x5d   :  { %s372_s14 = scalar_lea.vmem %s3544_s1, %s3147_s11 }
  0x5e   :  { %v388_v9 = vld [vmem:[%s372_s14] sm:$0x1] }
  0x5f   :  { %389 = vst [vmem:[#allocation3 + $0x9] sm:$0x1] %v388_v9 }
  0x60   :  { %407 = vsyncadd [#allocation4 + $0x1], 16  ;;  %s3148_s15 = sld [smem:[#allocation6 + $0x11]] }
  0x66   :  { %s410_s18 = scalar_lea.vmem %s3544_s1, %s3148_s15 }
  0x67   :  { %v426_v10 = vld [vmem:[%s410_s18] sm:$0x1] }
  0x68   :  { %427 = vst [vmem:[#allocation3 + $0xa] sm:$0x1] %v426_v10 }
  0x69   :  { %445 = vsyncadd [#allocation4 + $0x1], 16  ;;  %s3149_s19 = sld [smem:[#allocation6 + $0x19]] }
  0x6f   :  { %s448_s22 = scalar_lea.vmem %s3544_s1, %s3149_s19 }
  0x70   :  { %v464_v11 = vld [vmem:[%s448_s22] sm:$0x1] }
  0x71   :  { %465 = vst [vmem:[#allocation3 + $0xb] sm:$0x1] %v464_v11 }
  0x72   :  { %483 = vsyncadd [#allocation4 + $0x1], 16  ;;  %s3150_s23 = sld [smem:[#allocation6 + $0x21]] }
  0x78   :  { %s486_s26 = scalar_lea.vmem %s3544_s1, %s3150_s23 }
  0x79   :  { %v502_v12 = vld [vmem:[%s486_s26] sm:$0x1] }
  0x7a   :  { %503 = vst [vmem:[#allocation3 + $0xc] sm:$0x1] %v502_v12 }
  0x7b   :  { %521 = vsyncadd [#allocation4 + $0x1], 16  ;;  %s3151_s27 = sld [smem:[#allocation6 + $0x29]] }
  0x81   :  { %s524_s30 = scalar_lea.vmem %s3544_s1, %s3151_s27 }
  0x82   :  { %v540_v13 = vld [vmem:[%s524_s30] sm:$0x1] }
  0x83   :  { %541 = vst [vmem:[#allocation3 + $0xd] sm:$0x1] %v540_v13 }
  0x84   :  { %559 = vsyncadd [#allocation4 + $0x1], 16  ;;  %s3152_s7 = sld [smem:[#allocation6 + $0x31]] }
  0x8a   :  { %s562_s9 = scalar_lea.vmem %s3544_s1, %s3152_s7 }
  0x8b   :  { %v578_v14 = vld [vmem:[%s562_s9] sm:$0x1] }
  0x8c   :  { %579 = vst [vmem:[#allocation3 + $0xe] sm:$0x1] %v578_v14 }
  0x8d   :  { %597 = vsyncadd [#allocation4 + $0x1], 16  ;;  %s3153_s10 = sld [smem:[#allocation6 + $0x39]] }
  0x93   :  { %s600_s13 = scalar_lea.vmem %s3544_s1, %s3153_s10 }
  0x94   :  { %v616_v15 = vld [vmem:[%s600_s13] sm:$0x1] }
  0x95   :  { %617 = vst [vmem:[#allocation3 + $0xf] sm:$0x1] %v616_v15 }
  0x96   :  { %635 = vsyncadd [#allocation4 + $0x1], 16  ;;  %s3154_s14 = sld [smem:[#allocation6 + $0x2]] }
  0x9c   :  { %s638_s17 = scalar_lea.vmem %s3544_s1, %s3154_s14 }
  0x9d   :  { %v655_v16 = vld [vmem:[%s638_s17] sm:$0x1] }
  0x9e   :  { %656 = vst [vmem:[#allocation3 + $0x10] sm:$0x1] %v655_v16 }
  0x9f   :  { %674 = vsyncadd [#allocation4 + $0x2], 16  ;;  %s3155_s18 = sld [smem:[#allocation6 + $0xa]] }
  0xa5   :  { %s677_s21 = scalar_lea.vmem %s3544_s1, %s3155_s18 }
  0xa6   :  { %v693_v17 = vld [vmem:[%s677_s21] sm:$0x1] }
  0xa7   :  { %694 = vst [vmem:[#allocation3 + $0x11] sm:$0x1] %v693_v17 }
  0xa8   :  { %712 = vsyncadd [#allocation4 + $0x2], 16  ;;  %s3156_s22 = sld [smem:[#allocation6 + $0x12]] }
  0xae   :  { %s715_s25 = scalar_lea.vmem %s3544_s1, %s3156_s22 }
  0xaf   :  { %v731_v18 = vld [vmem:[%s715_s25] sm:$0x1] }
  0xb0   :  { %732 = vst [vmem:[#allocation3 + $0x12] sm:$0x1] %v731_v18 }
  0xb1   :  { %750 = vsyncadd [#allocation4 + $0x2], 16  ;;  %s3157_s26 = sld [smem:[#allocation6 + $0x1a]] }
  0xb7   :  { %s753_s29 = scalar_lea.vmem %s3544_s1, %s3157_s26 }
  0xb8   :  { %v769_v19 = vld [vmem:[%s753_s29] sm:$0x1] }
  0xb9   :  { %770 = vst [vmem:[#allocation3 + $0x13] sm:$0x1] %v769_v19 }
  0xba   :  { %788 = vsyncadd [#allocation4 + $0x2], 16  ;;  %s3158_s30 = sld [smem:[#allocation6 + $0x22]] }
  0xc0   :  { %s791_s8 = scalar_lea.vmem %s3544_s1, %s3158_s30 }
  0xc1   :  { %v807_v20 = vld [vmem:[%s791_s8] sm:$0x1] }
  0xc2   :  { %808 = vst [vmem:[#allocation3 + $0x14] sm:$0x1] %v807_v20 }
  0xc3   :  { %826 = vsyncadd [#allocation4 + $0x2], 16  ;;  %s3159_s9 = sld [smem:[#allocation6 + $0x2a]] }
  0xc9   :  { %s829_s12 = scalar_lea.vmem %s3544_s1, %s3159_s9 }
  0xca   :  { %v845_v21 = vld [vmem:[%s829_s12] sm:$0x1] }
  0xcb   :  { %846 = vst [vmem:[#allocation3 + $0x15] sm:$0x1] %v845_v21 }
  0xcc   :  { %864 = vsyncadd [#allocation4 + $0x2], 16  ;;  %s3160_s13 = sld [smem:[#allocation6 + $0x32]] }
  0xd2   :  { %s867_s16 = scalar_lea.vmem %s3544_s1, %s3160_s13 }
  0xd3   :  { %v883_v22 = vld [vmem:[%s867_s16] sm:$0x1] }
  0xd4   :  { %884 = vst [vmem:[#allocation3 + $0x16] sm:$0x1] %v883_v22 }
  0xd5   :  { %902 = vsyncadd [#allocation4 + $0x2], 16  ;;  %s3161_s17 = sld [smem:[#allocation6 + $0x3a]] }
  0xdb   :  { %s905_s20 = scalar_lea.vmem %s3544_s1, %s3161_s17 }
  0xdc   :  { %v921_v23 = vld [vmem:[%s905_s20] sm:$0x1] }
  0xdd   :  { %922 = vst [vmem:[#allocation3 + $0x17] sm:$0x1] %v921_v23 }
  0xde   :  { %940 = vsyncadd [#allocation4 + $0x2], 16  ;;  %s3162_s21 = sld [smem:[#allocation6 + $0x3]] }
  0xe4   :  { %s943_s24 = scalar_lea.vmem %s3544_s1, %s3162_s21 }
  0xe5   :  { %v960_v24 = vld [vmem:[%s943_s24] sm:$0x1] }
  0xe6   :  { %961 = vst [vmem:[#allocation3 + $0x18] sm:$0x1] %v960_v24 }
  0xe7   :  { %979 = vsyncadd [#allocation4 + $0x3], 16  ;;  %s3163_s25 = sld [smem:[#allocation6 + $0xb]] }
  0xed   :  { %s982_s28 = scalar_lea.vmem %s3544_s1, %s3163_s25 }
  0xee   :  { %v998_v25 = vld [vmem:[%s982_s28] sm:$0x1] }
  0xef   :  { %999 = vst [vmem:[#allocation3 + $0x19] sm:$0x1] %v998_v25 }
  0xf0   :  { %1017 = vsyncadd [#allocation4 + $0x3], 16  ;;  %s3164_s29 = sld [smem:[#allocation6 + $0x13]] }
  0xf6   :  { %s1020_s0 = scalar_lea.vmem %s3544_s1, %s3164_s29 }
  0xf7   :  { %v1036_v26 = vld [vmem:[%s1020_s0] sm:$0x1] }
  0xf8   :  { %1037 = vst [vmem:[#allocation3 + $0x1a] sm:$0x1] %v1036_v26 }
  0xf9   :  { %1055 = vsyncadd [#allocation4 + $0x3], 16  ;;  %s3165_s8 = sld [smem:[#allocation6 + $0x1b]] }
  0xff   :  { %s1058_s11 = scalar_lea.vmem %s3544_s1, %s3165_s8 }
 0x100   :  { %v1074_v27 = vld [vmem:[%s1058_s11] sm:$0x1] }
 0x101   :  { %1075 = vst [vmem:[#allocation3 + $0x1b] sm:$0x1] %v1074_v27 }
 0x102   :  { %1093 = vsyncadd [#allocation4 + $0x3], 16  ;;  %s3166_s12 = sld [smem:[#allocation6 + $0x23]] }
 0x108   :  { %s1096_s15 = scalar_lea.vmem %s3544_s1, %s3166_s12 }
 0x109   :  { %v1112_v28 = vld [vmem:[%s1096_s15] sm:$0x1] }
 0x10a   :  { %1113 = vst [vmem:[#allocation3 + $0x1c] sm:$0x1] %v1112_v28 }
 0x10b   :  { %1131 = vsyncadd [#allocation4 + $0x3], 16  ;;  %s3167_s16 = sld [smem:[#allocation6 + $0x2b]] }
 0x111   :  { %s1134_s19 = scalar_lea.vmem %s3544_s1, %s3167_s16 }
 0x112   :  { %v1150_v29 = vld [vmem:[%s1134_s19] sm:$0x1] }
 0x113   :  { %1151 = vst [vmem:[#allocation3 + $0x1d] sm:$0x1] %v1150_v29 }
 0x114   :  { %1169 = vsyncadd [#allocation4 + $0x3], 16  ;;  %s3168_s20 = sld [smem:[#allocation6 + $0x33]] }
 0x11a   :  { %s1172_s23 = scalar_lea.vmem %s3544_s1, %s3168_s20 }
 0x11b   :  { %v1188_v30 = vld [vmem:[%s1172_s23] sm:$0x1] }
 0x11c   :  { %1189 = vst [vmem:[#allocation3 + $0x1e] sm:$0x1] %v1188_v30 }
 0x11d   :  { %1207 = vsyncadd [#allocation4 + $0x3], 16  ;;  %s3169_s24 = sld [smem:[#allocation6 + $0x3b]] }
 0x123   :  { %s1210_s27 = scalar_lea.vmem %s3544_s1, %s3169_s24 }
 0x124   :  { %v1226_v31 = vld [vmem:[%s1210_s27] sm:$0x1] }
 0x125   :  { %1227 = vst [vmem:[#allocation3 + $0x1f] sm:$0x1] %v1226_v31 }
 0x126   :  { %1245 = vsyncadd [#allocation4 + $0x3], 16  ;;  %s3170_s28 = sld [smem:[#allocation6 + $0x4]] }
 0x12c   :  { %s1248_s7 = scalar_lea.vmem %s3544_s1, %s3170_s28 }
 0x12d   :  { %v1265_v32 = vld [vmem:[%s1248_s7] sm:$0x1] }
 0x12e   :  { %1266 = vst [vmem:[#allocation3 + $0x20] sm:$0x1] %v1265_v32 }
 0x12f   :  { %1284 = vsyncadd [#allocation4 + $0x4], 16  ;;  %s3171_s0 = sld [smem:[#allocation6 + $0xc]] }
 0x135   :  { %s1287_s10 = scalar_lea.vmem %s3544_s1, %s3171_s0 }
 0x136   :  { %v1303_v33 = vld [vmem:[%s1287_s10] sm:$0x1] }
 0x137   :  { %1304 = vst [vmem:[#allocation3 + $0x21] sm:$0x1] %v1303_v33 }
 0x138   :  { %1322 = vsyncadd [#allocation4 + $0x4], 16  ;;  %s3172_s11 = sld [smem:[#allocation6 + $0x14]] }
 0x13e   :  { %s1325_s14 = scalar_lea.vmem %s3544_s1, %s3172_s11 }
 0x13f   :  { %v1341_v34 = vld [vmem:[%s1325_s14] sm:$0x1] }
 0x140   :  { %1342 = vst [vmem:[#allocation3 + $0x22] sm:$0x1] %v1341_v34 }
 0x141   :  { %1360 = vsyncadd [#allocation4 + $0x4], 16  ;;  %s3173_s15 = sld [smem:[#allocation6 + $0x1c]] }
 0x147   :  { %s1363_s18 = scalar_lea.vmem %s3544_s1, %s3173_s15 }
 0x148   :  { %v1379_v35 = vld [vmem:[%s1363_s18] sm:$0x1] }
 0x149   :  { %1380 = vst [vmem:[#allocation3 + $0x23] sm:$0x1] %v1379_v35 }
 0x14a   :  { %1398 = vsyncadd [#allocation4 + $0x4], 16  ;;  %s3174_s19 = sld [smem:[#allocation6 + $0x24]] }
 0x150   :  { %s1401_s22 = scalar_lea.vmem %s3544_s1, %s3174_s19 }
 0x151   :  { %v1417_v36 = vld [vmem:[%s1401_s22] sm:$0x1] }
 0x152   :  { %1418 = vst [vmem:[#allocation3 + $0x24] sm:$0x1] %v1417_v36 }
 0x153   :  { %1436 = vsyncadd [#allocation4 + $0x4], 16  ;;  %s3175_s23 = sld [smem:[#allocation6 + $0x2c]] }
 0x159   :  { %s1439_s26 = scalar_lea.vmem %s3544_s1, %s3175_s23 }
 0x15a   :  { %v1455_v37 = vld [vmem:[%s1439_s26] sm:$0x1] }
 0x15b   :  { %1456 = vst [vmem:[#allocation3 + $0x25] sm:$0x1] %v1455_v37 }
 0x15c   :  { %1474 = vsyncadd [#allocation4 + $0x4], 16  ;;  %s3176_s27 = sld [smem:[#allocation6 + $0x34]] }
 0x162   :  { %s1477_s30 = scalar_lea.vmem %s3544_s1, %s3176_s27 }
 0x163   :  { %v1493_v38 = vld [vmem:[%s1477_s30] sm:$0x1] }
 0x164   :  { %1494 = vst [vmem:[#allocation3 + $0x26] sm:$0x1] %v1493_v38 }
 0x165   :  { %1512 = vsyncadd [#allocation4 + $0x4], 16  ;;  %s3177_s7 = sld [smem:[#allocation6 + $0x3c]] }
 0x16b   :  { %s1515_s9 = scalar_lea.vmem %s3544_s1, %s3177_s7 }
 0x16c   :  { %v1531_v39 = vld [vmem:[%s1515_s9] sm:$0x1] }
 0x16d   :  { %1532 = vst [vmem:[#allocation3 + $0x27] sm:$0x1] %v1531_v39 }
 0x16e   :  { %1550 = vsyncadd [#allocation4 + $0x4], 16  ;;  %s3178_s10 = sld [smem:[#allocation6 + $0x5]] }
 0x174   :  { %s1553_s13 = scalar_lea.vmem %s3544_s1, %s3178_s10 }
 0x175   :  { %v1570_v40 = vld [vmem:[%s1553_s13] sm:$0x1] }
 0x176   :  { %1571 = vst [vmem:[#allocation3 + $0x28] sm:$0x1] %v1570_v40 }
 0x177   :  { %1589 = vsyncadd [#allocation4 + $0x5], 16  ;;  %s3179_s14 = sld [smem:[#allocation6 + $0xd]] }
 0x17d   :  { %s1592_s17 = scalar_lea.vmem %s3544_s1, %s3179_s14 }
 0x17e   :  { %v1608_v41 = vld [vmem:[%s1592_s17] sm:$0x1] }
 0x17f   :  { %1609 = vst [vmem:[#allocation3 + $0x29] sm:$0x1] %v1608_v41 }
 0x180   :  { %1627 = vsyncadd [#allocation4 + $0x5], 16  ;;  %s3180_s18 = sld [smem:[#allocation6 + $0x15]] }
 0x186   :  { %s1630_s21 = scalar_lea.vmem %s3544_s1, %s3180_s18 }
 0x187   :  { %v1646_v42 = vld [vmem:[%s1630_s21] sm:$0x1] }
 0x188   :  { %1647 = vst [vmem:[#allocation3 + $0x2a] sm:$0x1] %v1646_v42 }
 0x189   :  { %1665 = vsyncadd [#allocation4 + $0x5], 16  ;;  %s3181_s22 = sld [smem:[#allocation6 + $0x1d]] }
 0x18f   :  { %s1668_s25 = scalar_lea.vmem %s3544_s1, %s3181_s22 }
 0x190   :  { %v1684_v43 = vld [vmem:[%s1668_s25] sm:$0x1] }
 0x191   :  { %1685 = vst [vmem:[#allocation3 + $0x2b] sm:$0x1] %v1684_v43 }
 0x192   :  { %1703 = vsyncadd [#allocation4 + $0x5], 16  ;;  %s3182_s26 = sld [smem:[#allocation6 + $0x25]] }
 0x198   :  { %s1706_s29 = scalar_lea.vmem %s3544_s1, %s3182_s26 }
 0x199   :  { %v1722_v44 = vld [vmem:[%s1706_s29] sm:$0x1] }
 0x19a   :  { %1723 = vst [vmem:[#allocation3 + $0x2c] sm:$0x1] %v1722_v44 }
 0x19b   :  { %1741 = vsyncadd [#allocation4 + $0x5], 16  ;;  %s3183_s30 = sld [smem:[#allocation6 + $0x2d]] }
 0x1a1   :  { %s1744_s8 = scalar_lea.vmem %s3544_s1, %s3183_s30 }
 0x1a2   :  { %v1760_v45 = vld [vmem:[%s1744_s8] sm:$0x1] }
 0x1a3   :  { %1761 = vst [vmem:[#allocation3 + $0x2d] sm:$0x1] %v1760_v45 }
 0x1a4   :  { %1779 = vsyncadd [#allocation4 + $0x5], 16  ;;  %s3184_s9 = sld [smem:[#allocation6 + $0x35]] }
 0x1aa   :  { %s1782_s12 = scalar_lea.vmem %s3544_s1, %s3184_s9 }
 0x1ab   :  { %v1798_v46 = vld [vmem:[%s1782_s12] sm:$0x1] }
 0x1ac   :  { %1799 = vst [vmem:[#allocation3 + $0x2e] sm:$0x1] %v1798_v46 }
 0x1ad   :  { %1817 = vsyncadd [#allocation4 + $0x5], 16  ;;  %s3185_s13 = sld [smem:[#allocation6 + $0x3d]] }
 0x1b3   :  { %s1820_s16 = scalar_lea.vmem %s3544_s1, %s3185_s13 }
 0x1b4   :  { %v1836_v47 = vld [vmem:[%s1820_s16] sm:$0x1] }
 0x1b5   :  { %1837 = vst [vmem:[#allocation3 + $0x2f] sm:$0x1] %v1836_v47 }
 0x1b6   :  { %1855 = vsyncadd [#allocation4 + $0x5], 16  ;;  %s3186_s17 = sld [smem:[#allocation6 + $0x6]] }
 0x1bc   :  { %s1858_s20 = scalar_lea.vmem %s3544_s1, %s3186_s17 }
 0x1bd   :  { %v1875_v48 = vld [vmem:[%s1858_s20] sm:$0x1] }
 0x1be   :  { %1876 = vst [vmem:[#allocation3 + $0x30] sm:$0x1] %v1875_v48 }
 0x1bf   :  { %1894 = vsyncadd [#allocation4 + $0x6], 16  ;;  %s3187_s21 = sld [smem:[#allocation6 + $0xe]] }
 0x1c5   :  { %s1897_s24 = scalar_lea.vmem %s3544_s1, %s3187_s21 }
 0x1c6   :  { %v1913_v49 = vld [vmem:[%s1897_s24] sm:$0x1] }
 0x1c7   :  { %1914 = vst [vmem:[#allocation3 + $0x31] sm:$0x1] %v1913_v49 }
 0x1c8   :  { %1932 = vsyncadd [#allocation4 + $0x6], 16  ;;  %s3188_s25 = sld [smem:[#allocation6 + $0x16]] }
 0x1ce   :  { %s1935_s28 = scalar_lea.vmem %s3544_s1, %s3188_s25 }
 0x1cf   :  { %v1951_v50 = vld [vmem:[%s1935_s28] sm:$0x1] }
 0x1d0   :  { %1952 = vst [vmem:[#allocation3 + $0x32] sm:$0x1] %v1951_v50 }
 0x1d1   :  { %1970 = vsyncadd [#allocation4 + $0x6], 16  ;;  %s3189_s29 = sld [smem:[#allocation6 + $0x1e]] }
 0x1d7   :  { %s1973_s0 = scalar_lea.vmem %s3544_s1, %s3189_s29 }
 0x1d8   :  { %v1989_v51 = vld [vmem:[%s1973_s0] sm:$0x1] }
 0x1d9   :  { %1990 = vst [vmem:[#allocation3 + $0x33] sm:$0x1] %v1989_v51 }
 0x1da   :  { %2008 = vsyncadd [#allocation4 + $0x6], 16  ;;  %s3190_s8 = sld [smem:[#allocation6 + $0x26]] }
 0x1e0   :  { %s2011_s11 = scalar_lea.vmem %s3544_s1, %s3190_s8 }
 0x1e1   :  { %v2027_v52 = vld [vmem:[%s2011_s11] sm:$0x1] }
 0x1e2   :  { %2028 = vst [vmem:[#allocation3 + $0x34] sm:$0x1] %v2027_v52 }
 0x1e3   :  { %2046 = vsyncadd [#allocation4 + $0x6], 16  ;;  %s3191_s12 = sld [smem:[#allocation6 + $0x2e]] }
 0x1e9   :  { %s2049_s15 = scalar_lea.vmem %s3544_s1, %s3191_s12 }
 0x1ea   :  { %v2065_v53 = vld [vmem:[%s2049_s15] sm:$0x1] }
 0x1eb   :  { %2066 = vst [vmem:[#allocation3 + $0x35] sm:$0x1] %v2065_v53 }
 0x1ec   :  { %2084 = vsyncadd [#allocation4 + $0x6], 16  ;;  %s3192_s16 = sld [smem:[#allocation6 + $0x36]] }
 0x1f2   :  { %s2087_s19 = scalar_lea.vmem %s3544_s1, %s3192_s16 }
 0x1f3   :  { %v2103_v54 = vld [vmem:[%s2087_s19] sm:$0x1] }
 0x1f4   :  { %2104 = vst [vmem:[#allocation3 + $0x36] sm:$0x1] %v2103_v54 }
 0x1f5   :  { %2122 = vsyncadd [#allocation4 + $0x6], 16  ;;  %s3193_s20 = sld [smem:[#allocation6 + $0x3e]] }
 0x1fb   :  { %s2125_s23 = scalar_lea.vmem %s3544_s1, %s3193_s20 }
 0x1fc   :  { %v2141_v55 = vld [vmem:[%s2125_s23] sm:$0x1] }
 0x1fd   :  { %2142 = vst [vmem:[#allocation3 + $0x37] sm:$0x1] %v2141_v55 }
 0x1fe   :  { %2160 = vsyncadd [#allocation4 + $0x6], 16  ;;  %s3194_s24 = sld [smem:[#allocation6 + $0x7]] }
 0x1ff   :  { %s3195_s25 = sld [smem:[#allocation6 + $0xf]] }
 0x200   :  { %s3196_s26 = sld [smem:[#allocation6 + $0x17]] }
 0x201   :  { %s3197_s27 = sld [smem:[#allocation6 + $0x1f]] }
 0x202   :  { %s3198_s28 = sld [smem:[#allocation6 + $0x27]] }
 0x203   :  { %s3199_s29 = sld [smem:[#allocation6 + $0x2f]] }
 0x204   :  { %s3200_s30 = sld [smem:[#allocation6 + $0x37]]  ;;  %s2185_s8 = scalar_lea.vmem %s3544_s1, %s3194_s24 }
 0x205   :  { %s3483_s9 = sld [smem:[#allocation6 + $0x3f]]  ;;  %v2202_v56 = vld [vmem:[%s2185_s8] sm:$0x1] }
 0x206   :  { %2203 = vst [vmem:[#allocation3 + $0x38] sm:$0x1] %v2202_v56 }
 0x207   :  { %2221 = vsyncadd [#allocation4 + $0x7], 16  ;;  %s2222_s12 = scalar_lea.vmem %s3544_s1, %s3195_s25 }
 0x208   :  { %v2238_v57 = vld [vmem:[%s2222_s12] sm:$0x1] }
 0x209   :  { %2239 = vst [vmem:[#allocation3 + $0x39] sm:$0x1] %v2238_v57 }
 0x20a   :  { %2257 = vsyncadd [#allocation4 + $0x7], 16  ;;  %s2258_s15 = scalar_lea.vmem %s3544_s1, %s3196_s26 }
 0x20b   :  { %v2274_v58 = vld [vmem:[%s2258_s15] sm:$0x1] }
 0x20c   :  { %2275 = vst [vmem:[#allocation3 + $0x3a] sm:$0x1] %v2274_v58 }
 0x20d   :  { %2293 = vsyncadd [#allocation4 + $0x7], 16  ;;  %s2294_s18 = scalar_lea.vmem %s3544_s1, %s3197_s27 }
 0x20e   :  { %v2310_v59 = vld [vmem:[%s2294_s18] sm:$0x1] }
 0x20f   :  { %2311 = vst [vmem:[#allocation3 + $0x3b] sm:$0x1] %v2310_v59 }
 0x210   :  { %2329 = vsyncadd [#allocation4 + $0x7], 16  ;;  %s2330_s21 = scalar_lea.vmem %s3544_s1, %s3198_s28 }
 0x211   :  { %v2346_v60 = vld [vmem:[%s2330_s21] sm:$0x1] }
 0x212   :  { %2347 = vst [vmem:[#allocation3 + $0x3c] sm:$0x1] %v2346_v60 }
 0x213   :  { %2365 = vsyncadd [#allocation4 + $0x7], 16  ;;  %s2366_s24 = scalar_lea.vmem %s3544_s1, %s3199_s29 }
 0x214   :  { %v2382_v61 = vld [vmem:[%s2366_s24] sm:$0x1] }
 0x215   :  { %2383 = vst [vmem:[#allocation3 + $0x3d] sm:$0x1] %v2382_v61 }
 0x216   :  { %2401 = vsyncadd [#allocation4 + $0x7], 16  ;;  %s2402_s27 = scalar_lea.vmem %s3544_s1, %s3200_s30 }
 0x217   :  { %v2418_v62 = vld [vmem:[%s2402_s27] sm:$0x1] }
 0x218   :  { %2419 = vst [vmem:[#allocation3 + $0x3e] sm:$0x1] %v2418_v62 }
 0x219   :  { %2437 = vsyncadd [#allocation4 + $0x7], 16  ;;  %s2438_s0 = scalar_lea.vmem %s3544_s1, %s3483_s9 }
 0x21a   :  { %v2454_v63 = vld [vmem:[%s2438_s0] sm:$0x1] }
 0x21b   :  { %2455 = vst [vmem:[#allocation3 + $0x3f] sm:$0x1] %v2454_v63 }
 0x21c   :  { %2473 = vsyncadd [#allocation4 + $0x7], 16 }
 0x21d   :  { %3254 = dma.done.wait [#allocation4], 128 }
 0x21e   :  { %3255 = vsyncadd [#allocation4], 4294967168  ;;  %v2490_v0 = vld [vmem:[#allocation3] sm:$0xff] }
 0x21f   :  { %3256 = dma.done.wait [#allocation4 + $0x1], 128 }
 0x220   :  { %3257 = vsyncadd [#allocation4 + $0x1], 4294967168  ;;  %v2517_v1 = vld [vmem:[#allocation3 + $0x8] sm:$0xff] }
 0x221   :  { %v2518_v2 = vadd.f32 %v2517_v1, %v2490_v0 }
 0x222   :  { %3258 = dma.done.wait [#allocation4 + $0x2], 128 }
 0x223   :  { %3259 = vsyncadd [#allocation4 + $0x2], 4294967168  ;;  %v2544_v3 = vld [vmem:[#allocation3 + $0x10] sm:$0xff] }
 0x224   :  { %v2545_v4 = vadd.f32 %v2544_v3, %v2518_v2 }
 0x225   :  { %3260 = dma.done.wait [#allocation4 + $0x3], 128 }
 0x226   :  { %3261 = vsyncadd [#allocation4 + $0x3], 4294967168  ;;  %v2571_v5 = vld [vmem:[#allocation3 + $0x18] sm:$0xff] }
 0x227   :  { %v2572_v6 = vadd.f32 %v2571_v5, %v2545_v4 }
 0x228   :  { %3262 = dma.done.wait [#allocation4 + $0x4], 128 }
 0x229   :  { %3263 = vsyncadd [#allocation4 + $0x4], 4294967168  ;;  %v2598_v7 = vld [vmem:[#allocation3 + $0x20] sm:$0xff] }
 0x22a   :  { %v2599_v8 = vadd.f32 %v2598_v7, %v2572_v6 }
 0x22b   :  { %3264 = dma.done.wait [#allocation4 + $0x5], 128 }
 0x22c   :  { %3265 = vsyncadd [#allocation4 + $0x5], 4294967168  ;;  %v2625_v9 = vld [vmem:[#allocation3 + $0x28] sm:$0xff] }
 0x22d   :  { %v2626_v10 = vadd.f32 %v2625_v9, %v2599_v8 }
 0x22e   :  { %3266 = dma.done.wait [#allocation4 + $0x6], 128 }
 0x22f   :  { %3267 = vsyncadd [#allocation4 + $0x6], 4294967168  ;;  %v2652_v11 = vld [vmem:[#allocation3 + $0x30] sm:$0xff] }
 0x230   :  { %v2653_v12 = vadd.f32 %v2652_v11, %v2626_v10 }
 0x231   :  { %3268 = dma.done.wait [#allocation4 + $0x7], 128 }
 0x232   :  { %3269 = vsyncadd [#allocation4 + $0x7], 4294967168  ;;  %v2688_v13 = vld [vmem:[%s3545_s2 + $0x18] sm:$0xff]  ;;  %v2687_v14 = vld [vmem:[%s3545_s2 + $0x10] sm:$0xff]  ;;  %vm2681_vm0 = vcmask 261120   ;;  %s3273_s24 = smov [#allocation7]  }
 0x233   :  { %2708 = vmatpush.msra.mxu0 %v2688_v13  ;;  %v2679_v15 = vld [vmem:[#allocation3 + $0x38] sm:$0xff]  ;;  %v2719_v16 = vld [vmem:[%s3547_s4 + $0x18] sm:$0xff]  ;;  %v2686_v17 = vld [vmem:[%s3545_s2 + $0x8] sm:$0xff]  ;;  %s2753_s25 = sshll.u32 %s3273_s24, 4  ;;  %s2755_s7 = sshll.u32 %s3549_s6, 4  ;;  %s2754_s25 = int_to_ptr.vmem [resolvable:$true] %s2753_s25  ;;  %s2756_s7 = int_to_ptr.hbm [resolvable:$true] %s2755_s7 }
 0x234   :  { %v2680_v18 = vadd.f32 %v2679_v15, %v2653_v12  ;;  %2739 = vmatpush.msra.mxu1 %v2719_v16  ;;  %v2718_v19 = vld [vmem:[%s3547_s4 + $0x10] sm:$0xff]  ;;  %v2685_v20 = vld [vmem:[%s3545_s2] sm:$0xff]  ;;  %v2717_v23 = vld [vmem:[%s3547_s4 + $0x8] sm:$0xff] }
 0x235   :  { %2709 = vmatpush.msra.mxu0 %v2687_v14  ;;  %v2716_v24 = vld [vmem:[%s3547_s4] sm:$0xff] }
 0x236   :  { %2682 = vst.msk [vmem:[#allocation2] sm:$0xff] %vm2681_vm0, %v2680_v18  ;;  %2740 = vmatpush.msra.mxu1 %v2718_v19  ;;  %v3214_v25 = vld [vmem:[%s3546_s3] ss:$0 sm:$0xff] }
 0x237   :  { %2710 = vmatpush.msra.mxu0 %v2686_v17  ;;  %v3215_v28 = vld [vmem:[%s3548_s5] ss:$0 sm:$0xff] }
 0x238   :  { %2741 = vmatpush.msra.mxu1 %v2717_v23 }
 0x239   :  { %2711 = vmatpush.msra.mxu0 %v2685_v20 }
 0x23a   :  { %2742 = vmatpush.msra.mxu1 %v2716_v24 }
 0x23d   :  { %v2683_v21 = vld [vmem:[#allocation2] sm:$0xff] }
 0x23e   :  { %v2684_v22 = vmul.f32 0.125, %v2683_v21 }
 0x240   :  { %3202 = vmatmul.msk.f32.vlgmr.msra.gmra.mxu0 %vm2681_vm0, %v2684_v22 }
 0x2bd   :  { %v2713_v26 = vpop.f32.mrf.mxu0 }
 0x2be   :  { %v2714_v27 = vadd.f32 %v3214_v25, %v2713_v26 }
 0x2c0   :  { %3203 = vmatmul.msk.f32.vlgmr.msra.gmra.mxu1 %vm2681_vm0, %v2714_v27 }
 0x33d   :  { %v2744_v29 = vpop.f32.mrf.mxu1 }
 0x33e   :  { %v2745_v30 = vadd.f32 %v3215_v28, %v2744_v29 }
 0x340   :  { %2747 = vst [vmem:[#allocation7] sm:$0xff] %v2745_v30 }
 0x341   :  { %2758 = dma.vmem_to_hbm [thread:$0]  %s2754_s25, 128, %s2756_s7, [#allocation8]  }
 0x342   :  { %3270 = dma.done.wait [#allocation8], 128  }
 0x343   :  { %3271 = vsyncadd [#allocation8], 4294967168 }
 0x344   :  { %2763 = vsyncpa [#allocation8], 1 }
 0x345   :  { %2764 = vsyncmov [#allocation4] }
 0x348   :  { %s2765_s3 = vpop.sfrf %2764 }
 0x349   :  { %p3204_p0 = scmp.ne.s32.totalorder %s2765_s3, 0 }
 0x34b   :  { %2769 = shalt.err (%p3204_p0)  }
 0x34c   :  { %2771 = vsyncmov [#allocation4 + $0x1] }
 0x34f   :  { %s2772_s4 = vpop.sfrf %2771 }
 0x350   :  { %p3205_p1 = scmp.ne.s32.totalorder %s2772_s4, 0 }
 0x352   :  { %2776 = shalt.err (%p3205_p1)  }
 0x353   :  { %2778 = vsyncmov [#allocation4 + $0x2] }
 0x356   :  { %s2779_s5 = vpop.sfrf %2778 }
 0x357   :  { %p3206_p2 = scmp.ne.s32.totalorder %s2779_s5, 0 }
 0x359   :  { %2783 = shalt.err (%p3206_p2)  }
 0x35a   :  { %2785 = vsyncmov [#allocation4 + $0x3] }
 0x35d   :  { %s2786_s6 = vpop.sfrf %2785 }
 0x35e   :  { %p3207_p3 = scmp.ne.s32.totalorder %s2786_s6, 0 }
 0x360   :  { %2790 = shalt.err (%p3207_p3)  }
 0x361   :  { %2792 = vsyncmov [#allocation4 + $0x4] }
 0x364   :  { %s2793_s28 = vpop.sfrf %2792 }
 0x365   :  { %p3208_p4 = scmp.ne.s32.totalorder %s2793_s28, 0 }
 0x367   :  { %2797 = shalt.err (%p3208_p4)  }
 0x368   :  { %2799 = vsyncmov [#allocation4 + $0x5] }
 0x36b   :  { %s2800_s0 = vpop.sfrf %2799 }
 0x36c   :  { %p3209_p5 = scmp.ne.s32.totalorder %s2800_s0, 0 }
 0x36e   :  { %2804 = shalt.err (%p3209_p5)  }
 0x36f   :  { %2806 = vsyncmov [#allocation4 + $0x6] }
 0x372   :  { %s2807_s1 = vpop.sfrf %2806 }
 0x373   :  { %p3210_p6 = scmp.ne.s32.totalorder %s2807_s1, 0 }
 0x375   :  { %2811 = shalt.err (%p3210_p6)  }
 0x376   :  { %2813 = vsyncmov [#allocation4 + $0x7] }
 0x379   :  { %s2814_s29 = vpop.sfrf %2813 }
 0x37a   :  { %p3211_p7 = scmp.ne.s32.totalorder %s2814_s29, 0 }
 0x37c   :  { %2818 = shalt.err (%p3211_p7)  }

</bundles_post_ra>
